<compile_context>
chip_gen: v5e
topology: v5e:2x2
jax: 0.10.0
libtpu: 0.0.40
codegen_flags: <defaults>
</compile_context>

<pallas_src>
import jax
import jax.numpy as jnp
from jax.experimental import pallas as pl
from jax.experimental.pallas import tpu as pltpu

NEIGHBOR_NUM = 15
PAIR_FEAT = 45
SPR_HID = 100
SPR_OUT = 20
AFTER_IN = NEIGHBOR_NUM * SPR_OUT  # 300
AFTER_HID = 100
HP = 128  # padded hidden width (exact MXU lane tile)


def _round_up(x, m):
    return (x + m - 1) // m * m


def _layer(x, w_ref, b_ref, cdt):
    """x @ W + b, ReLU.  Matmul operands in compute dtype, accumulate f32."""
    y = jnp.dot(x.astype(cdt), w_ref[...], preferred_element_type=jnp.float32)
    return jnp.maximum(y + b_ref[...], 0.0)


def deepddg_kernel(
    x_ref,                                       # (15, TB, 45) compute dtype
    w1_ref, b1_ref, w2_ref, b2_ref, w3_ref, b3_ref,   # SPRNet layers 1-3
    wf_ref, bf_ref,                              # fused w4/a1 (15,128,128),(1,128)
    a2_ref, ab2_ref, a3_ref, ab3_ref, a4_ref, ab4_ref, a5_ref, ab5_ref,
    o_ref,                                       # (TB, 1) f32
):
    n, tb, f = x_ref.shape
    cdt = w1_ref.dtype

    # Collapse (neighbor, batch-tile) into one big M dimension: row = n*tb + b.
    # tb is a multiple of 16, so this reshape is layout-preserving (no relayout).
    x = x_ref[...].reshape(n * tb, f)

    # ---- SPRNet layers 1-3: (15*tb, .) @ (., 128) — MXU rows are full ----
    h = _layer(x, w1_ref, b1_ref, cdt)           # (15*tb, 128)
    h = _layer(h, w2_ref, b2_ref, cdt)
    h = _layer(h, w3_ref, b3_ref, cdt)
    h = h.astype(cdt)

    # ---- fused SPR layer-4 + after_spr layer-1: accumulate over neighbors ----
    # out[b, :] = sum_n h3[n, b, :] @ wf[n] + bf
    acc = jnp.zeros((tb, bf_ref.shape[-1]), jnp.float32)
    for j in range(n):                            # static unrolled, 15 matmuls
        acc = acc + jnp.dot(h[j * tb:(j + 1) * tb, :], wf_ref[j],
                            preferred_element_type=jnp.float32)
    y = jnp.maximum(acc + bf_ref[...], 0.0)       # (tb, 128)

    # ---- after_spr layers 2-5 ----
    y = _layer(y, a2_ref, ab2_ref, cdt)
    y = _layer(y, a3_ref, ab3_ref, cdt)
    y = _layer(y, a4_ref, ab4_ref, cdt)
    y = jnp.dot(y.astype(cdt), a5_ref[...],
                preferred_element_type=jnp.float32) + ab5_ref[...]   # (tb, 1)

    # softsign
    o_ref[...] = (y / (1.0 + jnp.abs(y))).astype(o_ref.dtype)


def prepare_params(params, compute_dtype=jnp.float32):
    """Fold w4 into a1, zero-pad hidden dims 100->128, cast matmul weights."""
    f32 = jnp.float32

    def padw(w, rows, cols):
        out = jnp.zeros((rows, cols), f32)
        return out.at[:w.shape[0], :w.shape[1]].set(w.astype(f32))

    def padb(b, cols):
        out = jnp.zeros((1, cols), f32)
        return out.at[:, :b.shape[1]].set(b.astype(f32))

    # Exact fusion of spr layer-4 and after_spr layer-1 (both linear, no ReLU
    # in between):  wf[n,k,h] = sum_o w4[k,o] * a1[n*20+o, h]
    a1_r = params["a1"].reshape(NEIGHBOR_NUM, SPR_OUT, AFTER_HID)
    wf = jnp.einsum("ko,noh->nkh", params["w4"].astype(f32), a1_r.astype(f32))
    bf = (jnp.einsum("o,noh->h", params["b4"][0].astype(f32), a1_r.astype(f32))[None, :]
          + params["ab1"].astype(f32))

    wf_p = jnp.zeros((NEIGHBOR_NUM, HP, HP), f32)
    wf_p = wf_p.at[:, :SPR_HID, :AFTER_HID].set(wf)

    weights = [
        padw(params["w1"], PAIR_FEAT, HP).astype(compute_dtype), padb(params["b1"], HP),
        padw(params["w2"], HP, HP).astype(compute_dtype),        padb(params["b2"], HP),
        padw(params["w3"], HP, HP).astype(compute_dtype),        padb(params["b3"], HP),
        wf_p.astype(compute_dtype),                              padb(bf, HP),
        padw(params["a2"], HP, HP).astype(compute_dtype),        padb(params["ab2"], HP),
        padw(params["a3"], HP, HP).astype(compute_dtype),        padb(params["ab3"], HP),
        padw(params["a4"], HP, HP).astype(compute_dtype),        padb(params["ab4"], HP),
        padw(params["a5"], HP, 1).astype(compute_dtype),         params["ab5"].astype(f32),
    ]
    return weights


def deepddg_forward(x, params, *, tb=128, compute_dtype=jnp.float32):
    B, N, F = x.shape
    assert N == NEIGHBOR_NUM and F == PAIR_FEAT

    # Batch tile: multiple of 16 (keeps the in-kernel reshape / per-neighbor
    # slices tile-aligned for both f32 and bf16), capped by the batch.
    tb = max(16, min(tb, _round_up(B, 16)))
    tb = _round_up(tb, 16)
    Bp = _round_up(B, tb)
    if Bp != B:
        x = jnp.concatenate([x, jnp.zeros((Bp - B, N, F), x.dtype)], axis=0)

    # Neighbor-major layout: per batch tile the kernel sees (15, tb, 45) which
    # collapses to a contiguous (15*tb, 45) M dimension, and each neighbor's
    # rows stay a contiguous, tile-aligned block for the fused contraction.
    x_nm = jnp.transpose(x, (1, 0, 2)).astype(compute_dtype)

    weights = prepare_params(params, compute_dtype)
    grid = (Bp // tb,)

    def full_spec(a):
        nd = a.ndim
        return pl.BlockSpec(a.shape, lambda i, nd=nd: (0,) * nd)

    out = pl.pallas_call(
        deepddg_kernel,
        out_shape=jax.ShapeDtypeStruct((Bp, 1), jnp.float32),
        grid_spec=pltpu.PrefetchScalarGridSpec(
            num_scalar_prefetch=0,
            grid=grid,
            in_specs=[pl.BlockSpec((NEIGHBOR_NUM, tb, PAIR_FEAT),
                                   lambda i: (0, i, 0))]
                     + [full_spec(w) for w in weights],
            out_specs=pl.BlockSpec((tb, 1), lambda i: (i, 0)),
        ),
        compiler_params=pltpu.CompilerParams(
            dimension_semantics=("parallel",),
        ),
    )(x_nm, *weights)
    return out[:B]


def init_params(key):
    """Deterministic synthetic parameters; Linear weights stored (in, out)."""
    ks = jax.random.split(key, 18)

    def lin(kw, kb, fan_in, fan_out):
        scale = 1.0 / jnp.sqrt(jnp.float32(fan_in))
        w = jax.random.uniform(kw, (fan_in, fan_out), jnp.float32, -scale, scale)
        b = jax.random.uniform(kb, (1, fan_out), jnp.float32, -scale, scale)
        return w, b

    p = {}
    p["w1"], p["b1"] = lin(ks[0], ks[1], PAIR_FEAT, SPR_HID)
    p["w2"], p["b2"] = lin(ks[2], ks[3], SPR_HID, SPR_HID)
    p["w3"], p["b3"] = lin(ks[4], ks[5], SPR_HID, SPR_HID)
    p["w4"], p["b4"] = lin(ks[6], ks[7], SPR_HID, SPR_OUT)
    p["a1"], p["ab1"] = lin(ks[8], ks[9], AFTER_IN, AFTER_HID)
    p["a2"], p["ab2"] = lin(ks[10], ks[11], AFTER_HID, AFTER_HID)
    p["a3"], p["ab3"] = lin(ks[12], ks[13], AFTER_HID, AFTER_HID)
    p["a4"], p["ab4"] = lin(ks[14], ks[15], AFTER_HID, AFTER_HID)
    p["a5"], p["ab5"] = lin(ks[16], ks[17], AFTER_HID, 1)
    return p


def deepddg_reference(x, p):
    """Pure-JAX f32 reference mirroring the PyTorch module (unfused)."""
    B, N, _ = x.shape
    h = x
    h = jnp.maximum(h @ p["w1"] + p["b1"][None], 0.0)
    h = jnp.maximum(h @ p["w2"] + p["b2"][None], 0.0)
    h = jnp.maximum(h @ p["w3"] + p["b3"][None], 0.0)
    h = h @ p["w4"] + p["b4"][None]
    h = h.reshape(B, N * SPR_OUT)
    y = jnp.maximum(h @ p["a1"] + p["ab1"], 0.0)
    y = jnp.maximum(y @ p["a2"] + p["ab2"], 0.0)
    y = jnp.maximum(y @ p["a3"] + p["ab3"], 0.0)
    y = jnp.maximum(y @ p["a4"] + p["ab4"], 0.0)
    y = y @ p["a5"] + p["ab5"]
    return y / (1.0 + jnp.abs(y))


if __name__ == "__main__":
    key = jax.random.PRNGKey(0)
    k_x, k_p = jax.random.split(key)

    B = 256                     # small but enough to fill the MXU (tb=128, grid=2)
    x = jax.random.normal(k_x, (B, NEIGHBOR_NUM, PAIR_FEAT), jnp.float32)
    params = init_params(k_p)
    ref = deepddg_reference(x, params)

    # f32 path (exact up to reassociation from the w4/a1 fusion)
    out_f32 = jax.block_until_ready(
        deepddg_forward(x, params, tb=128, compute_dtype=jnp.float32))
    assert out_f32.shape == (B, 1), out_f32.shape
    assert jnp.allclose(out_f32, ref, atol=1e-3, rtol=1e-3), (
        float(jnp.max(jnp.abs(out_f32 - ref))))

    # bf16 matmul path (f32 accumulation) for v6e/v7x MXUs — looser tolerance
    out_bf16 = jax.block_until_ready(
        deepddg_forward(x, params, tb=128, compute_dtype=jnp.bfloat16))
    assert out_bf16.shape == (B, 1), out_bf16.shape
    assert jnp.allclose(out_bf16, ref, atol=5e-2, rtol=5e-2), (
        float(jnp.max(jnp.abs(out_bf16 - ref))))

    print("KERNEL_OK")
</pallas_src>

<mosaic_0001>
module attributes {stable_mosaic.version = 11 : i64} {
  func.func @deepddg_kernel(%arg0: i32, %arg1: memref<15x128x45xf32, #tpu.memory_space<vmem>>, %arg2: memref<45x128xf32, #tpu.memory_space<vmem>>, %arg3: memref<1x128xf32, #tpu.memory_space<vmem>>, %arg4: memref<128x128xf32, #tpu.memory_space<vmem>>, %arg5: memref<1x128xf32, #tpu.memory_space<vmem>>, %arg6: memref<128x128xf32, #tpu.memory_space<vmem>>, %arg7: memref<1x128xf32, #tpu.memory_space<vmem>>, %arg8: memref<15x128x128xf32, #tpu.memory_space<vmem>>, %arg9: memref<1x128xf32, #tpu.memory_space<vmem>>, %arg10: memref<128x128xf32, #tpu.memory_space<vmem>>, %arg11: memref<1x128xf32, #tpu.memory_space<vmem>>, %arg12: memref<128x128xf32, #tpu.memory_space<vmem>>, %arg13: memref<1x128xf32, #tpu.memory_space<vmem>>, %arg14: memref<128x128xf32, #tpu.memory_space<vmem>>, %arg15: memref<1x128xf32, #tpu.memory_space<vmem>>, %arg16: memref<128x1xf32, #tpu.memory_space<vmem>>, %arg17: memref<1x1xf32, #tpu.memory_space<vmem>>, %arg18: memref<128x1xf32, #tpu.memory_space<vmem>>) attributes {dimension_semantics = [#tpu.dimension_semantics<parallel>], iteration_bounds = array<i64: 2>, scalar_prefetch = 0 : i64, scratch_operands = 0 : i64, tpu.core_type = #tpu.core_type<tc>, window_params = [{transform_indices = @transform_0, window_bounds = array<i64: 15, 128, 45>}, {pipeline_mode = #tpu.pipeline_mode<synchronous>, transform_indices = @transform_1, window_bounds = array<i64: 45, 128>}, {pipeline_mode = #tpu.pipeline_mode<synchronous>, transform_indices = @transform_2, window_bounds = array<i64: 1, 128>}, {pipeline_mode = #tpu.pipeline_mode<synchronous>, transform_indices = @transform_3, window_bounds = array<i64: 128, 128>}, {pipeline_mode = #tpu.pipeline_mode<synchronous>, transform_indices = @transform_4, window_bounds = array<i64: 1, 128>}, {pipeline_mode = #tpu.pipeline_mode<synchronous>, transform_indices = @transform_5, window_bounds = array<i64: 128, 128>}, {pipeline_mode = #tpu.pipeline_mode<synchronous>, transform_indices = @transform_6, window_bounds = array<i64: 1, 128>}, {pipeline_mode = #tpu.pipeline_mode<synchronous>, transform_indices = @transform_7, window_bounds = array<i64: 15, 128, 128>}, {pipeline_mode = #tpu.pipeline_mode<synchronous>, transform_indices = @transform_8, window_bounds = array<i64: 1, 128>}, {pipeline_mode = #tpu.pipeline_mode<synchronous>, transform_indices = @transform_9, window_bounds = array<i64: 128, 128>}, {pipeline_mode = #tpu.pipeline_mode<synchronous>, transform_indices = @transform_10, window_bounds = array<i64: 1, 128>}, {pipeline_mode = #tpu.pipeline_mode<synchronous>, transform_indices = @transform_11, window_bounds = array<i64: 128, 128>}, {pipeline_mode = #tpu.pipeline_mode<synchronous>, transform_indices = @transform_12, window_bounds = array<i64: 1, 128>}, {pipeline_mode = #tpu.pipeline_mode<synchronous>, transform_indices = @transform_13, window_bounds = array<i64: 128, 128>}, {pipeline_mode = #tpu.pipeline_mode<synchronous>, transform_indices = @transform_14, window_bounds = array<i64: 1, 128>}, {pipeline_mode = #tpu.pipeline_mode<synchronous>, transform_indices = @transform_15, window_bounds = array<i64: 128, 1>}, {pipeline_mode = #tpu.pipeline_mode<synchronous>, transform_indices = @transform_16, window_bounds = array<i64: 1, 1>}, {transform_indices = @transform_17, window_bounds = array<i64: 128, 1>}]} {
    %c0 = arith.constant 0 : index
    %c0_0 = arith.constant 0 : index
    %c0_1 = arith.constant 0 : index
    %0 = vector.load %arg1[%c0, %c0_0, %c0_1] : memref<15x128x45xf32, #tpu.memory_space<vmem>>, vector<15x128x45xf32>
    %1 = vector.shape_cast %0 : vector<15x128x45xf32> to vector<1920x45xf32>
    %c0_2 = arith.constant 0 : index
    %c0_3 = arith.constant 0 : index
    %2 = vector.load %arg2[%c0_2, %c0_3] : memref<45x128xf32, #tpu.memory_space<vmem>>, vector<45x128xf32>
    %cst = arith.constant dense<0.000000e+00> : vector<1920x128xf32>
    %3 = tpu.matmul %1, %2, %cst {dimension_numbers = #tpu.dot_dimension_numbers<[1], [0], [0], [1], [0, 0, 1, 1], [], []>} : vector<1920x45xf32>, vector<45x128xf32>, vector<1920x128xf32> -> vector<1920x128xf32>
    %c0_4 = arith.constant 0 : index
    %c0_5 = arith.constant 0 : index
    %4 = vector.load %arg3[%c0_4, %c0_5] : memref<1x128xf32, #tpu.memory_space<vmem>>, vector<1x128xf32>
    %5 = vector.broadcast %4 : vector<1x128xf32> to vector<1920x128xf32>
    %6 = arith.addf %3, %5 : vector<1920x128xf32>
    %cst_6 = arith.constant 0.000000e+00 : f32
    %7 = vector.broadcast %cst_6 : f32 to vector<1920x128xf32>
    %8 = arith.maximumf %6, %7 : vector<1920x128xf32>
    %c0_7 = arith.constant 0 : index
    %c0_8 = arith.constant 0 : index
    %9 = vector.load %arg4[%c0_7, %c0_8] : memref<128x128xf32, #tpu.memory_space<vmem>>, vector<128x128xf32>
    %cst_9 = arith.constant dense<0.000000e+00> : vector<1920x128xf32>
    %10 = tpu.matmul %8, %9, %cst_9 {dimension_numbers = #tpu.dot_dimension_numbers<[1], [0], [0], [1], [0, 0, 1, 1], [], []>} : vector<1920x128xf32>, vector<128x128xf32>, vector<1920x128xf32> -> vector<1920x128xf32>
    %c0_10 = arith.constant 0 : index
    %c0_11 = arith.constant 0 : index
    %11 = vector.load %arg5[%c0_10, %c0_11] : memref<1x128xf32, #tpu.memory_space<vmem>>, vector<1x128xf32>
    %12 = vector.broadcast %11 : vector<1x128xf32> to vector<1920x128xf32>
    %13 = arith.addf %10, %12 : vector<1920x128xf32>
    %cst_12 = arith.constant 0.000000e+00 : f32
    %14 = vector.broadcast %cst_12 : f32 to vector<1920x128xf32>
    %15 = arith.maximumf %13, %14 : vector<1920x128xf32>
    %c0_13 = arith.constant 0 : index
    %c0_14 = arith.constant 0 : index
    %16 = vector.load %arg6[%c0_13, %c0_14] : memref<128x128xf32, #tpu.memory_space<vmem>>, vector<128x128xf32>
    %cst_15 = arith.constant dense<0.000000e+00> : vector<1920x128xf32>
    %17 = tpu.matmul %15, %16, %cst_15 {dimension_numbers = #tpu.dot_dimension_numbers<[1], [0], [0], [1], [0, 0, 1, 1], [], []>} : vector<1920x128xf32>, vector<128x128xf32>, vector<1920x128xf32> -> vector<1920x128xf32>
    %c0_16 = arith.constant 0 : index
    %c0_17 = arith.constant 0 : index
    %18 = vector.load %arg7[%c0_16, %c0_17] : memref<1x128xf32, #tpu.memory_space<vmem>>, vector<1x128xf32>
    %19 = vector.broadcast %18 : vector<1x128xf32> to vector<1920x128xf32>
    %20 = arith.addf %17, %19 : vector<1920x128xf32>
    %cst_18 = arith.constant 0.000000e+00 : f32
    %21 = vector.broadcast %cst_18 : f32 to vector<1920x128xf32>
    %22 = arith.maximumf %20, %21 : vector<1920x128xf32>
    %cst_19 = arith.constant 0.000000e+00 : f32
    %23 = vector.broadcast %cst_19 : f32 to vector<128x128xf32>
    %24 = vector.extract_strided_slice %22 {offsets = [0, 0], sizes = [128, 128], strides = [1, 1]} : vector<1920x128xf32> to vector<128x128xf32>
    %c0_20 = arith.constant 0 : index
    %c0_21 = arith.constant 0 : index
    %c0_22 = arith.constant 0 : index
    %25 = vector.load %arg8[%c0_20, %c0_21, %c0_22] : memref<15x128x128xf32, #tpu.memory_space<vmem>>, vector<1x128x128xf32>
    %26 = vector.shape_cast %25 : vector<1x128x128xf32> to vector<128x128xf32>
    %cst_23 = arith.constant dense<0.000000e+00> : vector<128x128xf32>
    %27 = tpu.matmul %24, %26, %cst_23 {dimension_numbers = #tpu.dot_dimension_numbers<[1], [0], [0], [1], [0, 0, 1, 1], [], []>} : vector<128x128xf32>, vector<128x128xf32>, vector<128x128xf32> -> vector<128x128xf32>
    %28 = arith.addf %23, %27 : vector<128x128xf32>
    %29 = vector.extract_strided_slice %22 {offsets = [128, 0], sizes = [128, 128], strides = [1, 1]} : vector<1920x128xf32> to vector<128x128xf32>
    %c1 = arith.constant 1 : index
    %c0_24 = arith.constant 0 : index
    %c0_25 = arith.constant 0 : index
    %30 = vector.load %arg8[%c1, %c0_24, %c0_25] : memref<15x128x128xf32, #tpu.memory_space<vmem>>, vector<1x128x128xf32>
    %31 = vector.shape_cast %30 : vector<1x128x128xf32> to vector<128x128xf32>
    %cst_26 = arith.constant dense<0.000000e+00> : vector<128x128xf32>
    %32 = tpu.matmul %29, %31, %cst_26 {dimension_numbers = #tpu.dot_dimension_numbers<[1], [0], [0], [1], [0, 0, 1, 1], [], []>} : vector<128x128xf32>, vector<128x128xf32>, vector<128x128xf32> -> vector<128x128xf32>
    %33 = arith.addf %28, %32 : vector<128x128xf32>
    %34 = vector.extract_strided_slice %22 {offsets = [256, 0], sizes = [128, 128], strides = [1, 1]} : vector<1920x128xf32> to vector<128x128xf32>
    %c2 = arith.constant 2 : index
    %c0_27 = arith.constant 0 : index
    %c0_28 = arith.constant 0 : index
    %35 = vector.load %arg8[%c2, %c0_27, %c0_28] : memref<15x128x128xf32, #tpu.memory_space<vmem>>, vector<1x128x128xf32>
    %36 = vector.shape_cast %35 : vector<1x128x128xf32> to vector<128x128xf32>
    %cst_29 = arith.constant dense<0.000000e+00> : vector<128x128xf32>
    %37 = tpu.matmul %34, %36, %cst_29 {dimension_numbers = #tpu.dot_dimension_numbers<[1], [0], [0], [1], [0, 0, 1, 1], [], []>} : vector<128x128xf32>, vector<128x128xf32>, vector<128x128xf32> -> vector<128x128xf32>
    %38 = arith.addf %33, %37 : vector<128x128xf32>
    %39 = vector.extract_strided_slice %22 {offsets = [384, 0], sizes = [128, 128], strides = [1, 1]} : vector<1920x128xf32> to vector<128x128xf32>
    %c3 = arith.constant 3 : index
    %c0_30 = arith.constant 0 : index
    %c0_31 = arith.constant 0 : index
    %40 = vector.load %arg8[%c3, %c0_30, %c0_31] : memref<15x128x128xf32, #tpu.memory_space<vmem>>, vector<1x128x128xf32>
    %41 = vector.shape_cast %40 : vector<1x128x128xf32> to vector<128x128xf32>
    %cst_32 = arith.constant dense<0.000000e+00> : vector<128x128xf32>
    %42 = tpu.matmul %39, %41, %cst_32 {dimension_numbers = #tpu.dot_dimension_numbers<[1], [0], [0], [1], [0, 0, 1, 1], [], []>} : vector<128x128xf32>, vector<128x128xf32>, vector<128x128xf32> -> vector<128x128xf32>
    %43 = arith.addf %38, %42 : vector<128x128xf32>
    %44 = vector.extract_strided_slice %22 {offsets = [512, 0], sizes = [128, 128], strides = [1, 1]} : vector<1920x128xf32> to vector<128x128xf32>
    %c4 = arith.constant 4 : index
    %c0_33 = arith.constant 0 : index
    %c0_34 = arith.constant 0 : index
    %45 = vector.load %arg8[%c4, %c0_33, %c0_34] : memref<15x128x128xf32, #tpu.memory_space<vmem>>, vector<1x128x128xf32>
    %46 = vector.shape_cast %45 : vector<1x128x128xf32> to vector<128x128xf32>
    %cst_35 = arith.constant dense<0.000000e+00> : vector<128x128xf32>
    %47 = tpu.matmul %44, %46, %cst_35 {dimension_numbers = #tpu.dot_dimension_numbers<[1], [0], [0], [1], [0, 0, 1, 1], [], []>} : vector<128x128xf32>, vector<128x128xf32>, vector<128x128xf32> -> vector<128x128xf32>
    %48 = arith.addf %43, %47 : vector<128x128xf32>
    %49 = vector.extract_strided_slice %22 {offsets = [640, 0], sizes = [128, 128], strides = [1, 1]} : vector<1920x128xf32> to vector<128x128xf32>
    %c5 = arith.constant 5 : index
    %c0_36 = arith.constant 0 : index
    %c0_37 = arith.constant 0 : index
    %50 = vector.load %arg8[%c5, %c0_36, %c0_37] : memref<15x128x128xf32, #tpu.memory_space<vmem>>, vector<1x128x128xf32>
    %51 = vector.shape_cast %50 : vector<1x128x128xf32> to vector<128x128xf32>
    %cst_38 = arith.constant dense<0.000000e+00> : vector<128x128xf32>
    %52 = tpu.matmul %49, %51, %cst_38 {dimension_numbers = #tpu.dot_dimension_numbers<[1], [0], [0], [1], [0, 0, 1, 1], [], []>} : vector<128x128xf32>, vector<128x128xf32>, vector<128x128xf32> -> vector<128x128xf32>
    %53 = arith.addf %48, %52 : vector<128x128xf32>
    %54 = vector.extract_strided_slice %22 {offsets = [768, 0], sizes = [128, 128], strides = [1, 1]} : vector<1920x128xf32> to vector<128x128xf32>
    %c6 = arith.constant 6 : index
    %c0_39 = arith.constant 0 : index
    %c0_40 = arith.constant 0 : index
    %55 = vector.load %arg8[%c6, %c0_39, %c0_40] : memref<15x128x128xf32, #tpu.memory_space<vmem>>, vector<1x128x128xf32>
    %56 = vector.shape_cast %55 : vector<1x128x128xf32> to vector<128x128xf32>
    %cst_41 = arith.constant dense<0.000000e+00> : vector<128x128xf32>
    %57 = tpu.matmul %54, %56, %cst_41 {dimension_numbers = #tpu.dot_dimension_numbers<[1], [0], [0], [1], [0, 0, 1, 1], [], []>} : vector<128x128xf32>, vector<128x128xf32>, vector<128x128xf32> -> vector<128x128xf32>
    %58 = arith.addf %53, %57 : vector<128x128xf32>
    %59 = vector.extract_strided_slice %22 {offsets = [896, 0], sizes = [128, 128], strides = [1, 1]} : vector<1920x128xf32> to vector<128x128xf32>
    %c7 = arith.constant 7 : index
    %c0_42 = arith.constant 0 : index
    %c0_43 = arith.constant 0 : index
    %60 = vector.load %arg8[%c7, %c0_42, %c0_43] : memref<15x128x128xf32, #tpu.memory_space<vmem>>, vector<1x128x128xf32>
    %61 = vector.shape_cast %60 : vector<1x128x128xf32> to vector<128x128xf32>
    %cst_44 = arith.constant dense<0.000000e+00> : vector<128x128xf32>
    %62 = tpu.matmul %59, %61, %cst_44 {dimension_numbers = #tpu.dot_dimension_numbers<[1], [0], [0], [1], [0, 0, 1, 1], [], []>} : vector<128x128xf32>, vector<128x128xf32>, vector<128x128xf32> -> vector<128x128xf32>
    %63 = arith.addf %58, %62 : vector<128x128xf32>
    %64 = vector.extract_strided_slice %22 {offsets = [1024, 0], sizes = [128, 128], strides = [1, 1]} : vector<1920x128xf32> to vector<128x128xf32>
    %c8 = arith.constant 8 : index
    %c0_45 = arith.constant 0 : index
    %c0_46 = arith.constant 0 : index
    %65 = vector.load %arg8[%c8, %c0_45, %c0_46] : memref<15x128x128xf32, #tpu.memory_space<vmem>>, vector<1x128x128xf32>
    %66 = vector.shape_cast %65 : vector<1x128x128xf32> to vector<128x128xf32>
    %cst_47 = arith.constant dense<0.000000e+00> : vector<128x128xf32>
    %67 = tpu.matmul %64, %66, %cst_47 {dimension_numbers = #tpu.dot_dimension_numbers<[1], [0], [0], [1], [0, 0, 1, 1], [], []>} : vector<128x128xf32>, vector<128x128xf32>, vector<128x128xf32> -> vector<128x128xf32>
    %68 = arith.addf %63, %67 : vector<128x128xf32>
    %69 = vector.extract_strided_slice %22 {offsets = [1152, 0], sizes = [128, 128], strides = [1, 1]} : vector<1920x128xf32> to vector<128x128xf32>
    %c9 = arith.constant 9 : index
    %c0_48 = arith.constant 0 : index
    %c0_49 = arith.constant 0 : index
    %70 = vector.load %arg8[%c9, %c0_48, %c0_49] : memref<15x128x128xf32, #tpu.memory_space<vmem>>, vector<1x128x128xf32>
    %71 = vector.shape_cast %70 : vector<1x128x128xf32> to vector<128x128xf32>
    %cst_50 = arith.constant dense<0.000000e+00> : vector<128x128xf32>
    %72 = tpu.matmul %69, %71, %cst_50 {dimension_numbers = #tpu.dot_dimension_numbers<[1], [0], [0], [1], [0, 0, 1, 1], [], []>} : vector<128x128xf32>, vector<128x128xf32>, vector<128x128xf32> -> vector<128x128xf32>
    %73 = arith.addf %68, %72 : vector<128x128xf32>
    %74 = vector.extract_strided_slice %22 {offsets = [1280, 0], sizes = [128, 128], strides = [1, 1]} : vector<1920x128xf32> to vector<128x128xf32>
    %c10 = arith.constant 10 : index
    %c0_51 = arith.constant 0 : index
    %c0_52 = arith.constant 0 : index
    %75 = vector.load %arg8[%c10, %c0_51, %c0_52] : memref<15x128x128xf32, #tpu.memory_space<vmem>>, vector<1x128x128xf32>
    %76 = vector.shape_cast %75 : vector<1x128x128xf32> to vector<128x128xf32>
    %cst_53 = arith.constant dense<0.000000e+00> : vector<128x128xf32>
    %77 = tpu.matmul %74, %76, %cst_53 {dimension_numbers = #tpu.dot_dimension_numbers<[1], [0], [0], [1], [0, 0, 1, 1], [], []>} : vector<128x128xf32>, vector<128x128xf32>, vector<128x128xf32> -> vector<128x128xf32>
    %78 = arith.addf %73, %77 : vector<128x128xf32>
    %79 = vector.extract_strided_slice %22 {offsets = [1408, 0], sizes = [128, 128], strides = [1, 1]} : vector<1920x128xf32> to vector<128x128xf32>
    %c11 = arith.constant 11 : index
    %c0_54 = arith.constant 0 : index
    %c0_55 = arith.constant 0 : index
    %80 = vector.load %arg8[%c11, %c0_54, %c0_55] : memref<15x128x128xf32, #tpu.memory_space<vmem>>, vector<1x128x128xf32>
    %81 = vector.shape_cast %80 : vector<1x128x128xf32> to vector<128x128xf32>
    %cst_56 = arith.constant dense<0.000000e+00> : vector<128x128xf32>
    %82 = tpu.matmul %79, %81, %cst_56 {dimension_numbers = #tpu.dot_dimension_numbers<[1], [0], [0], [1], [0, 0, 1, 1], [], []>} : vector<128x128xf32>, vector<128x128xf32>, vector<128x128xf32> -> vector<128x128xf32>
    %83 = arith.addf %78, %82 : vector<128x128xf32>
    %84 = vector.extract_strided_slice %22 {offsets = [1536, 0], sizes = [128, 128], strides = [1, 1]} : vector<1920x128xf32> to vector<128x128xf32>
    %c12 = arith.constant 12 : index
    %c0_57 = arith.constant 0 : index
    %c0_58 = arith.constant 0 : index
    %85 = vector.load %arg8[%c12, %c0_57, %c0_58] : memref<15x128x128xf32, #tpu.memory_space<vmem>>, vector<1x128x128xf32>
    %86 = vector.shape_cast %85 : vector<1x128x128xf32> to vector<128x128xf32>
    %cst_59 = arith.constant dense<0.000000e+00> : vector<128x128xf32>
    %87 = tpu.matmul %84, %86, %cst_59 {dimension_numbers = #tpu.dot_dimension_numbers<[1], [0], [0], [1], [0, 0, 1, 1], [], []>} : vector<128x128xf32>, vector<128x128xf32>, vector<128x128xf32> -> vector<128x128xf32>
    %88 = arith.addf %83, %87 : vector<128x128xf32>
    %89 = vector.extract_strided_slice %22 {offsets = [1664, 0], sizes = [128, 128], strides = [1, 1]} : vector<1920x128xf32> to vector<128x128xf32>
    %c13 = arith.constant 13 : index
    %c0_60 = arith.constant 0 : index
    %c0_61 = arith.constant 0 : index
    %90 = vector.load %arg8[%c13, %c0_60, %c0_61] : memref<15x128x128xf32, #tpu.memory_space<vmem>>, vector<1x128x128xf32>
    %91 = vector.shape_cast %90 : vector<1x128x128xf32> to vector<128x128xf32>
    %cst_62 = arith.constant dense<0.000000e+00> : vector<128x128xf32>
    %92 = tpu.matmul %89, %91, %cst_62 {dimension_numbers = #tpu.dot_dimension_numbers<[1], [0], [0], [1], [0, 0, 1, 1], [], []>} : vector<128x128xf32>, vector<128x128xf32>, vector<128x128xf32> -> vector<128x128xf32>
    %93 = arith.addf %88, %92 : vector<128x128xf32>
    %94 = vector.extract_strided_slice %22 {offsets = [1792, 0], sizes = [128, 128], strides = [1, 1]} : vector<1920x128xf32> to vector<128x128xf32>
    %c14 = arith.constant 14 : index
    %c0_63 = arith.constant 0 : index
    %c0_64 = arith.constant 0 : index
    %95 = vector.load %arg8[%c14, %c0_63, %c0_64] : memref<15x128x128xf32, #tpu.memory_space<vmem>>, vector<1x128x128xf32>
    %96 = vector.shape_cast %95 : vector<1x128x128xf32> to vector<128x128xf32>
    %cst_65 = arith.constant dense<0.000000e+00> : vector<128x128xf32>
    %97 = tpu.matmul %94, %96, %cst_65 {dimension_numbers = #tpu.dot_dimension_numbers<[1], [0], [0], [1], [0, 0, 1, 1], [], []>} : vector<128x128xf32>, vector<128x128xf32>, vector<128x128xf32> -> vector<128x128xf32>
    %98 = arith.addf %93, %97 : vector<128x128xf32>
    %c0_66 = arith.constant 0 : index
    %c0_67 = arith.constant 0 : index
    %99 = vector.load %arg9[%c0_66, %c0_67] : memref<1x128xf32, #tpu.memory_space<vmem>>, vector<1x128xf32>
    %100 = vector.broadcast %99 : vector<1x128xf32> to vector<128x128xf32>
    %101 = arith.addf %98, %100 : vector<128x128xf32>
    %cst_68 = arith.constant 0.000000e+00 : f32
    %102 = vector.broadcast %cst_68 : f32 to vector<128x128xf32>
    %103 = arith.maximumf %101, %102 : vector<128x128xf32>
    %c0_69 = arith.constant 0 : index
    %c0_70 = arith.constant 0 : index
    %104 = vector.load %arg10[%c0_69, %c0_70] : memref<128x128xf32, #tpu.memory_space<vmem>>, vector<128x128xf32>
    %cst_71 = arith.constant dense<0.000000e+00> : vector<128x128xf32>
    %105 = tpu.matmul %103, %104, %cst_71 {dimension_numbers = #tpu.dot_dimension_numbers<[1], [0], [0], [1], [0, 0, 1, 1], [], []>} : vector<128x128xf32>, vector<128x128xf32>, vector<128x128xf32> -> vector<128x128xf32>
    %c0_72 = arith.constant 0 : index
    %c0_73 = arith.constant 0 : index
    %106 = vector.load %arg11[%c0_72, %c0_73] : memref<1x128xf32, #tpu.memory_space<vmem>>, vector<1x128xf32>
    %107 = vector.broadcast %106 : vector<1x128xf32> to vector<128x128xf32>
    %108 = arith.addf %105, %107 : vector<128x128xf32>
    %cst_74 = arith.constant 0.000000e+00 : f32
    %109 = vector.broadcast %cst_74 : f32 to vector<128x128xf32>
    %110 = arith.maximumf %108, %109 : vector<128x128xf32>
    %c0_75 = arith.constant 0 : index
    %c0_76 = arith.constant 0 : index
    %111 = vector.load %arg12[%c0_75, %c0_76] : memref<128x128xf32, #tpu.memory_space<vmem>>, vector<128x128xf32>
    %cst_77 = arith.constant dense<0.000000e+00> : vector<128x128xf32>
    %112 = tpu.matmul %110, %111, %cst_77 {dimension_numbers = #tpu.dot_dimension_numbers<[1], [0], [0], [1], [0, 0, 1, 1], [], []>} : vector<128x128xf32>, vector<128x128xf32>, vector<128x128xf32> -> vector<128x128xf32>
    %c0_78 = arith.constant 0 : index
    %c0_79 = arith.constant 0 : index
    %113 = vector.load %arg13[%c0_78, %c0_79] : memref<1x128xf32, #tpu.memory_space<vmem>>, vector<1x128xf32>
    %114 = vector.broadcast %113 : vector<1x128xf32> to vector<128x128xf32>
    %115 = arith.addf %112, %114 : vector<128x128xf32>
    %cst_80 = arith.constant 0.000000e+00 : f32
    %116 = vector.broadcast %cst_80 : f32 to vector<128x128xf32>
    %117 = arith.maximumf %115, %116 : vector<128x128xf32>
    %c0_81 = arith.constant 0 : index
    %c0_82 = arith.constant 0 : index
    %118 = vector.load %arg14[%c0_81, %c0_82] : memref<128x128xf32, #tpu.memory_space<vmem>>, vector<128x128xf32>
    %cst_83 = arith.constant dense<0.000000e+00> : vector<128x128xf32>
    %119 = tpu.matmul %117, %118, %cst_83 {dimension_numbers = #tpu.dot_dimension_numbers<[1], [0], [0], [1], [0, 0, 1, 1], [], []>} : vector<128x128xf32>, vector<128x128xf32>, vector<128x128xf32> -> vector<128x128xf32>
    %c0_84 = arith.constant 0 : index
    %c0_85 = arith.constant 0 : index
    %120 = vector.load %arg15[%c0_84, %c0_85] : memref<1x128xf32, #tpu.memory_space<vmem>>, vector<1x128xf32>
    %121 = vector.broadcast %120 : vector<1x128xf32> to vector<128x128xf32>
    %122 = arith.addf %119, %121 : vector<128x128xf32>
    %cst_86 = arith.constant 0.000000e+00 : f32
    %123 = vector.broadcast %cst_86 : f32 to vector<128x128xf32>
    %124 = arith.maximumf %122, %123 : vector<128x128xf32>
    %c0_87 = arith.constant 0 : index
    %c0_88 = arith.constant 0 : index
    %125 = vector.load %arg16[%c0_87, %c0_88] : memref<128x1xf32, #tpu.memory_space<vmem>>, vector<128x1xf32>
    %cst_89 = arith.constant dense<0.000000e+00> : vector<128x1xf32>
    %126 = tpu.matmul %124, %125, %cst_89 {dimension_numbers = #tpu.dot_dimension_numbers<[1], [0], [0], [1], [0, 0, 1, 1], [], []>} : vector<128x128xf32>, vector<128x1xf32>, vector<128x1xf32> -> vector<128x1xf32>
    %c0_90 = arith.constant 0 : index
    %c0_91 = arith.constant 0 : index
    %127 = vector.load %arg17[%c0_90, %c0_91] : memref<1x1xf32, #tpu.memory_space<vmem>>, vector<1x1xf32>
    %128 = vector.broadcast %127 : vector<1x1xf32> to vector<128x1xf32>
    %129 = arith.addf %126, %128 : vector<128x1xf32>
    %130 = math.absf %129 : vector<128x1xf32>
    %cst_92 = arith.constant 1.000000e+00 : f32
    %131 = vector.broadcast %cst_92 : f32 to vector<128x1xf32>
    %132 = arith.addf %131, %130 : vector<128x1xf32>
    %133 = arith.divf %129, %132 : vector<128x1xf32>
    %c0_93 = arith.constant 0 : index
    %c0_94 = arith.constant 0 : index
    %134 = vector.load %arg18[%c0_93, %c0_94] : memref<128x1xf32, #tpu.memory_space<vmem>>, vector<128x1xf32>
    tpu.vector_store %arg18[%c0_93, %c0_94], %133 {strides = array<i32>} : memref<128x1xf32, #tpu.memory_space<vmem>>, vector<128x1xf32>,
    return
  }
  func.func @transform_0(%arg0: i32) -> (i32, i32, i32) {
    %c0_i32 = arith.constant 0 : i32
    %c0_i32_0 = arith.constant 0 : i32
    %c0_i32_1 = arith.constant 0 : i32
    return %c0_i32, %arg0, %c0_i32_0 : i32, i32, i32
  }
  func.func @transform_1(%arg0: i32) -> (i32, i32) {
    %c0_i32 = arith.constant 0 : i32
    %c0_i32_0 = arith.constant 0 : i32
    %c0_i32_1 = arith.constant 0 : i32
    return %c0_i32, %c0_i32_0 : i32, i32
  }
  func.func @transform_2(%arg0: i32) -> (i32, i32) {
    %c0_i32 = arith.constant 0 : i32
    %c0_i32_0 = arith.constant 0 : i32
    %c0_i32_1 = arith.constant 0 : i32
    return %c0_i32, %c0_i32_0 : i32, i32
  }
  func.func @transform_3(%arg0: i32) -> (i32, i32) {
    %c0_i32 = arith.constant 0 : i32
    %c0_i32_0 = arith.constant 0 : i32
    %c0_i32_1 = arith.constant 0 : i32
    return %c0_i32, %c0_i32_0 : i32, i32
  }
  func.func @transform_4(%arg0: i32) -> (i32, i32) {
    %c0_i32 = arith.constant 0 : i32
    %c0_i32_0 = arith.constant 0 : i32
    %c0_i32_1 = arith.constant 0 : i32
    return %c0_i32, %c0_i32_0 : i32, i32
  }
  func.func @transform_5(%arg0: i32) -> (i32, i32) {
    %c0_i32 = arith.constant 0 : i32
    %c0_i32_0 = arith.constant 0 : i32
    %c0_i32_1 = arith.constant 0 : i32
    return %c0_i32, %c0_i32_0 : i32, i32
  }
  func.func @transform_6(%arg0: i32) -> (i32, i32) {
    %c0_i32 = arith.constant 0 : i32
    %c0_i32_0 = arith.constant 0 : i32
    %c0_i32_1 = arith.constant 0 : i32
    return %c0_i32, %c0_i32_0 : i32, i32
  }
  func.func @transform_7(%arg0: i32) -> (i32, i32, i32) {
    %c0_i32 = arith.constant 0 : i32
    %c0_i32_0 = arith.constant 0 : i32
    %c0_i32_1 = arith.constant 0 : i32
    %c0_i32_2 = arith.constant 0 : i32
    return %c0_i32, %c0_i32_0, %c0_i32_1 : i32, i32, i32
  }
  func.func @transform_8(%arg0: i32) -> (i32, i32) {
    %c0_i32 = arith.constant 0 : i32
    %c0_i32_0 = arith.constant 0 : i32
    %c0_i32_1 = arith.constant 0 : i32
    return %c0_i32, %c0_i32_0 : i32, i32
  }
  func.func @transform_9(%arg0: i32) -> (i32, i32) {
    %c0_i32 = arith.constant 0 : i32
    %c0_i32_0 = arith.constant 0 : i32
    %c0_i32_1 = arith.constant 0 : i32
    return %c0_i32, %c0_i32_0 : i32, i32
  }
  func.func @transform_10(%arg0: i32) -> (i32, i32) {
    %c0_i32 = arith.constant 0 : i32
    %c0_i32_0 = arith.constant 0 : i32
    %c0_i32_1 = arith.constant 0 : i32
    return %c0_i32, %c0_i32_0 : i32, i32
  }
  func.func @transform_11(%arg0: i32) -> (i32, i32) {
    %c0_i32 = arith.constant 0 : i32
    %c0_i32_0 = arith.constant 0 : i32
    %c0_i32_1 = arith.constant 0 : i32
    return %c0_i32, %c0_i32_0 : i32, i32
  }
  func.func @transform_12(%arg0: i32) -> (i32, i32) {
    %c0_i32 = arith.constant 0 : i32
    %c0_i32_0 = arith.constant 0 : i32
    %c0_i32_1 = arith.constant 0 : i32
    return %c0_i32, %c0_i32_0 : i32, i32
  }
  func.func @transform_13(%arg0: i32) -> (i32, i32) {
    %c0_i32 = arith.constant 0 : i32
    %c0_i32_0 = arith.constant 0 : i32
    %c0_i32_1 = arith.constant 0 : i32
    return %c0_i32, %c0_i32_0 : i32, i32
  }
  func.func @transform_14(%arg0: i32) -> (i32, i32) {
    %c0_i32 = arith.constant 0 : i32
    %c0_i32_0 = arith.constant 0 : i32
    %c0_i32_1 = arith.constant 0 : i32
    return %c0_i32, %c0_i32_0 : i32, i32
  }
  func.func @transform_15(%arg0: i32) -> (i32, i32) {
    %c0_i32 = arith.constant 0 : i32
    %c0_i32_0 = arith.constant 0 : i32
    %c0_i32_1 = arith.constant 0 : i32
    return %c0_i32, %c0_i32_0 : i32, i32
  }
  func.func @transform_16(%arg0: i32) -> (i32, i32) {
    %c0_i32 = arith.constant 0 : i32
    %c0_i32_0 = arith.constant 0 : i32
    %c0_i32_1 = arith.constant 0 : i32
    return %c0_i32, %c0_i32_0 : i32, i32
  }
  func.func @transform_17(%arg0: i32) -> (i32, i32) {
    %c0_i32 = arith.constant 0 : i32
    %c0_i32_0 = arith.constant 0 : i32
    return %arg0, %c0_i32 : i32, i32
  }
}

</mosaic_0001>

<bundles_post_ra>
// kernel: tpu_custom_call.1
= control target key start
LH: loop header
LB: loop body
LE: loop exit
PB: predicated region body
PF: predicated region fallthrough
CT: control target
= control target key end

     0   :  { %s12223_s0 = inlined_call_operand.vmem [shape: f32[15,256,45], index: 0, kind: input, shape index: {}]   ;;  %s12224_s1 = inlined_call_operand.vmem [shape: f32[45,128], index: 1, kind: input, shape index: {}]   ;;  %s12225_s2 = inlined_call_operand.vmem [shape: f32[1,128], index: 2, kind: input, shape index: {}]   ;;  %s12226_s3 = inlined_call_operand.vmem [shape: f32[128,128], index: 3, kind: input, shape index: {}]   ;;  %s12227_s4 = inlined_call_operand.vmem [shape: f32[1,128], index: 4, kind: input, shape index: {}]   ;;  %s12228_s5 = inlined_call_operand.vmem [shape: f32[128,128], index: 5, kind: input, shape index: {}]   ;;  %s12229_s6 = inlined_call_operand.vmem [shape: f32[1,128], index: 6, kind: input, shape index: {}]   ;;  %s12230_s7 = inlined_call_operand.vmem [shape: f32[15,128,128], index: 7, kind: input, shape index: {}]   ;;  %s12231_s8 = inlined_call_operand.vmem [shape: f32[1,128], index: 8, kind: input, shape index: {}]   ;;  %s12232_s9 = inlined_call_operand.vmem [shape: f32[128,128], index: 9, kind: input, shape index: {}]   ;;  %s12233_s10 = inlined_call_operand.vmem [shape: f32[1,128], index: 10, kind: input, shape index: {}]   ;;  %s12234_s11 = inlined_call_operand.vmem [shape: f32[128,128], index: 11, kind: input, shape index: {}]   ;;  %s12235_s12 = inlined_call_operand.vmem [shape: f32[1,128], index: 12, kind: input, shape index: {}]   ;;  %s12236_s13 = inlined_call_operand.vmem [shape: f32[128,128], index: 13, kind: input, shape index: {}]   ;;  %s12237_s14 = inlined_call_operand.vmem [shape: f32[1,128], index: 14, kind: input, shape index: {}]   ;;  %s12238_s15 = inlined_call_operand.vmem [shape: f32[128,1], index: 15, kind: input, shape index: {}]   ;;  %s12239_s16 = inlined_call_operand.<no memory space> [shape: f32[1,1], index: 16, kind: input, shape index: {}]   ;;  %s12240_s17 = inlined_call_operand.vmem [shape: f32[256,1], index: 17, kind: output, shape index: {}]  }
   0x1   :  { %12242 = sst [smem:[#allocation4_spill]] %s12223_s0  ;;  %v22_v0 = vstv %s12239_s16 }
   0x2   :  { %12243 = sst [smem:[#allocation5_spill]] %s12224_s1  ;;  %23 = vst [vmem:[#allocation2] sm:$0x1] %v22_v0 }
   0x3   :  { %s8384_s26 = smov 0   ;;  %s8386_s27 = smov 0  }
   0x4   :  { %s8388_s28 = smov 0  }
   0x5 LB: > { %s8401_s29 = sadd.s32 1, %s8289_s28   ;;  %s36_s30 = sadd.s32 1, %s8285_s27  ;;  %s8289_s28 = sphi %s8388_s28, %s12249_s28   ;;  %s8285_s27 = sphi %s8386_s27, %s12248_s27   ;;  %s8281_s26 = sphi %s8384_s26, %s12247_s26  }
   0x6   : > { %s33_s0 = ssub.s32 %s8289_s28, %s8401_s29  ;;  %p43_p1 = scmp.ne.s32.totalorder %s8285_s27, %s8281_s26 }
   0x7   : > { %p34_p0 = scmp.eq.s32.totalorder %s33_s0, 0  ;;  %p44_p2 = scmp.eq.s32.totalorder %s8289_s28, 0 }
   0x8   : > { %p7706_p4 = scmp.ge.s32.totalorder %s8289_s28, 2 }
   0x9   : > { %s8410_s18 = scalar_select %p34_p0, %s8285_s27, %s36_s30  }
   0xa   : > { %p45_p3 = por %p44_p2, %p43_p1  ;;  %479 = sbr.rel (%p7706_p4) target bundleno = 265 (0x109), region = 80 }
   0xf   : > { %482 = sbr.rel (!%p45_p3) target bundleno = 265 (0x109), region = 84  ;;  %s484_s19 = sand.u32 (%p45_p3), 1, %s8285_s27  }
  0x10   : > { %s8179_s1 = sshll.u32 (%p45_p3), %s8289_s28, 7  ;;  %s8180_s20 = smul.u32 (%p45_p3), 1920, %s484_s19 }
  0x11   : > { %s12244_s23 = sld [smem:[#allocation4_spill]] (%p45_p3) }
  0x12   : > { %s8423_s25 = scalar_lea.vmem (%p45_p3), [#allocation3], %s8180_s20 }
  0x17   : > { %s8418_s24 = scalar_lea.vmem %s12244_s23, %s8179_s1 }
  0x18   : > { %v996_v1 = vld [vmem:[%s8418_s24] sm:$0xff]  ;;  %v998_v2 = vld [vmem:[%s8418_s24 + $0x8] sm:$0xff]  ;;  %v1000_v3 = vld [vmem:[%s8418_s24 + $0x10] sm:$0xff] }
  0x19   : > { %997 = vst [vmem:[%s8423_s25] sm:$0xff] %v996_v1  ;;  %v1002_v4 = vld [vmem:[%s8418_s24 + $0x18] sm:$0xff]  ;;  %v1004_v5 = vld [vmem:[%s8418_s24 + $0x20] sm:$0xff]  ;;  %v1006_v6 = vld [vmem:[%s8418_s24 + $0x28] sm:$0xff] }
  0x1a   : > { %999 = vst [vmem:[%s8423_s25 + $0x8] sm:$0xff] %v998_v2  ;;  %v1008_v7 = vld [vmem:[%s8418_s24 + $0x30] sm:$0xff]  ;;  %v1010_v8 = vld [vmem:[%s8418_s24 + $0x38] sm:$0xff]  ;;  %v1012_v9 = vld [vmem:[%s8418_s24 + $0x40] sm:$0xff] }
  0x1b   : > { %1001 = vst [vmem:[%s8423_s25 + $0x10] sm:$0xff] %v1000_v3  ;;  %v1014_v10 = vld [vmem:[%s8418_s24 + $0x48] sm:$0xff]  ;;  %v1016_v11 = vld [vmem:[%s8418_s24 + $0x50] sm:$0xff]  ;;  %v1018_v12 = vld [vmem:[%s8418_s24 + $0x58] sm:$0xff] }
  0x1c   : > { %1003 = vst [vmem:[%s8423_s25 + $0x18] sm:$0xff] %v1002_v4  ;;  %v1020_v13 = vld [vmem:[%s8418_s24 + $0x60] sm:$0xff]  ;;  %v1022_v14 = vld [vmem:[%s8418_s24 + $0x68] sm:$0xff]  ;;  %v1024_v15 = vld [vmem:[%s8418_s24 + $0x70] sm:$0xff] }
  0x1d   : > { %1005 = vst [vmem:[%s8423_s25 + $0x20] sm:$0xff] %v1004_v5  ;;  %v1026_v16 = vld [vmem:[%s8418_s24 + $0x78] sm:$0xff]  ;;  %v1028_v17 = vld [vmem:[%s8418_s24 + $0x100] sm:$0xff]  ;;  %v1030_v18 = vld [vmem:[%s8418_s24 + $0x108] sm:$0xff] }
  0x1e   : > { %1007 = vst [vmem:[%s8423_s25 + $0x28] sm:$0xff] %v1006_v6  ;;  %v1032_v19 = vld [vmem:[%s8418_s24 + $0x110] sm:$0xff]  ;;  %v1034_v20 = vld [vmem:[%s8418_s24 + $0x118] sm:$0xff]  ;;  %v1036_v21 = vld [vmem:[%s8418_s24 + $0x120] sm:$0xff] }
  0x1f   : > { %1009 = vst [vmem:[%s8423_s25 + $0x30] sm:$0xff] %v1008_v7  ;;  %v1038_v22 = vld [vmem:[%s8418_s24 + $0x128] sm:$0xff]  ;;  %v1040_v23 = vld [vmem:[%s8418_s24 + $0x130] sm:$0xff]  ;;  %v1042_v24 = vld [vmem:[%s8418_s24 + $0x138] sm:$0xff] }
  0x20   : > { %1011 = vst [vmem:[%s8423_s25 + $0x38] sm:$0xff] %v1010_v8  ;;  %v1044_v25 = vld [vmem:[%s8418_s24 + $0x140] sm:$0xff]  ;;  %v1046_v26 = vld [vmem:[%s8418_s24 + $0x148] sm:$0xff]  ;;  %v1048_v27 = vld [vmem:[%s8418_s24 + $0x150] sm:$0xff] }
  0x21   : > { %1013 = vst [vmem:[%s8423_s25 + $0x40] sm:$0xff] %v1012_v9  ;;  %v1050_v28 = vld [vmem:[%s8418_s24 + $0x158] sm:$0xff]  ;;  %v1052_v29 = vld [vmem:[%s8418_s24 + $0x160] sm:$0xff]  ;;  %v1054_v30 = vld [vmem:[%s8418_s24 + $0x168] sm:$0xff] }
  0x22   : > { %1015 = vst [vmem:[%s8423_s25 + $0x48] sm:$0xff] %v1014_v10  ;;  %v1056_v31 = vld [vmem:[%s8418_s24 + $0x170] sm:$0xff]  ;;  %v1058_v32 = vld [vmem:[%s8418_s24 + $0x178] sm:$0xff]  ;;  %v1060_v33 = vld [vmem:[%s8418_s24 + $0x200] sm:$0xff] }
  0x23   : > { %1017 = vst [vmem:[%s8423_s25 + $0x50] sm:$0xff] %v1016_v11  ;;  %v1062_v34 = vld [vmem:[%s8418_s24 + $0x208] sm:$0xff]  ;;  %v1064_v35 = vld [vmem:[%s8418_s24 + $0x210] sm:$0xff]  ;;  %v1066_v36 = vld [vmem:[%s8418_s24 + $0x218] sm:$0xff] }
  0x24   : > { %1019 = vst [vmem:[%s8423_s25 + $0x58] sm:$0xff] %v1018_v12  ;;  %v1068_v37 = vld [vmem:[%s8418_s24 + $0x220] sm:$0xff]  ;;  %v1070_v38 = vld [vmem:[%s8418_s24 + $0x228] sm:$0xff]  ;;  %v1072_v39 = vld [vmem:[%s8418_s24 + $0x230] sm:$0xff] }
  0x25   : > { %1021 = vst [vmem:[%s8423_s25 + $0x60] sm:$0xff] %v1020_v13  ;;  %v1074_v40 = vld [vmem:[%s8418_s24 + $0x238] sm:$0xff]  ;;  %v1076_v41 = vld [vmem:[%s8418_s24 + $0x240] sm:$0xff]  ;;  %v1078_v42 = vld [vmem:[%s8418_s24 + $0x248] sm:$0xff] }
  0x26   : > { %1023 = vst [vmem:[%s8423_s25 + $0x68] sm:$0xff] %v1022_v14  ;;  %v1080_v43 = vld [vmem:[%s8418_s24 + $0x250] sm:$0xff]  ;;  %v1082_v44 = vld [vmem:[%s8418_s24 + $0x258] sm:$0xff]  ;;  %v1084_v45 = vld [vmem:[%s8418_s24 + $0x260] sm:$0xff] }
  0x27   : > { %1025 = vst [vmem:[%s8423_s25 + $0x70] sm:$0xff] %v1024_v15  ;;  %v1086_v46 = vld [vmem:[%s8418_s24 + $0x268] sm:$0xff]  ;;  %v1088_v47 = vld [vmem:[%s8418_s24 + $0x270] sm:$0xff]  ;;  %v1090_v48 = vld [vmem:[%s8418_s24 + $0x278] sm:$0xff] }
  0x28   : > { %1027 = vst [vmem:[%s8423_s25 + $0x78] sm:$0xff] %v1026_v16  ;;  %v1092_v49 = vld [vmem:[%s8418_s24 + $0x300] sm:$0xff]  ;;  %v1094_v50 = vld [vmem:[%s8418_s24 + $0x308] sm:$0xff]  ;;  %v1096_v51 = vld [vmem:[%s8418_s24 + $0x310] sm:$0xff] }
  0x29   : > { %1029 = vst [vmem:[%s8423_s25 + $0x80] sm:$0xff] %v1028_v17  ;;  %v1098_v52 = vld [vmem:[%s8418_s24 + $0x318] sm:$0xff]  ;;  %v1100_v53 = vld [vmem:[%s8418_s24 + $0x320] sm:$0xff]  ;;  %v1102_v54 = vld [vmem:[%s8418_s24 + $0x328] sm:$0xff] }
  0x2a   : > { %1031 = vst [vmem:[%s8423_s25 + $0x88] sm:$0xff] %v1030_v18  ;;  %v1104_v55 = vld [vmem:[%s8418_s24 + $0x330] sm:$0xff]  ;;  %v1106_v56 = vld [vmem:[%s8418_s24 + $0x338] sm:$0xff]  ;;  %v1108_v57 = vld [vmem:[%s8418_s24 + $0x340] sm:$0xff] }
  0x2b   : > { %1033 = vst [vmem:[%s8423_s25 + $0x90] sm:$0xff] %v1032_v19  ;;  %v1110_v58 = vld [vmem:[%s8418_s24 + $0x348] sm:$0xff]  ;;  %v1112_v59 = vld [vmem:[%s8418_s24 + $0x350] sm:$0xff]  ;;  %v1114_v60 = vld [vmem:[%s8418_s24 + $0x358] sm:$0xff] }
  0x2c   : > { %1035 = vst [vmem:[%s8423_s25 + $0x98] sm:$0xff] %v1034_v20  ;;  %v1116_v61 = vld [vmem:[%s8418_s24 + $0x360] sm:$0xff]  ;;  %v1118_v62 = vld [vmem:[%s8418_s24 + $0x368] sm:$0xff]  ;;  %v1120_v63 = vld [vmem:[%s8418_s24 + $0x370] sm:$0xff] }
  0x2d   : > { %1037 = vst [vmem:[%s8423_s25 + $0xa0] sm:$0xff] %v1036_v21  ;;  %v1122_v0 = vld [vmem:[%s8418_s24 + $0x378] sm:$0xff]  ;;  %v1124_v1 = vld [vmem:[%s8418_s24 + $0x400] sm:$0xff]  ;;  %v1126_v2 = vld [vmem:[%s8418_s24 + $0x408] sm:$0xff] }
  0x2e   : > { %1039 = vst [vmem:[%s8423_s25 + $0xa8] sm:$0xff] %v1038_v22  ;;  %v1128_v3 = vld [vmem:[%s8418_s24 + $0x410] sm:$0xff]  ;;  %v1130_v4 = vld [vmem:[%s8418_s24 + $0x418] sm:$0xff]  ;;  %v1132_v5 = vld [vmem:[%s8418_s24 + $0x420] sm:$0xff] }
  0x2f   : > { %1041 = vst [vmem:[%s8423_s25 + $0xb0] sm:$0xff] %v1040_v23  ;;  %v1134_v6 = vld [vmem:[%s8418_s24 + $0x428] sm:$0xff]  ;;  %v1136_v7 = vld [vmem:[%s8418_s24 + $0x430] sm:$0xff]  ;;  %v1138_v8 = vld [vmem:[%s8418_s24 + $0x438] sm:$0xff] }
  0x30   : > { %1043 = vst [vmem:[%s8423_s25 + $0xb8] sm:$0xff] %v1042_v24  ;;  %v1140_v9 = vld [vmem:[%s8418_s24 + $0x440] sm:$0xff]  ;;  %v1142_v10 = vld [vmem:[%s8418_s24 + $0x448] sm:$0xff]  ;;  %v1144_v11 = vld [vmem:[%s8418_s24 + $0x450] sm:$0xff] }
  0x31   : > { %1045 = vst [vmem:[%s8423_s25 + $0xc0] sm:$0xff] %v1044_v25  ;;  %v1146_v12 = vld [vmem:[%s8418_s24 + $0x458] sm:$0xff]  ;;  %v1148_v13 = vld [vmem:[%s8418_s24 + $0x460] sm:$0xff]  ;;  %v1150_v14 = vld [vmem:[%s8418_s24 + $0x468] sm:$0xff] }
  0x32   : > { %1047 = vst [vmem:[%s8423_s25 + $0xc8] sm:$0xff] %v1046_v26  ;;  %v1152_v15 = vld [vmem:[%s8418_s24 + $0x470] sm:$0xff]  ;;  %v1154_v16 = vld [vmem:[%s8418_s24 + $0x478] sm:$0xff]  ;;  %v1156_v17 = vld [vmem:[%s8418_s24 + $0x500] sm:$0xff] }
  0x33   : > { %1049 = vst [vmem:[%s8423_s25 + $0xd0] sm:$0xff] %v1048_v27  ;;  %v1158_v18 = vld [vmem:[%s8418_s24 + $0x508] sm:$0xff]  ;;  %v1160_v19 = vld [vmem:[%s8418_s24 + $0x510] sm:$0xff]  ;;  %v1162_v20 = vld [vmem:[%s8418_s24 + $0x518] sm:$0xff] }
  0x34   : > { %1051 = vst [vmem:[%s8423_s25 + $0xd8] sm:$0xff] %v1050_v28  ;;  %v1164_v21 = vld [vmem:[%s8418_s24 + $0x520] sm:$0xff]  ;;  %v1166_v22 = vld [vmem:[%s8418_s24 + $0x528] sm:$0xff]  ;;  %v1168_v23 = vld [vmem:[%s8418_s24 + $0x530] sm:$0xff] }
  0x35   : > { %1053 = vst [vmem:[%s8423_s25 + $0xe0] sm:$0xff] %v1052_v29  ;;  %v1170_v24 = vld [vmem:[%s8418_s24 + $0x538] sm:$0xff]  ;;  %v1172_v25 = vld [vmem:[%s8418_s24 + $0x540] sm:$0xff]  ;;  %v1174_v26 = vld [vmem:[%s8418_s24 + $0x548] sm:$0xff] }
  0x36   : > { %1055 = vst [vmem:[%s8423_s25 + $0xe8] sm:$0xff] %v1054_v30  ;;  %v1176_v27 = vld [vmem:[%s8418_s24 + $0x550] sm:$0xff]  ;;  %v1178_v28 = vld [vmem:[%s8418_s24 + $0x558] sm:$0xff]  ;;  %v1180_v29 = vld [vmem:[%s8418_s24 + $0x560] sm:$0xff] }
  0x37   : > { %1057 = vst [vmem:[%s8423_s25 + $0xf0] sm:$0xff] %v1056_v31  ;;  %v1182_v30 = vld [vmem:[%s8418_s24 + $0x568] sm:$0xff]  ;;  %v1184_v31 = vld [vmem:[%s8418_s24 + $0x570] sm:$0xff] }
  0x38   : > { %1059 = vst [vmem:[%s8423_s25 + $0xf8] sm:$0xff] %v1058_v32  ;;  %v1186_v32 = vld [vmem:[%s8418_s24 + $0x578] sm:$0xff] }
  0x39   : > { %1061 = vst [vmem:[%s8423_s25 + $0x100] sm:$0xff] %v1060_v33  ;;  %v1188_v33 = vld [vmem:[%s8418_s24 + $0x600] sm:$0xff] }
  0x3a   : > { %1063 = vst [vmem:[%s8423_s25 + $0x108] sm:$0xff] %v1062_v34  ;;  %v1190_v34 = vld [vmem:[%s8418_s24 + $0x608] sm:$0xff] }
  0x3b   : > { %1065 = vst [vmem:[%s8423_s25 + $0x110] sm:$0xff] %v1064_v35  ;;  %v1192_v35 = vld [vmem:[%s8418_s24 + $0x610] sm:$0xff] }
  0x3c   : > { %1067 = vst [vmem:[%s8423_s25 + $0x118] sm:$0xff] %v1066_v36  ;;  %v1194_v36 = vld [vmem:[%s8418_s24 + $0x618] sm:$0xff] }
  0x3d   : > { %1069 = vst [vmem:[%s8423_s25 + $0x120] sm:$0xff] %v1068_v37  ;;  %v1196_v37 = vld [vmem:[%s8418_s24 + $0x620] sm:$0xff] }
  0x3e   : > { %1071 = vst [vmem:[%s8423_s25 + $0x128] sm:$0xff] %v1070_v38  ;;  %v1198_v38 = vld [vmem:[%s8418_s24 + $0x628] sm:$0xff] }
  0x3f   : > { %1073 = vst [vmem:[%s8423_s25 + $0x130] sm:$0xff] %v1072_v39  ;;  %v1200_v39 = vld [vmem:[%s8418_s24 + $0x630] sm:$0xff] }
  0x40   : > { %1075 = vst [vmem:[%s8423_s25 + $0x138] sm:$0xff] %v1074_v40  ;;  %v1202_v40 = vld [vmem:[%s8418_s24 + $0x638] sm:$0xff] }
  0x41   : > { %1077 = vst [vmem:[%s8423_s25 + $0x140] sm:$0xff] %v1076_v41  ;;  %v1204_v41 = vld [vmem:[%s8418_s24 + $0x640] sm:$0xff] }
  0x42   : > { %1079 = vst [vmem:[%s8423_s25 + $0x148] sm:$0xff] %v1078_v42  ;;  %v1206_v42 = vld [vmem:[%s8418_s24 + $0x648] sm:$0xff] }
  0x43   : > { %1081 = vst [vmem:[%s8423_s25 + $0x150] sm:$0xff] %v1080_v43  ;;  %v1208_v43 = vld [vmem:[%s8418_s24 + $0x650] sm:$0xff] }
  0x44   : > { %1083 = vst [vmem:[%s8423_s25 + $0x158] sm:$0xff] %v1082_v44  ;;  %v1210_v44 = vld [vmem:[%s8418_s24 + $0x658] sm:$0xff] }
  0x45   : > { %1085 = vst [vmem:[%s8423_s25 + $0x160] sm:$0xff] %v1084_v45  ;;  %v1212_v45 = vld [vmem:[%s8418_s24 + $0x660] sm:$0xff] }
  0x46   : > { %1087 = vst [vmem:[%s8423_s25 + $0x168] sm:$0xff] %v1086_v46  ;;  %v1214_v46 = vld [vmem:[%s8418_s24 + $0x668] sm:$0xff] }
  0x47   : > { %1089 = vst [vmem:[%s8423_s25 + $0x170] sm:$0xff] %v1088_v47  ;;  %v1216_v47 = vld [vmem:[%s8418_s24 + $0x670] sm:$0xff] }
  0x48   : > { %1091 = vst [vmem:[%s8423_s25 + $0x178] sm:$0xff] %v1090_v48  ;;  %v1218_v48 = vld [vmem:[%s8418_s24 + $0x678] sm:$0xff] }
  0x49   : > { %1093 = vst [vmem:[%s8423_s25 + $0x180] sm:$0xff] %v1092_v49  ;;  %v1220_v49 = vld [vmem:[%s8418_s24 + $0x700] sm:$0xff] }
  0x4a   : > { %1095 = vst [vmem:[%s8423_s25 + $0x188] sm:$0xff] %v1094_v50  ;;  %v1222_v50 = vld [vmem:[%s8418_s24 + $0x708] sm:$0xff] }
  0x4b   : > { %1097 = vst [vmem:[%s8423_s25 + $0x190] sm:$0xff] %v1096_v51  ;;  %v1224_v51 = vld [vmem:[%s8418_s24 + $0x710] sm:$0xff] }
  0x4c   : > { %1099 = vst [vmem:[%s8423_s25 + $0x198] sm:$0xff] %v1098_v52  ;;  %v1226_v52 = vld [vmem:[%s8418_s24 + $0x718] sm:$0xff] }
  0x4d   : > { %1101 = vst [vmem:[%s8423_s25 + $0x1a0] sm:$0xff] %v1100_v53  ;;  %v1228_v53 = vld [vmem:[%s8418_s24 + $0x720] sm:$0xff] }
  0x4e   : > { %1103 = vst [vmem:[%s8423_s25 + $0x1a8] sm:$0xff] %v1102_v54  ;;  %v1230_v54 = vld [vmem:[%s8418_s24 + $0x728] sm:$0xff] }
  0x4f   : > { %1105 = vst [vmem:[%s8423_s25 + $0x1b0] sm:$0xff] %v1104_v55  ;;  %v1232_v55 = vld [vmem:[%s8418_s24 + $0x730] sm:$0xff] }
  0x50   : > { %1107 = vst [vmem:[%s8423_s25 + $0x1b8] sm:$0xff] %v1106_v56  ;;  %v1234_v56 = vld [vmem:[%s8418_s24 + $0x738] sm:$0xff] }
  0x51   : > { %1109 = vst [vmem:[%s8423_s25 + $0x1c0] sm:$0xff] %v1108_v57  ;;  %v1236_v57 = vld [vmem:[%s8418_s24 + $0x740] sm:$0xff] }
  0x52   : > { %1111 = vst [vmem:[%s8423_s25 + $0x1c8] sm:$0xff] %v1110_v58  ;;  %v1238_v58 = vld [vmem:[%s8418_s24 + $0x748] sm:$0xff] }
  0x53   : > { %1113 = vst [vmem:[%s8423_s25 + $0x1d0] sm:$0xff] %v1112_v59  ;;  %v1240_v59 = vld [vmem:[%s8418_s24 + $0x750] sm:$0xff] }
  0x54   : > { %1115 = vst [vmem:[%s8423_s25 + $0x1d8] sm:$0xff] %v1114_v60  ;;  %v1242_v60 = vld [vmem:[%s8418_s24 + $0x758] sm:$0xff] }
  0x55   : > { %1117 = vst [vmem:[%s8423_s25 + $0x1e0] sm:$0xff] %v1116_v61  ;;  %v1244_v61 = vld [vmem:[%s8418_s24 + $0x760] sm:$0xff] }
  0x56   : > { %1119 = vst [vmem:[%s8423_s25 + $0x1e8] sm:$0xff] %v1118_v62  ;;  %v1246_v62 = vld [vmem:[%s8418_s24 + $0x768] sm:$0xff] }
  0x57   : > { %1121 = vst [vmem:[%s8423_s25 + $0x1f0] sm:$0xff] %v1120_v63  ;;  %v1248_v63 = vld [vmem:[%s8418_s24 + $0x770] sm:$0xff] }
  0x58   : > { %1123 = vst [vmem:[%s8423_s25 + $0x1f8] sm:$0xff] %v1122_v0  ;;  %v1250_v0 = vld [vmem:[%s8418_s24 + $0x778] sm:$0xff] }
  0x59   : > { %1125 = vst [vmem:[%s8423_s25 + $0x200] sm:$0xff] %v1124_v1  ;;  %v1252_v1 = vld [vmem:[%s8418_s24 + $0x800] sm:$0xff] }
  0x5a   : > { %1127 = vst [vmem:[%s8423_s25 + $0x208] sm:$0xff] %v1126_v2  ;;  %v1254_v2 = vld [vmem:[%s8418_s24 + $0x808] sm:$0xff] }
  0x5b   : > { %1129 = vst [vmem:[%s8423_s25 + $0x210] sm:$0xff] %v1128_v3  ;;  %v1256_v3 = vld [vmem:[%s8418_s24 + $0x810] sm:$0xff] }
  0x5c   : > { %1131 = vst [vmem:[%s8423_s25 + $0x218] sm:$0xff] %v1130_v4  ;;  %v1258_v4 = vld [vmem:[%s8418_s24 + $0x818] sm:$0xff] }
  0x5d   : > { %1133 = vst [vmem:[%s8423_s25 + $0x220] sm:$0xff] %v1132_v5  ;;  %v1260_v5 = vld [vmem:[%s8418_s24 + $0x820] sm:$0xff] }
  0x5e   : > { %1135 = vst [vmem:[%s8423_s25 + $0x228] sm:$0xff] %v1134_v6  ;;  %v1262_v6 = vld [vmem:[%s8418_s24 + $0x828] sm:$0xff] }
  0x5f   : > { %1137 = vst [vmem:[%s8423_s25 + $0x230] sm:$0xff] %v1136_v7  ;;  %v1264_v7 = vld [vmem:[%s8418_s24 + $0x830] sm:$0xff] }
  0x60   : > { %1139 = vst [vmem:[%s8423_s25 + $0x238] sm:$0xff] %v1138_v8  ;;  %v1266_v8 = vld [vmem:[%s8418_s24 + $0x838] sm:$0xff] }
  0x61   : > { %1141 = vst [vmem:[%s8423_s25 + $0x240] sm:$0xff] %v1140_v9  ;;  %v1268_v9 = vld [vmem:[%s8418_s24 + $0x840] sm:$0xff] }
  0x62   : > { %1143 = vst [vmem:[%s8423_s25 + $0x248] sm:$0xff] %v1142_v10  ;;  %v1270_v10 = vld [vmem:[%s8418_s24 + $0x848] sm:$0xff] }
  0x63   : > { %1145 = vst [vmem:[%s8423_s25 + $0x250] sm:$0xff] %v1144_v11  ;;  %v1272_v11 = vld [vmem:[%s8418_s24 + $0x850] sm:$0xff] }
  0x64   : > { %1147 = vst [vmem:[%s8423_s25 + $0x258] sm:$0xff] %v1146_v12  ;;  %v1274_v12 = vld [vmem:[%s8418_s24 + $0x858] sm:$0xff] }
  0x65   : > { %1149 = vst [vmem:[%s8423_s25 + $0x260] sm:$0xff] %v1148_v13  ;;  %v1276_v13 = vld [vmem:[%s8418_s24 + $0x860] sm:$0xff] }
  0x66   : > { %1151 = vst [vmem:[%s8423_s25 + $0x268] sm:$0xff] %v1150_v14  ;;  %v1278_v14 = vld [vmem:[%s8418_s24 + $0x868] sm:$0xff] }
  0x67   : > { %1153 = vst [vmem:[%s8423_s25 + $0x270] sm:$0xff] %v1152_v15  ;;  %v1280_v15 = vld [vmem:[%s8418_s24 + $0x870] sm:$0xff] }
  0x68   : > { %1155 = vst [vmem:[%s8423_s25 + $0x278] sm:$0xff] %v1154_v16  ;;  %v1282_v16 = vld [vmem:[%s8418_s24 + $0x878] sm:$0xff] }
  0x69   : > { %1157 = vst [vmem:[%s8423_s25 + $0x280] sm:$0xff] %v1156_v17  ;;  %v1284_v17 = vld [vmem:[%s8418_s24 + $0x900] sm:$0xff] }
  0x6a   : > { %1159 = vst [vmem:[%s8423_s25 + $0x288] sm:$0xff] %v1158_v18  ;;  %v1286_v18 = vld [vmem:[%s8418_s24 + $0x908] sm:$0xff] }
  0x6b   : > { %1161 = vst [vmem:[%s8423_s25 + $0x290] sm:$0xff] %v1160_v19  ;;  %v1288_v19 = vld [vmem:[%s8418_s24 + $0x910] sm:$0xff] }
  0x6c   : > { %1163 = vst [vmem:[%s8423_s25 + $0x298] sm:$0xff] %v1162_v20  ;;  %v1290_v20 = vld [vmem:[%s8418_s24 + $0x918] sm:$0xff] }
  0x6d   : > { %1165 = vst [vmem:[%s8423_s25 + $0x2a0] sm:$0xff] %v1164_v21  ;;  %v1292_v21 = vld [vmem:[%s8418_s24 + $0x920] sm:$0xff] }
  0x6e   : > { %1167 = vst [vmem:[%s8423_s25 + $0x2a8] sm:$0xff] %v1166_v22  ;;  %v1294_v22 = vld [vmem:[%s8418_s24 + $0x928] sm:$0xff] }
  0x6f   : > { %1169 = vst [vmem:[%s8423_s25 + $0x2b0] sm:$0xff] %v1168_v23  ;;  %v1296_v23 = vld [vmem:[%s8418_s24 + $0x930] sm:$0xff] }
  0x70   : > { %1171 = vst [vmem:[%s8423_s25 + $0x2b8] sm:$0xff] %v1170_v24  ;;  %v1298_v24 = vld [vmem:[%s8418_s24 + $0x938] sm:$0xff] }
  0x71   : > { %1173 = vst [vmem:[%s8423_s25 + $0x2c0] sm:$0xff] %v1172_v25  ;;  %v1300_v25 = vld [vmem:[%s8418_s24 + $0x940] sm:$0xff] }
  0x72   : > { %1175 = vst [vmem:[%s8423_s25 + $0x2c8] sm:$0xff] %v1174_v26  ;;  %v1302_v26 = vld [vmem:[%s8418_s24 + $0x948] sm:$0xff] }
  0x73   : > { %1177 = vst [vmem:[%s8423_s25 + $0x2d0] sm:$0xff] %v1176_v27  ;;  %v1304_v27 = vld [vmem:[%s8418_s24 + $0x950] sm:$0xff] }
  0x74   : > { %1179 = vst [vmem:[%s8423_s25 + $0x2d8] sm:$0xff] %v1178_v28  ;;  %v1306_v28 = vld [vmem:[%s8418_s24 + $0x958] sm:$0xff] }
  0x75   : > { %1181 = vst [vmem:[%s8423_s25 + $0x2e0] sm:$0xff] %v1180_v29  ;;  %v1308_v29 = vld [vmem:[%s8418_s24 + $0x960] sm:$0xff] }
  0x76   : > { %1183 = vst [vmem:[%s8423_s25 + $0x2e8] sm:$0xff] %v1182_v30  ;;  %v1310_v30 = vld [vmem:[%s8418_s24 + $0x968] sm:$0xff] }
  0x77   : > { %1185 = vst [vmem:[%s8423_s25 + $0x2f0] sm:$0xff] %v1184_v31  ;;  %v1312_v31 = vld [vmem:[%s8418_s24 + $0x970] sm:$0xff] }
  0x78   : > { %1187 = vst [vmem:[%s8423_s25 + $0x2f8] sm:$0xff] %v1186_v32  ;;  %v1314_v32 = vld [vmem:[%s8418_s24 + $0x978] sm:$0xff] }
  0x79   : > { %1189 = vst [vmem:[%s8423_s25 + $0x300] sm:$0xff] %v1188_v33  ;;  %v1316_v33 = vld [vmem:[%s8418_s24 + $0xa00] sm:$0xff] }
  0x7a   : > { %1191 = vst [vmem:[%s8423_s25 + $0x308] sm:$0xff] %v1190_v34  ;;  %v1318_v34 = vld [vmem:[%s8418_s24 + $0xa08] sm:$0xff] }
  0x7b   : > { %1193 = vst [vmem:[%s8423_s25 + $0x310] sm:$0xff] %v1192_v35  ;;  %v1320_v35 = vld [vmem:[%s8418_s24 + $0xa10] sm:$0xff] }
  0x7c   : > { %1195 = vst [vmem:[%s8423_s25 + $0x318] sm:$0xff] %v1194_v36  ;;  %v1322_v36 = vld [vmem:[%s8418_s24 + $0xa18] sm:$0xff] }
  0x7d   : > { %1197 = vst [vmem:[%s8423_s25 + $0x320] sm:$0xff] %v1196_v37  ;;  %v1324_v37 = vld [vmem:[%s8418_s24 + $0xa20] sm:$0xff] }
  0x7e   : > { %1199 = vst [vmem:[%s8423_s25 + $0x328] sm:$0xff] %v1198_v38  ;;  %v1326_v38 = vld [vmem:[%s8418_s24 + $0xa28] sm:$0xff] }
  0x7f   : > { %1201 = vst [vmem:[%s8423_s25 + $0x330] sm:$0xff] %v1200_v39  ;;  %v1328_v39 = vld [vmem:[%s8418_s24 + $0xa30] sm:$0xff] }
  0x80   : > { %1203 = vst [vmem:[%s8423_s25 + $0x338] sm:$0xff] %v1202_v40  ;;  %v1330_v40 = vld [vmem:[%s8418_s24 + $0xa38] sm:$0xff] }
  0x81   : > { %1205 = vst [vmem:[%s8423_s25 + $0x340] sm:$0xff] %v1204_v41  ;;  %v1332_v41 = vld [vmem:[%s8418_s24 + $0xa40] sm:$0xff] }
  0x82   : > { %1207 = vst [vmem:[%s8423_s25 + $0x348] sm:$0xff] %v1206_v42  ;;  %v1334_v42 = vld [vmem:[%s8418_s24 + $0xa48] sm:$0xff] }
  0x83   : > { %1209 = vst [vmem:[%s8423_s25 + $0x350] sm:$0xff] %v1208_v43  ;;  %v1336_v43 = vld [vmem:[%s8418_s24 + $0xa50] sm:$0xff] }
  0x84   : > { %1211 = vst [vmem:[%s8423_s25 + $0x358] sm:$0xff] %v1210_v44  ;;  %v1338_v44 = vld [vmem:[%s8418_s24 + $0xa58] sm:$0xff] }
  0x85   : > { %1213 = vst [vmem:[%s8423_s25 + $0x360] sm:$0xff] %v1212_v45  ;;  %v1340_v45 = vld [vmem:[%s8418_s24 + $0xa60] sm:$0xff] }
  0x86   : > { %1215 = vst [vmem:[%s8423_s25 + $0x368] sm:$0xff] %v1214_v46  ;;  %v1342_v46 = vld [vmem:[%s8418_s24 + $0xa68] sm:$0xff] }
  0x87   : > { %1217 = vst [vmem:[%s8423_s25 + $0x370] sm:$0xff] %v1216_v47  ;;  %v1344_v47 = vld [vmem:[%s8418_s24 + $0xa70] sm:$0xff] }
  0x88   : > { %1219 = vst [vmem:[%s8423_s25 + $0x378] sm:$0xff] %v1218_v48  ;;  %v1346_v48 = vld [vmem:[%s8418_s24 + $0xa78] sm:$0xff] }
  0x89   : > { %1221 = vst [vmem:[%s8423_s25 + $0x380] sm:$0xff] %v1220_v49  ;;  %v1348_v49 = vld [vmem:[%s8418_s24 + $0xb00] sm:$0xff] }
  0x8a   : > { %1223 = vst [vmem:[%s8423_s25 + $0x388] sm:$0xff] %v1222_v50  ;;  %v1350_v50 = vld [vmem:[%s8418_s24 + $0xb08] sm:$0xff] }
  0x8b   : > { %1225 = vst [vmem:[%s8423_s25 + $0x390] sm:$0xff] %v1224_v51  ;;  %v1352_v51 = vld [vmem:[%s8418_s24 + $0xb10] sm:$0xff] }
  0x8c   : > { %1227 = vst [vmem:[%s8423_s25 + $0x398] sm:$0xff] %v1226_v52  ;;  %v1354_v52 = vld [vmem:[%s8418_s24 + $0xb18] sm:$0xff] }
  0x8d   : > { %1229 = vst [vmem:[%s8423_s25 + $0x3a0] sm:$0xff] %v1228_v53  ;;  %v1356_v53 = vld [vmem:[%s8418_s24 + $0xb20] sm:$0xff] }
  0x8e   : > { %1231 = vst [vmem:[%s8423_s25 + $0x3a8] sm:$0xff] %v1230_v54  ;;  %v1358_v54 = vld [vmem:[%s8418_s24 + $0xb28] sm:$0xff] }
  0x8f   : > { %1233 = vst [vmem:[%s8423_s25 + $0x3b0] sm:$0xff] %v1232_v55  ;;  %v1360_v55 = vld [vmem:[%s8418_s24 + $0xb30] sm:$0xff] }
  0x90   : > { %1235 = vst [vmem:[%s8423_s25 + $0x3b8] sm:$0xff] %v1234_v56  ;;  %v1362_v56 = vld [vmem:[%s8418_s24 + $0xb38] sm:$0xff] }
  0x91   : > { %1237 = vst [vmem:[%s8423_s25 + $0x3c0] sm:$0xff] %v1236_v57  ;;  %v1364_v57 = vld [vmem:[%s8418_s24 + $0xb40] sm:$0xff] }
  0x92   : > { %1239 = vst [vmem:[%s8423_s25 + $0x3c8] sm:$0xff] %v1238_v58  ;;  %v1366_v58 = vld [vmem:[%s8418_s24 + $0xb48] sm:$0xff] }
  0x93   : > { %1241 = vst [vmem:[%s8423_s25 + $0x3d0] sm:$0xff] %v1240_v59  ;;  %v1368_v59 = vld [vmem:[%s8418_s24 + $0xb50] sm:$0xff] }
  0x94   : > { %1243 = vst [vmem:[%s8423_s25 + $0x3d8] sm:$0xff] %v1242_v60  ;;  %v1370_v60 = vld [vmem:[%s8418_s24 + $0xb58] sm:$0xff] }
  0x95   : > { %1245 = vst [vmem:[%s8423_s25 + $0x3e0] sm:$0xff] %v1244_v61  ;;  %v1372_v61 = vld [vmem:[%s8418_s24 + $0xb60] sm:$0xff] }
  0x96   : > { %1247 = vst [vmem:[%s8423_s25 + $0x3e8] sm:$0xff] %v1246_v62  ;;  %v1374_v62 = vld [vmem:[%s8418_s24 + $0xb68] sm:$0xff] }
  0x97   : > { %1249 = vst [vmem:[%s8423_s25 + $0x3f0] sm:$0xff] %v1248_v63  ;;  %v1376_v63 = vld [vmem:[%s8418_s24 + $0xb70] sm:$0xff] }
  0x98   : > { %1251 = vst [vmem:[%s8423_s25 + $0x3f8] sm:$0xff] %v1250_v0  ;;  %v1378_v0 = vld [vmem:[%s8418_s24 + $0xb78] sm:$0xff] }
  0x99   : > { %1253 = vst [vmem:[%s8423_s25 + $0x400] sm:$0xff] %v1252_v1  ;;  %v1380_v1 = vld [vmem:[%s8418_s24 + $0xc00] sm:$0xff] }
  0x9a   : > { %1255 = vst [vmem:[%s8423_s25 + $0x408] sm:$0xff] %v1254_v2  ;;  %v1382_v2 = vld [vmem:[%s8418_s24 + $0xc08] sm:$0xff] }
  0x9b   : > { %1257 = vst [vmem:[%s8423_s25 + $0x410] sm:$0xff] %v1256_v3  ;;  %v1384_v3 = vld [vmem:[%s8418_s24 + $0xc10] sm:$0xff] }
  0x9c   : > { %1259 = vst [vmem:[%s8423_s25 + $0x418] sm:$0xff] %v1258_v4  ;;  %v1386_v4 = vld [vmem:[%s8418_s24 + $0xc18] sm:$0xff] }
  0x9d   : > { %1261 = vst [vmem:[%s8423_s25 + $0x420] sm:$0xff] %v1260_v5  ;;  %v1388_v5 = vld [vmem:[%s8418_s24 + $0xc20] sm:$0xff] }
  0x9e   : > { %1263 = vst [vmem:[%s8423_s25 + $0x428] sm:$0xff] %v1262_v6  ;;  %v1390_v6 = vld [vmem:[%s8418_s24 + $0xc28] sm:$0xff] }
  0x9f   : > { %1265 = vst [vmem:[%s8423_s25 + $0x430] sm:$0xff] %v1264_v7  ;;  %v1392_v7 = vld [vmem:[%s8418_s24 + $0xc30] sm:$0xff] }
  0xa0   : > { %1267 = vst [vmem:[%s8423_s25 + $0x438] sm:$0xff] %v1266_v8  ;;  %v1394_v8 = vld [vmem:[%s8418_s24 + $0xc38] sm:$0xff] }
  0xa1   : > { %1269 = vst [vmem:[%s8423_s25 + $0x440] sm:$0xff] %v1268_v9  ;;  %v1396_v9 = vld [vmem:[%s8418_s24 + $0xc40] sm:$0xff] }
  0xa2   : > { %1271 = vst [vmem:[%s8423_s25 + $0x448] sm:$0xff] %v1270_v10  ;;  %v1398_v10 = vld [vmem:[%s8418_s24 + $0xc48] sm:$0xff] }
  0xa3   : > { %1273 = vst [vmem:[%s8423_s25 + $0x450] sm:$0xff] %v1272_v11  ;;  %v1400_v11 = vld [vmem:[%s8418_s24 + $0xc50] sm:$0xff] }
  0xa4   : > { %1275 = vst [vmem:[%s8423_s25 + $0x458] sm:$0xff] %v1274_v12  ;;  %v1402_v12 = vld [vmem:[%s8418_s24 + $0xc58] sm:$0xff] }
  0xa5   : > { %1277 = vst [vmem:[%s8423_s25 + $0x460] sm:$0xff] %v1276_v13  ;;  %v1404_v13 = vld [vmem:[%s8418_s24 + $0xc60] sm:$0xff] }
  0xa6   : > { %1279 = vst [vmem:[%s8423_s25 + $0x468] sm:$0xff] %v1278_v14  ;;  %v1406_v14 = vld [vmem:[%s8418_s24 + $0xc68] sm:$0xff] }
  0xa7   : > { %1281 = vst [vmem:[%s8423_s25 + $0x470] sm:$0xff] %v1280_v15  ;;  %v1408_v15 = vld [vmem:[%s8418_s24 + $0xc70] sm:$0xff] }
  0xa8   : > { %1283 = vst [vmem:[%s8423_s25 + $0x478] sm:$0xff] %v1282_v16  ;;  %v1410_v16 = vld [vmem:[%s8418_s24 + $0xc78] sm:$0xff] }
  0xa9   : > { %1285 = vst [vmem:[%s8423_s25 + $0x480] sm:$0xff] %v1284_v17  ;;  %v1412_v17 = vld [vmem:[%s8418_s24 + $0xd00] sm:$0xff] }
  0xaa   : > { %1287 = vst [vmem:[%s8423_s25 + $0x488] sm:$0xff] %v1286_v18  ;;  %v1414_v18 = vld [vmem:[%s8418_s24 + $0xd08] sm:$0xff] }
  0xab   : > { %1289 = vst [vmem:[%s8423_s25 + $0x490] sm:$0xff] %v1288_v19  ;;  %v1416_v19 = vld [vmem:[%s8418_s24 + $0xd10] sm:$0xff] }
  0xac   : > { %1291 = vst [vmem:[%s8423_s25 + $0x498] sm:$0xff] %v1290_v20  ;;  %v1418_v20 = vld [vmem:[%s8418_s24 + $0xd18] sm:$0xff] }
  0xad   : > { %1293 = vst [vmem:[%s8423_s25 + $0x4a0] sm:$0xff] %v1292_v21  ;;  %v1420_v21 = vld [vmem:[%s8418_s24 + $0xd20] sm:$0xff] }
  0xae   : > { %1295 = vst [vmem:[%s8423_s25 + $0x4a8] sm:$0xff] %v1294_v22  ;;  %v1422_v22 = vld [vmem:[%s8418_s24 + $0xd28] sm:$0xff] }
  0xaf   : > { %1297 = vst [vmem:[%s8423_s25 + $0x4b0] sm:$0xff] %v1296_v23  ;;  %v1424_v23 = vld [vmem:[%s8418_s24 + $0xd30] sm:$0xff] }
  0xb0   : > { %1299 = vst [vmem:[%s8423_s25 + $0x4b8] sm:$0xff] %v1298_v24  ;;  %v1426_v24 = vld [vmem:[%s8418_s24 + $0xd38] sm:$0xff] }
  0xb1   : > { %1301 = vst [vmem:[%s8423_s25 + $0x4c0] sm:$0xff] %v1300_v25  ;;  %v1428_v25 = vld [vmem:[%s8418_s24 + $0xd40] sm:$0xff] }
  0xb2   : > { %1303 = vst [vmem:[%s8423_s25 + $0x4c8] sm:$0xff] %v1302_v26  ;;  %v1430_v26 = vld [vmem:[%s8418_s24 + $0xd48] sm:$0xff] }
  0xb3   : > { %1305 = vst [vmem:[%s8423_s25 + $0x4d0] sm:$0xff] %v1304_v27  ;;  %v1432_v27 = vld [vmem:[%s8418_s24 + $0xd50] sm:$0xff] }
  0xb4   : > { %1307 = vst [vmem:[%s8423_s25 + $0x4d8] sm:$0xff] %v1306_v28  ;;  %v1434_v28 = vld [vmem:[%s8418_s24 + $0xd58] sm:$0xff] }
  0xb5   : > { %1309 = vst [vmem:[%s8423_s25 + $0x4e0] sm:$0xff] %v1308_v29  ;;  %v1436_v29 = vld [vmem:[%s8418_s24 + $0xd60] sm:$0xff] }
  0xb6   : > { %1311 = vst [vmem:[%s8423_s25 + $0x4e8] sm:$0xff] %v1310_v30  ;;  %v1438_v30 = vld [vmem:[%s8418_s24 + $0xd68] sm:$0xff] }
  0xb7   : > { %1313 = vst [vmem:[%s8423_s25 + $0x4f0] sm:$0xff] %v1312_v31  ;;  %v1440_v31 = vld [vmem:[%s8418_s24 + $0xd70] sm:$0xff] }
  0xb8   : > { %1315 = vst [vmem:[%s8423_s25 + $0x4f8] sm:$0xff] %v1314_v32  ;;  %v1442_v32 = vld [vmem:[%s8418_s24 + $0xd78] sm:$0xff] }
  0xb9   : > { %1317 = vst [vmem:[%s8423_s25 + $0x500] sm:$0xff] %v1316_v33  ;;  %v1444_v33 = vld [vmem:[%s8418_s24 + $0xe00] sm:$0xff] }
  0xba   : > { %1319 = vst [vmem:[%s8423_s25 + $0x508] sm:$0xff] %v1318_v34  ;;  %v1446_v34 = vld [vmem:[%s8418_s24 + $0xe08] sm:$0xff] }
  0xbb   : > { %1321 = vst [vmem:[%s8423_s25 + $0x510] sm:$0xff] %v1320_v35  ;;  %v1448_v35 = vld [vmem:[%s8418_s24 + $0xe10] sm:$0xff] }
  0xbc   : > { %1323 = vst [vmem:[%s8423_s25 + $0x518] sm:$0xff] %v1322_v36  ;;  %v1450_v36 = vld [vmem:[%s8418_s24 + $0xe18] sm:$0xff] }
  0xbd   : > { %1325 = vst [vmem:[%s8423_s25 + $0x520] sm:$0xff] %v1324_v37  ;;  %v1452_v37 = vld [vmem:[%s8418_s24 + $0xe20] sm:$0xff] }
  0xbe   : > { %1327 = vst [vmem:[%s8423_s25 + $0x528] sm:$0xff] %v1326_v38  ;;  %v1454_v38 = vld [vmem:[%s8418_s24 + $0xe28] sm:$0xff] }
  0xbf   : > { %1329 = vst [vmem:[%s8423_s25 + $0x530] sm:$0xff] %v1328_v39  ;;  %v1456_v39 = vld [vmem:[%s8418_s24 + $0xe30] sm:$0xff] }
  0xc0   : > { %1331 = vst [vmem:[%s8423_s25 + $0x538] sm:$0xff] %v1330_v40  ;;  %v1458_v40 = vld [vmem:[%s8418_s24 + $0xe38] sm:$0xff] }
  0xc1   : > { %1333 = vst [vmem:[%s8423_s25 + $0x540] sm:$0xff] %v1332_v41  ;;  %v1460_v41 = vld [vmem:[%s8418_s24 + $0xe40] sm:$0xff] }
  0xc2   : > { %1335 = vst [vmem:[%s8423_s25 + $0x548] sm:$0xff] %v1334_v42  ;;  %v1462_v42 = vld [vmem:[%s8418_s24 + $0xe48] sm:$0xff] }
  0xc3   : > { %1337 = vst [vmem:[%s8423_s25 + $0x550] sm:$0xff] %v1336_v43  ;;  %v1464_v43 = vld [vmem:[%s8418_s24 + $0xe50] sm:$0xff] }
  0xc4   : > { %1339 = vst [vmem:[%s8423_s25 + $0x558] sm:$0xff] %v1338_v44  ;;  %v1466_v44 = vld [vmem:[%s8418_s24 + $0xe58] sm:$0xff] }
  0xc5   : > { %1341 = vst [vmem:[%s8423_s25 + $0x560] sm:$0xff] %v1340_v45  ;;  %v1468_v45 = vld [vmem:[%s8418_s24 + $0xe60] sm:$0xff] }
  0xc6   : > { %1343 = vst [vmem:[%s8423_s25 + $0x568] sm:$0xff] %v1342_v46  ;;  %v1470_v46 = vld [vmem:[%s8418_s24 + $0xe68] sm:$0xff] }
  0xc7   : > { %1345 = vst [vmem:[%s8423_s25 + $0x570] sm:$0xff] %v1344_v47  ;;  %v1472_v47 = vld [vmem:[%s8418_s24 + $0xe70] sm:$0xff] }
  0xc8   : > { %1347 = vst [vmem:[%s8423_s25 + $0x578] sm:$0xff] %v1346_v48  ;;  %v1474_v48 = vld [vmem:[%s8418_s24 + $0xe78] sm:$0xff] }
  0xc9   : > { %1349 = vst [vmem:[%s8423_s25 + $0x580] sm:$0xff] %v1348_v49 }
  0xca   : > { %1351 = vst [vmem:[%s8423_s25 + $0x588] sm:$0xff] %v1350_v50 }
  0xcb   : > { %1353 = vst [vmem:[%s8423_s25 + $0x590] sm:$0xff] %v1352_v51 }
  0xcc   : > { %1355 = vst [vmem:[%s8423_s25 + $0x598] sm:$0xff] %v1354_v52 }
  0xcd   : > { %1357 = vst [vmem:[%s8423_s25 + $0x5a0] sm:$0xff] %v1356_v53 }
  0xce   : > { %1359 = vst [vmem:[%s8423_s25 + $0x5a8] sm:$0xff] %v1358_v54 }
  0xcf   : > { %1361 = vst [vmem:[%s8423_s25 + $0x5b0] sm:$0xff] %v1360_v55 }
  0xd0   : > { %1363 = vst [vmem:[%s8423_s25 + $0x5b8] sm:$0xff] %v1362_v56 }
  0xd1   : > { %1365 = vst [vmem:[%s8423_s25 + $0x5c0] sm:$0xff] %v1364_v57 }
  0xd2   : > { %1367 = vst [vmem:[%s8423_s25 + $0x5c8] sm:$0xff] %v1366_v58 }
  0xd3   : > { %1369 = vst [vmem:[%s8423_s25 + $0x5d0] sm:$0xff] %v1368_v59 }
  0xd4   : > { %1371 = vst [vmem:[%s8423_s25 + $0x5d8] sm:$0xff] %v1370_v60 }
  0xd5   : > { %1373 = vst [vmem:[%s8423_s25 + $0x5e0] sm:$0xff] %v1372_v61 }
  0xd6   : > { %1375 = vst [vmem:[%s8423_s25 + $0x5e8] sm:$0xff] %v1374_v62 }
  0xd7   : > { %1377 = vst [vmem:[%s8423_s25 + $0x5f0] sm:$0xff] %v1376_v63 }
  0xd8   : > { %1379 = vst [vmem:[%s8423_s25 + $0x5f8] sm:$0xff] %v1378_v0 }
  0xd9   : > { %1381 = vst [vmem:[%s8423_s25 + $0x600] sm:$0xff] %v1380_v1 }
  0xda   : > { %1383 = vst [vmem:[%s8423_s25 + $0x608] sm:$0xff] %v1382_v2 }
  0xdb   : > { %1385 = vst [vmem:[%s8423_s25 + $0x610] sm:$0xff] %v1384_v3 }
  0xdc   : > { %1387 = vst [vmem:[%s8423_s25 + $0x618] sm:$0xff] %v1386_v4 }
  0xdd   : > { %1389 = vst [vmem:[%s8423_s25 + $0x620] sm:$0xff] %v1388_v5 }
  0xde   : > { %1391 = vst [vmem:[%s8423_s25 + $0x628] sm:$0xff] %v1390_v6 }
  0xdf   : > { %1393 = vst [vmem:[%s8423_s25 + $0x630] sm:$0xff] %v1392_v7 }
  0xe0   : > { %1395 = vst [vmem:[%s8423_s25 + $0x638] sm:$0xff] %v1394_v8 }
  0xe1   : > { %1397 = vst [vmem:[%s8423_s25 + $0x640] sm:$0xff] %v1396_v9 }
  0xe2   : > { %1399 = vst [vmem:[%s8423_s25 + $0x648] sm:$0xff] %v1398_v10 }
  0xe3   : > { %1401 = vst [vmem:[%s8423_s25 + $0x650] sm:$0xff] %v1400_v11 }
  0xe4   : > { %1403 = vst [vmem:[%s8423_s25 + $0x658] sm:$0xff] %v1402_v12 }
  0xe5   : > { %1405 = vst [vmem:[%s8423_s25 + $0x660] sm:$0xff] %v1404_v13 }
  0xe6   : > { %1407 = vst [vmem:[%s8423_s25 + $0x668] sm:$0xff] %v1406_v14 }
  0xe7   : > { %1409 = vst [vmem:[%s8423_s25 + $0x670] sm:$0xff] %v1408_v15 }
  0xe8   : > { %1411 = vst [vmem:[%s8423_s25 + $0x678] sm:$0xff] %v1410_v16 }
  0xe9   : > { %1413 = vst [vmem:[%s8423_s25 + $0x680] sm:$0xff] %v1412_v17 }
  0xea   : > { %1415 = vst [vmem:[%s8423_s25 + $0x688] sm:$0xff] %v1414_v18 }
  0xeb   : > { %1417 = vst [vmem:[%s8423_s25 + $0x690] sm:$0xff] %v1416_v19 }
  0xec   : > { %1419 = vst [vmem:[%s8423_s25 + $0x698] sm:$0xff] %v1418_v20 }
  0xed   : > { %1421 = vst [vmem:[%s8423_s25 + $0x6a0] sm:$0xff] %v1420_v21 }
  0xee   : > { %1423 = vst [vmem:[%s8423_s25 + $0x6a8] sm:$0xff] %v1422_v22 }
  0xef   : > { %1425 = vst [vmem:[%s8423_s25 + $0x6b0] sm:$0xff] %v1424_v23 }
  0xf0   : > { %1427 = vst [vmem:[%s8423_s25 + $0x6b8] sm:$0xff] %v1426_v24 }
  0xf1   : > { %1429 = vst [vmem:[%s8423_s25 + $0x6c0] sm:$0xff] %v1428_v25 }
  0xf2   : > { %1431 = vst [vmem:[%s8423_s25 + $0x6c8] sm:$0xff] %v1430_v26 }
  0xf3   : > { %1433 = vst [vmem:[%s8423_s25 + $0x6d0] sm:$0xff] %v1432_v27 }
  0xf4   : > { %1435 = vst [vmem:[%s8423_s25 + $0x6d8] sm:$0xff] %v1434_v28 }
  0xf5   : > { %1437 = vst [vmem:[%s8423_s25 + $0x6e0] sm:$0xff] %v1436_v29 }
  0xf6   : > { %1439 = vst [vmem:[%s8423_s25 + $0x6e8] sm:$0xff] %v1438_v30 }
  0xf7   : > { %1441 = vst [vmem:[%s8423_s25 + $0x6f0] sm:$0xff] %v1440_v31 }
  0xf8   : > { %1443 = vst [vmem:[%s8423_s25 + $0x6f8] sm:$0xff] %v1442_v32 }
  0xf9   : > { %1445 = vst [vmem:[%s8423_s25 + $0x700] sm:$0xff] %v1444_v33 }
  0xfa   : > { %1447 = vst [vmem:[%s8423_s25 + $0x708] sm:$0xff] %v1446_v34 }
  0xfb   : > { %1449 = vst [vmem:[%s8423_s25 + $0x710] sm:$0xff] %v1448_v35 }
  0xfc   : > { %1451 = vst [vmem:[%s8423_s25 + $0x718] sm:$0xff] %v1450_v36 }
  0xfd   : > { %1453 = vst [vmem:[%s8423_s25 + $0x720] sm:$0xff] %v1452_v37 }
  0xfe   : > { %1455 = vst [vmem:[%s8423_s25 + $0x728] sm:$0xff] %v1454_v38 }
  0xff   : > { %1457 = vst [vmem:[%s8423_s25 + $0x730] sm:$0xff] %v1456_v39 }
 0x100   : > { %1459 = vst [vmem:[%s8423_s25 + $0x738] sm:$0xff] %v1458_v40 }
 0x101   : > { %1461 = vst [vmem:[%s8423_s25 + $0x740] sm:$0xff] %v1460_v41 }
 0x102   : > { %1463 = vst [vmem:[%s8423_s25 + $0x748] sm:$0xff] %v1462_v42 }
 0x103   : > { %1465 = vst [vmem:[%s8423_s25 + $0x750] sm:$0xff] %v1464_v43 }
 0x104   : > { %1467 = vst [vmem:[%s8423_s25 + $0x758] sm:$0xff] %v1466_v44 }
 0x105   : > { %1469 = vst [vmem:[%s8423_s25 + $0x760] sm:$0xff] %v1468_v45 }
 0x106   : > { %1471 = vst [vmem:[%s8423_s25 + $0x768] sm:$0xff] %v1470_v46 }
 0x107   : > { %1473 = vst [vmem:[%s8423_s25 + $0x770] sm:$0xff] %v1472_v47 }
 0x108   : > { %1475 = vst [vmem:[%s8423_s25 + $0x778] sm:$0xff] %v1474_v48 }
 0x109 PF: > { %p7709_p5 = scmp.ge.s32.totalorder %s8289_s28, 1  ;;  %p1480_p6 = scmp.lt.s32.totalorder %s8289_s28, 3 }
 0x10b   : > { %p1481_p7 = pnand %p7709_p5, %p1480_p6 }
 0x10c   : > { %s12245_s19 = sld [smem:[#allocation5_spill]] (!%p1481_p7)  ;;  %s1487_s21 = sand.u32 (!%p1481_p7), 1, %s8281_s26  }
 0x10d   : > { %1484 = sbr.rel (%p1481_p7) target bundleno = 3414 (0xd56), region = 122  ;;  %s12246_s25 = sadd.s32 (!%p1481_p7), 4294967295, %s8289_s28  }
 0x10e   : > { %s8181_s24 = smul.u32 (!%p1481_p7), 1920, %s1487_s21  ;;  %s7710_s0 = sshll.u32 (!%p1481_p7), %s12246_s25, 4 }
 0x10f   : > { %p1540_p8 = scmp.lt.s32.totalorder (!%p1481_p7), %s7710_s0, 31 }
 0x110   : > { %s8923_s26 = scalar_lea.vmem (!%p1481_p7), [#allocation3], %s8181_s24 }
 0x112   : > { %v1790_v49 = vld [vmem:[%s12245_s19 + $0x28] sm:$0x1f]  ;;  %vm2516_vm0 = vcmask 1044480   ;;  %v1789_v50 = vld [vmem:[%s12245_s19 + $0x20] sm:$0xff]  ;;  %v1788_v51 = vld [vmem:[%s12245_s19 + $0x18] sm:$0xff]  ;;  %vm1795_vm1 = vcmask 367616  }
 0x113   : > { %7712 = vmatpush.msk.msra.mxu0 %vm2516_vm0, %v1790_v49  ;;  %v1787_v52 = vld [vmem:[%s12245_s19 + $0x10] sm:$0xff]  ;;  %v1786_v53 = vld [vmem:[%s12245_s19 + $0x8] sm:$0xff]  ;;  %v1785_v54 = vld [vmem:[%s12245_s19] sm:$0xff]  ;;  %s12251_s0 = smov (!%p1540_p8, %s7710_s0), 31  ;;  %vm7624_vm6 = vcmask 7168  }
 0x114   : > { %v1545_v55 = vld [vmem:[%s8923_s26] sm:$0xff]  ;;  %v1546_v56 = vld [vmem:[%s8923_s26 + $0x8] sm:$0xff]  ;;  %v1547_v57 = vld [vmem:[%s8923_s26 + $0x10] sm:$0xff]  ;;  %s7711_s28 = sshll.u32 %s12251_s0, 3 }
 0x115   : > { %2531 = vmatpush.msra.mxu0 %v1789_v50  ;;  %v1548_v58 = vld [vmem:[%s8923_s26 + $0x18] sm:$0xff]  ;;  %v1549_v59 = vld [vmem:[%s8923_s26 + $0x20] sm:$0xff]  ;;  %v1550_v60 = vld [vmem:[%s8923_s26 + $0x28] sm:$0xff]  ;;  %s12166_s20 = scalar_lea.vmem %s12240_s17, %s7711_s28 }
 0x116   : > { %v1551_v61 = vld [vmem:[%s8923_s26 + $0x30] sm:$0xff]  ;;  %v1552_v62 = vld [vmem:[%s8923_s26 + $0x38] sm:$0xff]  ;;  %v1553_v63 = vld [vmem:[%s8923_s26 + $0x40] sm:$0xff] }
 0x117   : > { %2532 = vmatpush.msra.mxu0 %v1788_v51  ;;  %v3512_v0 = vld [vmem:[%s12226_s3 + $0x78] sm:$0xff]  ;;  %v3511_v1 = vld [vmem:[%s12226_s3 + $0x70] sm:$0xff]  ;;  %v3510_v2 = vld [vmem:[%s12226_s3 + $0x68] sm:$0xff] }
 0x118   : > { %3517 = vmatpush.msra.mxu1 %v3512_v0  ;;  %v1554_v3 = vld [vmem:[%s8923_s26 + $0x48] sm:$0xff]  ;;  %v3509_v4 = vld [vmem:[%s12226_s3 + $0x60] sm:$0xff]  ;;  %v3508_v5 = vld [vmem:[%s12226_s3 + $0x58] sm:$0xff] }
 0x119   : > { %2533 = vmatpush.msra.mxu0 %v1787_v52  ;;  %v3507_v6 = vld [vmem:[%s12226_s3 + $0x50] sm:$0xff]  ;;  %v3506_v7 = vld [vmem:[%s12226_s3 + $0x48] sm:$0xff]  ;;  %v3505_v9 = vld [vmem:[%s12226_s3 + $0x40] sm:$0xff] }
 0x11a   : > { %3518 = vmatpush.msra.mxu1 %v3511_v1  ;;  %v1555_v8 = vld [vmem:[%s8923_s26 + $0x50] sm:$0xff]  ;;  %v3502_v12 = vld [vmem:[%s12226_s3 + $0x28] sm:$0xff]  ;;  %v1556_v13 = vld [vmem:[%s8923_s26 + $0x58] sm:$0xff] }
 0x11b   : > { %2534 = vmatpush.msra.mxu0 %v1786_v53  ;;  %v3504_v10 = vld [vmem:[%s12226_s3 + $0x38] sm:$0xff]  ;;  %v3503_v11 = vld [vmem:[%s12226_s3 + $0x30] sm:$0xff]  ;;  %v3501_v14 = vld [vmem:[%s12226_s3 + $0x20] sm:$0xff] }
 0x11c   : > { %3519 = vmatpush.msra.mxu1 %v3510_v2  ;;  %v3500_v15 = vld [vmem:[%s12226_s3 + $0x18] sm:$0xff]  ;;  %v3499_v16 = vld [vmem:[%s12226_s3 + $0x10] sm:$0xff]  ;;  %v1557_v17 = vld [vmem:[%s8923_s26 + $0x60] sm:$0xff] }
 0x11d   : > { %2535 = vmatpush.msra.mxu0 %v1785_v54  ;;  %v3498_v18 = vld [vmem:[%s12226_s3 + $0x8] sm:$0xff]  ;;  %v3497_v19 = vld [vmem:[%s12226_s3] sm:$0xff]  ;;  %v1559_v21 = vld [vmem:[%s8923_s26 + $0x70] sm:$0xff] }
 0x11e   : > { %7713 = vmatmul.msk.f32.vlgmr.msra.gmra.mxu0 %vm1795_vm1, %v1545_v55  ;;  %3520 = vmatpush.msra.mxu1 %v3509_v4  ;;  %v1558_v20 = vld [vmem:[%s8923_s26 + $0x68] sm:$0xff]  ;;  %v1560_v22 = vld [vmem:[%s8923_s26 + $0x78] sm:$0xff]  ;;  %v1561_v25 = vld [vmem:[%s8923_s26 + $0x80] sm:$0xff] }
 0x11f   : > { %v9008_v23 = vld [vmem:[%s12225_s2] ss:$0 sm:$0xff]  ;;  %v1562_v29 = vld [vmem:[%s8923_s26 + $0x88] sm:$0xff]  ;;  %v1563_v33 = vld [vmem:[%s8923_s26 + $0x90] sm:$0xff] }
 0x120   : > { %3521 = vmatpush.msra.mxu1 %v3508_v5  ;;  %v1564_v37 = vld [vmem:[%s8923_s26 + $0x98] sm:$0xff]  ;;  %v1565_v41 = vld [vmem:[%s8923_s26 + $0xa0] sm:$0xff]  ;;  %v1566_v45 = vld [vmem:[%s8923_s26 + $0xa8] sm:$0xff] }
 0x121   : > { %v1567_v49 = vld [vmem:[%s8923_s26 + $0xb0] sm:$0xff]  ;;  %v1568_v53 = vld [vmem:[%s8923_s26 + $0xb8] sm:$0xff]  ;;  %v4507_v2 = vld [vmem:[%s12228_s5 + $0x68] sm:$0xff] }
 0x122   : > { %3522 = vmatpush.msra.mxu1 %v3507_v6  ;;  %v4508_v0 = vld [vmem:[%s12228_s5 + $0x70] sm:$0xff]  ;;  %v4505_v4 = vld [vmem:[%s12228_s5 + $0x58] sm:$0xff] }
 0x123   : > { %v1571_v6 = vld [vmem:[%s8923_s26 + $0xd0] sm:$0xff] }
 0x124   : > { %3523 = vmatpush.msra.mxu1 %v3506_v7 }
 0x126   : > { %7714 = vmatmul.msk.f32.gmra.mxu0 %vm1795_vm1, %v1546_v56  ;;  %3524 = vmatpush.msra.mxu1 %v3505_v9 }
 0x128   : > { %3525 = vmatpush.msra.mxu1 %v3504_v10  ;;  %v4503_v10 = vld [vmem:[%s12228_s5 + $0x48] sm:$0xff] }
 0x12a   : > { %3526 = vmatpush.msra.mxu1 %v3503_v11  ;;  %v4502_v11 = vld [vmem:[%s12228_s5 + $0x40] sm:$0xff] }
 0x12c   : > { %3527 = vmatpush.msra.mxu1 %v3502_v12  ;;  %v4501_v12 = vld [vmem:[%s12228_s5 + $0x38] sm:$0xff] }
 0x12e   : > { %7715 = vmatmul.msk.f32.gmra.mxu0 %vm1795_vm1, %v1547_v57  ;;  %3528 = vmatpush.msra.mxu1 %v3501_v14  ;;  %v1569_v57 = vld [vmem:[%s8923_s26 + $0xc0] sm:$0xff]  ;;  %v1572_v14 = vld [vmem:[%s8923_s26 + $0xd8] sm:$0xff] }
 0x130   : > { %3529 = vmatpush.msra.mxu1 %v3500_v15 }
 0x132   : > { %3530 = vmatpush.msra.mxu1 %v3499_v16  ;;  %v4500_v16 = vld [vmem:[%s12228_s5 + $0x30] sm:$0xff] }
 0x134   : > { %3531 = vmatpush.msra.mxu1 %v3498_v18  ;;  %v4499_v18 = vld [vmem:[%s12228_s5 + $0x28] sm:$0xff] }
 0x136   : > { %7716 = vmatmul.msk.f32.gmra.mxu0 %vm1795_vm1, %v1548_v58  ;;  %3532 = vmatpush.msra.mxu1 %v3497_v19  ;;  %v4498_v19 = vld [vmem:[%s12228_s5 + $0x20] sm:$0xff] }
 0x13e   : > { %7717 = vmatmul.msk.f32.gmra.mxu0 %vm1795_vm1, %v1549_v59 }
 0x146   : > { %7718 = vmatmul.msk.f32.gmra.mxu0 %vm1795_vm1, %v1550_v60  ;;  %v4509_v60 = vld [vmem:[%s12228_s5 + $0x78] sm:$0xff] }
 0x147   : > { %4514 = vmatpush.msra.mxu2 %v4509_v60 }
 0x149   : > { %4515 = vmatpush.msra.mxu2 %v4508_v0 }
 0x14b   : > { %4516 = vmatpush.msra.mxu2 %v4507_v2 }
 0x14e   : > { %7719 = vmatmul.msk.f32.gmra.mxu0 %vm1795_vm1, %v1551_v61 }
 0x156   : > { %7720 = vmatmul.msk.f32.gmra.mxu0 %vm1795_vm1, %v1552_v62  ;;  %v1570_v62 = vld [vmem:[%s8923_s26 + $0xc8] sm:$0xff] }
 0x15e   : > { %7721 = vmatmul.msk.f32.gmra.mxu0 %vm1795_vm1, %v1553_v63 }
 0x166   : > { %7722 = vmatmul.msk.f32.gmra.mxu0 %vm1795_vm1, %v1554_v3  ;;  %v4506_v3 = vld [vmem:[%s12228_s5 + $0x60] sm:$0xff] }
 0x167   : > { %4517 = vmatpush.msra.mxu2 %v4506_v3 }
 0x169   : > { %4518 = vmatpush.msra.mxu2 %v4505_v4 }
 0x16e   : > { %7723 = vmatmul.msk.f32.gmra.mxu0 %vm1795_vm1, %v1555_v8  ;;  %v4504_v8 = vld [vmem:[%s12228_s5 + $0x50] sm:$0xff] }
 0x16f   : > { %4519 = vmatpush.msra.mxu2 %v4504_v8 }
 0x171   : > { %4520 = vmatpush.msra.mxu2 %v4503_v10 }
 0x173   : > { %4521 = vmatpush.msra.mxu2 %v4502_v11 }
 0x175   : > { %4522 = vmatpush.msra.mxu2 %v4501_v12 }
 0x176   : > { %7724 = vmatmul.msk.f32.gmra.mxu0 %vm1795_vm1, %v1556_v13 }
 0x177   : > { %4523 = vmatpush.msra.mxu2 %v4500_v16 }
 0x179   : > { %4524 = vmatpush.msra.mxu2 %v4499_v18 }
 0x17b   : > { %4525 = vmatpush.msra.mxu2 %v4498_v19 }
 0x17e   : > { %7725 = vmatmul.msk.f32.gmra.mxu0 %vm1795_vm1, %v1557_v17 }
 0x186   : > { %7726 = vmatmul.msk.f32.gmra.mxu0 %vm1795_vm1, %v1558_v20  ;;  %v4497_v20 = vld [vmem:[%s12228_s5 + $0x18] sm:$0xff] }
 0x187   : > { %4526 = vmatpush.msra.mxu2 %v4497_v20 }
 0x18e   : > { %7727 = vmatmul.msk.f32.gmra.mxu0 %vm1795_vm1, %v1559_v21 }
 0x196   : > { %7728 = vmatmul.msk.f32.gmra.mxu0 %vm1795_vm1, %v1560_v22  ;;  %v1573_v22 = vld [vmem:[%s8923_s26 + $0xe0] sm:$0xff] }
 0x19b   : > { %v2537_v24 = vpop.f32.mrf.mxu0 }
 0x19c   : > { %v2538_v26 = vadd.f32 %v9008_v23, %v2537_v24 }
 0x19e   : > { %7729 = vmatmul.msk.f32.gmra.mxu0 %vm1795_vm1, %v1561_v25  ;;  %v3257_v27 = vmax.f32 %v2538_v26, 0.0  ;;  %v4496_v25 = vld [vmem:[%s12228_s5 + $0x10] sm:$0xff] }
 0x19f   : > { %4527 = vmatpush.msra.mxu2 %v4496_v25 }
 0x1a0   : > { %3533 = vmatmul.f32.vlgmr.msra.gmra.mxu1 %v3257_v27  ;;  %v4495_v27 = vld [vmem:[%s12228_s5 + $0x8] sm:$0xff] }
 0x1a1   : > { %4528 = vmatpush.msra.mxu2 %v4495_v27 }
 0x1a3   : > { %v2540_v28 = vpop.f32.mrf.mxu0 }
 0x1a4   : > { %v2541_v30 = vadd.f32 %v9008_v23, %v2540_v28  ;;  %v4494_v28 = vld [vmem:[%s12228_s5] sm:$0xff] }
 0x1a5   : > { %4529 = vmatpush.msra.mxu2 %v4494_v28 }
 0x1a6   : > { %7730 = vmatmul.msk.f32.gmra.mxu0 %vm1795_vm1, %v1562_v29  ;;  %v3258_v31 = vmax.f32 %v2541_v30, 0.0  ;;  %v1574_v30 = vld [vmem:[%s8923_s26 + $0xe8] sm:$0xff] }
 0x1a8   : > { %3536 = vmatmul.f32.gmra.mxu1 %v3258_v31 }
 0x1ab   : > { %v2543_v32 = vpop.f32.mrf.mxu0 }
 0x1ac   : > { %v2544_v34 = vadd.f32 %v9008_v23, %v2543_v32 }
 0x1ae   : > { %7731 = vmatmul.msk.f32.gmra.mxu0 %vm1795_vm1, %v1563_v33  ;;  %v3259_v35 = vmax.f32 %v2544_v34, 0.0  ;;  %v1575_v34 = vld [vmem:[%s8923_s26 + $0xf0] sm:$0xff] }
 0x1b0   : > { %3539 = vmatmul.f32.gmra.mxu1 %v3259_v35 }
 0x1b3   : > { %v2546_v36 = vpop.f32.mrf.mxu0 }
 0x1b4   : > { %v2547_v38 = vadd.f32 %v9008_v23, %v2546_v36 }
 0x1b6   : > { %7732 = vmatmul.msk.f32.gmra.mxu0 %vm1795_vm1, %v1564_v37  ;;  %v3260_v39 = vmax.f32 %v2547_v38, 0.0  ;;  %v1576_v38 = vld [vmem:[%s8923_s26 + $0xf8] sm:$0xff] }
 0x1b8   : > { %3542 = vmatmul.f32.gmra.mxu1 %v3260_v39 }
 0x1bb   : > { %v2549_v40 = vpop.f32.mrf.mxu0 }
 0x1bc   : > { %v2550_v42 = vadd.f32 %v9008_v23, %v2549_v40 }
 0x1be   : > { %7733 = vmatmul.msk.f32.gmra.mxu0 %vm1795_vm1, %v1565_v41  ;;  %v3261_v43 = vmax.f32 %v2550_v42, 0.0  ;;  %v9109_v41 = vld [vmem:[%s12227_s4] ss:$0 sm:$0xff] }
 0x1c0   : > { %3545 = vmatmul.f32.gmra.mxu1 %v3261_v43 }
 0x1c3   : > { %v2552_v44 = vpop.f32.mrf.mxu0 }
 0x1c4   : > { %v2553_v46 = vadd.f32 %v9008_v23, %v2552_v44 }
 0x1c6   : > { %7734 = vmatmul.msk.f32.gmra.mxu0 %vm1795_vm1, %v1566_v45  ;;  %v3262_v47 = vmax.f32 %v2553_v46, 0.0 }
 0x1c8   : > { %3548 = vmatmul.f32.gmra.mxu1 %v3262_v47 }
 0x1cb   : > { %v2555_v48 = vpop.f32.mrf.mxu0 }
 0x1cc   : > { %v2556_v50 = vadd.f32 %v9008_v23, %v2555_v48 }
 0x1ce   : > { %7735 = vmatmul.msk.f32.gmra.mxu0 %vm1795_vm1, %v1567_v49  ;;  %v3263_v51 = vmax.f32 %v2556_v50, 0.0 }
 0x1d0   : > { %3551 = vmatmul.f32.gmra.mxu1 %v3263_v51 }
 0x1d3   : > { %v2558_v52 = vpop.f32.mrf.mxu0 }
 0x1d4   : > { %v2559_v54 = vadd.f32 %v9008_v23, %v2558_v52 }
 0x1d6   : > { %7736 = vmatmul.msk.f32.gmra.mxu0 %vm1795_vm1, %v1568_v53  ;;  %v3264_v55 = vmax.f32 %v2559_v54, 0.0 }
 0x1d8   : > { %3554 = vmatmul.f32.gmra.mxu1 %v3264_v55 }
 0x1db   : > { %v2561_v56 = vpop.f32.mrf.mxu0 }
 0x1dc   : > { %v2562_v58 = vadd.f32 %v9008_v23, %v2561_v56 }
 0x1de   : > { %7737 = vmatmul.msk.f32.gmra.mxu0 %vm1795_vm1, %v1569_v57  ;;  %v3265_v59 = vmax.f32 %v2562_v58, 0.0 }
 0x1e0   : > { %3557 = vmatmul.f32.gmra.mxu1 %v3265_v59 }
 0x1e3   : > { %v2564_v61 = vpop.f32.mrf.mxu0 }
 0x1e4   : > { %v2565_v63 = vadd.f32 %v9008_v23, %v2564_v61 }
 0x1e6   : > { %7738 = vmatmul.msk.f32.gmra.mxu0 %vm1795_vm1, %v1570_v62  ;;  %v3266_v1 = vmax.f32 %v2565_v63, 0.0 }
 0x1e8   : > { %3560 = vmatmul.f32.gmra.mxu1 %v3266_v1 }
 0x1eb   : > { %v2567_v5 = vpop.f32.mrf.mxu0 }
 0x1ec   : > { %v2568_v7 = vadd.f32 %v9008_v23, %v2567_v5 }
 0x1ee   : > { %7739 = vmatmul.msk.f32.gmra.mxu0 %vm1795_vm1, %v1571_v6  ;;  %v3267_v9 = vmax.f32 %v2568_v7, 0.0 }
 0x1f0   : > { %3563 = vmatmul.f32.gmra.mxu1 %v3267_v9 }
 0x1f3   : > { %v2570_v13 = vpop.f32.mrf.mxu0 }
 0x1f4   : > { %v2571_v15 = vadd.f32 %v9008_v23, %v2570_v13 }
 0x1f6   : > { %7740 = vmatmul.msk.f32.gmra.mxu0 %vm1795_vm1, %v1572_v14  ;;  %v3268_v17 = vmax.f32 %v2571_v15, 0.0 }
 0x1f8   : > { %3566 = vmatmul.f32.gmra.mxu1 %v3268_v17 }
 0x1fb   : > { %v2573_v21 = vpop.f32.mrf.mxu0 }
 0x1fc   : > { %v2574_v24 = vadd.f32 %v9008_v23, %v2573_v21 }
 0x1fe   : > { %7741 = vmatmul.msk.f32.gmra.mxu0 %vm1795_vm1, %v1573_v22  ;;  %v3269_v26 = vmax.f32 %v2574_v24, 0.0 }
 0x200   : > { %3569 = vmatmul.f32.gmra.mxu1 %v3269_v26 }
 0x203   : > { %v2576_v29 = vpop.f32.mrf.mxu0 }
 0x204   : > { %v2577_v31 = vadd.f32 %v9008_v23, %v2576_v29 }
 0x206   : > { %7742 = vmatmul.msk.f32.gmra.mxu0 %vm1795_vm1, %v1574_v30  ;;  %v3270_v32 = vmax.f32 %v2577_v31, 0.0 }
 0x208   : > { %3572 = vmatmul.f32.gmra.mxu1 %v3270_v32 }
 0x20b   : > { %v2579_v33 = vpop.f32.mrf.mxu0 }
 0x20c   : > { %v2580_v35 = vadd.f32 %v9008_v23, %v2579_v33 }
 0x20e   : > { %7743 = vmatmul.msk.f32.gmra.mxu0 %vm1795_vm1, %v1575_v34  ;;  %v3271_v36 = vmax.f32 %v2580_v35, 0.0 }
 0x210   : > { %3575 = vmatmul.f32.gmra.mxu1 %v3271_v36 }
 0x213   : > { %v2582_v37 = vpop.f32.mrf.mxu0 }
 0x214   : > { %v2583_v39 = vadd.f32 %v9008_v23, %v2582_v37 }
 0x216   : > { %7744 = vmatmul.msk.f32.gmra.mxu0 %vm1795_vm1, %v1576_v38  ;;  %v3272_v40 = vmax.f32 %v2583_v39, 0.0 }
 0x218   : > { %3578 = vmatmul.f32.gmra.mxu1 %v3272_v40 }
 0x21b   : > { %v2585_v42 = vpop.f32.mrf.mxu0 }
 0x21c   : > { %v2586_v43 = vadd.f32 %v9008_v23, %v2585_v42 }
 0x21d   : > { %v3534_v44 = vpop.f32.mrf.mxu1 }
 0x21e   : > { %v3535_v45 = vadd.f32 %v9109_v41, %v3534_v44  ;;  %v3273_v46 = vmax.f32 %v2586_v43, 0.0 }
 0x220   : > { %3581 = vmatmul.f32.gmra.mxu1 %v3273_v46  ;;  %v4254_v47 = vmax.f32 %v3535_v45, 0.0 }
 0x222   : > { %4530 = vmatmul.f32.vlgmr.msra.gmra.mxu2 %v4254_v47 }
 0x223   : > { %v2588_v48 = vpop.f32.mrf.mxu0 }
 0x224   : > { %v2589_v49 = vadd.f32 %v9008_v23, %v2588_v48 }
 0x225   : > { %v3537_v50 = vpop.f32.mrf.mxu1 }
 0x226   : > { %v3538_v51 = vadd.f32 %v9109_v41, %v3537_v50  ;;  %v3274_v52 = vmax.f32 %v2589_v49, 0.0 }
 0x228   : > { %3584 = vmatmul.f32.gmra.mxu1 %v3274_v52  ;;  %v4255_v53 = vmax.f32 %v3538_v51, 0.0 }
 0x22a   : > { %4533 = vmatmul.f32.gmra.mxu2 %v4255_v53 }
 0x22b   : > { %v2591_v54 = vpop.f32.mrf.mxu0 }
 0x22c   : > { %v2592_v55 = vadd.f32 %v9008_v23, %v2591_v54 }
 0x22d   : > { %v3540_v56 = vpop.f32.mrf.mxu1 }
 0x22e   : > { %v3541_v57 = vadd.f32 %v9109_v41, %v3540_v56  ;;  %v3275_v58 = vmax.f32 %v2592_v55, 0.0  ;;  %v1577_v55 = vld [vmem:[%s8923_s26 + $0x100] sm:$0xff] }
 0x22f   : > { %7745 = vmatmul.msk.f32.gmra.mxu0 %vm1795_vm1, %v1577_v55 }
 0x230   : > { %3587 = vmatmul.f32.gmra.mxu1 %v3275_v58  ;;  %v4256_v59 = vmax.f32 %v3541_v57, 0.0 }
 0x232   : > { %4536 = vmatmul.f32.gmra.mxu2 %v4256_v59 }
 0x233   : > { %v2594_v60 = vpop.f32.mrf.mxu0 }
 0x234   : > { %v2595_v61 = vadd.f32 %v9008_v23, %v2594_v60 }
 0x235   : > { %v3543_v62 = vpop.f32.mrf.mxu1 }
 0x236   : > { %v3544_v63 = vadd.f32 %v9109_v41, %v3543_v62  ;;  %v3276_v0 = vmax.f32 %v2595_v61, 0.0  ;;  %v1578_v62 = vld [vmem:[%s8923_s26 + $0x108] sm:$0xff] }
 0x237   : > { %7746 = vmatmul.msk.f32.gmra.mxu0 %vm1795_vm1, %v1578_v62 }
 0x238   : > { %3590 = vmatmul.f32.gmra.mxu1 %v3276_v0  ;;  %v4257_v1 = vmax.f32 %v3544_v63, 0.0 }
 0x23a   : > { %4539 = vmatmul.f32.gmra.mxu2 %v4257_v1 }
 0x23b   : > { %v2597_v2 = vpop.f32.mrf.mxu0 }
 0x23c   : > { %v2598_v3 = vadd.f32 %v9008_v23, %v2597_v2 }
 0x23d   : > { %v3546_v4 = vpop.f32.mrf.mxu1 }
 0x23e   : > { %v3547_v5 = vadd.f32 %v9109_v41, %v3546_v4  ;;  %v3277_v6 = vmax.f32 %v2598_v3, 0.0 }
 0x240   : > { %3593 = vmatmul.f32.gmra.mxu1 %v3277_v6  ;;  %v4258_v7 = vmax.f32 %v3547_v5, 0.0  ;;  %v1579_v5 = vld [vmem:[%s8923_s26 + $0x110] sm:$0xff] }
 0x241   : > { %7747 = vmatmul.msk.f32.gmra.mxu0 %vm1795_vm1, %v1579_v5 }
 0x242   : > { %4542 = vmatmul.f32.gmra.mxu2 %v4258_v7 }
 0x243   : > { %v2600_v8 = vpop.f32.mrf.mxu0 }
 0x244   : > { %v2601_v9 = vadd.f32 %v9008_v23, %v2600_v8 }
 0x245   : > { %v3549_v10 = vpop.f32.mrf.mxu1 }
 0x246   : > { %v3550_v11 = vadd.f32 %v9109_v41, %v3549_v10  ;;  %v3278_v12 = vmax.f32 %v2601_v9, 0.0 }
 0x248   : > { %3596 = vmatmul.f32.gmra.mxu1 %v3278_v12  ;;  %v4259_v13 = vmax.f32 %v3550_v11, 0.0  ;;  %v1580_v12 = vld [vmem:[%s8923_s26 + $0x118] sm:$0xff] }
 0x249   : > { %7748 = vmatmul.msk.f32.gmra.mxu0 %vm1795_vm1, %v1580_v12  ;;  %v7964_v12 = vld [vmem:[%s12230_s7 + $0xd8] sm:$0xff] }
 0x24a   : > { %4545 = vmatmul.f32.gmra.mxu2 %v4259_v13 }
 0x24b   : > { %v2603_v14 = vpop.f32.mrf.mxu0 }
 0x24c   : > { %v2604_v15 = vadd.f32 %v9008_v23, %v2603_v14 }
 0x24d   : > { %v3552_v16 = vpop.f32.mrf.mxu1 }
 0x24e   : > { %v3553_v17 = vadd.f32 %v9109_v41, %v3552_v16  ;;  %v3279_v18 = vmax.f32 %v2604_v15, 0.0 }
 0x250   : > { %3599 = vmatmul.f32.gmra.mxu1 %v3279_v18  ;;  %v4260_v19 = vmax.f32 %v3553_v17, 0.0  ;;  %v1581_v17 = vld [vmem:[%s8923_s26 + $0x120] sm:$0xff] }
 0x251   : > { %7749 = vmatmul.msk.f32.gmra.mxu0 %vm1795_vm1, %v1581_v17 }
 0x252   : > { %4548 = vmatmul.f32.gmra.mxu2 %v4260_v19 }
 0x253   : > { %v2606_v20 = vpop.f32.mrf.mxu0 }
 0x254   : > { %v2607_v21 = vadd.f32 %v9008_v23, %v2606_v20 }
 0x255   : > { %v3555_v22 = vpop.f32.mrf.mxu1 }
 0x256   : > { %v3556_v24 = vadd.f32 %v9109_v41, %v3555_v22  ;;  %v3280_v25 = vmax.f32 %v2607_v21, 0.0  ;;  %v1582_v22 = vld [vmem:[%s8923_s26 + $0x128] sm:$0xff] }
 0x258   : > { %3602 = vmatmul.f32.gmra.mxu1 %v3280_v25  ;;  %v4261_v26 = vmax.f32 %v3556_v24, 0.0 }
 0x259   : > { %7750 = vmatmul.msk.f32.gmra.mxu0 %vm1795_vm1, %v1582_v22  ;;  %v7960_v22 = vld [vmem:[%s12230_s7 + $0xb8] sm:$0xff] }
 0x25a   : > { %4551 = vmatmul.f32.gmra.mxu2 %v4261_v26 }
 0x25b   : > { %v2609_v27 = vpop.f32.mrf.mxu0 }
 0x25c   : > { %v2610_v28 = vadd.f32 %v9008_v23, %v2609_v27 }
 0x25d   : > { %v3558_v29 = vpop.f32.mrf.mxu1 }
 0x25e   : > { %v3281_v30 = vmax.f32 %v2610_v28, 0.0  ;;  %v3559_v31 = vadd.f32 %v9109_v41, %v3558_v29  ;;  %v1583_v28 = vld [vmem:[%s8923_s26 + $0x130] sm:$0xff] }
 0x260   : > { %3605 = vmatmul.f32.gmra.mxu1 %v3281_v30  ;;  %v4262_v32 = vmax.f32 %v3559_v31, 0.0 }
 0x261   : > { %7751 = vmatmul.msk.f32.gmra.mxu0 %vm1795_vm1, %v1583_v28 }
 0x262   : > { %4554 = vmatmul.f32.gmra.mxu2 %v4262_v32 }
 0x263   : > { %v2612_v33 = vpop.f32.mrf.mxu0 }
 0x264   : > { %v2613_v34 = vadd.f32 %v9008_v23, %v2612_v33  ;;  %v1584_v33 = vld [vmem:[%s8923_s26 + $0x138] sm:$0xff] }
 0x265   : > { %v3561_v35 = vpop.f32.mrf.mxu1 }
 0x266   : > { %v3282_v36 = vmax.f32 %v2613_v34, 0.0  ;;  %v3562_v37 = vadd.f32 %v9109_v41, %v3561_v35 }
 0x268   : > { %3608 = vmatmul.f32.gmra.mxu1 %v3282_v36  ;;  %v4263_v38 = vmax.f32 %v3562_v37, 0.0 }
 0x269   : > { %7752 = vmatmul.msk.f32.gmra.mxu0 %vm1795_vm1, %v1584_v33 }
 0x26a   : > { %4557 = vmatmul.f32.gmra.mxu2 %v4263_v38  ;;  %v1585_v38 = vld [vmem:[%s8923_s26 + $0x140] sm:$0xff] }
 0x26b   : > { %v2615_v39 = vpop.f32.mrf.mxu0 }
 0x26c   : > { %v2616_v40 = vadd.f32 %v9008_v23, %v2615_v39 }
 0x26d   : > { %v3564_v42 = vpop.f32.mrf.mxu1 }
 0x26e   : > { %v3283_v43 = vmax.f32 %v2616_v40, 0.0  ;;  %v3565_v44 = vadd.f32 %v9109_v41, %v3564_v42 }
 0x270   : > { %3611 = vmatmul.f32.gmra.mxu1 %v3283_v43  ;;  %v4264_v45 = vmax.f32 %v3565_v44, 0.0  ;;  %v1586_v44 = vld [vmem:[%s8923_s26 + $0x148] sm:$0xff] }
 0x271   : > { %7753 = vmatmul.msk.f32.gmra.mxu0 %vm1795_vm1, %v1585_v38  ;;  %v7956_v38 = vld [vmem:[%s12230_s7 + $0x98] sm:$0xff] }
 0x272   : > { %4560 = vmatmul.f32.gmra.mxu2 %v4264_v45 }
 0x273   : > { %v2618_v46 = vpop.f32.mrf.mxu0 }
 0x274   : > { %v2619_v47 = vadd.f32 %v9008_v23, %v2618_v46 }
 0x275   : > { %v3567_v48 = vpop.f32.mrf.mxu1 }
 0x276   : > { %v3284_v49 = vmax.f32 %v2619_v47, 0.0  ;;  %v3568_v50 = vadd.f32 %v9109_v41, %v3567_v48 }
 0x278   : > { %3614 = vmatmul.f32.gmra.mxu1 %v3284_v49  ;;  %v4265_v51 = vmax.f32 %v3568_v50, 0.0  ;;  %v1587_v49 = vld [vmem:[%s8923_s26 + $0x150] sm:$0xff] }
 0x279   : > { %7754 = vmatmul.msk.f32.gmra.mxu0 %vm1795_vm1, %v1586_v44 }
 0x27a   : > { %4563 = vmatmul.f32.gmra.mxu2 %v4265_v51 }
 0x27b   : > { %v2621_v52 = vpop.f32.mrf.mxu0 }
 0x27c   : > { %v2622_v53 = vadd.f32 %v9008_v23, %v2621_v52 }
 0x27d   : > { %v3570_v54 = vpop.f32.mrf.mxu1 }
 0x27e   : > { %v3285_v56 = vmax.f32 %v2622_v53, 0.0  ;;  %v3571_v57 = vadd.f32 %v9109_v41, %v3570_v54  ;;  %v1588_v54 = vld [vmem:[%s8923_s26 + $0x158] sm:$0xff] }
 0x280   : > { %3617 = vmatmul.f32.gmra.mxu1 %v3285_v56  ;;  %v4266_v58 = vmax.f32 %v3571_v57, 0.0 }
 0x281   : > { %7755 = vmatmul.msk.f32.gmra.mxu0 %vm1795_vm1, %v1587_v49 }
 0x282   : > { %4566 = vmatmul.f32.gmra.mxu2 %v4266_v58 }
 0x283   : > { %v2624_v59 = vpop.f32.mrf.mxu0 }
 0x284   : > { %v2625_v60 = vadd.f32 %v9008_v23, %v2624_v59  ;;  %v1589_v59 = vld [vmem:[%s8923_s26 + $0x160] sm:$0xff] }
 0x285   : > { %v3573_v61 = vpop.f32.mrf.mxu1 }
 0x286   : > { %v3286_v63 = vmax.f32 %v2625_v60, 0.0  ;;  %v3574_v0 = vadd.f32 %v9109_v41, %v3573_v61 }
 0x288   : > { %3620 = vmatmul.f32.gmra.mxu1 %v3286_v63  ;;  %v4267_v1 = vmax.f32 %v3574_v0, 0.0  ;;  %v1590_v0 = vld [vmem:[%s8923_s26 + $0x168] sm:$0xff] }
 0x289   : > { %7756 = vmatmul.msk.f32.gmra.mxu0 %vm1795_vm1, %v1588_v54  ;;  %v5506_v54 = vld [vmem:[%s12230_s7 + $0x78] sm:$0xff] }
 0x28a   : > { %4569 = vmatmul.f32.gmra.mxu2 %v4267_v1 }
 0x28b   : > { %v2627_v2 = vpop.f32.mrf.mxu0 }
 0x28c   : > { %v2628_v3 = vadd.f32 %v9008_v23, %v2627_v2 }
 0x28d   : > { %v3576_v4 = vpop.f32.mrf.mxu1 }
 0x28e   : > { %v3287_v6 = vmax.f32 %v2628_v3, 0.0  ;;  %v3577_v7 = vadd.f32 %v9109_v41, %v3576_v4  ;;  %v7968_v3 = vld [vmem:[%s12230_s7 + $0xf8] sm:$0xff]  ;;  %v7967_v4 = vld [vmem:[%s12230_s7 + $0xf0] sm:$0xff] }
 0x28f   : > { %5524 = vmatpush.msra.mxu3 %v7968_v3 }
 0x290   : > { %3623 = vmatmul.f32.gmra.mxu1 %v3287_v6  ;;  %v4268_v8 = vmax.f32 %v3577_v7, 0.0  ;;  %v1591_v7 = vld [vmem:[%s8923_s26 + $0x170] sm:$0xff] }
 0x291   : > { %7757 = vmatmul.msk.f32.gmra.mxu0 %vm1795_vm1, %v1589_v59  ;;  %5525 = vmatpush.msra.mxu3 %v7967_v4 }
 0x292   : > { %4572 = vmatmul.f32.gmra.mxu2 %v4268_v8 }
 0x293   : > { %v2630_v9 = vpop.f32.mrf.mxu0 }
 0x294   : > { %v2631_v10 = vadd.f32 %v9008_v23, %v2630_v9  ;;  %v7966_v9 = vld [vmem:[%s12230_s7 + $0xe8] sm:$0xff] }
 0x295   : > { %v3579_v11 = vpop.f32.mrf.mxu1  ;;  %5526 = vmatpush.msra.mxu3 %v7966_v9 }
 0x296   : > { %v3288_v13 = vmax.f32 %v2631_v10, 0.0  ;;  %v3580_v14 = vadd.f32 %v9109_v41, %v3579_v11  ;;  %v7965_v11 = vld [vmem:[%s12230_s7 + $0xe0] sm:$0xff] }
 0x297   : > { %5527 = vmatpush.msra.mxu3 %v7965_v11 }
 0x298   : > { %3626 = vmatmul.f32.gmra.mxu1 %v3288_v13  ;;  %v4269_v15 = vmax.f32 %v3580_v14, 0.0  ;;  %v7963_v13 = vld [vmem:[%s12230_s7 + $0xd0] sm:$0xff] }
 0x299   : > { %7758 = vmatmul.msk.f32.gmra.mxu0 %vm1795_vm1, %v1590_v0  ;;  %5528 = vmatpush.msra.mxu3 %v7964_v12  ;;  %v5504_v12 = vld [vmem:[%s12230_s7 + $0x68] sm:$0xff] }
 0x29a   : > { %4575 = vmatmul.f32.gmra.mxu2 %v4269_v15 }
 0x29b   : > { %5529 = vmatpush.msra.mxu3 %v7963_v13 }
 0x29d   : > { %v3582_v16 = vpop.f32.mrf.mxu1 }
 0x29e   : > { %v3583_v18 = vadd.f32 %v9109_v41, %v3582_v16  ;;  %v1592_v16 = vld [vmem:[%s8923_s26 + $0x178] sm:$0xff] }
 0x2a0   : > { %v4270_v19 = vmax.f32 %v3583_v18, 0.0  ;;  %v7962_v18 = vld [vmem:[%s12230_s7 + $0xc8] sm:$0xff] }
 0x2a1   : > { %7759 = vmatmul.msk.f32.gmra.mxu0 %vm1795_vm1, %v1591_v7  ;;  %5530 = vmatpush.msra.mxu3 %v7962_v18 }
 0x2a2   : > { %4578 = vmatmul.f32.gmra.mxu2 %v4270_v19 }
 0x2a5   : > { %v3585_v20 = vpop.f32.mrf.mxu1  ;;  %v9154_v21 = vpop.f32.mrf.mxu2 }
 0x2a6   : > { %v3586_v24 = vadd.f32 %v9109_v41, %v3585_v20  ;;  %v7961_v20 = vld [vmem:[%s12230_s7 + $0xc0] sm:$0xff] }
 0x2a7   : > { %5531 = vmatpush.msra.mxu3 %v7961_v20 }
 0x2a8   : > { %v4271_v25 = vmax.f32 %v3586_v24, 0.0 }
 0x2a9   : > { %7760 = vmatmul.msk.f32.gmra.mxu0 %vm1795_vm1, %v1592_v16  ;;  %5532 = vmatpush.msra.mxu3 %v7960_v22  ;;  %v9304_v22 = vld [vmem:[%s12229_s6] ss:$0 sm:$0xff] }
 0x2aa   : > { %4581 = vmatmul.f32.gmra.mxu2 %v4271_v25 }
 0x2ac   : > { %v2633_v24 = vpop.f32.mrf.mxu0 }
 0x2ad   : > { %v3588_v26 = vpop.f32.mrf.mxu1  ;;  %v9159_v27 = vpop.f32.mrf.mxu2  ;;  %v2634_v25 = vadd.f32 %v9008_v23, %v2633_v24 }
 0x2ae   : > { %v3589_v29 = vadd.f32 %v9109_v41, %v3588_v26  ;;  %v7959_v26 = vld [vmem:[%s12230_s7 + $0xb0] sm:$0xff] }
 0x2af   : > { %5533 = vmatpush.msra.mxu3 %v7959_v26  ;;  %v3289_v33 = vmax.f32 %v2634_v25, 0.0  ;;  %v1598_v26 = vld [vmem:[%s8923_s26 + $0x1a8] sm:$0xff] }
 0x2b0   : > { %v4272_v30 = vmax.f32 %v3589_v29, 0.0 }
 0x2b1   : > { %3629 = vmatmul.f32.gmra.mxu1 %v3289_v33  ;;  %v5502_v33 = vld [vmem:[%s12230_s7 + $0x58] sm:$0xff] }
 0x2b2   : > { %4584 = vmatmul.f32.gmra.mxu2 %v4272_v30  ;;  %v1593_v30 = vld [vmem:[%s8923_s26 + $0x180] sm:$0xff] }
 0x2b3   : > { %7761 = vmatmul.msk.f32.gmra.mxu0 %vm1795_vm1, %v1593_v30 }
 0x2b5   : > { %v3591_v31 = vpop.f32.mrf.mxu1  ;;  %v9164_v32 = vpop.f32.mrf.mxu2 }
 0x2b6   : > { %v3592_v34 = vadd.f32 %v9109_v41, %v3591_v31 }
 0x2b8   : > { %v4273_v35 = vmax.f32 %v3592_v34, 0.0  ;;  %v7958_v34 = vld [vmem:[%s12230_s7 + $0xa8] sm:$0xff] }
 0x2b9   : > { %5534 = vmatpush.msra.mxu3 %v7958_v34 }
 0x2ba   : > { %4587 = vmatmul.f32.gmra.mxu2 %v4273_v35 }
 0x2bd   : > { %v3594_v36 = vpop.f32.mrf.mxu1  ;;  %v9169_v37 = vpop.f32.mrf.mxu2 }
 0x2be   : > { %v3595_v39 = vadd.f32 %v9109_v41, %v3594_v36  ;;  %v7957_v36 = vld [vmem:[%s12230_s7 + $0xa0] sm:$0xff] }
 0x2bf   : > { %5535 = vmatpush.msra.mxu3 %v7957_v36 }
 0x2c0   : > { %v4274_v40 = vmax.f32 %v3595_v39, 0.0  ;;  %v2636_v39 = vpop.f32.mrf.mxu0 }
 0x2c1   : > { %5536 = vmatpush.msra.mxu3 %v7956_v38  ;;  %v1599_v38 = vld [vmem:[%s8923_s26 + $0x1b0] sm:$0xff] }
 0x2c2   : > { %4590 = vmatmul.f32.gmra.mxu2 %v4274_v40  ;;  %v2637_v40 = vadd.f32 %v9008_v23, %v2636_v39 }
 0x2c4   : > { %v3290_v49 = vmax.f32 %v2637_v40, 0.0 }
 0x2c5   : > { %v3597_v42 = vpop.f32.mrf.mxu1  ;;  %v9174_v43 = vpop.f32.mrf.mxu2 }
 0x2c6   : > { %v3598_v45 = vadd.f32 %v9109_v41, %v3597_v42  ;;  %v7955_v42 = vld [vmem:[%s12230_s7 + $0x90] sm:$0xff]  ;;  %3632 = vmatmul.f32.gmra.mxu1 %v3290_v49 }
 0x2c7   : > { %5537 = vmatpush.msra.mxu3 %v7955_v42 }
 0x2c8   : > { %v4275_v46 = vmax.f32 %v3598_v45, 0.0 }
 0x2ca   : > { %4593 = vmatmul.f32.gmra.mxu2 %v4275_v46  ;;  %v1594_v46 = vld [vmem:[%s8923_s26 + $0x188] sm:$0xff] }
 0x2cb   : > { %7762 = vmatmul.msk.f32.gmra.mxu0 %vm1795_vm1, %v1594_v46 }
 0x2cd   : > { %v3600_v47 = vpop.f32.mrf.mxu1  ;;  %v9179_v48 = vpop.f32.mrf.mxu2 }
 0x2ce   : > { %v3601_v50 = vadd.f32 %v9109_v41, %v3600_v47 }
 0x2d0   : > { %v4276_v51 = vmax.f32 %v3601_v50, 0.0  ;;  %v7954_v50 = vld [vmem:[%s12230_s7 + $0x88] sm:$0xff] }
 0x2d1   : > { %5538 = vmatpush.msra.mxu3 %v7954_v50  ;;  %v1600_v50 = vld [vmem:[%s8923_s26 + $0x1b8] sm:$0xff] }
 0x2d2   : > { %4596 = vmatmul.f32.gmra.mxu2 %v4276_v51  ;;  %v7953_v51 = vld [vmem:[%s12230_s7 + $0x80] sm:$0xff] }
 0x2d3   : > { %5539 = vmatpush.msra.mxu3 %v7953_v51 }
 0x2d5   : > { %v3603_v52 = vpop.f32.mrf.mxu1  ;;  %v9184_v53 = vpop.f32.mrf.mxu2  ;;  %5589 = vmatpush.msrb.mxu3 %v5506_v54 }
 0x2d6   : > { %v3604_v55 = vadd.f32 %v9109_v41, %v3603_v52 }
 0x2d8   : > { %v4277_v56 = vmax.f32 %v3604_v55, 0.0  ;;  %v2639_v55 = vpop.f32.mrf.mxu0 }
 0x2da   : > { %4599 = vmatmul.f32.gmra.mxu2 %v4277_v56  ;;  %v2640_v56 = vadd.f32 %v9008_v23, %v2639_v55  ;;  %v5500_v55 = vld [vmem:[%s12230_s7 + $0x48] sm:$0xff] }
 0x2dd   : > { %v3606_v57 = vpop.f32.mrf.mxu1  ;;  %v9189_v58 = vpop.f32.mrf.mxu2 }
 0x2de   : > { %v3607_v60 = vadd.f32 %v9109_v41, %v3606_v57 }
 0x2e0   : > { %v4278_v61 = vmax.f32 %v3607_v60, 0.0  ;;  %v1595_v60 = vld [vmem:[%s8923_s26 + $0x190] sm:$0xff]  ;;  %v2642_v3 = vpop.f32.mrf.mxu0 }
 0x2e1   : > { %7763 = vmatmul.msk.f32.gmra.mxu0 %vm1795_vm1, %v1595_v60  ;;  %v2643_v4 = vadd.f32 %v9008_v23, %v2642_v3 }
 0x2e2   : > { %4602 = vmatmul.f32.gmra.mxu2 %v4278_v61 }
 0x2e5   : > { %v3609_v62 = vpop.f32.mrf.mxu1  ;;  %v9194_v63 = vpop.f32.mrf.mxu2 }
 0x2e6   : > { %v3610_v1 = vadd.f32 %v9109_v41, %v3609_v62  ;;  %v3291_v62 = vmax.f32 %v2640_v56, 0.0 }
 0x2e8   : > { %v4279_v2 = vmax.f32 %v3610_v1, 0.0  ;;  %3635 = vmatmul.f32.gmra.mxu1 %v3291_v62  ;;  %v5505_v1 = vld [vmem:[%s12230_s7 + $0x70] sm:$0xff]  ;;  %v2645_v13 = vpop.f32.mrf.mxu0 }
 0x2e9   : > { %5590 = vmatpush.msrb.mxu3 %v5505_v1 }
 0x2ea   : > { %4605 = vmatmul.f32.gmra.mxu2 %v4279_v2  ;;  %v6979_v2 = vld [vmem:[%s12232_s9 + $0x78] sm:$0xff] }
 0x2eb   : > { %6984 = vmatpush.msrb.mxu0 %v6979_v2  ;;  %5591 = vmatpush.msrb.mxu3 %v5504_v12  ;;  %v5499_v2 = vld [vmem:[%s12230_s7 + $0x40] sm:$0xff]  ;;  %v5498_v12 = vld [vmem:[%s12230_s7 + $0x38] sm:$0xff] }
 0x2ed   : > { %v3612_v5 = vpop.f32.mrf.mxu1  ;;  %v9205_v6 = vpop.f32.mrf.mxu2 }
 0x2ee   : > { %v3613_v8 = vadd.f32 %v9109_v41, %v3612_v5 }
 0x2f0   : > { %v4280_v10 = vmax.f32 %v3613_v8, 0.0  ;;  %v1596_v8 = vld [vmem:[%s8923_s26 + $0x198] sm:$0xff]  ;;  %v2648_v20 = vpop.f32.mrf.mxu0 }
 0x2f1   : > { %7764 = vmatmul.msk.f32.gmra.mxu0 %vm1795_vm1, %v1596_v8  ;;  %v2649_v24 = vadd.f32 %v9008_v23, %v2648_v20  ;;  %v1602_v8 = vld [vmem:[%s8923_s26 + $0x1c8] sm:$0xff] }
 0x2f2   : > { %4608 = vmatmul.f32.gmra.mxu2 %v4280_v10  ;;  %v3292_v10 = vmax.f32 %v2643_v4, 0.0 }
 0x2f3   : > { %v3294_v30 = vmax.f32 %v2649_v24, 0.0 }
 0x2f4   : > { %3638 = vmatmul.f32.gmra.mxu1 %v3292_v10 }
 0x2f5   : > { %v3615_v14 = vpop.f32.mrf.mxu1  ;;  %v9222_v15 = vpop.f32.mrf.mxu2 }
 0x2f6   : > { %v3616_v17 = vadd.f32 %v9109_v41, %v3615_v14  ;;  %v2646_v14 = vadd.f32 %v9008_v23, %v2645_v13 }
 0x2f8   : > { %v4281_v19 = vmax.f32 %v3616_v17, 0.0  ;;  %v1597_v17 = vld [vmem:[%s8923_s26 + $0x1a0] sm:$0xff]  ;;  %v3293_v18 = vmax.f32 %v2646_v14, 0.0  ;;  %v2651_v34 = vpop.f32.mrf.mxu0 }
 0x2f9   : > { %7765 = vmatmul.msk.f32.gmra.mxu0 %vm1795_vm1, %v1597_v17 }
 0x2fa   : > { %4611 = vmatmul.f32.gmra.mxu2 %v4281_v19  ;;  %v5503_v19 = vld [vmem:[%s12230_s7 + $0x60] sm:$0xff] }
 0x2fb   : > { %5592 = vmatpush.msrb.mxu3 %v5503_v19 }
 0x2fc   : > { %3641 = vmatmul.f32.gmra.mxu1 %v3293_v18  ;;  %v1603_v18 = vld [vmem:[%s8923_s26 + $0x1d0] sm:$0xff] }
 0x2fd   : > { %v3618_v28 = vpop.f32.mrf.mxu1  ;;  %v9240_v29 = vpop.f32.mrf.mxu2  ;;  %5593 = vmatpush.msrb.mxu3 %v5502_v33 }
 0x2fe   : > { %v3619_v31 = vadd.f32 %v9109_v41, %v3618_v28 }
 0x300   : > { %v4282_v35 = vmax.f32 %v3619_v31, 0.0  ;;  %v2654_v46 = vpop.f32.mrf.mxu0 }
 0x301   : > { %7766 = vmatmul.msk.f32.gmra.mxu0 %vm1795_vm1, %v1598_v26 }
 0x302   : > { %4614 = vmatmul.f32.gmra.mxu2 %v4282_v35  ;;  %v2652_v35 = vadd.f32 %v9008_v23, %v2651_v34 }
 0x304   : > { %3644 = vmatmul.f32.gmra.mxu1 %v3294_v30  ;;  %v3295_v40 = vmax.f32 %v2652_v35, 0.0 }
 0x305   : > { %v3621_v44 = vpop.f32.mrf.mxu1  ;;  %v9258_v45 = vpop.f32.mrf.mxu2 }
 0x306   : > { %v3622_v47 = vadd.f32 %v9109_v41, %v3621_v44  ;;  %v5501_v44 = vld [vmem:[%s12230_s7 + $0x50] sm:$0xff] }
 0x307   : > { %5594 = vmatpush.msrb.mxu3 %v5501_v44 }
 0x308   : > { %v4283_v52 = vmax.f32 %v3622_v47, 0.0  ;;  %v2655_v47 = vadd.f32 %v9008_v23, %v2654_v46  ;;  %v2657_v56 = vpop.f32.mrf.mxu0 }
 0x309   : > { %7767 = vmatmul.msk.f32.gmra.mxu0 %vm1795_vm1, %v1599_v38  ;;  %5595 = vmatpush.msrb.mxu3 %v5500_v55 }
 0x30a   : > { %4617 = vmatmul.f32.gmra.mxu2 %v4283_v52  ;;  %v3296_v52 = vmax.f32 %v2655_v47, 0.0 }
 0x30b   : > { %5596 = vmatpush.msrb.mxu3 %v5499_v2 }
 0x30c   : > { %3647 = vmatmul.f32.gmra.mxu1 %v3295_v40 }
 0x30d   : > { %v3624_v57 = vpop.f32.mrf.mxu1  ;;  %v9273_v59 = vpop.f32.mrf.mxu2  ;;  %5597 = vmatpush.msrb.mxu3 %v5498_v12 }
 0x30e   : > { %v3625_v61 = vadd.f32 %v9109_v41, %v3624_v57  ;;  %v2658_v57 = vadd.f32 %v9008_v23, %v2657_v56 }
 0x310   : > { %v4284_v0 = vmax.f32 %v3625_v61, 0.0  ;;  %v1601_v61 = vld [vmem:[%s8923_s26 + $0x1c0] sm:$0xff]  ;;  %v2660_v3 = vpop.f32.mrf.mxu0 }
 0x311   : > { %7768 = vmatmul.msk.f32.gmra.mxu0 %vm1795_vm1, %v1600_v50  ;;  %v2661_v4 = vadd.f32 %v9008_v23, %v2660_v3 }
 0x312   : > { %4620 = vmatmul.f32.gmra.mxu2 %v4284_v0  ;;  %v3297_v0 = vmax.f32 %v2658_v57, 0.0 }
 0x313   : > { %v3298_v10 = vmax.f32 %v2661_v4, 0.0 }
 0x314   : > { %3650 = vmatmul.f32.gmra.mxu1 %v3296_v52 }
 0x315   : > { %v3627_v5 = vpop.f32.mrf.mxu1  ;;  %v9285_v7 = vpop.f32.mrf.mxu2 }
 0x316   : > { %v3628_v9 = vadd.f32 %v9109_v41, %v3627_v5 }
 0x318   : > { %v4285_v11 = vmax.f32 %v3628_v9, 0.0  ;;  %v2663_v13 = vpop.f32.mrf.mxu0 }
 0x319   : > { %7769 = vmatmul.msk.f32.gmra.mxu0 %vm1795_vm1, %v1601_v61  ;;  %v2664_v14 = vadd.f32 %v9008_v23, %v2663_v13  ;;  %v9351_v23 = vld [vmem:[%s12225_s2] ss:$0 sm:$0xff] }
 0x31a   : > { %4623 = vmatmul.f32.gmra.mxu2 %v4285_v11 }
 0x31b   : > { %v3299_v20 = vmax.f32 %v2664_v14, 0.0 }
 0x31c   : > { %3653 = vmatmul.f32.gmra.mxu1 %v3297_v0 }
 0x31d   : > { %v9294_v16 = vpop.f32.mrf.mxu2 }
 0x320   : > { %v2666_v26 = vpop.f32.mrf.mxu0 }
 0x321   : > { %7770 = vmatmul.msk.f32.gmra.mxu0 %vm1795_vm1, %v1602_v8 }
 0x324   : > { %3656 = vmatmul.f32.gmra.mxu1 %v3298_v10 }
 0x325   : > { %v4579_v25 = vpop.f32.mrf.mxu2 }
 0x326   : > { %v4580_v28 = vadd.f32 %v9304_v22, %v4579_v25  ;;  %v5497_v25 = vld [vmem:[%s12230_s7 + $0x30] sm:$0xff] }
 0x327   : > { %5598 = vmatpush.msrb.mxu3 %v5497_v25  ;;  %v1609_v25 = vld [vmem:[%s8923_s26 + $0x200] sm:$0xff] }
 0x328   : > { %v5267_v31 = vmax.f32 %v4580_v28, 0.0  ;;  %v2667_v28 = vadd.f32 %v9351_v23, %v2666_v26  ;;  %v2669_v38 = vpop.f32.mrf.mxu0 }
 0x329   : > { %7771 = vmatmul.msk.f32.gmra.mxu0 %vm1795_vm1, %v1603_v18 }
 0x32a   : > { %5540 = vmatmul.f32.vlgmr.msra.gmra.mxu3 %v5267_v31  ;;  %v1604_v31 = vld [vmem:[%s8923_s26 + $0x1d8] sm:$0xff]  ;;  %v3300_v34 = vmax.f32 %v2667_v28, 0.0 }
 0x32c   : > { %3659 = vmatmul.f32.gmra.mxu1 %v3299_v20 }
 0x32d   : > { %v4582_v36 = vpop.f32.mrf.mxu2 }
 0x32e   : > { %v4583_v39 = vadd.f32 %v9304_v22, %v4582_v36  ;;  %v5496_v36 = vld [vmem:[%s12230_s7 + $0x28] sm:$0xff] }
 0x32f   : > { %5599 = vmatpush.msrb.mxu3 %v5496_v36  ;;  %v1610_v36 = vld [vmem:[%s8923_s26 + $0x208] sm:$0xff] }
 0x330   : > { %v5268_v42 = vmax.f32 %v4583_v39, 0.0  ;;  %v2670_v39 = vadd.f32 %v9351_v23, %v2669_v38  ;;  %v2672_v50 = vpop.f32.mrf.mxu0 }
 0x331   : > { %7772 = vmatmul.msk.f32.gmra.mxu0 %vm1795_vm1, %v1604_v31 }
 0x332   : > { %5543 = vmatmul.f32.gmra.mxu3 %v5268_v42  ;;  %v1605_v42 = vld [vmem:[%s8923_s26 + $0x1e0] sm:$0xff]  ;;  %v3301_v46 = vmax.f32 %v2670_v39, 0.0 }
 0x334   : > { %3662 = vmatmul.f32.gmra.mxu1 %v3300_v34  ;;  %v5491_v34 = vld [vmem:[%s12230_s7] sm:$0xff] }
 0x335   : > { %v4585_v49 = vpop.f32.mrf.mxu2 }
 0x336   : > { %v4586_v51 = vadd.f32 %v9304_v22, %v4585_v49  ;;  %v5495_v49 = vld [vmem:[%s12230_s7 + $0x20] sm:$0xff] }
 0x337   : > { %5600 = vmatpush.msrb.mxu3 %v5495_v49 }
 0x338   : > { %v5269_v54 = vmax.f32 %v4586_v51, 0.0  ;;  %v2673_v51 = vadd.f32 %v9351_v23, %v2672_v50  ;;  %v2675_v61 = vpop.f32.mrf.mxu0  ;;  %v7984_v50 = vld [vmem:[%s12230_s7 + $0x178] sm:$0xff] }
 0x339   : > { %7773 = vmatmul.msk.f32.gmra.mxu0 %vm1795_vm1, %v1605_v42 }
 0x33a   : > { %5546 = vmatmul.f32.gmra.mxu3 %v5269_v54  ;;  %v1606_v54 = vld [vmem:[%s8923_s26 + $0x1e8] sm:$0xff]  ;;  %v3302_v56 = vmax.f32 %v2673_v51, 0.0 }
 0x33b   : > { %v6978_v51 = vld [vmem:[%s12232_s9 + $0x70] sm:$0xff] }
 0x33c   : > { %3665 = vmatmul.f32.gmra.mxu1 %v3301_v46  ;;  %6985 = vmatpush.msrb.mxu0 %v6978_v51  ;;  %v4535_v51 = vadd.f32 %v9304_v22, %v9159_v27  ;;  %v7979_v27 = vld [vmem:[%s12230_s7 + $0x150] sm:$0xff] }
 0x33d   : > { %v4588_v60 = vpop.f32.mrf.mxu2 }
 0x33e   : > { %v4589_v62 = vadd.f32 %v9304_v22, %v4588_v60  ;;  %v5494_v60 = vld [vmem:[%s12230_s7 + $0x18] sm:$0xff] }
 0x33f   : > { %5601 = vmatpush.msrb.mxu3 %v5494_v60 }
 0x340   : > { %v5270_v1 = vmax.f32 %v4589_v62, 0.0  ;;  %v2676_v62 = vadd.f32 %v9351_v23, %v2675_v61  ;;  %v2678_v8 = vpop.f32.mrf.mxu0 }
 0x341   : > { %7774 = vmatmul.msk.f32.gmra.mxu0 %vm1795_vm1, %v1606_v54 }
 0x342   : > { %5549 = vmatmul.f32.gmra.mxu3 %v5270_v1  ;;  %v1607_v1 = vld [vmem:[%s8923_s26 + $0x1f0] sm:$0xff]  ;;  %v3303_v3 = vmax.f32 %v2676_v62, 0.0 }
 0x344   : > { %3668 = vmatmul.f32.gmra.mxu1 %v3302_v56 }
 0x345   : > { %v4591_v5 = vpop.f32.mrf.mxu2 }
 0x346   : > { %v4592_v9 = vadd.f32 %v9304_v22, %v4591_v5  ;;  %v5493_v5 = vld [vmem:[%s12230_s7 + $0x10] sm:$0xff] }
 0x347   : > { %5602 = vmatpush.msrb.mxu3 %v5493_v5 }
 0x348   : > { %v5271_v11 = vmax.f32 %v4592_v9, 0.0  ;;  %v2679_v9 = vadd.f32 %v9351_v23, %v2678_v8  ;;  %v2681_v18 = vpop.f32.mrf.mxu0 }
 0x349   : > { %7775 = vmatmul.msk.f32.gmra.mxu0 %vm1795_vm1, %v1607_v1 }
 0x34a   : > { %5552 = vmatmul.f32.gmra.mxu3 %v5271_v11  ;;  %v1608_v11 = vld [vmem:[%s8923_s26 + $0x1f8] sm:$0xff]  ;;  %v3304_v13 = vmax.f32 %v2679_v9, 0.0 }
 0x34b   : > { %v1612_v9 = vld [vmem:[%s8923_s26 + $0x218] sm:$0xff] }
 0x34c   : > { %3671 = vmatmul.f32.gmra.mxu1 %v3303_v3 }
 0x34d   : > { %v4594_v17 = vpop.f32.mrf.mxu2 }
 0x34e   : > { %v4595_v19 = vadd.f32 %v9304_v22, %v4594_v17  ;;  %v5492_v17 = vld [vmem:[%s12230_s7 + $0x8] sm:$0xff] }
 0x34f   : > { %5603 = vmatpush.msrb.mxu3 %v5492_v17 }
 0x350   : > { %v5272_v24 = vmax.f32 %v4595_v19, 0.0  ;;  %v2682_v19 = vadd.f32 %v9351_v23, %v2681_v18  ;;  %v7982_v18 = vld [vmem:[%s12230_s7 + $0x168] sm:$0xff] }
 0x351   : > { %7776 = vmatmul.msk.f32.gmra.mxu0 %vm1795_vm1, %v1608_v11  ;;  %5604 = vmatpush.msrb.mxu3 %v5491_v34 }
 0x352   : > { %5555 = vmatmul.f32.gmra.mxu3 %v5272_v24  ;;  %v3630_v24 = vpop.f32.mrf.mxu1  ;;  %v3305_v28 = vmax.f32 %v2682_v19, 0.0 }
 0x353   : > { %5671 = vmatpush.msra.mxu3 %v7984_v50  ;;  %v7980_v50 = vld [vmem:[%s12230_s7 + $0x158] sm:$0xff] }
 0x354   : > { %3674 = vmatmul.f32.gmra.mxu1 %v3304_v13 }
 0x355   : > { %v4597_v30 = vpop.f32.mrf.mxu2 }
 0x356   : > { %v4598_v33 = vadd.f32 %v9304_v22, %v4597_v30  ;;  %v3631_v30 = vadd.f32 %v9109_v41, %v3630_v24 }
 0x358   : > { %v5273_v35 = vmax.f32 %v4598_v33, 0.0  ;;  %v4286_v33 = vmax.f32 %v3631_v30, 0.0  ;;  %v9432_v30 = vld [vmem:[%s12227_s4] ss:$0 sm:$0xff] }
 0x359   : > { %7777 = vmatmul.msk.f32.gmra.mxu0 %vm1795_vm1, %v1609_v25 }
 0x35a   : > { %5558 = vmatmul.f32.gmra.mxu3 %v5273_v35  ;;  %4626 = vmatmul.f32.gmra.mxu2 %v4286_v33  ;;  %v2684_v35 = vpop.f32.mrf.mxu0 }
 0x35b   : > { %v2685_v38 = vadd.f32 %v9351_v23, %v2684_v35  ;;  %v7981_v35 = vld [vmem:[%s12230_s7 + $0x160] sm:$0xff] }
 0x35c   : > { %3677 = vmatmul.f32.gmra.mxu1 %v3305_v28 }
 0x35d   : > { %v4600_v40 = vpop.f32.mrf.mxu2 }
 0x35e   : > { %v4601_v44 = vadd.f32 %v9304_v22, %v4600_v40  ;;  %v3633_v40 = vpop.f32.mrf.mxu1 }
 0x35f   : > { %v3634_v46 = vadd.f32 %v9109_v41, %v3633_v40 }
 0x360   : > { %v5274_v47 = vmax.f32 %v4601_v44, 0.0  ;;  %v3306_v44 = vmax.f32 %v2685_v38, 0.0  ;;  %v4532_v38 = vadd.f32 %v9304_v22, %v9154_v21 }
 0x361   : > { %7778 = vmatmul.msk.f32.gmra.mxu0 %vm1795_vm1, %v1610_v36  ;;  %v4287_v49 = vmax.f32 %v3634_v46, 0.0 }
 0x362   : > { %5561 = vmatmul.f32.gmra.mxu3 %v5274_v47 }
 0x363   : > { %4629 = vmatmul.f32.gmra.mxu2 %v4287_v49 }
 0x364   : > { %3680 = vmatmul.f32.gmra.mxu1 %v3306_v44 }
 0x365   : > { %v4603_v52 = vpop.f32.mrf.mxu2 }
 0x366   : > { %v4604_v55 = vadd.f32 %v9304_v22, %v4603_v52  ;;  %v2687_v52 = vpop.f32.mrf.mxu0  ;;  %v3636_v56 = vpop.f32.mrf.mxu1 }
 0x367   : > { %v2688_v54 = vadd.f32 %v9351_v23, %v2687_v52  ;;  %v3637_v62 = vadd.f32 %v9109_v41, %v3636_v56  ;;  %v1615_v56 = vld [vmem:[%s8923_s26 + $0x230] sm:$0xff] }
 0x368   : > { %v5275_v57 = vmax.f32 %v4604_v55, 0.0 }
 0x369   : > { %v3307_v61 = vmax.f32 %v2688_v54, 0.0  ;;  %v4288_v1 = vmax.f32 %v3637_v62, 0.0 }
 0x36a   : > { %5564 = vmatmul.f32.gmra.mxu3 %v5275_v57  ;;  %v1611_v57 = vld [vmem:[%s8923_s26 + $0x210] sm:$0xff] }
 0x36b   : > { %7779 = vmatmul.msk.f32.gmra.mxu0 %vm1795_vm1, %v1611_v57  ;;  %4632 = vmatmul.f32.gmra.mxu2 %v4288_v1  ;;  %v4538_v1 = vadd.f32 %v9304_v22, %v9164_v32  ;;  %v7978_v32 = vld [vmem:[%s12230_s7 + $0x148] sm:$0xff] }
 0x36c   : > { %3683 = vmatmul.f32.gmra.mxu1 %v3307_v61  ;;  %v5252_v61 = vmax.f32 %v4535_v51, 0.0 }
 0x36d   : > { %v4606_v0 = vpop.f32.mrf.mxu2 }
 0x36e   : > { %v4607_v2 = vadd.f32 %v9304_v22, %v4606_v0  ;;  %v2690_v3 = vpop.f32.mrf.mxu0 }
 0x370   : > { %v5276_v4 = vmax.f32 %v4607_v2, 0.0  ;;  %v7983_v2 = vld [vmem:[%s12230_s7 + $0x170] sm:$0xff] }
 0x371   : > { %5672 = vmatpush.msra.mxu3 %v7983_v2  ;;  %v3639_v8 = vpop.f32.mrf.mxu1 }
 0x372   : > { %5567 = vmatmul.f32.gmra.mxu3 %v5276_v4  ;;  %v2691_v4 = vadd.f32 %v9351_v23, %v2690_v3  ;;  %v3640_v13 = vadd.f32 %v9109_v41, %v3639_v8 }
 0x373   : > { %7780 = vmatmul.msk.f32.gmra.mxu0 %vm1795_vm1, %v1612_v9  ;;  %5673 = vmatpush.msra.mxu3 %v7982_v18 }
 0x374   : > { %v4289_v17 = vmax.f32 %v3640_v13, 0.0  ;;  %v4541_v13 = vadd.f32 %v9304_v22, %v9169_v37  ;;  %v7977_v37 = vld [vmem:[%s12230_s7 + $0x140] sm:$0xff] }
 0x375   : > { %v4609_v10 = vpop.f32.mrf.mxu2  ;;  %5674 = vmatpush.msra.mxu3 %v7981_v35  ;;  %v1618_v35 = vld [vmem:[%s8923_s26 + $0x248] sm:$0xff] }
 0x376   : > { %v4610_v12 = vadd.f32 %v9304_v22, %v4609_v10  ;;  %v7080_v10 = vld [vmem:[%s12234_s11 + $0x78] sm:$0xff]  ;;  %4635 = vmatmul.f32.gmra.mxu2 %v4289_v17  ;;  %v2693_v19 = vpop.f32.mrf.mxu0 }
 0x377   : > { %7085 = vmatpush.msrb.mxu1 %v7080_v10  ;;  %5675 = vmatpush.msra.mxu3 %v7980_v50  ;;  %v5253_v10 = vmax.f32 %v4538_v1, 0.0  ;;  %v1619_v50 = vld [vmem:[%s8923_s26 + $0x250] sm:$0xff] }
 0x378   : > { %v5277_v14 = vmax.f32 %v4610_v12, 0.0  ;;  %v3308_v12 = vmax.f32 %v2691_v4, 0.0 }
 0x379   : > { %v3642_v25 = vpop.f32.mrf.mxu1  ;;  %5676 = vmatpush.msra.mxu3 %v7979_v27  ;;  %v1620_v27 = vld [vmem:[%s8923_s26 + $0x258] sm:$0xff] }
 0x37a   : > { %5570 = vmatmul.f32.gmra.mxu3 %v5277_v14  ;;  %3686 = vmatmul.f32.gmra.mxu1 %v3308_v12 }
 0x37b   : > { %5677 = vmatpush.msra.mxu3 %v7978_v32  ;;  %v1621_v32 = vld [vmem:[%s8923_s26 + $0x260] sm:$0xff] }
 0x37d   : > { %v4612_v20 = vpop.f32.mrf.mxu2  ;;  %5678 = vmatpush.msra.mxu3 %v7977_v37  ;;  %v1622_v37 = vld [vmem:[%s8923_s26 + $0x268] sm:$0xff] }
 0x37e   : > { %v4613_v26 = vadd.f32 %v9304_v22, %v4612_v20  ;;  %v2694_v20 = vadd.f32 %v9351_v23, %v2693_v19  ;;  %v2696_v36 = vpop.f32.mrf.mxu0  ;;  %v1617_v19 = vld [vmem:[%s8923_s26 + $0x240] sm:$0xff] }
 0x380   : > { %v5278_v31 = vmax.f32 %v4613_v26, 0.0  ;;  %v1613_v26 = vld [vmem:[%s8923_s26 + $0x220] sm:$0xff]  ;;  %v3309_v28 = vmax.f32 %v2694_v20, 0.0 }
 0x381   : > { %7781 = vmatmul.msk.f32.gmra.mxu0 %vm1795_vm1, %v1613_v26  ;;  %v3645_v40 = vpop.f32.mrf.mxu1 }
 0x382   : > { %5573 = vmatmul.f32.gmra.mxu3 %v5278_v31  ;;  %v3643_v31 = vadd.f32 %v9432_v30, %v3642_v25  ;;  %3689 = vmatmul.f32.gmra.mxu1 %v3309_v28  ;;  %v3646_v46 = vadd.f32 %v9432_v30, %v3645_v40  ;;  %v5254_v25 = vmax.f32 %v4541_v13, 0.0  ;;  %v4544_v28 = vadd.f32 %v9304_v22, %v9174_v43  ;;  %v7976_v43 = vld [vmem:[%s12230_s7 + $0x138] sm:$0xff] }
 0x383   : > { %5679 = vmatpush.msra.mxu3 %v7976_v43  ;;  %v1623_v43 = vld [vmem:[%s8923_s26 + $0x270] sm:$0xff] }
 0x384   : > { %v4290_v34 = vmax.f32 %v3643_v31, 0.0  ;;  %v4291_v49 = vmax.f32 %v3646_v46, 0.0 }
 0x385   : > { %v4615_v39 = vpop.f32.mrf.mxu2 }
 0x386   : > { %v4616_v42 = vadd.f32 %v9304_v22, %v4615_v39  ;;  %4638 = vmatmul.f32.gmra.mxu2 %v4290_v34  ;;  %v2697_v39 = vadd.f32 %v9351_v23, %v2696_v36  ;;  %v2699_v21 = vpop.f32.mrf.mxu0 }
 0x387   : > { %v2700_v52 = vadd.f32 %v9351_v23, %v2699_v21 }
 0x388   : > { %v5279_v47 = vmax.f32 %v4616_v42, 0.0  ;;  %v1614_v42 = vld [vmem:[%s8923_s26 + $0x228] sm:$0xff]  ;;  %v3310_v44 = vmax.f32 %v2697_v39, 0.0  ;;  %v5255_v39 = vmax.f32 %v4544_v28, 0.0 }
 0x389   : > { %7782 = vmatmul.msk.f32.gmra.mxu0 %vm1795_vm1, %v1614_v42  ;;  %v3311_v57 = vmax.f32 %v2700_v52, 0.0 }
 0x38a   : > { %5576 = vmatmul.f32.gmra.mxu3 %v5279_v47  ;;  %v5251_v47 = vmax.f32 %v4532_v38, 0.0  ;;  %3692 = vmatmul.f32.gmra.mxu1 %v3310_v44  ;;  %v4547_v44 = vadd.f32 %v9304_v22, %v9179_v48  ;;  %v7975_v48 = vld [vmem:[%s12230_s7 + $0x130] sm:$0xff] }
 0x38b   : > { %5680 = vmatpush.msra.mxu3 %v7975_v48  ;;  %v1624_v48 = vld [vmem:[%s8923_s26 + $0x278] sm:$0xff] }
 0x38c   : > { %v5256_v52 = vmax.f32 %v4547_v44, 0.0 }
 0x38d   : > { %v4618_v55 = vpop.f32.mrf.mxu2 }
 0x38e   : > { %v4619_v60 = vadd.f32 %v9304_v22, %v4618_v55  ;;  %4641 = vmatmul.f32.gmra.mxu2 %v4291_v49  ;;  %v3648_v55 = vpop.f32.mrf.mxu1 }
 0x390   : > { %v5280_v0 = vmax.f32 %v4619_v60, 0.0  ;;  %v3649_v60 = vadd.f32 %v9432_v30, %v3648_v55 }
 0x391   : > { %7783 = vmatmul.msk.f32.gmra.mxu0 %vm1795_vm1, %v1615_v56 }
 0x392   : > { %5579 = vmatmul.f32.gmra.mxu3 %v5280_v0  ;;  %v4292_v62 = vmax.f32 %v3649_v60, 0.0  ;;  %3695 = vmatmul.f32.gmra.mxu1 %v3311_v57  ;;  %v2702_v0 = vpop.f32.mrf.mxu0  ;;  %v4550_v57 = vadd.f32 %v9304_v22, %v9184_v53  ;;  %v7974_v53 = vld [vmem:[%s12230_s7 + $0x128] sm:$0xff] }
 0x393   : > { %v2703_v2 = vadd.f32 %v9351_v23, %v2702_v0  ;;  %5681 = vmatpush.msra.mxu3 %v7974_v53  ;;  %v1625_v53 = vld [vmem:[%s8923_s26 + $0x280] sm:$0xff] }
 0x395   : > { %v4621_v5 = vpop.f32.mrf.mxu2  ;;  %v3312_v8 = vmax.f32 %v2703_v2, 0.0  ;;  %v5257_v2 = vmax.f32 %v4550_v57, 0.0 }
 0x396   : > { %v4622_v11 = vadd.f32 %v9304_v22, %v4621_v5  ;;  %4644 = vmatmul.f32.gmra.mxu2 %v4292_v62  ;;  %v3651_v4 = vpop.f32.mrf.mxu1  ;;  %v1616_v5 = vld [vmem:[%s8923_s26 + $0x238] sm:$0xff] }
 0x397   : > { %v3652_v9 = vadd.f32 %v9432_v30, %v3651_v4 }
 0x398   : > { %v5281_v14 = vmax.f32 %v4622_v11, 0.0 }
 0x399   : > { %7784 = vmatmul.msk.f32.gmra.mxu0 %vm1795_vm1, %v1616_v5  ;;  %v4293_v11 = vmax.f32 %v3652_v9, 0.0 }
 0x39a   : > { %5582 = vmatmul.f32.gmra.mxu3 %v5281_v14  ;;  %3698 = vmatmul.f32.gmra.mxu1 %v3312_v8  ;;  %v2705_v12 = vpop.f32.mrf.mxu0  ;;  %v4553_v8 = vadd.f32 %v9304_v22, %v9189_v58  ;;  %v7973_v58 = vld [vmem:[%s12230_s7 + $0x120] sm:$0xff] }
 0x39b   : > { %v2706_v14 = vadd.f32 %v9351_v23, %v2705_v12  ;;  %5682 = vmatpush.msra.mxu3 %v7973_v58 }
 0x39d   : > { %v4624_v24 = vpop.f32.mrf.mxu2  ;;  %v3313_v20 = vmax.f32 %v2706_v14, 0.0  ;;  %v5258_v14 = vmax.f32 %v4553_v8, 0.0 }
 0x39e   : > { %v4625_v41 = vadd.f32 %v9304_v22, %v4624_v24  ;;  %4647 = vmatmul.f32.gmra.mxu2 %v4293_v11  ;;  %v3654_v18 = vpop.f32.mrf.mxu1 }
 0x39f   : > { %v3655_v24 = vadd.f32 %v9432_v30, %v3654_v18 }
 0x3a0   : > { %v5282_v33 = vmax.f32 %v4625_v41, 0.0 }
 0x3a1   : > { %7785 = vmatmul.msk.f32.gmra.mxu0 %vm1795_vm1, %v1617_v19  ;;  %v4294_v26 = vmax.f32 %v3655_v24, 0.0 }
 0x3a2   : > { %5585 = vmatmul.f32.gmra.mxu3 %v5282_v33  ;;  %3701 = vmatmul.f32.gmra.mxu1 %v3313_v20  ;;  %v2708_v41 = vpop.f32.mrf.mxu0  ;;  %v4556_v20 = vadd.f32 %v9304_v22, %v9194_v63  ;;  %v7972_v63 = vld [vmem:[%s12230_s7 + $0x118] sm:$0xff] }
 0x3a3   : > { %v2709_v31 = vadd.f32 %v9351_v23, %v2708_v41  ;;  %5683 = vmatpush.msra.mxu3 %v7972_v63 }
 0x3a5   : > { %v3314_v36 = vmax.f32 %v2709_v31, 0.0  ;;  %v5259_v31 = vmax.f32 %v4556_v20, 0.0 }
 0x3a6   : > { %4650 = vmatmul.f32.gmra.mxu2 %v4294_v26  ;;  %v3657_v34 = vpop.f32.mrf.mxu1 }
 0x3a7   : > { %v3658_v38 = vadd.f32 %v9432_v30, %v3657_v34 }
 0x3a9   : > { %7786 = vmatmul.msk.f32.gmra.mxu0 %vm1795_vm1, %v1618_v35  ;;  %v4295_v40 = vmax.f32 %v3658_v38, 0.0 }
 0x3aa   : > { %5605 = vmatmul.f32.vlgmr.msrb.gmra.mxu3 %v5251_v47  ;;  %3704 = vmatmul.f32.gmra.mxu1 %v3314_v36  ;;  %v2711_v42 = vpop.f32.mrf.mxu0  ;;  %v4559_v36 = vadd.f32 %v9304_v22, %v9205_v6  ;;  %v7971_v6 = vld [vmem:[%s12230_s7 + $0x110] sm:$0xff] }
 0x3ab   : > { %v2712_v46 = vadd.f32 %v9351_v23, %v2711_v42  ;;  %5684 = vmatpush.msra.mxu3 %v7971_v6  ;;  %v4574_v6 = vadd.f32 %v9304_v22, %v9285_v7 }
 0x3ad   : > { %v9451_v54 = vpop.f32.mrf.mxu3  ;;  %v3315_v21 = vmax.f32 %v2712_v46, 0.0  ;;  %v5260_v46 = vmax.f32 %v4559_v36, 0.0  ;;  %v1627_v36 = vld [vmem:[%s8923_s26 + $0x290] sm:$0xff] }
 0x3ae   : > { %4653 = vmatmul.f32.gmra.mxu2 %v4295_v40  ;;  %v3660_v49 = vpop.f32.mrf.mxu1 }
 0x3af   : > { %v3661_v51 = vadd.f32 %v9432_v30, %v3660_v49 }
 0x3b1   : > { %7787 = vmatmul.msk.f32.gmra.mxu0 %vm1795_vm1, %v1619_v50  ;;  %v4296_v55 = vmax.f32 %v3661_v51, 0.0 }
 0x3b2   : > { %5608 = vmatmul.f32.gmra.mxu3 %v5252_v61  ;;  %3707 = vmatmul.f32.gmra.mxu1 %v3315_v21  ;;  %v2714_v56 = vpop.f32.mrf.mxu0  ;;  %v4562_v21 = vadd.f32 %v9304_v22, %v9222_v15  ;;  %v7970_v15 = vld [vmem:[%s12230_s7 + $0x108] sm:$0xff] }
 0x3b3   : > { %v2715_v60 = vadd.f32 %v9351_v23, %v2714_v56  ;;  %5685 = vmatpush.msra.mxu3 %v7970_v15  ;;  %v7998_v15 = vld [vmem:[%s12230_s7 + $0x1e8] sm:$0xff] }
 0x3b5   : > { %v9462_v3 = vpop.f32.mrf.mxu3  ;;  %v3316_v0 = vmax.f32 %v2715_v60, 0.0  ;;  %v5261_v60 = vmax.f32 %v4562_v21, 0.0 }
 0x3b6   : > { %4656 = vmatmul.f32.gmra.mxu2 %v4296_v55  ;;  %v3663_v62 = vpop.f32.mrf.mxu1 }
 0x3b7   : > { %v3664_v1 = vadd.f32 %v9432_v30, %v3663_v62 }
 0x3b9   : > { %7788 = vmatmul.msk.f32.gmra.mxu0 %vm1795_vm1, %v1620_v27  ;;  %v4297_v4 = vmax.f32 %v3664_v1, 0.0 }
 0x3ba   : > { %5611 = vmatmul.f32.gmra.mxu3 %v5253_v10  ;;  %3710 = vmatmul.f32.gmra.mxu1 %v3316_v0  ;;  %v2717_v5 = vpop.f32.mrf.mxu0  ;;  %v4565_v0 = vadd.f32 %v9304_v22, %v9240_v29  ;;  %v7969_v29 = vld [vmem:[%s12230_s7 + $0x100] sm:$0xff] }
 0x3bb   : > { %v2718_v9 = vadd.f32 %v9351_v23, %v2717_v5  ;;  %5686 = vmatpush.msra.mxu3 %v7969_v29 }
 0x3bd   : > { %v9473_v17 = vpop.f32.mrf.mxu3  ;;  %v3317_v12 = vmax.f32 %v2718_v9, 0.0  ;;  %v5262_v9 = vmax.f32 %v4565_v0, 0.0  ;;  %v4577_v0 = vadd.f32 %v9304_v22, %v9294_v16  ;;  %v7997_v16 = vld [vmem:[%s12230_s7 + $0x1e0] sm:$0xff] }
 0x3be   : > { %4659 = vmatmul.f32.gmra.mxu2 %v4297_v4  ;;  %v3666_v11 = vpop.f32.mrf.mxu1 }
 0x3bf   : > { %v3667_v13 = vadd.f32 %v9432_v30, %v3666_v11  ;;  %v5266_v29 = vmax.f32 %v4577_v0, 0.0  ;;  %v7994_v0 = vld [vmem:[%s12230_s7 + $0x1c8] sm:$0xff] }
 0x3c1   : > { %7789 = vmatmul.msk.f32.gmra.mxu0 %vm1795_vm1, %v1621_v32  ;;  %v4298_v18 = vmax.f32 %v3667_v13, 0.0  ;;  %v6977_v32 = vld [vmem:[%s12232_s9 + $0x68] sm:$0xff]  ;;  %v4568_v13 = vadd.f32 %v9304_v22, %v9258_v45  ;;  %v8000_v45 = vld [vmem:[%s12230_s7 + $0x1f8] sm:$0xff] }
 0x3c2   : > { %5614 = vmatmul.f32.gmra.mxu3 %v5254_v25  ;;  %3713 = vmatmul.f32.gmra.mxu1 %v3317_v12  ;;  %v2720_v19 = vpop.f32.mrf.mxu0 }
 0x3c3   : > { %v2721_v24 = vadd.f32 %v9351_v23, %v2720_v19  ;;  %6986 = vmatpush.msrb.mxu0 %v6977_v32  ;;  %v1626_v19 = vld [vmem:[%s8923_s26 + $0x288] sm:$0xff]  ;;  %5769 = vmatpush.msrb.mxu3 %v8000_v45 }
 0x3c5   : > { %v9484_v33 = vpop.f32.mrf.mxu3  ;;  %v3318_v41 = vmax.f32 %v2721_v24, 0.0 }
 0x3c6   : > { %4662 = vmatmul.f32.gmra.mxu2 %v4298_v18  ;;  %v3669_v26 = vpop.f32.mrf.mxu1 }
 0x3c7   : > { %v3670_v28 = vadd.f32 %v9432_v30, %v3669_v26 }
 0x3c9   : > { %7790 = vmatmul.msk.f32.gmra.mxu0 %vm1795_vm1, %v1622_v37  ;;  %v4299_v34 = vmax.f32 %v3670_v28, 0.0  ;;  %v5263_v37 = vmax.f32 %v4568_v13, 0.0 }
 0x3ca   : > { %5617 = vmatmul.f32.gmra.mxu3 %v5255_v39  ;;  %3716 = vmatmul.f32.gmra.mxu1 %v3318_v41  ;;  %v2723_v35 = vpop.f32.mrf.mxu0 }
 0x3cb   : > { %v2724_v38 = vadd.f32 %v9351_v23, %v2723_v35 }
 0x3cd   : > { %v9495_v47 = vpop.f32.mrf.mxu3  ;;  %v3319_v42 = vmax.f32 %v2724_v38, 0.0 }
 0x3ce   : > { %4665 = vmatmul.f32.gmra.mxu2 %v4299_v34  ;;  %v3672_v40 = vpop.f32.mrf.mxu1 }
 0x3cf   : > { %v3673_v44 = vadd.f32 %v9432_v30, %v3672_v40 }
 0x3d1   : > { %7791 = vmatmul.msk.f32.gmra.mxu0 %vm1795_vm1, %v1623_v43  ;;  %v4300_v49 = vmax.f32 %v3673_v44, 0.0 }
 0x3d2   : > { %5620 = vmatmul.f32.gmra.mxu3 %v5256_v52  ;;  %3719 = vmatmul.f32.gmra.mxu1 %v3319_v42  ;;  %v2726_v50 = vpop.f32.mrf.mxu0  ;;  %v7079_v42 = vld [vmem:[%s12234_s11 + $0x70] sm:$0xff] }
 0x3d3   : > { %v2727_v51 = vadd.f32 %v9351_v23, %v2726_v50  ;;  %7086 = vmatpush.msrb.mxu1 %v7079_v42 }
 0x3d5   : > { %v9506_v61 = vpop.f32.mrf.mxu3  ;;  %v3320_v56 = vmax.f32 %v2727_v51, 0.0 }
 0x3d6   : > { %4668 = vmatmul.f32.gmra.mxu2 %v4300_v49  ;;  %v3675_v55 = vpop.f32.mrf.mxu1 }
 0x3d7   : > { %v3676_v57 = vadd.f32 %v9432_v30, %v3675_v55  ;;  %v1628_v55 = vld [vmem:[%s8923_s26 + $0x298] sm:$0xff] }
 0x3d9   : > { %7792 = vmatmul.msk.f32.gmra.mxu0 %vm1795_vm1, %v1624_v48  ;;  %v4301_v62 = vmax.f32 %v3676_v57, 0.0 }
 0x3da   : > { %5623 = vmatmul.f32.gmra.mxu3 %v5257_v2  ;;  %3722 = vmatmul.f32.gmra.mxu1 %v3320_v56  ;;  %v2729_v27 = vpop.f32.mrf.mxu0 }
 0x3db   : > { %v2730_v1 = vadd.f32 %v9351_v23, %v2729_v27 }
 0x3dd   : > { %v9517_v10 = vpop.f32.mrf.mxu3  ;;  %v3321_v5 = vmax.f32 %v2730_v1, 0.0  ;;  %v4627_v26 = vpop.f32.mrf.mxu2 }
 0x3de   : > { %4671 = vmatmul.f32.gmra.mxu2 %v4301_v62  ;;  %v3678_v4 = vpop.f32.mrf.mxu1  ;;  %v5265_v62 = vmax.f32 %v4574_v6, 0.0  ;;  %v7995_v6 = vld [vmem:[%s12230_s7 + $0x1d0] sm:$0xff] }
 0x3df   : > { %v3679_v8 = vadd.f32 %v9432_v30, %v3678_v4 }
 0x3e1   : > { %7793 = vmatmul.msk.f32.gmra.mxu0 %vm1795_vm1, %v1625_v53  ;;  %v4302_v11 = vmax.f32 %v3679_v8, 0.0 }
 0x3e2   : > { %5626 = vmatmul.f32.gmra.mxu3 %v5258_v14  ;;  %3725 = vmatmul.f32.gmra.mxu1 %v3321_v5  ;;  %v2732_v12 = vpop.f32.mrf.mxu0  ;;  %v1629_v5 = vld [vmem:[%s8923_s26 + $0x2a0] sm:$0xff] }
 0x3e3   : > { %v2733_v14 = vadd.f32 %v9351_v23, %v2732_v12  ;;  %v4628_v12 = vadd.f32 %v9304_v22, %v4627_v26 }
 0x3e5   : > { %v9528_v25 = vpop.f32.mrf.mxu3  ;;  %v3322_v20 = vmax.f32 %v2733_v14, 0.0 }
 0x3e6   : > { %4674 = vmatmul.f32.gmra.mxu2 %v4302_v11  ;;  %v3681_v58 = vpop.f32.mrf.mxu1  ;;  %v4630_v43 = vpop.f32.mrf.mxu2 }
 0x3e7   : > { %v3682_v24 = vadd.f32 %v9432_v30, %v3681_v58 }
 0x3e9   : > { %7794 = vmatmul.msk.f32.gmra.mxu0 %vm1795_vm1, %v1626_v19  ;;  %v4303_v41 = vmax.f32 %v3682_v24, 0.0  ;;  %v5283_v24 = vmax.f32 %v4628_v12, 0.0 }
 0x3ea   : > { %5629 = vmatmul.f32.gmra.mxu3 %v5259_v31  ;;  %3728 = vmatmul.f32.gmra.mxu1 %v3322_v20  ;;  %v2735_v28 = vpop.f32.mrf.mxu0  ;;  %v4571_v31 = vadd.f32 %v9304_v22, %v9273_v59  ;;  %v1630_v20 = vld [vmem:[%s8923_s26 + $0x2a8] sm:$0xff] }
 0x3eb   : > { %v2736_v34 = vadd.f32 %v9351_v23, %v2735_v28  ;;  %v4631_v28 = vadd.f32 %v9304_v22, %v4630_v43  ;;  %v9642_v43 = vld [vmem:[%s12229_s6] ss:$0 sm:$0xff] }
 0x3ec   : > { %v5264_v44 = vmax.f32 %v4571_v31, 0.0  ;;  %v7996_v31 = vld [vmem:[%s12230_s7 + $0x1d8] sm:$0xff] }
 0x3ed   : > { %v9539_v39 = vpop.f32.mrf.mxu3  ;;  %v3323_v38 = vmax.f32 %v2736_v34, 0.0  ;;  %v5284_v42 = vmax.f32 %v4631_v28, 0.0 }
 0x3ee   : > { %4677 = vmatmul.f32.gmra.mxu2 %v4303_v41  ;;  %v3684_v35 = vpop.f32.mrf.mxu1  ;;  %v4633_v57 = vpop.f32.mrf.mxu2 }
 0x3ef   : > { %v3685_v40 = vadd.f32 %v9432_v30, %v3684_v35 }
 0x3f1   : > { %7795 = vmatmul.msk.f32.gmra.mxu0 %vm1795_vm1, %v1627_v36  ;;  %v4304_v59 = vmax.f32 %v3685_v40, 0.0  ;;  %v1631_v40 = vld [vmem:[%s8923_s26 + $0x2b0] sm:$0xff] }
 0x3f2   : > { %5632 = vmatmul.f32.gmra.mxu3 %v5260_v46  ;;  %3731 = vmatmul.f32.gmra.mxu1 %v3323_v38  ;;  %v7999_v46 = vld [vmem:[%s12230_s7 + $0x1f0] sm:$0xff]  ;;  %v2738_v49 = vpop.f32.mrf.mxu0 }
 0x3f3   : > { %5770 = vmatpush.msrb.mxu3 %v7999_v46  ;;  %v2739_v50 = vadd.f32 %v9351_v23, %v2738_v49  ;;  %v4634_v49 = vadd.f32 %v9642_v43, %v4633_v57 }
 0x3f5   : > { %v9550_v52 = vpop.f32.mrf.mxu3  ;;  %v3324_v48 = vmax.f32 %v2739_v50, 0.0  ;;  %5771 = vmatpush.msrb.mxu3 %v7998_v15 }
 0x3f6   : > { %4680 = vmatmul.f32.gmra.mxu2 %v4304_v59 }
 0x3f7   : > { %v3687_v51 = vpop.f32.mrf.mxu1  ;;  %5772 = vmatpush.msrb.mxu3 %v7997_v16 }
 0x3f8   : > { %v3688_v56 = vadd.f32 %v9432_v30, %v3687_v51 }
 0x3f9   : > { %7796 = vmatmul.msk.f32.gmra.mxu0 %vm1795_vm1, %v1628_v55  ;;  %v4636_v11 = vpop.f32.mrf.mxu2  ;;  %5773 = vmatpush.msrb.mxu3 %v7996_v31 }
 0x3fa   : > { %5635 = vmatmul.f32.gmra.mxu3 %v5261_v60  ;;  %v7181_v60 = vld [vmem:[%s12236_s13 + $0x78] sm:$0xff]  ;;  %v4305_v7 = vmax.f32 %v3688_v56, 0.0  ;;  %3734 = vmatmul.f32.gmra.mxu1 %v3324_v48 }
 0x3fb   : > { %7186 = vmatpush.msrb.mxu2 %v7181_v60  ;;  %5774 = vmatpush.msrb.mxu3 %v7995_v6  ;;  %v1632_v56 = vld [vmem:[%s8923_s26 + $0x2b8] sm:$0xff]  ;;  %v5285_v60 = vmax.f32 %v4634_v49, 0.0 }
 0x3fd   : > { %v9561_v2 = vpop.f32.mrf.mxu3  ;;  %5775 = vmatpush.msrb.mxu3 %v7994_v0 }
 0x3fe   : > { %4683 = vmatmul.f32.gmra.mxu2 %v4305_v7  ;;  %v2741_v27 = vpop.f32.mrf.mxu0 }
 0x3ff   : > { %v2742_v1 = vadd.f32 %v9351_v23, %v2741_v27  ;;  %v3690_v53 = vpop.f32.mrf.mxu1  ;;  %v4637_v27 = vadd.f32 %v9642_v43, %v4636_v11 }
 0x401   : > { %v3325_v8 = vmax.f32 %v2742_v1, 0.0  ;;  %7797 = vmatmul.msk.f32.gmra.mxu0 %vm1795_vm1, %v1629_v5 }
 0x402   : > { %5638 = vmatmul.f32.gmra.mxu3 %v5262_v9  ;;  %v3691_v9 = vadd.f32 %v9432_v30, %v3690_v53 }
 0x403   : > { %3737 = vmatmul.f32.gmra.mxu1 %v3325_v8 }
 0x404   : > { %v4306_v32 = vmax.f32 %v3691_v9, 0.0  ;;  %v1633_v9 = vld [vmem:[%s8923_s26 + $0x2c0] sm:$0xff] }
 0x405   : > { %v9575_v18 = vpop.f32.mrf.mxu3 }
 0x406   : > { %4686 = vmatmul.f32.gmra.mxu2 %v4306_v32  ;;  %v2744_v13 = vpop.f32.mrf.mxu0 }
 0x407   : > { %v2745_v14 = vadd.f32 %v9351_v23, %v2744_v13  ;;  %v3693_v19 = vpop.f32.mrf.mxu1 }
 0x408   : > { %v3694_v41 = vadd.f32 %v9432_v30, %v3693_v19 }
 0x409   : > { %v4639_v45 = vpop.f32.mrf.mxu2  ;;  %7798 = vmatmul.msk.f32.gmra.mxu0 %vm1795_vm1, %v1630_v20 }
 0x40a   : > { %5641 = vmatmul.f32.gmra.mxu3 %v5263_v37  ;;  %v3326_v37 = vmax.f32 %v2745_v14, 0.0  ;;  %v4307_v26 = vmax.f32 %v3694_v41, 0.0  ;;  %v4640_v13 = vadd.f32 %v9642_v43, %v4639_v45  ;;  %v7993_v14 = vld [vmem:[%s12230_s7 + $0x1c0] sm:$0xff]  ;;  %v1634_v41 = vld [vmem:[%s8923_s26 + $0x2c8] sm:$0xff] }
 0x40b   : > { %5776 = vmatpush.msrb.mxu3 %v7993_v14  ;;  %v1637_v14 = vld [vmem:[%s8923_s26 + $0x2e0] sm:$0xff] }
 0x40c   : > { %3740 = vmatmul.f32.gmra.mxu1 %v3326_v37 }
 0x40d   : > { %v9586_v63 = vpop.f32.mrf.mxu3 }
 0x40e   : > { %4689 = vmatmul.f32.gmra.mxu2 %v4307_v26  ;;  %v2747_v34 = vpop.f32.mrf.mxu0  ;;  %v5287_v26 = vmax.f32 %v4640_v13, 0.0 }
 0x40f   : > { %v2748_v35 = vadd.f32 %v9351_v23, %v2747_v34  ;;  %v3696_v38 = vpop.f32.mrf.mxu1 }
 0x410   : > { %v3697_v59 = vadd.f32 %v9432_v30, %v3696_v38  ;;  %v7992_v38 = vld [vmem:[%s12230_s7 + $0x1b8] sm:$0xff] }
 0x411   : > { %v4642_v46 = vpop.f32.mrf.mxu2  ;;  %7799 = vmatmul.msk.f32.gmra.mxu0 %vm1795_vm1, %v1631_v40  ;;  %5777 = vmatpush.msrb.mxu3 %v7992_v38 }
 0x412   : > { %5644 = vmatmul.f32.gmra.mxu3 %v5264_v44  ;;  %v3327_v44 = vmax.f32 %v2748_v35, 0.0  ;;  %v4308_v22 = vmax.f32 %v3697_v59, 0.0  ;;  %v4643_v35 = vadd.f32 %v9642_v43, %v4642_v46 }
 0x414   : > { %3743 = vmatmul.f32.gmra.mxu1 %v3327_v44  ;;  %v5288_v49 = vmax.f32 %v4643_v35, 0.0 }
 0x415   : > { %v9600_v21 = vpop.f32.mrf.mxu3 }
 0x416   : > { %4692 = vmatmul.f32.gmra.mxu2 %v4308_v22  ;;  %v2750_v50 = vpop.f32.mrf.mxu0  ;;  %v1635_v22 = vld [vmem:[%s8923_s26 + $0x2d0] sm:$0xff] }
 0x417   : > { %v2751_v51 = vadd.f32 %v9351_v23, %v2750_v50  ;;  %v3699_v48 = vpop.f32.mrf.mxu1 }
 0x418   : > { %v3700_v7 = vadd.f32 %v9432_v30, %v3699_v48 }
 0x419   : > { %v4645_v15 = vpop.f32.mrf.mxu2  ;;  %7800 = vmatmul.msk.f32.gmra.mxu0 %vm1795_vm1, %v1632_v56 }
 0x41a   : > { %5647 = vmatmul.f32.gmra.mxu3 %v5265_v62  ;;  %v3328_v62 = vmax.f32 %v2751_v51, 0.0  ;;  %v4309_v57 = vmax.f32 %v3700_v7, 0.0  ;;  %v4646_v48 = vadd.f32 %v9642_v43, %v4645_v15 }
 0x41c   : > { %3746 = vmatmul.f32.gmra.mxu1 %v3328_v62  ;;  %v5289_v0 = vmax.f32 %v4646_v48, 0.0 }
 0x41d   : > { %v9614_v4 = vpop.f32.mrf.mxu3 }
 0x41e   : > { %4695 = vmatmul.f32.gmra.mxu2 %v4309_v57  ;;  %v2753_v1 = vpop.f32.mrf.mxu0 }
 0x41f   : > { %v2754_v53 = vadd.f32 %v9351_v23, %v2753_v1  ;;  %v3702_v8 = vpop.f32.mrf.mxu1 }
 0x420   : > { %v3703_v12 = vadd.f32 %v9432_v30, %v3702_v8 }
 0x421   : > { %v3329_v32 = vmax.f32 %v2754_v53, 0.0  ;;  %v4648_v16 = vpop.f32.mrf.mxu2  ;;  %7801 = vmatmul.msk.f32.gmra.mxu0 %vm1795_vm1, %v1633_v9 }
 0x422   : > { %5650 = vmatmul.f32.gmra.mxu3 %v5266_v29  ;;  %v5286_v29 = vmax.f32 %v4637_v27, 0.0  ;;  %v4310_v11 = vmax.f32 %v3703_v12, 0.0  ;;  %v1636_v27 = vld [vmem:[%s8923_s26 + $0x2d8] sm:$0xff]  ;;  %v4649_v9 = vadd.f32 %v9642_v43, %v4648_v16 }
 0x424   : > { %3749 = vmatmul.f32.gmra.mxu1 %v3329_v32 }
 0x425   : > { %v9624_v58 = vpop.f32.mrf.mxu3 }
 0x426   : > { %4698 = vmatmul.f32.gmra.mxu2 %v4310_v11  ;;  %v2756_v19 = vpop.f32.mrf.mxu0 }
 0x427   : > { %v2757_v20 = vadd.f32 %v9351_v23, %v2756_v19  ;;  %v3705_v37 = vpop.f32.mrf.mxu1  ;;  %v5290_v19 = vmax.f32 %v4649_v9, 0.0 }
 0x428   : > { %v3706_v31 = vadd.f32 %v9432_v30, %v3705_v37 }
 0x429   : > { %v3330_v28 = vmax.f32 %v2757_v20, 0.0  ;;  %v4651_v34 = vpop.f32.mrf.mxu2  ;;  %7802 = vmatmul.msk.f32.gmra.mxu0 %vm1795_vm1, %v1634_v41 }
 0x42a   : > { %5687 = vmatmul.f32.vlgmr.msra.gmra.mxu3 %v5283_v24  ;;  %v4311_v45 = vmax.f32 %v3706_v31, 0.0 }
 0x42c   : > { %3752 = vmatmul.f32.gmra.mxu1 %v3330_v28  ;;  %v7989_v28 = vld [vmem:[%s12230_s7 + $0x1a0] sm:$0xff] }
 0x42d   : > { %v9634_v36 = vpop.f32.mrf.mxu3 }
 0x42e   : > { %4701 = vmatmul.f32.gmra.mxu2 %v4311_v45  ;;  %v2759_v40 = vpop.f32.mrf.mxu0 }
 0x42f   : > { %v3708_v59 = vpop.f32.mrf.mxu1 }
 0x430   : > { %v3709_v50 = vadd.f32 %v9432_v30, %v3708_v59 }
 0x431   : > { %v4654_v51 = vpop.f32.mrf.mxu2  ;;  %7803 = vmatmul.msk.f32.gmra.mxu0 %vm1795_vm1, %v1635_v22 }
 0x432   : > { %5690 = vmatmul.f32.gmra.mxu3 %v5284_v42  ;;  %v2760_v42 = vadd.f32 %v9351_v23, %v2759_v40  ;;  %v4312_v46 = vmax.f32 %v3709_v50, 0.0  ;;  %v7991_v23 = vld [vmem:[%s12230_s7 + $0x1b0] sm:$0xff]  ;;  %v7988_v50 = vld [vmem:[%s12230_s7 + $0x198] sm:$0xff] }
 0x433   : > { %5778 = vmatpush.msrb.mxu3 %v7991_v23  ;;  %v1638_v40 = vld [vmem:[%s8923_s26 + $0x2e8] sm:$0xff] }
 0x434   : > { %v3331_v6 = vmax.f32 %v2760_v42, 0.0 }
 0x435   : > { %v9649_v55 = vpop.f32.mrf.mxu3 }
 0x436   : > { %3755 = vmatmul.f32.gmra.mxu1 %v3331_v6  ;;  %4704 = vmatmul.f32.gmra.mxu2 %v4312_v46  ;;  %v2762_v56 = vpop.f32.mrf.mxu0  ;;  %v4655_v6 = vadd.f32 %v9642_v43, %v4654_v51 }
 0x437   : > { %v3711_v57 = vpop.f32.mrf.mxu1 }
 0x438   : > { %v3712_v1 = vadd.f32 %v9432_v30, %v3711_v57  ;;  %v5292_v57 = vmax.f32 %v4655_v6, 0.0 }
 0x439   : > { %v4657_v53 = vpop.f32.mrf.mxu2  ;;  %7804 = vmatmul.msk.f32.gmra.mxu0 %vm1795_vm1, %v1636_v27 }
 0x43a   : > { %5693 = vmatmul.f32.gmra.mxu3 %v5285_v60  ;;  %v9691_v60 = vld [vmem:[%s12225_s2] ss:$0 sm:$0xff]  ;;  %v4313_v8 = vmax.f32 %v3712_v1, 0.0  ;;  %v4658_v1 = vadd.f32 %v9642_v43, %v4657_v53 }
 0x43b   : > { %v2763_v62 = vadd.f32 %v9691_v60, %v2762_v56 }
 0x43d   : > { %v9659_v5 = vpop.f32.mrf.mxu3  ;;  %v3332_v15 = vmax.f32 %v2763_v62, 0.0  ;;  %v1639_v62 = vld [vmem:[%s8923_s26 + $0x2f0] sm:$0xff] }
 0x43e   : > { %4707 = vmatmul.f32.gmra.mxu2 %v4313_v8  ;;  %v2765_v32 = vpop.f32.mrf.mxu0  ;;  %v7987_v8 = vld [vmem:[%s12230_s7 + $0x190] sm:$0xff] }
 0x43f   : > { %3758 = vmatmul.f32.gmra.mxu1 %v3332_v15  ;;  %v2766_v12 = vadd.f32 %v9691_v60, %v2765_v32  ;;  %v3714_v13 = vpop.f32.mrf.mxu1 }
 0x440   : > { %v3715_v37 = vadd.f32 %v9432_v30, %v3714_v13  ;;  %v1640_v13 = vld [vmem:[%s8923_s26 + $0x2f8] sm:$0xff] }
 0x441   : > { %v3333_v20 = vmax.f32 %v2766_v12, 0.0  ;;  %v4660_v41 = vpop.f32.mrf.mxu2  ;;  %7805 = vmatmul.msk.f32.gmra.mxu0 %vm1795_vm1, %v1637_v14  ;;  %v5293_v14 = vmax.f32 %v4658_v1, 0.0 }
 0x442   : > { %5696 = vmatmul.f32.gmra.mxu3 %v5286_v29  ;;  %v7990_v29 = vld [vmem:[%s12230_s7 + $0x1a8] sm:$0xff]  ;;  %v4314_v16 = vmax.f32 %v3715_v37, 0.0 }
 0x443   : > { %5779 = vmatpush.msrb.mxu3 %v7990_v29 }
 0x445   : > { %v9669_v24 = vpop.f32.mrf.mxu3  ;;  %5780 = vmatpush.msrb.mxu3 %v7989_v28  ;;  %v6976_v28 = vld [vmem:[%s12232_s9 + $0x60] sm:$0xff] }
 0x446   : > { %4710 = vmatmul.f32.gmra.mxu2 %v4314_v16  ;;  %v2768_v31 = vpop.f32.mrf.mxu0  ;;  %v4661_v16 = vadd.f32 %v9642_v43, %v4660_v41  ;;  %6987 = vmatpush.msrb.mxu0 %v6976_v28 }
 0x447   : > { %3761 = vmatmul.f32.gmra.mxu1 %v3333_v20  ;;  %v2769_v45 = vadd.f32 %v9691_v60, %v2768_v31  ;;  %v3717_v38 = vpop.f32.mrf.mxu1  ;;  %5781 = vmatpush.msrb.mxu3 %v7988_v50 }
 0x448   : > { %v3718_v22 = vadd.f32 %v9432_v30, %v3717_v38 }
 0x449   : > { %v3334_v59 = vmax.f32 %v2769_v45, 0.0  ;;  %7806 = vmatmul.msk.f32.gmra.mxu0 %vm1795_vm1, %v1638_v40  ;;  %5782 = vmatpush.msrb.mxu3 %v7987_v8 }
 0x44a   : > { %5699 = vmatmul.f32.gmra.mxu3 %v5287_v26  ;;  %v4652_v26 = vadd.f32 %v9642_v43, %v4651_v34  ;;  %v4315_v34 = vmax.f32 %v3718_v22, 0.0 }
 0x44c   : > { %v5291_v42 = vmax.f32 %v4652_v26, 0.0  ;;  %v7986_v26 = vld [vmem:[%s12230_s7 + $0x188] sm:$0xff] }
 0x44d   : > { %v9679_v44 = vpop.f32.mrf.mxu3  ;;  %5783 = vmatpush.msrb.mxu3 %v7986_v26 }
 0x44e   : > { %4713 = vmatmul.f32.gmra.mxu2 %v4315_v34  ;;  %v2771_v46 = vpop.f32.mrf.mxu0 }
 0x44f   : > { %3764 = vmatmul.f32.gmra.mxu1 %v3334_v59  ;;  %v2772_v48 = vadd.f32 %v9691_v60, %v2771_v46  ;;  %v3720_v56 = vpop.f32.mrf.mxu1  ;;  %v5294_v59 = vmax.f32 %v4661_v16, 0.0  ;;  %v7985_v46 = vld [vmem:[%s12230_s7 + $0x180] sm:$0xff] }
 0x450   : > { %5784 = vmatpush.msrb.mxu3 %v7985_v46 }
 0x451   : > { %v3335_v27 = vmax.f32 %v2772_v48, 0.0  ;;  %7807 = vmatmul.msk.f32.gmra.mxu0 %vm1795_vm1, %v1639_v62 }
 0x452   : > { %5702 = vmatmul.f32.gmra.mxu3 %v5288_v49  ;;  %v4663_v49 = vpop.f32.mrf.mxu2 }
 0x453   : > { %v4664_v50 = vadd.f32 %v9642_v43, %v4663_v49  ;;  %v7078_v49 = vld [vmem:[%s12234_s11 + $0x68] sm:$0xff] }
 0x454   : > { %7087 = vmatpush.msrb.mxu1 %v7078_v49 }
 0x455   : > { %v9694_v7 = vpop.f32.mrf.mxu3 }
 0x456   : > { %v2774_v9 = vpop.f32.mrf.mxu0 }
 0x457   : > { %3767 = vmatmul.f32.gmra.mxu1 %v3335_v27  ;;  %v2775_v29 = vadd.f32 %v9691_v60, %v2774_v9  ;;  %v3723_v12 = vpop.f32.mrf.mxu1  ;;  %v1642_v27 = vld [vmem:[%s8923_s26 + $0x308] sm:$0xff] }
 0x458   : > { %v3724_v20 = vadd.f32 %v9432_v30, %v3723_v12  ;;  %v8016_v12 = vld [vmem:[%s12230_s7 + $0x278] sm:$0xff] }
 0x459   : > { %7808 = vmatmul.msk.f32.gmra.mxu0 %vm1795_vm1, %v1640_v13  ;;  %5867 = vmatpush.msra.mxu3 %v8016_v12 }
 0x45a   : > { %5705 = vmatmul.f32.gmra.mxu3 %v5289_v0  ;;  %v3721_v0 = vadd.f32 %v9432_v30, %v3720_v56  ;;  %v4666_v15 = vpop.f32.mrf.mxu2  ;;  %v4317_v53 = vmax.f32 %v3724_v20, 0.0 }
 0x45c   : > { %v4316_v51 = vmax.f32 %v3721_v0, 0.0  ;;  %v5295_v0 = vmax.f32 %v4664_v50, 0.0 }
 0x45d   : > { %v9704_v11 = vpop.f32.mrf.mxu3 }
 0x45e   : > { %4716 = vmatmul.f32.gmra.mxu2 %v4316_v51  ;;  %v2777_v31 = vpop.f32.mrf.mxu0 }
 0x45f   : > { %v2778_v45 = vadd.f32 %v9691_v60, %v2777_v31  ;;  %v3726_v40 = vpop.f32.mrf.mxu1 }
 0x460   : > { %v3727_v22 = vadd.f32 %v9432_v30, %v3726_v40 }
 0x461   : > { %v3337_v41 = vmax.f32 %v2778_v45, 0.0 }
 0x462   : > { %5708 = vmatmul.f32.gmra.mxu3 %v5290_v19  ;;  %v3336_v19 = vmax.f32 %v2775_v29, 0.0  ;;  %v4669_v37 = vpop.f32.mrf.mxu2  ;;  %v4318_v6 = vmax.f32 %v3727_v22, 0.0  ;;  %v4667_v29 = vadd.f32 %v9642_v43, %v4666_v15  ;;  %v7180_v15 = vld [vmem:[%s12236_s13 + $0x70] sm:$0xff] }
 0x463   : > { %7187 = vmatpush.msrb.mxu2 %v7180_v15  ;;  %v4670_v40 = vadd.f32 %v9642_v43, %v4669_v37  ;;  %v9789_v37 = vld [vmem:[%s12227_s4] ss:$0 sm:$0xff] }
 0x464   : > { %3770 = vmatmul.f32.gmra.mxu1 %v3336_v19  ;;  %v5296_v16 = vmax.f32 %v4667_v29, 0.0  ;;  %v1645_v29 = vld [vmem:[%s8923_s26 + $0x320] sm:$0xff] }
 0x465   : > { %v9714_v35 = vpop.f32.mrf.mxu3  ;;  %v5297_v50 = vmax.f32 %v4670_v40, 0.0  ;;  %v1646_v40 = vld [vmem:[%s8923_s26 + $0x328] sm:$0xff] }
 0x466   : > { %4719 = vmatmul.f32.gmra.mxu2 %v4317_v53  ;;  %v2780_v48 = vpop.f32.mrf.mxu0  ;;  %v1643_v53 = vld [vmem:[%s8923_s26 + $0x310] sm:$0xff] }
 0x467   : > { %v2781_v56 = vadd.f32 %v9691_v60, %v2780_v48 }
 0x469   : > { %v3338_v51 = vmax.f32 %v2781_v56, 0.0 }
 0x46a   : > { %5711 = vmatmul.f32.gmra.mxu3 %v5291_v42  ;;  %v1641_v42 = vld [vmem:[%s8923_s26 + $0x300] sm:$0xff]  ;;  %v4672_v34 = vpop.f32.mrf.mxu2 }
 0x46b   : > { %7809 = vmatmul.msk.f32.gmra.mxu0 %vm1795_vm1, %v1641_v42  ;;  %v8015_v42 = vld [vmem:[%s12230_s7 + $0x270] sm:$0xff] }
 0x46c   : > { %3773 = vmatmul.f32.gmra.mxu1 %v3337_v41  ;;  %5868 = vmatpush.msra.mxu3 %v8015_v42 }
 0x46d   : > { %v9724_v23 = vpop.f32.mrf.mxu3 }
 0x46e   : > { %4722 = vmatmul.f32.gmra.mxu2 %v4318_v6  ;;  %v2783_v13 = vpop.f32.mrf.mxu0  ;;  %v1644_v6 = vld [vmem:[%s8923_s26 + $0x318] sm:$0xff] }
 0x472   : > { %5714 = vmatmul.f32.gmra.mxu3 %v5292_v57  ;;  %v3729_v57 = vpop.f32.mrf.mxu1  ;;  %v4675_v8 = vpop.f32.mrf.mxu2 }
 0x473   : > { %v3730_v1 = vadd.f32 %v9432_v30, %v3729_v57  ;;  %7810 = vmatmul.msk.f32.gmra.mxu0 %vm1795_vm1, %v1642_v27  ;;  %v4673_v27 = vadd.f32 %v9642_v43, %v4672_v34 }
 0x474   : > { %3776 = vmatmul.f32.gmra.mxu1 %v3338_v51 }
 0x475   : > { %v9734_v32 = vpop.f32.mrf.mxu3  ;;  %v4319_v9 = vmax.f32 %v3730_v1, 0.0  ;;  %v5298_v12 = vmax.f32 %v4673_v27, 0.0 }
 0x477   : > { %4725 = vmatmul.f32.gmra.mxu2 %v4319_v9 }
 0x47a   : > { %5717 = vmatmul.f32.gmra.mxu3 %v5293_v14  ;;  %v2784_v14 = vadd.f32 %v9691_v60, %v2783_v13  ;;  %v3732_v20 = vpop.f32.mrf.mxu1  ;;  %v4678_v31 = vpop.f32.mrf.mxu2 }
 0x47b   : > { %v3733_v28 = vadd.f32 %v9432_v30, %v3732_v20  ;;  %7811 = vmatmul.msk.f32.gmra.mxu0 %vm1795_vm1, %v1643_v53  ;;  %v2786_v30 = vpop.f32.mrf.mxu0  ;;  %v4676_v53 = vadd.f32 %v9642_v43, %v4675_v8 }
 0x47c   : > { %v3339_v26 = vmax.f32 %v2784_v14, 0.0 }
 0x47d   : > { %v9747_v38 = vpop.f32.mrf.mxu3  ;;  %v4320_v45 = vmax.f32 %v3733_v28, 0.0  ;;  %v5299_v42 = vmax.f32 %v4676_v53, 0.0 }
 0x47e   : > { %3779 = vmatmul.f32.gmra.mxu1 %v3339_v26 }
 0x47f   : > { %4728 = vmatmul.f32.gmra.mxu2 %v4320_v45 }
 0x482   : > { %5720 = vmatmul.f32.gmra.mxu3 %v5294_v59  ;;  %v2787_v59 = vadd.f32 %v9691_v60, %v2786_v30  ;;  %v3735_v22 = vpop.f32.mrf.mxu1  ;;  %v4681_v56 = vpop.f32.mrf.mxu2 }
 0x483   : > { %v3736_v48 = vadd.f32 %v9789_v37, %v3735_v22  ;;  %7812 = vmatmul.msk.f32.gmra.mxu0 %vm1795_vm1, %v1644_v6  ;;  %v2789_v51 = vpop.f32.mrf.mxu0  ;;  %v4679_v6 = vadd.f32 %v9642_v43, %v4678_v31 }
 0x484   : > { %v3340_v46 = vmax.f32 %v2787_v59, 0.0  ;;  %v2790_v1 = vadd.f32 %v9691_v60, %v2789_v51  ;;  %v1647_v51 = vld [vmem:[%s8923_s26 + $0x330] sm:$0xff] }
 0x485   : > { %v9757_v62 = vpop.f32.mrf.mxu3  ;;  %v4321_v57 = vmax.f32 %v3736_v48, 0.0  ;;  %v5607_v48 = vadd.f32 %v9634_v36, %v9451_v54  ;;  %v4682_v54 = vadd.f32 %v9642_v43, %v4681_v56  ;;  %v8011_v36 = vld [vmem:[%s12230_s7 + $0x250] sm:$0xff] }
 0x486   : > { %3782 = vmatmul.f32.gmra.mxu1 %v3340_v46  ;;  %v3341_v13 = vmax.f32 %v2790_v1, 0.0  ;;  %v5300_v1 = vmax.f32 %v4679_v6, 0.0  ;;  %v5613_v6 = vadd.f32 %v9659_v5, %v9473_v17  ;;  %v8009_v5 = vld [vmem:[%s12230_s7 + $0x240] sm:$0xff] }
 0x487   : > { %4731 = vmatmul.f32.gmra.mxu2 %v4321_v57 }
 0x48a   : > { %5723 = vmatmul.f32.gmra.mxu3 %v5295_v0  ;;  %v8014_v0 = vld [vmem:[%s12230_s7 + $0x268] sm:$0xff]  ;;  %v3738_v9 = vpop.f32.mrf.mxu1  ;;  %v4684_v20 = vpop.f32.mrf.mxu2 }
 0x48b   : > { %5869 = vmatpush.msra.mxu3 %v8014_v0  ;;  %v3739_v14 = vadd.f32 %v9789_v37, %v3738_v9  ;;  %7813 = vmatmul.msk.f32.gmra.mxu0 %vm1795_vm1, %v1645_v29  ;;  %v2792_v26 = vpop.f32.mrf.mxu0 }
 0x48c   : > { %v2793_v28 = vadd.f32 %v9691_v60, %v2792_v26 }
 0x48d   : > { %v9770_v19 = vpop.f32.mrf.mxu3  ;;  %v4322_v34 = vmax.f32 %v3739_v14, 0.0 }
 0x48e   : > { %3785 = vmatmul.f32.gmra.mxu1 %v3341_v13  ;;  %v3342_v30 = vmax.f32 %v2793_v28, 0.0  ;;  %v1648_v28 = vld [vmem:[%s8923_s26 + $0x338] sm:$0xff] }
 0x48f   : > { %4734 = vmatmul.f32.gmra.mxu2 %v4322_v34  ;;  %v5610_v34 = vadd.f32 %v9649_v55, %v9462_v3  ;;  %v4685_v3 = vadd.f32 %v9642_v43, %v4684_v20  ;;  %v8010_v55 = vld [vmem:[%s12230_s7 + $0x248] sm:$0xff] }
 0x492   : > { %5726 = vmatmul.f32.gmra.mxu3 %v5296_v16  ;;  %v8013_v16 = vld [vmem:[%s12230_s7 + $0x260] sm:$0xff]  ;;  %v3741_v45 = vpop.f32.mrf.mxu1  ;;  %v4687_v22 = vpop.f32.mrf.mxu2 }
 0x493   : > { %5870 = vmatpush.msra.mxu3 %v8013_v16  ;;  %v3742_v59 = vadd.f32 %v9789_v37, %v3741_v45  ;;  %7814 = vmatmul.msk.f32.gmra.mxu0 %vm1795_vm1, %v1646_v40  ;;  %v2795_v46 = vpop.f32.mrf.mxu0  ;;  %v5301_v45 = vmax.f32 %v4682_v54, 0.0  ;;  %v4688_v17 = vadd.f32 %v9642_v43, %v4687_v22 }
 0x494   : > { %v2796_v57 = vadd.f32 %v9691_v60, %v2795_v46 }
 0x495   : > { %v9783_v41 = vpop.f32.mrf.mxu3  ;;  %v4323_v8 = vmax.f32 %v3742_v59, 0.0 }
 0x496   : > { %3788 = vmatmul.f32.gmra.mxu1 %v3342_v30  ;;  %v3343_v29 = vmax.f32 %v2796_v57, 0.0  ;;  %v1649_v57 = vld [vmem:[%s8923_s26 + $0x340] sm:$0xff] }
 0x497   : > { %4737 = vmatmul.f32.gmra.mxu2 %v4323_v8 }
 0x49a   : > { %5729 = vmatmul.f32.gmra.mxu3 %v5297_v50  ;;  %v8012_v50 = vld [vmem:[%s12230_s7 + $0x258] sm:$0xff]  ;;  %v3744_v0 = vpop.f32.mrf.mxu1 }
 0x49b   : > { %5871 = vmatpush.msra.mxu3 %v8012_v50  ;;  %v3745_v31 = vadd.f32 %v9789_v37, %v3744_v0  ;;  %7815 = vmatmul.msk.f32.gmra.mxu0 %vm1795_vm1, %v1647_v51  ;;  %v2798_v14 = vpop.f32.mrf.mxu0 }
 0x49c   : > { %v2799_v53 = vadd.f32 %v9691_v60, %v2798_v14 }
 0x49d   : > { %v9798_v49 = vpop.f32.mrf.mxu3  ;;  %v4324_v13 = vmax.f32 %v3745_v31, 0.0  ;;  %5872 = vmatpush.msra.mxu3 %v8011_v36 }
 0x49e   : > { %3791 = vmatmul.f32.gmra.mxu1 %v3343_v29 }
 0x49f   : > { %4740 = vmatmul.f32.gmra.mxu2 %v4324_v13  ;;  %5873 = vmatpush.msra.mxu3 %v8010_v55  ;;  %v5616_v13 = vadd.f32 %v9669_v24, %v9484_v33  ;;  %v8008_v24 = vld [vmem:[%s12230_s7 + $0x238] sm:$0xff] }
 0x4a1   : > { %5874 = vmatpush.msra.mxu3 %v8009_v5  ;;  %v1652_v5 = vld [vmem:[%s8923_s26 + $0x358] sm:$0xff] }
 0x4a2   : > { %5732 = vmatmul.f32.gmra.mxu3 %v5298_v12  ;;  %v4690_v12 = vpop.f32.mrf.mxu2  ;;  %v3747_v26 = vpop.f32.mrf.mxu1 }
 0x4a3   : > { %v3748_v56 = vadd.f32 %v9789_v37, %v3747_v26  ;;  %7816 = vmatmul.msk.f32.gmra.mxu0 %vm1795_vm1, %v1648_v28  ;;  %v2801_v8 = vpop.f32.mrf.mxu0  ;;  %v4691_v33 = vadd.f32 %v9642_v43, %v4690_v12  ;;  %5875 = vmatpush.msra.mxu3 %v8008_v24 }
 0x4a4   : > { %v2802_v50 = vadd.f32 %v9691_v60, %v2801_v8  ;;  %v1651_v8 = vld [vmem:[%s8923_s26 + $0x350] sm:$0xff] }
 0x4a5   : > { %v9808_v15 = vpop.f32.mrf.mxu3  ;;  %v4325_v59 = vmax.f32 %v3748_v56, 0.0  ;;  %v5619_v56 = vadd.f32 %v9679_v44, %v9495_v47  ;;  %v8007_v44 = vld [vmem:[%s12230_s7 + $0x230] sm:$0xff] }
 0x4a6   : > { %v3345_v51 = vmax.f32 %v2802_v50, 0.0  ;;  %5876 = vmatpush.msra.mxu3 %v8007_v44 }
 0x4a7   : > { %4743 = vmatmul.f32.gmra.mxu2 %v4325_v59 }
 0x4aa   : > { %5785 = vmatmul.f32.vlgmr.msrb.gmra.mxu3 %v5299_v42  ;;  %v3344_v42 = vmax.f32 %v2799_v53, 0.0  ;;  %v4693_v30 = vpop.f32.mrf.mxu2  ;;  %v5303_v53 = vmax.f32 %v4688_v17, 0.0 }
 0x4ab   : > { %7817 = vmatmul.msk.f32.gmra.mxu0 %vm1795_vm1, %v1649_v57  ;;  %v2804_v31 = vpop.f32.mrf.mxu0  ;;  %v4694_v47 = vadd.f32 %v9642_v43, %v4693_v30 }
 0x4ac   : > { %3794 = vmatmul.f32.gmra.mxu1 %v3344_v42  ;;  %v2805_v54 = vadd.f32 %v9691_v60, %v2804_v31 }
 0x4ad   : > { %v5688_v27 = vpop.f32.mrf.mxu3  ;;  %v5305_v31 = vmax.f32 %v4694_v47, 0.0 }
 0x4ae   : > { %v9821_v9 = vadd.f32 %v5688_v27, %v5607_v48  ;;  %v3750_v48 = vpop.f32.mrf.mxu1  ;;  %v5302_v27 = vmax.f32 %v4685_v3, 0.0  ;;  %v3346_v26 = vmax.f32 %v2805_v54, 0.0 }
 0x4af   : > { %v3751_v20 = vadd.f32 %v9789_v37, %v3750_v48 }
 0x4b1   : > { %v4326_v29 = vmax.f32 %v3751_v20, 0.0 }
 0x4b2   : > { %5788 = vmatmul.f32.gmra.mxu3 %v5300_v1  ;;  %v4696_v1 = vpop.f32.mrf.mxu2 }
 0x4b3   : > { %4746 = vmatmul.f32.gmra.mxu2 %v4326_v29  ;;  %v2807_v42 = vpop.f32.mrf.mxu0 }
 0x4b4   : > { %3797 = vmatmul.f32.gmra.mxu1 %v3345_v51  ;;  %v2808_v59 = vadd.f32 %v9691_v60, %v2807_v42  ;;  %v5622_v51 = vadd.f32 %v9694_v7, %v9506_v61  ;;  %v4697_v61 = vadd.f32 %v9642_v43, %v4696_v1  ;;  %v8006_v7 = vld [vmem:[%s12230_s7 + $0x228] sm:$0xff] }
 0x4b5   : > { %v5691_v16 = vpop.f32.mrf.mxu3  ;;  %5877 = vmatpush.msra.mxu3 %v8006_v7 }
 0x4b6   : > { %v9833_v40 = vadd.f32 %v5691_v16, %v5610_v34  ;;  %v3753_v14 = vpop.f32.mrf.mxu1  ;;  %v1650_v34 = vld [vmem:[%s8923_s26 + $0x348] sm:$0xff]  ;;  %v5306_v24 = vmax.f32 %v4697_v61, 0.0 }
 0x4b7   : > { %v3754_v22 = vadd.f32 %v9789_v37, %v3753_v14  ;;  %7818 = vmatmul.msk.f32.gmra.mxu0 %vm1795_vm1, %v1650_v34 }
 0x4ba   : > { %5791 = vmatmul.f32.gmra.mxu3 %v5301_v45  ;;  %v4699_v28 = vpop.f32.mrf.mxu2  ;;  %v4327_v45 = vmax.f32 %v3754_v22, 0.0 }
 0x4bc   : > { %3800 = vmatmul.f32.gmra.mxu1 %v3346_v26  ;;  %4749 = vmatmul.f32.gmra.mxu2 %v4327_v45 }
 0x4bd   : > { %v5694_v46 = vpop.f32.mrf.mxu3 }
 0x4be   : > { %v9845_v0 = vadd.f32 %v5694_v46, %v5613_v6  ;;  %v3756_v55 = vpop.f32.mrf.mxu1  ;;  %v5304_v6 = vmax.f32 %v4691_v33, 0.0  ;;  %v3347_v46 = vmax.f32 %v2808_v59, 0.0  ;;  %v1653_v33 = vld [vmem:[%s8923_s26 + $0x360] sm:$0xff] }
 0x4bf   : > { %v3757_v12 = vadd.f32 %v9789_v37, %v3756_v55  ;;  %7819 = vmatmul.msk.f32.gmra.mxu0 %vm1795_vm1, %v1651_v8  ;;  %v5628_v8 = vadd.f32 %v9714_v35, %v9528_v25  ;;  %v8004_v35 = vld [vmem:[%s12230_s7 + $0x218] sm:$0xff] }
 0x4c1   : > { %v4328_v57 = vmax.f32 %v3757_v12, 0.0 }
 0x4c2   : > { %5794 = vmatmul.f32.gmra.mxu3 %v5302_v27  ;;  %v4702_v48 = vpop.f32.mrf.mxu2  ;;  %v2810_v27 = vpop.f32.mrf.mxu0 }
 0x4c3   : > { %v2811_v20 = vadd.f32 %v9691_v60, %v2810_v27  ;;  %v4703_v25 = vadd.f32 %v9642_v43, %v4702_v48 }
 0x4c4   : > { %3803 = vmatmul.f32.gmra.mxu1 %v3347_v46  ;;  %4752 = vmatmul.f32.gmra.mxu2 %v4328_v57  ;;  %v1654_v57 = vld [vmem:[%s8923_s26 + $0x368] sm:$0xff] }
 0x4c5   : > { %v5697_v36 = vpop.f32.mrf.mxu3  ;;  %v3348_v54 = vmax.f32 %v2811_v20, 0.0 }
 0x4c6   : > { %v9857_v16 = vadd.f32 %v5697_v36, %v5616_v13  ;;  %v3759_v17 = vpop.f32.mrf.mxu1 }
 0x4c7   : > { %v3760_v30 = vadd.f32 %v9789_v37, %v3759_v17  ;;  %7820 = vmatmul.msk.f32.gmra.mxu0 %vm1795_vm1, %v1652_v5  ;;  %v5631_v17 = vadd.f32 %v9724_v23, %v9539_v39  ;;  %v8003_v23 = vld [vmem:[%s12230_s7 + $0x210] sm:$0xff] }
 0x4c9   : > { %v4329_v14 = vmax.f32 %v3760_v30, 0.0  ;;  %v1655_v30 = vld [vmem:[%s8923_s26 + $0x370] sm:$0xff] }
 0x4ca   : > { %5797 = vmatmul.f32.gmra.mxu3 %v5303_v53  ;;  %v4705_v36 = vpop.f32.mrf.mxu2  ;;  %v2813_v34 = vpop.f32.mrf.mxu0  ;;  %v5625_v53 = vadd.f32 %v9704_v11, %v9517_v10  ;;  %v4700_v10 = vadd.f32 %v9642_v43, %v4699_v28  ;;  %v8005_v11 = vld [vmem:[%s12230_s7 + $0x220] sm:$0xff] }
 0x4cb   : > { %v2814_v26 = vadd.f32 %v9691_v60, %v2813_v34  ;;  %5878 = vmatpush.msra.mxu3 %v8005_v11  ;;  %v4706_v39 = vadd.f32 %v9642_v43, %v4705_v36  ;;  %v1656_v36 = vld [vmem:[%s8923_s26 + $0x378] sm:$0xff] }
 0x4cc   : > { %3806 = vmatmul.f32.gmra.mxu1 %v3348_v54  ;;  %4755 = vmatmul.f32.gmra.mxu2 %v4329_v14  ;;  %v5307_v47 = vmax.f32 %v4700_v10, 0.0  ;;  %v5308_v14 = vmax.f32 %v4703_v25, 0.0 }
 0x4cd   : > { %v5700_v3 = vpop.f32.mrf.mxu3  ;;  %5879 = vmatpush.msra.mxu3 %v8004_v35 }
 0x4ce   : > { %v9869_v50 = vadd.f32 %v5700_v3, %v5619_v56  ;;  %v3762_v45 = vpop.f32.mrf.mxu1  ;;  %v3349_v56 = vmax.f32 %v2814_v26, 0.0  ;;  %v6975_v26 = vld [vmem:[%s12232_s9 + $0x58] sm:$0xff] }
 0x4cf   : > { %v3763_v1 = vadd.f32 %v9789_v37, %v3762_v45  ;;  %7821 = vmatmul.msk.f32.gmra.mxu0 %vm1795_vm1, %v1653_v33  ;;  %5880 = vmatpush.msra.mxu3 %v8003_v23  ;;  %v5634_v45 = vadd.f32 %v9734_v32, %v9550_v52  ;;  %v8002_v32 = vld [vmem:[%s12230_s7 + $0x208] sm:$0xff] }
 0x4d0   : > { %6988 = vmatpush.msrb.mxu0 %v6975_v26 }
 0x4d1   : > { %v4330_v3 = vmax.f32 %v3763_v1, 0.0  ;;  %v5309_v1 = vmax.f32 %v4706_v39, 0.0  ;;  %5881 = vmatpush.msra.mxu3 %v8002_v32  ;;  %v8031_v32 = vld [vmem:[%s12230_s7 + $0x2f0] sm:$0xff] }
 0x4d2   : > { %5800 = vmatmul.f32.gmra.mxu3 %v5304_v6  ;;  %v9896_v59 = vpop.f32.mrf.mxu2  ;;  %v2816_v55 = vpop.f32.mrf.mxu0 }
 0x4d3   : > { %v2817_v6 = vadd.f32 %v9691_v60, %v2816_v55  ;;  %v4709_v52 = vadd.f32 %v9642_v43, %v9896_v59 }
 0x4d4   : > { %3809 = vmatmul.f32.gmra.mxu1 %v3349_v56  ;;  %4758 = vmatmul.f32.gmra.mxu2 %v4330_v3 }
 0x4d5   : > { %v5703_v29 = vpop.f32.mrf.mxu3  ;;  %v3350_v27 = vmax.f32 %v2817_v6, 0.0 }
 0x4d6   : > { %v9881_v13 = vadd.f32 %v5703_v29, %v5622_v51  ;;  %v3765_v12 = vpop.f32.mrf.mxu1 }
 0x4d7   : > { %v3766_v28 = vadd.f32 %v9789_v37, %v3765_v12  ;;  %7822 = vmatmul.msk.f32.gmra.mxu0 %vm1795_vm1, %v1654_v57 }
 0x4d9   : > { %v4331_v20 = vmax.f32 %v3766_v28, 0.0  ;;  %v5310_v28 = vmax.f32 %v4709_v52, 0.0 }
 0x4da   : > { %5803 = vmatmul.f32.gmra.mxu3 %v5305_v31  ;;  %v9910_v51 = vpop.f32.mrf.mxu2  ;;  %v2819_v29 = vpop.f32.mrf.mxu0 }
 0x4db   : > { %v2820_v5 = vadd.f32 %v9691_v60, %v2819_v29  ;;  %v4712_v29 = vadd.f32 %v9642_v43, %v9910_v51 }
 0x4dc   : > { %3812 = vmatmul.f32.gmra.mxu1 %v3350_v27  ;;  %4761 = vmatmul.f32.gmra.mxu2 %v4331_v20  ;;  %v1657_v27 = vld [vmem:[%s8923_s26 + $0x380] sm:$0xff] }
 0x4dd   : > { %v5706_v22 = vpop.f32.mrf.mxu3  ;;  %v3351_v7 = vmax.f32 %v2820_v5, 0.0 }
 0x4de   : > { %v9893_v42 = vadd.f32 %v5706_v22, %v5625_v53  ;;  %v3768_v54 = vpop.f32.mrf.mxu1 }
 0x4df   : > { %v3769_v48 = vadd.f32 %v9789_v37, %v3768_v54  ;;  %7823 = vmatmul.msk.f32.gmra.mxu0 %vm1795_vm1, %v1655_v30 }
 0x4e1   : > { %v4332_v53 = vmax.f32 %v3769_v48, 0.0  ;;  %v5311_v48 = vmax.f32 %v4712_v29, 0.0 }
 0x4e2   : > { %5806 = vmatmul.f32.gmra.mxu3 %v5306_v24  ;;  %v9924_v34 = vpop.f32.mrf.mxu2  ;;  %v2822_v22 = vpop.f32.mrf.mxu0 }
 0x4e3   : > { %v2823_v33 = vadd.f32 %v9691_v60, %v2822_v22  ;;  %v4715_v26 = vadd.f32 %v9642_v43, %v9924_v34  ;;  %v8032_v22 = vld [vmem:[%s12230_s7 + $0x2f8] sm:$0xff] }
 0x4e4   : > { %3815 = vmatmul.f32.gmra.mxu1 %v3351_v7  ;;  %4764 = vmatmul.f32.gmra.mxu2 %v4332_v53  ;;  %v1658_v7 = vld [vmem:[%s8923_s26 + $0x388] sm:$0xff] }
 0x4e5   : > { %v5709_v46 = vpop.f32.mrf.mxu3  ;;  %v3352_v10 = vmax.f32 %v2823_v33, 0.0  ;;  %v5643_v33 = vadd.f32 %v9770_v19, %v9586_v63  ;;  %v9998_v63 = vld [vmem:[%s12229_s6] ss:$0 sm:$0xff] }
 0x4e6   : > { %v9907_v44 = vadd.f32 %v5709_v46, %v5628_v8  ;;  %v3771_v56 = vpop.f32.mrf.mxu1  ;;  %v5637_v46 = vadd.f32 %v9747_v38, %v9561_v2  ;;  %v7077_v2 = vld [vmem:[%s12234_s11 + $0x60] sm:$0xff] }
 0x4e7   : > { %v3772_v11 = vadd.f32 %v9789_v37, %v3771_v56  ;;  %7824 = vmatmul.msk.f32.gmra.mxu0 %vm1795_vm1, %v1656_v36  ;;  %7088 = vmatpush.msrb.mxu1 %v7077_v2 }
 0x4e9   : > { %v4333_v8 = vmax.f32 %v3772_v11, 0.0 }
 0x4ea   : > { %5809 = vmatmul.f32.gmra.mxu3 %v5307_v47  ;;  %v9941_v55 = vpop.f32.mrf.mxu2  ;;  %v2825_v6 = vpop.f32.mrf.mxu0 }
 0x4eb   : > { %v2826_v12 = vadd.f32 %v9691_v60, %v2825_v6  ;;  %v4718_v19 = vadd.f32 %v9998_v63, %v9941_v55 }
 0x4ec   : > { %3818 = vmatmul.f32.gmra.mxu1 %v3352_v10  ;;  %4767 = vmatmul.f32.gmra.mxu2 %v4333_v8  ;;  %v5312_v10 = vmax.f32 %v4715_v26, 0.0 }
 0x4ed   : > { %v5712_v31 = vpop.f32.mrf.mxu3  ;;  %v3353_v25 = vmax.f32 %v2826_v12, 0.0 }
 0x4ee   : > { %v9921_v61 = vadd.f32 %v5712_v31, %v5631_v17  ;;  %v3774_v47 = vpop.f32.mrf.mxu1  ;;  %v8001_v17 = vld [vmem:[%s12230_s7 + $0x200] sm:$0xff]  ;;  %v5640_v31 = vadd.f32 %v9757_v62, %v9575_v18  ;;  %v7179_v18 = vld [vmem:[%s12236_s13 + $0x68] sm:$0xff] }
 0x4ef   : > { %v3775_v59 = vadd.f32 %v9789_v37, %v3774_v47  ;;  %7825 = vmatmul.msk.f32.gmra.mxu0 %vm1795_vm1, %v1657_v27  ;;  %5882 = vmatpush.msra.mxu3 %v8001_v17  ;;  %v1660_v27 = vld [vmem:[%s8923_s26 + $0x398] sm:$0xff]  ;;  %v5649_v17 = vadd.f32 %v9798_v49, %v9614_v4 }
 0x4f0   : > { %7188 = vmatpush.msrb.mxu2 %v7179_v18  ;;  %v8029_v49 = vld [vmem:[%s12230_s7 + $0x2e0] sm:$0xff] }
 0x4f1   : > { %v4334_v38 = vmax.f32 %v3775_v59, 0.0  ;;  %5965 = vmatpush.msrb.mxu3 %v8032_v22 }
 0x4f2   : > { %5812 = vmatmul.f32.gmra.mxu3 %v5308_v14  ;;  %v9956_v35 = vpop.f32.mrf.mxu2  ;;  %v2828_v5 = vpop.f32.mrf.mxu0 }
 0x4f3   : > { %v2829_v54 = vadd.f32 %v9691_v60, %v2828_v5  ;;  %5966 = vmatpush.msrb.mxu3 %v8031_v32  ;;  %v1663_v32 = vld [vmem:[%s8923_s26 + $0x3b0] sm:$0xff] }
 0x4f4   : > { %3821 = vmatmul.f32.gmra.mxu1 %v3353_v25  ;;  %4770 = vmatmul.f32.gmra.mxu2 %v4334_v38 }
 0x4f5   : > { %v5715_v24 = vpop.f32.mrf.mxu3  ;;  %v3354_v39 = vmax.f32 %v2829_v54, 0.0 }
 0x4f6   : > { %v9938_v3 = vadd.f32 %v5715_v24, %v5634_v45  ;;  %v3777_v14 = vpop.f32.mrf.mxu1 }
 0x4f7   : > { %v3778_v51 = vadd.f32 %v9789_v37, %v3777_v14  ;;  %7826 = vmatmul.msk.f32.gmra.mxu0 %vm1795_vm1, %v1658_v7 }
 0x4f9   : > { %v4335_v62 = vmax.f32 %v3778_v51, 0.0 }
 0x4fa   : > { %5815 = vmatmul.f32.gmra.mxu3 %v5309_v1  ;;  %v9974_v23 = vpop.f32.mrf.mxu2  ;;  %v2831_v45 = vpop.f32.mrf.mxu0  ;;  %v1659_v1 = vld [vmem:[%s8923_s26 + $0x390] sm:$0xff] }
 0x4fb   : > { %v2832_v24 = vadd.f32 %v9691_v60, %v2831_v45  ;;  %v4724_v4 = vadd.f32 %v9998_v63, %v9974_v23 }
 0x4fc   : > { %3824 = vmatmul.f32.gmra.mxu1 %v3354_v39  ;;  %4773 = vmatmul.f32.gmra.mxu2 %v4335_v62  ;;  %v5652_v62 = vadd.f32 %v9808_v15, %v9624_v58  ;;  %v8028_v15 = vld [vmem:[%s12230_s7 + $0x2d8] sm:$0xff] }
 0x4fd   : > { %v5718_v57 = vpop.f32.mrf.mxu3  ;;  %v3355_v8 = vmax.f32 %v2832_v24, 0.0  ;;  %v5315_v24 = vmax.f32 %v4724_v4, 0.0 }
 0x4fe   : > { %v9953_v20 = vadd.f32 %v5718_v57, %v5637_v46  ;;  %v3780_v36 = vpop.f32.mrf.mxu1  ;;  %v5646_v46 = vadd.f32 %v9783_v41, %v9600_v21  ;;  %v4721_v21 = vadd.f32 %v9998_v63, %v9956_v35  ;;  %v8030_v41 = vld [vmem:[%s12230_s7 + $0x2e8] sm:$0xff] }
 0x4ff   : > { %v3781_v43 = vadd.f32 %v9789_v37, %v3780_v36  ;;  %7827 = vmatmul.msk.f32.gmra.mxu0 %vm1795_vm1, %v1659_v1  ;;  %5967 = vmatpush.msrb.mxu3 %v8030_v41 }
 0x500   : > { %v5314_v14 = vmax.f32 %v4721_v21, 0.0  ;;  %v1664_v21 = vld [vmem:[%s8923_s26 + $0x3b8] sm:$0xff] }
 0x501   : > { %v4336_v52 = vmax.f32 %v3781_v43, 0.0  ;;  %5968 = vmatpush.msrb.mxu3 %v8029_v49 }
 0x502   : > { %5818 = vmatmul.f32.gmra.mxu3 %v5310_v28  ;;  %v9992_v34 = vpop.f32.mrf.mxu2  ;;  %v2834_v6 = vpop.f32.mrf.mxu0  ;;  %v5313_v28 = vmax.f32 %v4718_v19, 0.0 }
 0x503   : > { %v2835_v12 = vadd.f32 %v9691_v60, %v2834_v6  ;;  %v4727_v58 = vadd.f32 %v9998_v63, %v9992_v34  ;;  %5969 = vmatpush.msrb.mxu3 %v8028_v15 }
 0x504   : > { %3827 = vmatmul.f32.gmra.mxu1 %v3355_v8  ;;  %4776 = vmatmul.f32.gmra.mxu2 %v4336_v52 }
 0x505   : > { %v5721_v30 = vpop.f32.mrf.mxu3  ;;  %v3356_v59 = vmax.f32 %v2835_v12, 0.0  ;;  %v5316_v6 = vmax.f32 %v4727_v58, 0.0 }
 0x506   : > { %v9971_v53 = vadd.f32 %v5721_v30, %v5640_v31  ;;  %v3783_v47 = vpop.f32.mrf.mxu1  ;;  %v1661_v30 = vld [vmem:[%s8923_s26 + $0x3a0] sm:$0xff] }
 0x507   : > { %v3784_v55 = vadd.f32 %v9789_v37, %v3783_v47  ;;  %7828 = vmatmul.msk.f32.gmra.mxu0 %vm1795_vm1, %v1660_v27 }
 0x509   : > { %v4337_v38 = vmax.f32 %v3784_v55, 0.0 }
 0x50a   : > { %5821 = vmatmul.f32.gmra.mxu3 %v5311_v48  ;;  %v4729_v2 = vpop.f32.mrf.mxu2  ;;  %v2837_v29 = vpop.f32.mrf.mxu0 }
 0x50b   : > { %v2838_v5 = vadd.f32 %v9691_v60, %v2837_v29  ;;  %v4730_v27 = vadd.f32 %v9998_v63, %v4729_v2 }
 0x50c   : > { %3830 = vmatmul.f32.gmra.mxu1 %v3356_v59  ;;  %4779 = vmatmul.f32.gmra.mxu2 %v4337_v38 }
 0x50d   : > { %v5724_v56 = vpop.f32.mrf.mxu3  ;;  %v3357_v48 = vmax.f32 %v2838_v5, 0.0  ;;  %v5317_v41 = vmax.f32 %v4730_v27, 0.0 }
 0x50e   : > { %v9989_v11 = vadd.f32 %v5724_v56, %v5643_v33  ;;  %v3786_v54 = vpop.f32.mrf.mxu1  ;;  %v1662_v33 = vld [vmem:[%s8923_s26 + $0x3a8] sm:$0xff] }
 0x50f   : > { %v3787_v35 = vadd.f32 %v9789_v37, %v3786_v54  ;;  %7829 = vmatmul.msk.f32.gmra.mxu0 %vm1795_vm1, %v1661_v30  ;;  %v8026_v30 = vld [vmem:[%s12230_s7 + $0x2c8] sm:$0xff] }
 0x511   : > { %v4338_v51 = vmax.f32 %v3787_v35, 0.0 }
 0x512   : > { %5824 = vmatmul.f32.gmra.mxu3 %v5312_v10  ;;  %v4732_v39 = vpop.f32.mrf.mxu2  ;;  %v2840_v18 = vpop.f32.mrf.mxu0 }
 0x513   : > { %v2841_v26 = vadd.f32 %v9691_v60, %v2840_v18  ;;  %v4733_v54 = vadd.f32 %v9998_v63, %v4732_v39 }
 0x514   : > { %3833 = vmatmul.f32.gmra.mxu1 %v3357_v48  ;;  %4782 = vmatmul.f32.gmra.mxu2 %v4338_v51  ;;  %v1665_v51 = vld [vmem:[%s8923_s26 + $0x3c0] sm:$0xff] }
 0x515   : > { %v5727_v57 = vpop.f32.mrf.mxu3  ;;  %v3358_v23 = vmax.f32 %v2841_v26, 0.0  ;;  %v5318_v4 = vmax.f32 %v4733_v54, 0.0 }
 0x516   : > { %v10009_v25 = vadd.f32 %v5727_v57, %v5646_v46  ;;  %v3789_v45 = vpop.f32.mrf.mxu1 }
 0x517   : > { %v3790_v36 = vadd.f32 %v9789_v37, %v3789_v45  ;;  %7830 = vmatmul.msk.f32.gmra.mxu0 %vm1795_vm1, %v1662_v33  ;;  %v8025_v45 = vld [vmem:[%s12230_s7 + $0x2c0] sm:$0xff] }
 0x519   : > { %v4339_v10 = vmax.f32 %v3790_v36, 0.0  ;;  %v1666_v36 = vld [vmem:[%s8923_s26 + $0x3c8] sm:$0xff] }
 0x51a   : > { %5827 = vmatmul.f32.gmra.mxu3 %v5313_v28  ;;  %v4735_v1 = vpop.f32.mrf.mxu2  ;;  %v2843_v8 = vpop.f32.mrf.mxu0  ;;  %v10058_v28 = vld [vmem:[%s12225_s2] ss:$0 sm:$0xff] }
 0x51b   : > { %v2844_v43 = vadd.f32 %v9691_v60, %v2843_v8  ;;  %v8027_v60 = vld [vmem:[%s12230_s7 + $0x2d0] sm:$0xff] }
 0x51c   : > { %3836 = vmatmul.f32.gmra.mxu1 %v3358_v23  ;;  %4785 = vmatmul.f32.gmra.mxu2 %v4339_v10 }
 0x51d   : > { %v5730_v31 = vpop.f32.mrf.mxu3  ;;  %v3359_v12 = vmax.f32 %v2844_v43, 0.0  ;;  %5970 = vmatpush.msrb.mxu3 %v8027_v60 }
 0x51e   : > { %v10022_v7 = vadd.f32 %v5730_v31, %v5649_v17  ;;  %v3792_v19 = vpop.f32.mrf.mxu1 }
 0x51f   : > { %v3793_v34 = vadd.f32 %v9789_v37, %v3792_v19  ;;  %7831 = vmatmul.msk.f32.gmra.mxu0 %vm1795_vm1, %v1663_v32  ;;  %5971 = vmatpush.msrb.mxu3 %v8026_v30  ;;  %v8024_v19 = vld [vmem:[%s12230_s7 + $0x2b8] sm:$0xff] }
 0x521   : > { %v4340_v47 = vmax.f32 %v3793_v34, 0.0  ;;  %5972 = vmatpush.msrb.mxu3 %v8025_v45  ;;  %v1667_v34 = vld [vmem:[%s8923_s26 + $0x3d0] sm:$0xff] }
 0x522   : > { %5830 = vmatmul.f32.gmra.mxu3 %v5314_v14  ;;  %v4738_v57 = vpop.f32.mrf.mxu2 }
 0x523   : > { %5973 = vmatpush.msrb.mxu3 %v8024_v19 }
 0x524   : > { %3839 = vmatmul.f32.gmra.mxu1 %v3359_v12  ;;  %4788 = vmatmul.f32.gmra.mxu2 %v4340_v47 }
 0x525   : > { %v5733_v22 = vpop.f32.mrf.mxu3 }
 0x526   : > { %v10035_v56 = vadd.f32 %v5733_v22, %v5652_v62  ;;  %v4736_v22 = vadd.f32 %v9998_v63, %v4735_v1 }
 0x527   : > { %7832 = vmatmul.msk.f32.gmra.mxu0 %vm1795_vm1, %v1664_v21 }
 0x528   : > { %v5319_v10 = vmax.f32 %v4736_v22, 0.0 }
 0x529   : > { %v3795_v38 = vpop.f32.mrf.mxu1 }
 0x52a   : > { %5883 = vmatmul.f32.vlgmr.msra.gmra.mxu3 %v5315_v24  ;;  %v3796_v17 = vadd.f32 %v9789_v37, %v3795_v38  ;;  %v4741_v5 = vpop.f32.mrf.mxu2  ;;  %v8023_v38 = vld [vmem:[%s12230_s7 + $0x2b0] sm:$0xff] }
 0x52b   : > { %5974 = vmatpush.msrb.mxu3 %v8023_v38 }
 0x52c   : > { %v4341_v31 = vmax.f32 %v3796_v17, 0.0  ;;  %v1668_v17 = vld [vmem:[%s8923_s26 + $0x3d8] sm:$0xff] }
 0x52d   : > { %v5786_v52 = vpop.f32.mrf.mxu3 }
 0x52e   : > { %v10047_v46 = vadd.f32 %v5786_v52, %v9821_v9  ;;  %v2846_v9 = vpop.f32.mrf.mxu0  ;;  %4791 = vmatmul.f32.gmra.mxu2 %v4341_v31  ;;  %v4739_v52 = vadd.f32 %v9998_v63, %v4738_v57 }
 0x52f   : > { %v2847_v59 = vadd.f32 %v10058_v28, %v2846_v9  ;;  %7833 = vmatmul.msk.f32.gmra.mxu0 %vm1795_vm1, %v1665_v51 }
 0x530   : > { %v5320_v47 = vmax.f32 %v4739_v52, 0.0 }
 0x531   : > { %v3360_v29 = vmax.f32 %v2847_v59, 0.0  ;;  %v3798_v35 = vpop.f32.mrf.mxu1 }
 0x532   : > { %5886 = vmatmul.f32.gmra.mxu3 %v5316_v6  ;;  %v3799_v39 = vadd.f32 %v9789_v37, %v3798_v35  ;;  %v4744_v62 = vpop.f32.mrf.mxu2  ;;  %v8022_v35 = vld [vmem:[%s12230_s7 + $0x2a8] sm:$0xff] }
 0x533   : > { %3842 = vmatmul.f32.gmra.mxu1 %v3360_v29  ;;  %5975 = vmatpush.msrb.mxu3 %v8022_v35 }
 0x534   : > { %v4342_v26 = vmax.f32 %v3799_v39, 0.0  ;;  %v1669_v39 = vld [vmem:[%s8923_s26 + $0x3e0] sm:$0xff] }
 0x535   : > { %v5789_v55 = vpop.f32.mrf.mxu3 }
 0x536   : > { %v10063_v2 = vadd.f32 %v5789_v55, %v9833_v40  ;;  %v2849_v40 = vpop.f32.mrf.mxu0  ;;  %4794 = vmatmul.f32.gmra.mxu2 %v4342_v26  ;;  %v4742_v55 = vadd.f32 %v9998_v63, %v4741_v5 }
 0x537   : > { %v2850_v14 = vadd.f32 %v10058_v28, %v2849_v40  ;;  %7834 = vmatmul.msk.f32.gmra.mxu0 %vm1795_vm1, %v1666_v36 }
 0x538   : > { %v5321_v31 = vmax.f32 %v4742_v55, 0.0 }
 0x539   : > { %v3361_v18 = vmax.f32 %v2850_v14, 0.0  ;;  %v3801_v23 = vpop.f32.mrf.mxu1 }
 0x53a   : > { %5889 = vmatmul.f32.gmra.mxu3 %v5317_v41  ;;  %v3802_v1 = vadd.f32 %v9789_v37, %v3801_v23  ;;  %v4747_v8 = vpop.f32.mrf.mxu2  ;;  %v8021_v23 = vld [vmem:[%s12230_s7 + $0x2a0] sm:$0xff] }
 0x53b   : > { %3845 = vmatmul.f32.gmra.mxu1 %v3361_v18  ;;  %5976 = vmatpush.msrb.mxu3 %v8021_v23 }
 0x53c   : > { %v4343_v43 = vmax.f32 %v3802_v1, 0.0  ;;  %v1670_v1 = vld [vmem:[%s8923_s26 + $0x3e8] sm:$0xff] }
 0x53d   : > { %v5792_v48 = vpop.f32.mrf.mxu3 }
 0x53e   : > { %v10074_v49 = vadd.f32 %v5792_v48, %v9845_v0  ;;  %v2852_v0 = vpop.f32.mrf.mxu0  ;;  %4797 = vmatmul.f32.gmra.mxu2 %v4343_v43  ;;  %v4745_v48 = vadd.f32 %v9998_v63, %v4744_v62 }
 0x53f   : > { %v2853_v33 = vadd.f32 %v10058_v28, %v2852_v0  ;;  %7835 = vmatmul.msk.f32.gmra.mxu0 %vm1795_vm1, %v1667_v34 }
 0x540   : > { %v5322_v26 = vmax.f32 %v4745_v48, 0.0 }
 0x541   : > { %v3362_v15 = vmax.f32 %v2853_v33, 0.0  ;;  %v3804_v12 = vpop.f32.mrf.mxu1 }
 0x542   : > { %5892 = vmatmul.f32.gmra.mxu3 %v5318_v4  ;;  %v3805_v57 = vadd.f32 %v9789_v37, %v3804_v12  ;;  %v4750_v9 = vpop.f32.mrf.mxu2  ;;  %v8020_v12 = vld [vmem:[%s12230_s7 + $0x298] sm:$0xff] }
 0x543   : > { %3848 = vmatmul.f32.gmra.mxu1 %v3362_v15  ;;  %5977 = vmatpush.msrb.mxu3 %v8020_v12  ;;  %v1674_v12 = vld [vmem:[%s8923_s26 + $0x408] sm:$0xff] }
 0x544   : > { %v4344_v59 = vmax.f32 %v3805_v57, 0.0 }
 0x545   : > { %v5795_v24 = vpop.f32.mrf.mxu3 }
 0x546   : > { %v10085_v58 = vadd.f32 %v5795_v24, %v9857_v16  ;;  %v2855_v16 = vpop.f32.mrf.mxu0  ;;  %4800 = vmatmul.f32.gmra.mxu2 %v4344_v59  ;;  %v4748_v24 = vadd.f32 %v9998_v63, %v4747_v8  ;;  %v1671_v59 = vld [vmem:[%s8923_s26 + $0x3f0] sm:$0xff] }
 0x547   : > { %v2856_v32 = vadd.f32 %v10058_v28, %v2855_v16  ;;  %7836 = vmatmul.msk.f32.gmra.mxu0 %vm1795_vm1, %v1668_v17  ;;  %v8019_v17 = vld [vmem:[%s12230_s7 + $0x290] sm:$0xff] }
 0x548   : > { %v5323_v43 = vmax.f32 %v4748_v24, 0.0  ;;  %5978 = vmatpush.msrb.mxu3 %v8019_v17  ;;  %v1673_v24 = vld [vmem:[%s8923_s26 + $0x400] sm:$0xff] }
 0x549   : > { %v3363_v60 = vmax.f32 %v2856_v32, 0.0  ;;  %v3807_v29 = vpop.f32.mrf.mxu1 }
 0x54a   : > { %5895 = vmatmul.f32.gmra.mxu3 %v5319_v10  ;;  %v3808_v5 = vadd.f32 %v9789_v37, %v3807_v29  ;;  %v4753_v40 = vpop.f32.mrf.mxu2 }
 0x54b   : > { %3851 = vmatmul.f32.gmra.mxu1 %v3363_v60  ;;  %v4754_v29 = vadd.f32 %v9998_v63, %v4753_v40  ;;  %v10165_v40 = vld [vmem:[%s12227_s4] ss:$0 sm:$0xff] }
 0x54c   : > { %v4345_v14 = vmax.f32 %v3808_v5, 0.0  ;;  %v1672_v5 = vld [vmem:[%s8923_s26 + $0x3f8] sm:$0xff] }
 0x54d   : > { %v5798_v6 = vpop.f32.mrf.mxu3 }
 0x54e   : > { %v10096_v27 = vadd.f32 %v5798_v6, %v9869_v50  ;;  %v2858_v50 = vpop.f32.mrf.mxu0  ;;  %4803 = vmatmul.f32.gmra.mxu2 %v4345_v14  ;;  %v4751_v6 = vadd.f32 %v9998_v63, %v4750_v9  ;;  %v5325_v14 = vmax.f32 %v4754_v29, 0.0  ;;  %v1675_v29 = vld [vmem:[%s8923_s26 + $0x410] sm:$0xff] }
 0x54f   : > { %v2859_v21 = vadd.f32 %v10058_v28, %v2858_v50  ;;  %7837 = vmatmul.msk.f32.gmra.mxu0 %vm1795_vm1, %v1669_v39  ;;  %v8018_v39 = vld [vmem:[%s12230_s7 + $0x288] sm:$0xff] }
 0x550   : > { %v5324_v55 = vmax.f32 %v4751_v6, 0.0  ;;  %5979 = vmatpush.msrb.mxu3 %v8018_v39 }
 0x551   : > { %v3364_v30 = vmax.f32 %v2859_v21, 0.0  ;;  %v3810_v18 = vpop.f32.mrf.mxu1 }
 0x552   : > { %5898 = vmatmul.f32.gmra.mxu3 %v5320_v47  ;;  %v3811_v62 = vadd.f32 %v9789_v37, %v3810_v18  ;;  %v10121_v0 = vpop.f32.mrf.mxu2 }
 0x553   : > { %3854 = vmatmul.f32.gmra.mxu1 %v3364_v30  ;;  %v4757_v18 = vadd.f32 %v9998_v63, %v10121_v0 }
 0x554   : > { %v4346_v33 = vmax.f32 %v3811_v62, 0.0 }
 0x555   : > { %v5801_v41 = vpop.f32.mrf.mxu3  ;;  %v5326_v23 = vmax.f32 %v4757_v18, 0.0 }
 0x556   : > { %v10107_v54 = vadd.f32 %v5801_v41, %v9881_v13  ;;  %v2861_v13 = vpop.f32.mrf.mxu0  ;;  %4806 = vmatmul.f32.gmra.mxu2 %v4346_v33 }
 0x557   : > { %v2862_v51 = vadd.f32 %v10058_v28, %v2861_v13  ;;  %7838 = vmatmul.msk.f32.gmra.mxu0 %vm1795_vm1, %v1670_v1 }
 0x559   : > { %v3365_v45 = vmax.f32 %v2862_v51, 0.0  ;;  %v3813_v15 = vpop.f32.mrf.mxu1 }
 0x55a   : > { %5901 = vmatmul.f32.gmra.mxu3 %v5321_v31  ;;  %v3814_v16 = vadd.f32 %v9789_v37, %v3813_v15  ;;  %v10134_v8 = vpop.f32.mrf.mxu2  ;;  %v7178_v15 = vld [vmem:[%s12236_s13 + $0x60] sm:$0xff] }
 0x55b   : > { %3857 = vmatmul.f32.gmra.mxu1 %v3365_v45  ;;  %7189 = vmatpush.msrb.mxu2 %v7178_v15  ;;  %v1677_v15 = vld [vmem:[%s8923_s26 + $0x420] sm:$0xff] }
 0x55c   : > { %v4347_v32 = vmax.f32 %v3814_v16, 0.0 }
 0x55d   : > { %v5804_v4 = vpop.f32.mrf.mxu3 }
 0x55e   : > { %v10118_v22 = vadd.f32 %v5804_v4, %v9893_v42  ;;  %v2864_v42 = vpop.f32.mrf.mxu0  ;;  %4809 = vmatmul.f32.gmra.mxu2 %v4347_v32  ;;  %v7076_v4 = vld [vmem:[%s12234_s11 + $0x58] sm:$0xff] }
 0x55f   : > { %v2865_v36 = vadd.f32 %v10058_v28, %v2864_v42  ;;  %7839 = vmatmul.msk.f32.gmra.mxu0 %vm1795_vm1, %v1671_v59  ;;  %7089 = vmatpush.msrb.mxu1 %v7076_v4 }
 0x561   : > { %v3366_v19 = vmax.f32 %v2865_v36, 0.0  ;;  %v3816_v57 = vpop.f32.mrf.mxu1 }
 0x562   : > { %5904 = vmatmul.f32.gmra.mxu3 %v5322_v26  ;;  %v3817_v50 = vadd.f32 %v9789_v37, %v3816_v57  ;;  %v10150_v21 = vpop.f32.mrf.mxu2 }
 0x563   : > { %3860 = vmatmul.f32.gmra.mxu1 %v3366_v19  ;;  %v4763_v59 = vadd.f32 %v9998_v63, %v10150_v21 }
 0x564   : > { %v4348_v41 = vmax.f32 %v3817_v50, 0.0 }
 0x565   : > { %v5807_v10 = vpop.f32.mrf.mxu3  ;;  %v5328_v17 = vmax.f32 %v4763_v59, 0.0 }
 0x566   : > { %v10131_v52 = vadd.f32 %v5807_v10, %v9907_v44  ;;  %v6974_v44 = vld [vmem:[%s12232_s9 + $0x50] sm:$0xff]  ;;  %v2867_v34 = vpop.f32.mrf.mxu0  ;;  %4812 = vmatmul.f32.gmra.mxu2 %v4348_v41 }
 0x567   : > { %6989 = vmatpush.msrb.mxu0 %v6974_v44  ;;  %v2868_v47 = vadd.f32 %v10058_v28, %v2867_v34 }
 0x568   : > { %7840 = vmatmul.msk.f32.gmra.mxu0 %vm1795_vm1, %v1672_v5 }
 0x569   : > { %v3367_v38 = vmax.f32 %v2868_v47, 0.0  ;;  %v3819_v37 = vpop.f32.mrf.mxu1 }
 0x56a   : > { %5907 = vmatmul.f32.gmra.mxu3 %v5323_v43  ;;  %v3820_v13 = vadd.f32 %v10165_v40, %v3819_v37  ;;  %v10168_v51 = vpop.f32.mrf.mxu2  ;;  %v4760_v43 = vadd.f32 %v9998_v63, %v10134_v8 }
 0x56b   : > { %3863 = vmatmul.f32.gmra.mxu1 %v3367_v38  ;;  %v4766_v5 = vadd.f32 %v9998_v63, %v10168_v51 }
 0x56c   : > { %v5327_v44 = vmax.f32 %v4760_v43, 0.0 }
 0x56d   : > { %v5810_v60 = vpop.f32.mrf.mxu3  ;;  %v5329_v18 = vmax.f32 %v4766_v5, 0.0 }
 0x56e   : > { %v10147_v9 = vadd.f32 %v5810_v60, %v9921_v61  ;;  %v2870_v61 = vpop.f32.mrf.mxu0 }
 0x56f   : > { %v2871_v31 = vadd.f32 %v10058_v28, %v2870_v61 }
 0x570   : > { %7841 = vmatmul.msk.f32.gmra.mxu0 %vm1795_vm1, %v1673_v24  ;;  %v8046_v24 = vld [vmem:[%s12230_s7 + $0x368] sm:$0xff] }
 0x571   : > { %v3368_v35 = vmax.f32 %v2871_v31, 0.0  ;;  %v3822_v33 = vpop.f32.mrf.mxu1 }
 0x572   : > { %5910 = vmatmul.f32.gmra.mxu3 %v5324_v55  ;;  %v3823_v10 = vadd.f32 %v10165_v40, %v3822_v33  ;;  %v4768_v0 = vpop.f32.mrf.mxu2  ;;  %v8048_v55 = vld [vmem:[%s12230_s7 + $0x378] sm:$0xff] }
 0x573   : > { %3866 = vmatmul.f32.gmra.mxu1 %v3368_v35  ;;  %v4769_v33 = vadd.f32 %v9998_v63, %v4768_v0 }
 0x574   : > { %v4350_v1 = vmax.f32 %v3823_v10, 0.0 }
 0x575   : > { %v5813_v30 = vpop.f32.mrf.mxu3 }
 0x576   : > { %v10160_v48 = vadd.f32 %v5813_v30, %v9938_v3  ;;  %v4349_v3 = vmax.f32 %v3820_v13, 0.0  ;;  %v2873_v26 = vpop.f32.mrf.mxu0 }
 0x577   : > { %v2874_v45 = vadd.f32 %v10058_v28, %v2873_v26 }
 0x578   : > { %4815 = vmatmul.f32.gmra.mxu2 %v4349_v3  ;;  %7842 = vmatmul.msk.f32.gmra.mxu0 %vm1795_vm1, %v1674_v12  ;;  %v1676_v3 = vld [vmem:[%s8923_s26 + $0x418] sm:$0xff] }
 0x579   : > { %v3369_v36 = vmax.f32 %v2874_v45, 0.0  ;;  %v3825_v6 = vpop.f32.mrf.mxu1 }
 0x57a   : > { %5913 = vmatmul.f32.gmra.mxu3 %v5325_v14  ;;  %v3826_v8 = vadd.f32 %v10165_v40, %v3825_v6  ;;  %v4771_v60 = vpop.f32.mrf.mxu2  ;;  %v8047_v14 = vld [vmem:[%s12230_s7 + $0x370] sm:$0xff]  ;;  %v8045_v6 = vld [vmem:[%s12230_s7 + $0x360] sm:$0xff] }
 0x57b   : > { %3869 = vmatmul.f32.gmra.mxu1 %v3369_v36 }
 0x57c   : > { %v4351_v57 = vmax.f32 %v3826_v8, 0.0  ;;  %v1678_v8 = vld [vmem:[%s8923_s26 + $0x428] sm:$0xff] }
 0x57d   : > { %v5816_v62 = vpop.f32.mrf.mxu3 }
 0x57e   : > { %v10182_v42 = vadd.f32 %v5816_v62, %v9953_v20  ;;  %v8017_v20 = vld [vmem:[%s12230_s7 + $0x280] sm:$0xff]  ;;  %v2876_v19 = vpop.f32.mrf.mxu0 }
 0x57f   : > { %5980 = vmatpush.msrb.mxu3 %v8017_v20  ;;  %v2877_v16 = vadd.f32 %v10058_v28, %v2876_v19 }
 0x580   : > { %4818 = vmatmul.f32.gmra.mxu2 %v4350_v1  ;;  %7843 = vmatmul.msk.f32.gmra.mxu0 %vm1795_vm1, %v1675_v29  ;;  %v5330_v1 = vmax.f32 %v4769_v33, 0.0 }
 0x581   : > { %v3370_v47 = vmax.f32 %v2877_v16, 0.0  ;;  %6063 = vmatpush.msra.mxu3 %v8048_v55  ;;  %v3828_v41 = vpop.f32.mrf.mxu1 }
 0x582   : > { %5916 = vmatmul.f32.gmra.mxu3 %v5326_v23  ;;  %v3829_v21 = vadd.f32 %v10165_v40, %v3828_v41  ;;  %v4774_v30 = vpop.f32.mrf.mxu2  ;;  %v8044_v41 = vld [vmem:[%s12230_s7 + $0x358] sm:$0xff] }
 0x583   : > { %3872 = vmatmul.f32.gmra.mxu1 %v3370_v47  ;;  %6064 = vmatpush.msra.mxu3 %v8047_v14 }
 0x584   : > { %v4352_v37 = vmax.f32 %v3829_v21, 0.0  ;;  %v1679_v21 = vld [vmem:[%s8923_s26 + $0x430] sm:$0xff] }
 0x585   : > { %v5819_v32 = vpop.f32.mrf.mxu3  ;;  %6065 = vmatpush.msra.mxu3 %v8046_v24 }
 0x586   : > { %v10197_v34 = vadd.f32 %v5819_v32, %v9971_v53  ;;  %v2879_v53 = vpop.f32.mrf.mxu0  ;;  %v4772_v32 = vadd.f32 %v9998_v63, %v4771_v60 }
 0x587   : > { %v2880_v38 = vadd.f32 %v10058_v28, %v2879_v53  ;;  %6066 = vmatpush.msra.mxu3 %v8045_v6 }
 0x588   : > { %4821 = vmatmul.f32.gmra.mxu2 %v4351_v57  ;;  %7844 = vmatmul.msk.f32.gmra.mxu0 %vm1795_vm1, %v1676_v3  ;;  %v5331_v57 = vmax.f32 %v4772_v32, 0.0 }
 0x589   : > { %v3371_v31 = vmax.f32 %v2880_v38, 0.0  ;;  %v3831_v4 = vpop.f32.mrf.mxu1  ;;  %6067 = vmatpush.msra.mxu3 %v8044_v41 }
 0x58a   : > { %5919 = vmatmul.f32.gmra.mxu3 %v5327_v44  ;;  %v3832_v51 = vadd.f32 %v10165_v40, %v3831_v4  ;;  %v4777_v45 = vpop.f32.mrf.mxu2  ;;  %v8043_v4 = vld [vmem:[%s12230_s7 + $0x350] sm:$0xff] }
 0x58b   : > { %3875 = vmatmul.f32.gmra.mxu1 %v3371_v31  ;;  %6068 = vmatpush.msra.mxu3 %v8043_v4 }
 0x58c   : > { %v4353_v62 = vmax.f32 %v3832_v51, 0.0  ;;  %v1680_v51 = vld [vmem:[%s8923_s26 + $0x438] sm:$0xff] }
 0x58d   : > { %v5822_v50 = vpop.f32.mrf.mxu3 }
 0x58e   : > { %v10209_v61 = vadd.f32 %v5822_v50, %v9989_v11  ;;  %v2882_v11 = vpop.f32.mrf.mxu0  ;;  %v4775_v50 = vadd.f32 %v9998_v63, %v4774_v30 }
 0x58f   : > { %v2883_v35 = vadd.f32 %v10058_v28, %v2882_v11 }
 0x590   : > { %4824 = vmatmul.f32.gmra.mxu2 %v4352_v37  ;;  %7845 = vmatmul.msk.f32.gmra.mxu0 %vm1795_vm1, %v1677_v15  ;;  %v5332_v37 = vmax.f32 %v4775_v50, 0.0 }
 0x591   : > { %v3372_v26 = vmax.f32 %v2883_v35, 0.0  ;;  %v3834_v10 = vpop.f32.mrf.mxu1 }
 0x592   : > { %5922 = vmatmul.f32.gmra.mxu3 %v5328_v17  ;;  %v3835_v0 = vadd.f32 %v10165_v40, %v3834_v10  ;;  %v4780_v19 = vpop.f32.mrf.mxu2  ;;  %v8042_v10 = vld [vmem:[%s12230_s7 + $0x348] sm:$0xff] }
 0x593   : > { %3878 = vmatmul.f32.gmra.mxu1 %v3372_v26  ;;  %6069 = vmatpush.msra.mxu3 %v8042_v10 }
 0x594   : > { %v4354_v16 = vmax.f32 %v3835_v0, 0.0  ;;  %v1681_v0 = vld [vmem:[%s8923_s26 + $0x440] sm:$0xff] }
 0x595   : > { %v5825_v13 = vpop.f32.mrf.mxu3 }
 0x596   : > { %v10221_v39 = vadd.f32 %v5825_v13, %v10009_v25  ;;  %v2885_v25 = vpop.f32.mrf.mxu0  ;;  %v4778_v13 = vadd.f32 %v9998_v63, %v4777_v45 }
 0x597   : > { %v2886_v23 = vadd.f32 %v10058_v28, %v2885_v25 }
 0x598   : > { %4827 = vmatmul.f32.gmra.mxu2 %v4353_v62  ;;  %7846 = vmatmul.msk.f32.gmra.mxu0 %vm1795_vm1, %v1678_v8  ;;  %v5333_v62 = vmax.f32 %v4778_v13, 0.0 }
 0x599   : > { %v3373_v20 = vmax.f32 %v2886_v23, 0.0  ;;  %v3837_v47 = vpop.f32.mrf.mxu1 }
 0x59a   : > { %5925 = vmatmul.f32.gmra.mxu3 %v5329_v18  ;;  %v3838_v60 = vadd.f32 %v10165_v40, %v3837_v47  ;;  %v4783_v53 = vpop.f32.mrf.mxu2  ;;  %v8041_v47 = vld [vmem:[%s12230_s7 + $0x340] sm:$0xff] }
 0x59b   : > { %3881 = vmatmul.f32.gmra.mxu1 %v3373_v20  ;;  %6070 = vmatpush.msra.mxu3 %v8041_v47 }
 0x59c   : > { %v4355_v38 = vmax.f32 %v3838_v60, 0.0  ;;  %v1682_v60 = vld [vmem:[%s8923_s26 + $0x448] sm:$0xff] }
 0x59d   : > { %v5828_v36 = vpop.f32.mrf.mxu3 }
 0x59e   : > { %v10232_v43 = vadd.f32 %v5828_v36, %v10022_v7  ;;  %v2888_v7 = vpop.f32.mrf.mxu0  ;;  %v4781_v36 = vadd.f32 %v9998_v63, %v4780_v19 }
 0x59f   : > { %v2889_v12 = vadd.f32 %v10058_v28, %v2888_v7 }
 0x5a0   : > { %4830 = vmatmul.f32.gmra.mxu2 %v4354_v16  ;;  %7847 = vmatmul.msk.f32.gmra.mxu0 %vm1795_vm1, %v1679_v21  ;;  %v5334_v16 = vmax.f32 %v4781_v36, 0.0 }
 0x5a1   : > { %v3374_v55 = vmax.f32 %v2889_v12, 0.0  ;;  %v3840_v31 = vpop.f32.mrf.mxu1 }
 0x5a2   : > { %5928 = vmatmul.f32.gmra.mxu3 %v5330_v1  ;;  %v3841_v30 = vadd.f32 %v10165_v40, %v3840_v31  ;;  %v4786_v11 = vpop.f32.mrf.mxu2  ;;  %v8040_v31 = vld [vmem:[%s12230_s7 + $0x338] sm:$0xff] }
 0x5a3   : > { %3884 = vmatmul.f32.gmra.mxu1 %v3374_v55  ;;  %6071 = vmatpush.msra.mxu3 %v8040_v31 }
 0x5a4   : > { %v4356_v35 = vmax.f32 %v3841_v30, 0.0  ;;  %v1683_v30 = vld [vmem:[%s8923_s26 + $0x450] sm:$0xff] }
 0x5a5   : > { %v5831_v44 = vpop.f32.mrf.mxu3 }
 0x5a6   : > { %v10243_v59 = vadd.f32 %v5831_v44, %v10035_v56  ;;  %v2891_v56 = vpop.f32.mrf.mxu0  ;;  %v4784_v44 = vadd.f32 %v9998_v63, %v4783_v53 }
 0x5a7   : > { %v2892_v29 = vadd.f32 %v10058_v28, %v2891_v56 }
 0x5a8   : > { %4833 = vmatmul.f32.gmra.mxu2 %v4355_v38  ;;  %7848 = vmatmul.msk.f32.gmra.mxu0 %vm1795_vm1, %v1680_v51  ;;  %v5335_v38 = vmax.f32 %v4784_v44, 0.0 }
 0x5a9   : > { %v3375_v14 = vmax.f32 %v2892_v29, 0.0 }
 0x5aa   : > { %5981 = vmatmul.f32.vlgmr.msrb.gmra.mxu3 %v5331_v57  ;;  %v4789_v25 = vpop.f32.mrf.mxu2 }
 0x5ab   : > { %3887 = vmatmul.f32.gmra.mxu1 %v3375_v14 }
 0x5ad   : > { %v5884_v17 = vpop.f32.mrf.mxu3 }
 0x5ae   : > { %v10254_v5 = vadd.f32 %v5884_v17, %v10047_v46  ;;  %v2894_v46 = vpop.f32.mrf.mxu0  ;;  %v4787_v17 = vadd.f32 %v9998_v63, %v4786_v11 }
 0x5af   : > { %v2895_v3 = vadd.f32 %v10058_v28, %v2894_v46 }
 0x5b0   : > { %4836 = vmatmul.f32.gmra.mxu2 %v4356_v35  ;;  %v3843_v26 = vpop.f32.mrf.mxu1  ;;  %7849 = vmatmul.msk.f32.gmra.mxu0 %vm1795_vm1, %v1681_v0  ;;  %v5336_v35 = vmax.f32 %v4787_v17, 0.0 }
 0x5b1   : > { %v3376_v24 = vmax.f32 %v2895_v3, 0.0  ;;  %v3844_v45 = vadd.f32 %v10165_v40, %v3843_v26  ;;  %v8039_v26 = vld [vmem:[%s12230_s7 + $0x330] sm:$0xff] }
 0x5b2   : > { %5984 = vmatmul.f32.gmra.mxu3 %v5332_v37  ;;  %v4792_v7 = vpop.f32.mrf.mxu2 }
 0x5b3   : > { %v4357_v23 = vmax.f32 %v3844_v45, 0.0  ;;  %3890 = vmatmul.f32.gmra.mxu1 %v3376_v24  ;;  %6072 = vmatpush.msra.mxu3 %v8039_v26  ;;  %v1684_v45 = vld [vmem:[%s8923_s26 + $0x458] sm:$0xff] }
 0x5b5   : > { %v5887_v18 = vpop.f32.mrf.mxu3 }
 0x5b6   : > { %v10265_v33 = vadd.f32 %v5887_v18, %v10063_v2  ;;  %v2897_v2 = vpop.f32.mrf.mxu0  ;;  %v4790_v18 = vadd.f32 %v9998_v63, %v4789_v25 }
 0x5b7   : > { %v2898_v15 = vadd.f32 %v10058_v28, %v2897_v2 }
 0x5b8   : > { %4839 = vmatmul.f32.gmra.mxu2 %v4357_v23  ;;  %v3846_v20 = vpop.f32.mrf.mxu1  ;;  %7850 = vmatmul.msk.f32.gmra.mxu0 %vm1795_vm1, %v1682_v60  ;;  %v5337_v23 = vmax.f32 %v4790_v18, 0.0 }
 0x5b9   : > { %v3377_v6 = vmax.f32 %v2898_v15, 0.0  ;;  %v3847_v19 = vadd.f32 %v10165_v40, %v3846_v20  ;;  %v8038_v20 = vld [vmem:[%s12230_s7 + $0x328] sm:$0xff] }
 0x5ba   : > { %5987 = vmatmul.f32.gmra.mxu3 %v5333_v62  ;;  %v4795_v56 = vpop.f32.mrf.mxu2 }
 0x5bb   : > { %v4358_v12 = vmax.f32 %v3847_v19, 0.0  ;;  %3893 = vmatmul.f32.gmra.mxu1 %v3377_v6  ;;  %6073 = vmatpush.msra.mxu3 %v8038_v20  ;;  %v1685_v19 = vld [vmem:[%s8923_s26 + $0x460] sm:$0xff] }
 0x5bd   : > { %v5890_v1 = vpop.f32.mrf.mxu3 }
 0x5be   : > { %v10276_v32 = vadd.f32 %v5890_v1, %v10074_v49  ;;  %v2900_v49 = vpop.f32.mrf.mxu0  ;;  %v4793_v1 = vadd.f32 %v9998_v63, %v4792_v7 }
 0x5bf   : > { %v2901_v8 = vadd.f32 %v10058_v28, %v2900_v49 }
 0x5c0   : > { %4842 = vmatmul.f32.gmra.mxu2 %v4358_v12  ;;  %v3849_v55 = vpop.f32.mrf.mxu1  ;;  %7851 = vmatmul.msk.f32.gmra.mxu0 %vm1795_vm1, %v1683_v30  ;;  %v5338_v12 = vmax.f32 %v4793_v1, 0.0  ;;  %v8036_v30 = vld [vmem:[%s12230_s7 + $0x318] sm:$0xff] }
 0x5c1   : > { %v3378_v41 = vmax.f32 %v2901_v8, 0.0  ;;  %v3850_v53 = vadd.f32 %v10165_v40, %v3849_v55  ;;  %v8037_v55 = vld [vmem:[%s12230_s7 + $0x320] sm:$0xff] }
 0x5c2   : > { %5990 = vmatmul.f32.gmra.mxu3 %v5334_v16  ;;  %v4798_v46 = vpop.f32.mrf.mxu2  ;;  %v1688_v1 = vld [vmem:[%s8923_s26 + $0x478] sm:$0xff] }
 0x5c3   : > { %v4359_v29 = vmax.f32 %v3850_v53, 0.0  ;;  %3896 = vmatmul.f32.gmra.mxu1 %v3378_v41  ;;  %6074 = vmatpush.msra.mxu3 %v8037_v55  ;;  %v1689_v55 = vld [vmem:[%s8923_s26 + $0x480] sm:$0xff] }
 0x5c5   : > { %v5893_v57 = vpop.f32.mrf.mxu3  ;;  %6075 = vmatpush.msra.mxu3 %v8036_v30 }
 0x5c6   : > { %v10287_v50 = vadd.f32 %v5893_v57, %v10085_v58  ;;  %v2903_v58 = vpop.f32.mrf.mxu0  ;;  %v4796_v57 = vadd.f32 %v9998_v63, %v4795_v56 }
 0x5c7   : > { %v2904_v21 = vadd.f32 %v10058_v28, %v2903_v58 }
 0x5c8   : > { %4845 = vmatmul.f32.gmra.mxu2 %v4359_v29  ;;  %v3852_v14 = vpop.f32.mrf.mxu1  ;;  %7852 = vmatmul.msk.f32.gmra.mxu0 %vm1795_vm1, %v1684_v45  ;;  %v1686_v29 = vld [vmem:[%s8923_s26 + $0x468] sm:$0xff]  ;;  %v5339_v17 = vmax.f32 %v4796_v57, 0.0 }
 0x5c9   : > { %v3379_v4 = vmax.f32 %v2904_v21, 0.0  ;;  %v3853_v11 = vadd.f32 %v10165_v40, %v3852_v14  ;;  %v4799_v14 = vadd.f32 %v9998_v63, %v4798_v46  ;;  %v7075_v46 = vld [vmem:[%s12234_s11 + $0x50] sm:$0xff] }
 0x5ca   : > { %5993 = vmatmul.f32.gmra.mxu3 %v5335_v38  ;;  %v10312_v2 = vpop.f32.mrf.mxu2  ;;  %7090 = vmatpush.msrb.mxu1 %v7075_v46  ;;  %v8035_v45 = vld [vmem:[%s12230_s7 + $0x310] sm:$0xff] }
 0x5cb   : > { %v4360_v3 = vmax.f32 %v3853_v11, 0.0  ;;  %3899 = vmatmul.f32.gmra.mxu1 %v3379_v4  ;;  %v5340_v18 = vmax.f32 %v4799_v14, 0.0  ;;  %6076 = vmatpush.msra.mxu3 %v8035_v45  ;;  %v1690_v14 = vld [vmem:[%s8923_s26 + $0x488] sm:$0xff] }
 0x5cd   : > { %v5896_v37 = vpop.f32.mrf.mxu3 }
 0x5ce   : > { %v10298_v13 = vadd.f32 %v5896_v37, %v10096_v27  ;;  %v2906_v27 = vpop.f32.mrf.mxu0 }
 0x5cf   : > { %v2907_v51 = vadd.f32 %v10058_v28, %v2906_v27 }
 0x5d0   : > { %4848 = vmatmul.f32.gmra.mxu2 %v4360_v3  ;;  %v3855_v24 = vpop.f32.mrf.mxu1  ;;  %7853 = vmatmul.msk.f32.gmra.mxu0 %vm1795_vm1, %v1685_v19  ;;  %v1687_v3 = vld [vmem:[%s8923_s26 + $0x470] sm:$0xff] }
 0x5d1   : > { %v3380_v10 = vmax.f32 %v2907_v51, 0.0  ;;  %v3856_v25 = vadd.f32 %v10165_v40, %v3855_v24 }
 0x5d2   : > { %5996 = vmatmul.f32.gmra.mxu3 %v5336_v35  ;;  %v10325_v7 = vpop.f32.mrf.mxu2 }
 0x5d3   : > { %v4361_v15 = vmax.f32 %v3856_v25, 0.0  ;;  %3902 = vmatmul.f32.gmra.mxu1 %v3380_v10 }
 0x5d5   : > { %v5899_v62 = vpop.f32.mrf.mxu3 }
 0x5d6   : > { %v10309_v36 = vadd.f32 %v5899_v62, %v10107_v54  ;;  %v2909_v54 = vpop.f32.mrf.mxu0 }
 0x5d7   : > { %v2910_v0 = vadd.f32 %v10058_v28, %v2909_v54 }
 0x5d8   : > { %4851 = vmatmul.f32.gmra.mxu2 %v4361_v15  ;;  %v3858_v6 = vpop.f32.mrf.mxu1  ;;  %7854 = vmatmul.msk.f32.gmra.mxu0 %vm1795_vm1, %v1686_v29 }
 0x5d9   : > { %v3381_v47 = vmax.f32 %v2910_v0, 0.0  ;;  %v3859_v49 = vadd.f32 %v10165_v40, %v3858_v6  ;;  %v7177_v6 = vld [vmem:[%s12236_s13 + $0x58] sm:$0xff] }
 0x5da   : > { %5999 = vmatmul.f32.gmra.mxu3 %v5337_v23  ;;  %v10341_v21 = vpop.f32.mrf.mxu2  ;;  %7190 = vmatpush.msrb.mxu2 %v7177_v6  ;;  %v1692_v6 = vld [vmem:[%s8923_s26 + $0x498] sm:$0xff] }
 0x5db   : > { %v4362_v8 = vmax.f32 %v3859_v49, 0.0  ;;  %3905 = vmatmul.f32.gmra.mxu1 %v3381_v47 }
 0x5dd   : > { %v5902_v16 = vpop.f32.mrf.mxu3 }
 0x5de   : > { %v10322_v44 = vadd.f32 %v5902_v16, %v10118_v22  ;;  %v6973_v22 = vld [vmem:[%s12232_s9 + $0x48] sm:$0xff]  ;;  %v2912_v60 = vpop.f32.mrf.mxu0 }
 0x5df   : > { %6990 = vmatpush.msrb.mxu0 %v6973_v22  ;;  %v2913_v38 = vadd.f32 %v10058_v28, %v2912_v60 }
 0x5e0   : > { %4854 = vmatmul.f32.gmra.mxu2 %v4362_v8  ;;  %v3861_v53 = vpop.f32.mrf.mxu1  ;;  %7855 = vmatmul.msk.f32.gmra.mxu0 %vm1795_vm1, %v1687_v3 }
 0x5e1   : > { %v3382_v31 = vmax.f32 %v2913_v38, 0.0  ;;  %v3862_v58 = vadd.f32 %v10165_v40, %v3861_v53 }
 0x5e2   : > { %6002 = vmatmul.f32.gmra.mxu3 %v5338_v12  ;;  %v10354_v63 = vpop.f32.mrf.mxu2 }
 0x5e3   : > { %v4363_v37 = vmax.f32 %v3862_v58, 0.0  ;;  %3908 = vmatmul.f32.gmra.mxu1 %v3382_v31 }
 0x5e5   : > { %v5905_v41 = vpop.f32.mrf.mxu3 }
 0x5e6   : > { %v10338_v56 = vadd.f32 %v5905_v41, %v10131_v52  ;;  %v2915_v52 = vpop.f32.mrf.mxu0 }
 0x5e7   : > { %v2916_v35 = vadd.f32 %v10058_v28, %v2915_v52 }
 0x5e8   : > { %4857 = vmatmul.f32.gmra.mxu2 %v4363_v37  ;;  %v3864_v11 = vpop.f32.mrf.mxu1  ;;  %7856 = vmatmul.msk.f32.gmra.mxu0 %vm1795_vm1, %v1688_v1  ;;  %v10423_v1 = vld [vmem:[%s12225_s2] ss:$0 sm:$0xff] }
 0x5e9   : > { %v3383_v27 = vmax.f32 %v2916_v35, 0.0  ;;  %v3865_v51 = vadd.f32 %v10165_v40, %v3864_v11 }
 0x5ea   : > { %6005 = vmatmul.f32.gmra.mxu3 %v5339_v17  ;;  %v8033_v17 = vld [vmem:[%s12230_s7 + $0x300] sm:$0xff] }
 0x5eb   : > { %v4364_v62 = vmax.f32 %v3865_v51, 0.0  ;;  %3911 = vmatmul.f32.gmra.mxu1 %v3383_v27 }
 0x5ed   : > { %v5908_v4 = vpop.f32.mrf.mxu3 }
 0x5ee   : > { %v10351_v26 = vadd.f32 %v5908_v4, %v10147_v9  ;;  %v10363_v9 = vld [vmem:[%s12229_s6] ss:$0 sm:$0xff]  ;;  %v2918_v23 = vpop.f32.mrf.mxu0 }
 0x5ef   : > { %v4802_v24 = vadd.f32 %v10363_v9, %v10312_v2  ;;  %v2919_v10 = vadd.f32 %v10058_v28, %v2918_v23  ;;  %v4813_v2 = vpop.f32.mrf.mxu2  ;;  %v4805_v12 = vadd.f32 %v10363_v9, %v10325_v7  ;;  %v4808_v29 = vadd.f32 %v10363_v9, %v10341_v21 }
 0x5f0   : > { %4860 = vmatmul.f32.gmra.mxu2 %v4364_v62  ;;  %v3867_v15 = vpop.f32.mrf.mxu1  ;;  %7857 = vmatmul.msk.f32.gmra.mxu0 %vm1795_vm1, %v1689_v55  ;;  %v4811_v3 = vadd.f32 %v10363_v9, %v10354_v63  ;;  %v1691_v62 = vld [vmem:[%s8923_s26 + $0x490] sm:$0xff] }
 0x5f1   : > { %v5341_v20 = vmax.f32 %v4802_v24, 0.0  ;;  %v3384_v0 = vmax.f32 %v2919_v10, 0.0  ;;  %v3868_v16 = vadd.f32 %v10165_v40, %v3867_v15  ;;  %v5342_v22 = vmax.f32 %v4805_v12, 0.0 }
 0x5f2   : > { %6008 = vmatmul.f32.gmra.mxu3 %v5340_v18  ;;  %v5343_v30 = vmax.f32 %v4808_v29, 0.0  ;;  %v8064_v18 = vld [vmem:[%s12230_s7 + $0x3f8] sm:$0xff]  ;;  %v5344_v24 = vmax.f32 %v4811_v3, 0.0  ;;  %v4814_v15 = vadd.f32 %v10363_v9, %v4813_v2 }
 0x5f3   : > { %v4365_v19 = vmax.f32 %v3868_v16, 0.0  ;;  %3914 = vmatmul.f32.gmra.mxu1 %v3384_v0 }
 0x5f5   : > { %v5911_v25 = vpop.f32.mrf.mxu3 }
 0x5f6   : > { %v10373_v54 = vadd.f32 %v5911_v25, %v10160_v48  ;;  %v8034_v48 = vld [vmem:[%s12230_s7 + $0x308] sm:$0xff]  ;;  %v2921_v47 = vpop.f32.mrf.mxu0 }
 0x5f7   : > { %6077 = vmatpush.msra.mxu3 %v8034_v48  ;;  %v2922_v49 = vadd.f32 %v10058_v28, %v2921_v47 }
 0x5f8   : > { %4863 = vmatmul.f32.gmra.mxu2 %v4365_v19  ;;  %v3870_v57 = vpop.f32.mrf.mxu1  ;;  %7858 = vmatmul.msk.f32.gmra.mxu0 %vm1795_vm1, %v1690_v14  ;;  %v5345_v19 = vmax.f32 %v4814_v15, 0.0 }
 0x5f9   : > { %v3385_v38 = vmax.f32 %v2922_v49, 0.0  ;;  %v3871_v7 = vadd.f32 %v10165_v40, %v3870_v57  ;;  %6078 = vmatpush.msra.mxu3 %v8033_v17  ;;  %v8062_v57 = vld [vmem:[%s12230_s7 + $0x3e8] sm:$0xff] }
 0x5fa   : > { %6011 = vmatmul.f32.gmra.mxu3 %v5341_v20 }
 0x5fb   : > { %v4816_v41 = vpop.f32.mrf.mxu2  ;;  %v4366_v53 = vmax.f32 %v3871_v7, 0.0  ;;  %3917 = vmatmul.f32.gmra.mxu1 %v3385_v38  ;;  %6161 = vmatpush.msrb.mxu3 %v8064_v18  ;;  %v1693_v7 = vld [vmem:[%s8923_s26 + $0x4a0] sm:$0xff] }
 0x5fd   : > { %v5914_v8 = vpop.f32.mrf.mxu3 }
 0x5fe   : > { %v10388_v60 = vadd.f32 %v5914_v8, %v10182_v42  ;;  %v2924_v42 = vpop.f32.mrf.mxu0  ;;  %v4817_v8 = vadd.f32 %v10363_v9, %v4816_v41 }
 0x5ff   : > { %v2925_v31 = vadd.f32 %v10058_v28, %v2924_v42 }
 0x600   : > { %4866 = vmatmul.f32.gmra.mxu2 %v4366_v53  ;;  %v3873_v37 = vpop.f32.mrf.mxu1  ;;  %7859 = vmatmul.msk.f32.gmra.mxu0 %vm1795_vm1, %v1691_v62  ;;  %v5346_v53 = vmax.f32 %v4817_v8, 0.0 }
 0x601   : > { %v3386_v35 = vmax.f32 %v2925_v31, 0.0  ;;  %v3874_v21 = vadd.f32 %v10165_v40, %v3873_v37  ;;  %v8061_v37 = vld [vmem:[%s12230_s7 + $0x3e0] sm:$0xff] }
 0x602   : > { %6014 = vmatmul.f32.gmra.mxu3 %v5342_v22 }
 0x603   : > { %v4819_v4 = vpop.f32.mrf.mxu2  ;;  %v4367_v11 = vmax.f32 %v3874_v21, 0.0  ;;  %3920 = vmatmul.f32.gmra.mxu1 %v3386_v35  ;;  %v1694_v21 = vld [vmem:[%s8923_s26 + $0x4a8] sm:$0xff] }
 0x605   : > { %v5917_v58 = vpop.f32.mrf.mxu3 }
 0x606   : > { %v10400_v52 = vadd.f32 %v5917_v58, %v10197_v34  ;;  %v2927_v34 = vpop.f32.mrf.mxu0  ;;  %v4820_v58 = vadd.f32 %v10363_v9, %v4819_v4 }
 0x607   : > { %v2928_v27 = vadd.f32 %v10058_v28, %v2927_v34  ;;  %v8063_v28 = vld [vmem:[%s12230_s7 + $0x3f0] sm:$0xff] }
 0x608   : > { %4869 = vmatmul.f32.gmra.mxu2 %v4367_v11  ;;  %v3876_v46 = vpop.f32.mrf.mxu1  ;;  %6162 = vmatpush.msrb.mxu3 %v8063_v28  ;;  %v5347_v11 = vmax.f32 %v4820_v58, 0.0 }
 0x609   : > { %v3387_v23 = vmax.f32 %v2928_v27, 0.0  ;;  %v3877_v63 = vadd.f32 %v10165_v40, %v3876_v46  ;;  %7860 = vmatmul.msk.f32.gmra.mxu0 %vm1795_vm1, %v1692_v6  ;;  %v8060_v46 = vld [vmem:[%s12230_s7 + $0x3d8] sm:$0xff] }
 0x60a   : > { %6017 = vmatmul.f32.gmra.mxu3 %v5343_v30 }
 0x60b   : > { %v4822_v10 = vpop.f32.mrf.mxu2  ;;  %v4368_v25 = vmax.f32 %v3877_v63, 0.0  ;;  %3923 = vmatmul.f32.gmra.mxu1 %v3387_v23  ;;  %6163 = vmatpush.msrb.mxu3 %v8062_v57  ;;  %v1695_v63 = vld [vmem:[%s8923_s26 + $0x4b0] sm:$0xff] }
 0x60d   : > { %v5920_v51 = vpop.f32.mrf.mxu3  ;;  %6164 = vmatpush.msrb.mxu3 %v8061_v37 }
 0x60e   : > { %v10412_v45 = vadd.f32 %v5920_v51, %v10209_v61  ;;  %v2930_v61 = vpop.f32.mrf.mxu0  ;;  %v4823_v51 = vadd.f32 %v10363_v9, %v4822_v10 }
 0x60f   : > { %v2931_v20 = vadd.f32 %v10423_v1, %v2930_v61  ;;  %6165 = vmatpush.msrb.mxu3 %v8060_v46 }
 0x610   : > { %4872 = vmatmul.f32.gmra.mxu2 %v4368_v25  ;;  %v3879_v16 = vpop.f32.mrf.mxu1  ;;  %v5348_v25 = vmax.f32 %v4823_v51, 0.0 }
 0x611   : > { %v3388_v12 = vmax.f32 %v2931_v20, 0.0  ;;  %v3880_v48 = vadd.f32 %v10165_v40, %v3879_v16  ;;  %7861 = vmatmul.msk.f32.gmra.mxu0 %vm1795_vm1, %v1693_v7  ;;  %v8059_v16 = vld [vmem:[%s12230_s7 + $0x3d0] sm:$0xff] }
 0x612   : > { %6020 = vmatmul.f32.gmra.mxu3 %v5344_v24 }
 0x613   : > { %v4825_v47 = vpop.f32.mrf.mxu2  ;;  %v4369_v49 = vmax.f32 %v3880_v48, 0.0  ;;  %3926 = vmatmul.f32.gmra.mxu1 %v3388_v12  ;;  %6166 = vmatpush.msrb.mxu3 %v8059_v16  ;;  %v1696_v48 = vld [vmem:[%s8923_s26 + $0x4b8] sm:$0xff] }
 0x615   : > { %v5923_v0 = vpop.f32.mrf.mxu3 }
 0x616   : > { %v10428_v2 = vadd.f32 %v5923_v0, %v10221_v39  ;;  %v2933_v39 = vpop.f32.mrf.mxu0  ;;  %v4826_v0 = vadd.f32 %v10363_v9, %v4825_v47 }
 0x617   : > { %v2934_v55 = vadd.f32 %v10423_v1, %v2933_v39 }
 0x618   : > { %4875 = vmatmul.f32.gmra.mxu2 %v4369_v49  ;;  %v3882_v38 = vpop.f32.mrf.mxu1  ;;  %v5349_v49 = vmax.f32 %v4826_v0, 0.0 }
 0x619   : > { %v3389_v17 = vmax.f32 %v2934_v55, 0.0  ;;  %v3883_v41 = vadd.f32 %v10165_v40, %v3882_v38  ;;  %7862 = vmatmul.msk.f32.gmra.mxu0 %vm1795_vm1, %v1694_v21  ;;  %v8058_v38 = vld [vmem:[%s12230_s7 + $0x3c8] sm:$0xff] }
 0x61a   : > { %6023 = vmatmul.f32.gmra.mxu3 %v5345_v19 }
 0x61b   : > { %v4828_v42 = vpop.f32.mrf.mxu2  ;;  %v4370_v31 = vmax.f32 %v3883_v41, 0.0  ;;  %3929 = vmatmul.f32.gmra.mxu1 %v3389_v17  ;;  %6167 = vmatpush.msrb.mxu3 %v8058_v38  ;;  %v1697_v41 = vld [vmem:[%s8923_s26 + $0x4c0] sm:$0xff] }
 0x61d   : > { %v5926_v22 = vpop.f32.mrf.mxu3 }
 0x61e   : > { %v10439_v29 = vadd.f32 %v5926_v22, %v10232_v43  ;;  %v2936_v43 = vpop.f32.mrf.mxu0  ;;  %v4829_v22 = vadd.f32 %v10363_v9, %v4828_v42 }
 0x61f   : > { %v2937_v14 = vadd.f32 %v10423_v1, %v2936_v43 }
 0x620   : > { %4878 = vmatmul.f32.gmra.mxu2 %v4370_v31  ;;  %v3885_v35 = vpop.f32.mrf.mxu1  ;;  %v5350_v31 = vmax.f32 %v4829_v22, 0.0 }
 0x621   : > { %v3390_v18 = vmax.f32 %v2937_v14, 0.0  ;;  %v3886_v4 = vadd.f32 %v10165_v40, %v3885_v35  ;;  %7863 = vmatmul.msk.f32.gmra.mxu0 %vm1795_vm1, %v1695_v63  ;;  %v8057_v35 = vld [vmem:[%s12230_s7 + $0x3c0] sm:$0xff] }
 0x622   : > { %6026 = vmatmul.f32.gmra.mxu3 %v5346_v53 }
 0x623   : > { %v4831_v34 = vpop.f32.mrf.mxu2  ;;  %v4371_v27 = vmax.f32 %v3886_v4, 0.0  ;;  %3932 = vmatmul.f32.gmra.mxu1 %v3390_v18  ;;  %6168 = vmatpush.msrb.mxu3 %v8057_v35  ;;  %v1698_v4 = vld [vmem:[%s8923_s26 + $0x4c8] sm:$0xff] }
 0x625   : > { %v5929_v30 = vpop.f32.mrf.mxu3 }
 0x626   : > { %v10450_v3 = vadd.f32 %v5929_v30, %v10243_v59  ;;  %v2939_v59 = vpop.f32.mrf.mxu0  ;;  %v4832_v30 = vadd.f32 %v10363_v9, %v4831_v34 }
 0x627   : > { %v2940_v62 = vadd.f32 %v10423_v1, %v2939_v59 }
 0x628   : > { %4881 = vmatmul.f32.gmra.mxu2 %v4371_v27  ;;  %v3888_v23 = vpop.f32.mrf.mxu1  ;;  %v5351_v27 = vmax.f32 %v4832_v30, 0.0 }
 0x629   : > { %v3391_v28 = vmax.f32 %v2940_v62, 0.0  ;;  %v3889_v10 = vadd.f32 %v10165_v40, %v3888_v23  ;;  %7864 = vmatmul.msk.f32.gmra.mxu0 %vm1795_vm1, %v1696_v48  ;;  %v8056_v23 = vld [vmem:[%s12230_s7 + $0x3b8] sm:$0xff] }
 0x62a   : > { %6079 = vmatmul.f32.vlgmr.msra.gmra.mxu3 %v5347_v11 }
 0x62b   : > { %v4834_v61 = vpop.f32.mrf.mxu2  ;;  %v4372_v20 = vmax.f32 %v3889_v10, 0.0  ;;  %3935 = vmatmul.f32.gmra.mxu1 %v3391_v28  ;;  %6169 = vmatpush.msrb.mxu3 %v8056_v23  ;;  %v1699_v10 = vld [vmem:[%s8923_s26 + $0x4d0] sm:$0xff] }
 0x62d   : > { %v5982_v24 = vpop.f32.mrf.mxu3 }
 0x62e   : > { %v10461_v15 = vadd.f32 %v5982_v24, %v10254_v5  ;;  %v2942_v5 = vpop.f32.mrf.mxu0  ;;  %v4835_v24 = vadd.f32 %v10363_v9, %v4834_v61 }
 0x62f   : > { %v2943_v6 = vadd.f32 %v10423_v1, %v2942_v5 }
 0x630   : > { %4884 = vmatmul.f32.gmra.mxu2 %v4372_v20  ;;  %v3891_v12 = vpop.f32.mrf.mxu1  ;;  %v5352_v20 = vmax.f32 %v4835_v24, 0.0 }
 0x631   : > { %v3392_v57 = vmax.f32 %v2943_v6, 0.0  ;;  %v3892_v47 = vadd.f32 %v10165_v40, %v3891_v12  ;;  %7865 = vmatmul.msk.f32.gmra.mxu0 %vm1795_vm1, %v1697_v41  ;;  %v8055_v12 = vld [vmem:[%s12230_s7 + $0x3b0] sm:$0xff] }
 0x632   : > { %6082 = vmatmul.f32.gmra.mxu3 %v5348_v25 }
 0x633   : > { %v4837_v39 = vpop.f32.mrf.mxu2  ;;  %v4373_v55 = vmax.f32 %v3892_v47, 0.0  ;;  %3938 = vmatmul.f32.gmra.mxu1 %v3392_v57  ;;  %6170 = vmatpush.msrb.mxu3 %v8055_v12  ;;  %v1700_v57 = vld [vmem:[%s8923_s26 + $0x4d8] sm:$0xff] }
 0x635   : > { %v5985_v19 = vpop.f32.mrf.mxu3 }
 0x636   : > { %v10472_v8 = vadd.f32 %v5985_v19, %v10265_v33  ;;  %v2945_v33 = vpop.f32.mrf.mxu0  ;;  %v4838_v19 = vadd.f32 %v10363_v9, %v4837_v39  ;;  %v10523_v39 = vld [vmem:[%s12227_s4] ss:$0 sm:$0xff] }
 0x637   : > { %v2946_v7 = vadd.f32 %v10423_v1, %v2945_v33 }
 0x638   : > { %4887 = vmatmul.f32.gmra.mxu2 %v4373_v55  ;;  %v3894_v17 = vpop.f32.mrf.mxu1  ;;  %v5353_v47 = vmax.f32 %v4838_v19, 0.0  ;;  %v1703_v19 = vld [vmem:[%s8923_s26 + $0x4f0] sm:$0xff] }
 0x639   : > { %v3393_v37 = vmax.f32 %v2946_v7, 0.0  ;;  %v3895_v42 = vadd.f32 %v10165_v40, %v3894_v17  ;;  %7866 = vmatmul.msk.f32.gmra.mxu0 %vm1795_vm1, %v1698_v4  ;;  %v6972_v17 = vld [vmem:[%s12232_s9 + $0x40] sm:$0xff] }
 0x63a   : > { %6085 = vmatmul.f32.gmra.mxu3 %v5349_v49  ;;  %6991 = vmatpush.msrb.mxu0 %v6972_v17  ;;  %v8053_v4 = vld [vmem:[%s12230_s7 + $0x3a0] sm:$0xff] }
 0x63b   : > { %v4840_v43 = vpop.f32.mrf.mxu2  ;;  %v4374_v14 = vmax.f32 %v3895_v42, 0.0  ;;  %3941 = vmatmul.f32.gmra.mxu1 %v3393_v37 }
 0x63d   : > { %v5988_v53 = vpop.f32.mrf.mxu3 }
 0x63e   : > { %v10483_v58 = vadd.f32 %v5988_v53, %v10276_v32  ;;  %v2948_v32 = vpop.f32.mrf.mxu0  ;;  %v4841_v53 = vadd.f32 %v10363_v9, %v4840_v43 }
 0x63f   : > { %v2949_v21 = vadd.f32 %v10423_v1, %v2948_v32 }
 0x640   : > { %4890 = vmatmul.f32.gmra.mxu2 %v4374_v14  ;;  %v3897_v18 = vpop.f32.mrf.mxu1  ;;  %v1701_v14 = vld [vmem:[%s8923_s26 + $0x4e0] sm:$0xff]  ;;  %v5354_v30 = vmax.f32 %v4841_v53, 0.0 }
 0x641   : > { %v3394_v46 = vmax.f32 %v2949_v21, 0.0  ;;  %v3898_v34 = vadd.f32 %v10165_v40, %v3897_v18  ;;  %7867 = vmatmul.msk.f32.gmra.mxu0 %vm1795_vm1, %v1699_v10  ;;  %v8052_v10 = vld [vmem:[%s12230_s7 + $0x398] sm:$0xff] }
 0x642   : > { %6088 = vmatmul.f32.gmra.mxu3 %v5350_v31 }
 0x643   : > { %v4843_v59 = vpop.f32.mrf.mxu2  ;;  %v4375_v62 = vmax.f32 %v3898_v34, 0.0  ;;  %3944 = vmatmul.f32.gmra.mxu1 %v3394_v46 }
 0x644   : > { %v4844_v18 = vadd.f32 %v10363_v9, %v4843_v59 }
 0x645   : > { %v5991_v11 = vpop.f32.mrf.mxu3 }
 0x646   : > { %v10494_v51 = vadd.f32 %v5991_v11, %v10287_v50  ;;  %v2951_v50 = vpop.f32.mrf.mxu0  ;;  %v5355_v24 = vmax.f32 %v4844_v18, 0.0  ;;  %v1705_v18 = vld [vmem:[%s8923_s26 + $0x500] sm:$0xff] }
 0x647   : > { %v2952_v63 = vadd.f32 %v10423_v1, %v2951_v50 }
 0x648   : > { %4893 = vmatmul.f32.gmra.mxu2 %v4375_v62  ;;  %v3900_v28 = vpop.f32.mrf.mxu1  ;;  %v1702_v62 = vld [vmem:[%s8923_s26 + $0x4e8] sm:$0xff] }
 0x649   : > { %v3395_v16 = vmax.f32 %v2952_v63, 0.0  ;;  %v3901_v61 = vadd.f32 %v10165_v40, %v3900_v28  ;;  %7868 = vmatmul.msk.f32.gmra.mxu0 %vm1795_vm1, %v1700_v57 }
 0x64a   : > { %6091 = vmatmul.f32.gmra.mxu3 %v5351_v27 }
 0x64b   : > { %v10508_v5 = vpop.f32.mrf.mxu2  ;;  %v4376_v6 = vmax.f32 %v3901_v61, 0.0  ;;  %3947 = vmatmul.f32.gmra.mxu1 %v3395_v16 }
 0x64d   : > { %v5994_v25 = vpop.f32.mrf.mxu3 }
 0x64e   : > { %v10505_v0 = vadd.f32 %v5994_v25, %v10298_v13  ;;  %v2954_v13 = vpop.f32.mrf.mxu0  ;;  %v7074_v25 = vld [vmem:[%s12234_s11 + $0x48] sm:$0xff] }
 0x64f   : > { %v2955_v48 = vadd.f32 %v10423_v1, %v2954_v13  ;;  %7091 = vmatpush.msrb.mxu1 %v7074_v25 }
 0x650   : > { %4896 = vmatmul.f32.gmra.mxu2 %v4376_v6  ;;  %v3903_v40 = vpop.f32.mrf.mxu1 }
 0x651   : > { %v3396_v22 = vmax.f32 %v2955_v48, 0.0  ;;  %v3904_v38 = vadd.f32 %v10523_v39, %v3903_v40  ;;  %7869 = vmatmul.msk.f32.gmra.mxu0 %vm1795_vm1, %v1701_v14  ;;  %v7176_v40 = vld [vmem:[%s12236_s13 + $0x50] sm:$0xff] }
 0x652   : > { %6094 = vmatmul.f32.gmra.mxu3 %v5352_v20  ;;  %7191 = vmatpush.msrb.mxu2 %v7176_v40  ;;  %v1707_v40 = vld [vmem:[%s8923_s26 + $0x510] sm:$0xff] }
 0x653   : > { %v10526_v33 = vpop.f32.mrf.mxu2  ;;  %v4377_v7 = vmax.f32 %v3904_v38, 0.0  ;;  %3950 = vmatmul.f32.gmra.mxu1 %v3396_v22 }
 0x655   : > { %v5997_v49 = vpop.f32.mrf.mxu3 }
 0x656   : > { %v10518_v55 = vadd.f32 %v5997_v49, %v10309_v36  ;;  %v8054_v36 = vld [vmem:[%s12230_s7 + $0x3a8] sm:$0xff]  ;;  %v2957_v41 = vpop.f32.mrf.mxu0 }
 0x657   : > { %6171 = vmatpush.msrb.mxu3 %v8054_v36  ;;  %v2958_v31 = vadd.f32 %v10423_v1, %v2957_v41  ;;  %v1704_v36 = vld [vmem:[%s8923_s26 + $0x4f8] sm:$0xff] }
 0x658   : > { %4899 = vmatmul.f32.gmra.mxu2 %v4377_v7  ;;  %v3906_v42 = vpop.f32.mrf.mxu1 }
 0x659   : > { %v3397_v35 = vmax.f32 %v2958_v31, 0.0  ;;  %v3907_v32 = vadd.f32 %v10523_v39, %v3906_v42  ;;  %6172 = vmatpush.msrb.mxu3 %v8053_v4  ;;  %7870 = vmatmul.msk.f32.gmra.mxu0 %vm1795_vm1, %v1702_v62 }
 0x65a   : > { %6097 = vmatmul.f32.gmra.mxu3 %v5353_v47  ;;  %v4850_v47 = vadd.f32 %v10363_v9, %v10526_v33 }
 0x65b   : > { %v10542_v21 = vpop.f32.mrf.mxu2  ;;  %v4378_v11 = vmax.f32 %v3907_v32, 0.0  ;;  %3953 = vmatmul.f32.gmra.mxu1 %v3397_v35  ;;  %6173 = vmatpush.msrb.mxu3 %v8052_v10 }
 0x65c   : > { %v5357_v17 = vmax.f32 %v4850_v47, 0.0  ;;  %v4853_v14 = vadd.f32 %v10363_v9, %v10542_v21 }
 0x65d   : > { %v6000_v37 = vpop.f32.mrf.mxu3 }
 0x65e   : > { %v10539_v43 = vadd.f32 %v6000_v37, %v10322_v44  ;;  %v2960_v44 = vpop.f32.mrf.mxu0  ;;  %v5358_v4 = vmax.f32 %v4853_v14, 0.0 }
 0x65f   : > { %v2961_v27 = vadd.f32 %v10423_v1, %v2960_v44 }
 0x660   : > { %4902 = vmatmul.f32.gmra.mxu2 %v4378_v11  ;;  %v3909_v34 = vpop.f32.mrf.mxu1 }
 0x661   : > { %v3398_v50 = vmax.f32 %v2961_v27, 0.0  ;;  %v3910_v63 = vadd.f32 %v10523_v39, %v3909_v34  ;;  %7871 = vmatmul.msk.f32.gmra.mxu0 %vm1795_vm1, %v1703_v19  ;;  %v8080_v19 = vld [vmem:[%s12230_s7 + $0x478] sm:$0xff] }
 0x662   : > { %6100 = vmatmul.f32.gmra.mxu3 %v5354_v30  ;;  %v8050_v30 = vld [vmem:[%s12230_s7 + $0x388] sm:$0xff] }
 0x663   : > { %v10555_v59 = vpop.f32.mrf.mxu2  ;;  %v4379_v28 = vmax.f32 %v3910_v63, 0.0  ;;  %3956 = vmatmul.f32.gmra.mxu1 %v3398_v50 }
 0x664   : > { %v4856_v62 = vadd.f32 %v10363_v9, %v10555_v59 }
 0x665   : > { %v6003_v46 = vpop.f32.mrf.mxu3 }
 0x666   : > { %v10552_v23 = vadd.f32 %v6003_v46, %v10338_v56  ;;  %v4847_v56 = vadd.f32 %v10363_v9, %v10508_v5  ;;  %v2963_v20 = vpop.f32.mrf.mxu0 }
 0x667   : > { %v2964_v16 = vadd.f32 %v10423_v1, %v2963_v20 }
 0x668   : > { %4905 = vmatmul.f32.gmra.mxu2 %v4379_v28  ;;  %v3912_v6 = vpop.f32.mrf.mxu1  ;;  %v5356_v12 = vmax.f32 %v4847_v56, 0.0  ;;  %v1706_v28 = vld [vmem:[%s8923_s26 + $0x508] sm:$0xff]  ;;  %v5359_v56 = vmax.f32 %v4856_v62, 0.0 }
 0x669   : > { %v3399_v48 = vmax.f32 %v2964_v16, 0.0  ;;  %v3913_v49 = vadd.f32 %v10523_v39, %v3912_v6  ;;  %7872 = vmatmul.msk.f32.gmra.mxu0 %vm1795_vm1, %v1704_v36 }
 0x66a   : > { %6103 = vmatmul.f32.gmra.mxu3 %v5355_v24  ;;  %v8049_v24 = vld [vmem:[%s12230_s7 + $0x380] sm:$0xff] }
 0x66b   : > { %v4858_v5 = vpop.f32.mrf.mxu2  ;;  %v4380_v57 = vmax.f32 %v3913_v49, 0.0  ;;  %3959 = vmatmul.f32.gmra.mxu1 %v3399_v48 }
 0x66c   : > { %v4859_v6 = vadd.f32 %v10363_v9, %v4858_v5 }
 0x66d   : > { %v6006_v61 = vpop.f32.mrf.mxu3 }
 0x66e   : > { %v10569_v13 = vadd.f32 %v6006_v61, %v10351_v26  ;;  %v8051_v26 = vld [vmem:[%s12230_s7 + $0x390] sm:$0xff]  ;;  %v2966_v22 = vpop.f32.mrf.mxu0 }
 0x66f   : > { %6174 = vmatpush.msrb.mxu3 %v8051_v26  ;;  %v2967_v38 = vadd.f32 %v10423_v1, %v2966_v22 }
 0x670   : > { %4908 = vmatmul.f32.gmra.mxu2 %v4380_v57  ;;  %v3915_v53 = vpop.f32.mrf.mxu1  ;;  %v5360_v57 = vmax.f32 %v4859_v6, 0.0 }
 0x671   : > { %v3400_v31 = vmax.f32 %v2967_v38, 0.0  ;;  %v3916_v33 = vadd.f32 %v10523_v39, %v3915_v53  ;;  %6175 = vmatpush.msrb.mxu3 %v8050_v30  ;;  %7873 = vmatmul.msk.f32.gmra.mxu0 %vm1795_vm1, %v1705_v18  ;;  %v8079_v53 = vld [vmem:[%s12230_s7 + $0x470] sm:$0xff] }
 0x672   : > { %6106 = vmatmul.f32.gmra.mxu3 %v5356_v12 }
 0x673   : > { %v4861_v37 = vpop.f32.mrf.mxu2  ;;  %v4381_v42 = vmax.f32 %v3916_v33, 0.0  ;;  %3962 = vmatmul.f32.gmra.mxu1 %v3400_v31  ;;  %6176 = vmatpush.msrb.mxu3 %v8049_v24  ;;  %v1708_v33 = vld [vmem:[%s8923_s26 + $0x518] sm:$0xff] }
 0x675   : > { %v6009_v7 = vpop.f32.mrf.mxu3  ;;  %6259 = vmatpush.msra.mxu3 %v8080_v19 }
 0x676   : > { %v10584_v41 = vadd.f32 %v6009_v7, %v10373_v54  ;;  %v2969_v54 = vpop.f32.mrf.mxu0  ;;  %v4862_v7 = vadd.f32 %v10363_v9, %v4861_v37 }
 0x677   : > { %v2970_v35 = vadd.f32 %v10423_v1, %v2969_v54  ;;  %6260 = vmatpush.msra.mxu3 %v8079_v53 }
 0x678   : > { %4911 = vmatmul.f32.gmra.mxu2 %v4381_v42  ;;  %v3918_v11 = vpop.f32.mrf.mxu1  ;;  %v5361_v42 = vmax.f32 %v4862_v7, 0.0 }
 0x679   : > { %v3401_v27 = vmax.f32 %v2970_v35, 0.0  ;;  %v3919_v21 = vadd.f32 %v10523_v39, %v3918_v11  ;;  %7874 = vmatmul.msk.f32.gmra.mxu0 %vm1795_vm1, %v1706_v28  ;;  %v8078_v11 = vld [vmem:[%s12230_s7 + $0x468] sm:$0xff] }
 0x67a   : > { %6109 = vmatmul.f32.gmra.mxu3 %v5357_v17 }
 0x67b   : > { %v4864_v46 = vpop.f32.mrf.mxu2  ;;  %v4382_v34 = vmax.f32 %v3919_v21, 0.0  ;;  %3965 = vmatmul.f32.gmra.mxu1 %v3401_v27  ;;  %6261 = vmatpush.msra.mxu3 %v8078_v11  ;;  %v1709_v21 = vld [vmem:[%s8923_s26 + $0x520] sm:$0xff] }
 0x67d   : > { %v6012_v32 = vpop.f32.mrf.mxu3 }
 0x67e   : > { %v10596_v44 = vadd.f32 %v6012_v32, %v10388_v60  ;;  %v2972_v60 = vpop.f32.mrf.mxu0  ;;  %v4865_v32 = vadd.f32 %v10363_v9, %v4864_v46 }
 0x67f   : > { %v2973_v50 = vadd.f32 %v10423_v1, %v2972_v60 }
 0x680   : > { %4914 = vmatmul.f32.gmra.mxu2 %v4382_v34  ;;  %v3921_v25 = vpop.f32.mrf.mxu1  ;;  %v5362_v34 = vmax.f32 %v4865_v32, 0.0 }
 0x681   : > { %v3402_v20 = vmax.f32 %v2973_v50, 0.0  ;;  %v3922_v59 = vadd.f32 %v10523_v39, %v3921_v25  ;;  %7875 = vmatmul.msk.f32.gmra.mxu0 %vm1795_vm1, %v1707_v40  ;;  %v8077_v25 = vld [vmem:[%s12230_s7 + $0x460] sm:$0xff] }
 0x682   : > { %6112 = vmatmul.f32.gmra.mxu3 %v5358_v4 }
 0x683   : > { %v4867_v16 = vpop.f32.mrf.mxu2  ;;  %v4383_v61 = vmax.f32 %v3922_v59, 0.0  ;;  %3968 = vmatmul.f32.gmra.mxu1 %v3402_v20  ;;  %6262 = vmatpush.msra.mxu3 %v8077_v25  ;;  %v1710_v59 = vld [vmem:[%s8923_s26 + $0x528] sm:$0xff] }
 0x685   : > { %v6015_v63 = vpop.f32.mrf.mxu3 }
 0x686   : > { %v10608_v10 = vadd.f32 %v6015_v63, %v10400_v52  ;;  %v2975_v52 = vpop.f32.mrf.mxu0  ;;  %v4868_v63 = vadd.f32 %v10363_v9, %v4867_v16 }
 0x687   : > { %v2976_v12 = vadd.f32 %v10423_v1, %v2975_v52 }
 0x688   : > { %4917 = vmatmul.f32.gmra.mxu2 %v4383_v61  ;;  %v3924_v49 = vpop.f32.mrf.mxu1  ;;  %v5363_v61 = vmax.f32 %v4868_v63, 0.0 }
 0x689   : > { %v3403_v26 = vmax.f32 %v2976_v12, 0.0  ;;  %v3925_v5 = vadd.f32 %v10523_v39, %v3924_v49  ;;  %7876 = vmatmul.msk.f32.gmra.mxu0 %vm1795_vm1, %v1708_v33  ;;  %v8076_v49 = vld [vmem:[%s12230_s7 + $0x458] sm:$0xff] }
 0x68a   : > { %6115 = vmatmul.f32.gmra.mxu3 %v5359_v56 }
 0x68b   : > { %v4870_v22 = vpop.f32.mrf.mxu2  ;;  %v4384_v38 = vmax.f32 %v3925_v5, 0.0  ;;  %3971 = vmatmul.f32.gmra.mxu1 %v3403_v26  ;;  %6263 = vmatpush.msra.mxu3 %v8076_v49  ;;  %v1711_v5 = vld [vmem:[%s8923_s26 + $0x530] sm:$0xff] }
 0x68d   : > { %v6018_v48 = vpop.f32.mrf.mxu3 }
 0x68e   : > { %v10619_v47 = vadd.f32 %v6018_v48, %v10412_v45  ;;  %v2978_v45 = vpop.f32.mrf.mxu0  ;;  %v4871_v48 = vadd.f32 %v10363_v9, %v4870_v22 }
 0x68f   : > { %v2979_v36 = vadd.f32 %v10423_v1, %v2978_v45 }
 0x690   : > { %4920 = vmatmul.f32.gmra.mxu2 %v4384_v38  ;;  %v3927_v31 = vpop.f32.mrf.mxu1  ;;  %v5364_v38 = vmax.f32 %v4871_v48, 0.0 }
 0x691   : > { %v3404_v30 = vmax.f32 %v2979_v36, 0.0  ;;  %v3928_v37 = vadd.f32 %v10523_v39, %v3927_v31  ;;  %7877 = vmatmul.msk.f32.gmra.mxu0 %vm1795_vm1, %v1709_v21  ;;  %v8075_v31 = vld [vmem:[%s12230_s7 + $0x450] sm:$0xff] }
 0x692   : > { %6118 = vmatmul.f32.gmra.mxu3 %v5360_v57 }
 0x693   : > { %v4873_v54 = vpop.f32.mrf.mxu2  ;;  %v4385_v35 = vmax.f32 %v3928_v37, 0.0  ;;  %3974 = vmatmul.f32.gmra.mxu1 %v3404_v30  ;;  %6264 = vmatpush.msra.mxu3 %v8075_v31  ;;  %v1712_v37 = vld [vmem:[%s8923_s26 + $0x538] sm:$0xff] }
 0x695   : > { %v6021_v17 = vpop.f32.mrf.mxu3 }
 0x696   : > { %v10630_v14 = vadd.f32 %v6021_v17, %v10428_v2  ;;  %v2981_v2 = vpop.f32.mrf.mxu0  ;;  %v4874_v17 = vadd.f32 %v10363_v9, %v4873_v54 }
 0x697   : > { %v2982_v18 = vadd.f32 %v10423_v1, %v2981_v2 }
 0x698   : > { %4923 = vmatmul.f32.gmra.mxu2 %v4385_v35  ;;  %v3930_v27 = vpop.f32.mrf.mxu1  ;;  %v5365_v35 = vmax.f32 %v4874_v17, 0.0 }
 0x699   : > { %v3405_v24 = vmax.f32 %v2982_v18, 0.0  ;;  %v3931_v46 = vadd.f32 %v10523_v39, %v3930_v27  ;;  %7878 = vmatmul.msk.f32.gmra.mxu0 %vm1795_vm1, %v1710_v59  ;;  %v8074_v27 = vld [vmem:[%s12230_s7 + $0x448] sm:$0xff] }
 0x69a   : > { %6121 = vmatmul.f32.gmra.mxu3 %v5361_v42 }
 0x69b   : > { %v4876_v60 = vpop.f32.mrf.mxu2  ;;  %v4386_v50 = vmax.f32 %v3931_v46, 0.0  ;;  %3977 = vmatmul.f32.gmra.mxu1 %v3405_v24  ;;  %6265 = vmatpush.msra.mxu3 %v8074_v27  ;;  %v1713_v46 = vld [vmem:[%s8923_s26 + $0x540] sm:$0xff] }
 0x69d   : > { %v6024_v4 = vpop.f32.mrf.mxu3 }
 0x69e   : > { %v10641_v62 = vadd.f32 %v6024_v4, %v10439_v29  ;;  %v2984_v29 = vpop.f32.mrf.mxu0  ;;  %v4877_v4 = vadd.f32 %v10363_v9, %v4876_v60 }
 0x69f   : > { %v2985_v28 = vadd.f32 %v10423_v1, %v2984_v29 }
 0x6a0   : > { %4926 = vmatmul.f32.gmra.mxu2 %v4386_v50  ;;  %v3933_v20 = vpop.f32.mrf.mxu1  ;;  %v5366_v50 = vmax.f32 %v4877_v4, 0.0 }
 0x6a1   : > { %v3406_v19 = vmax.f32 %v2985_v28, 0.0  ;;  %v3934_v16 = vadd.f32 %v10523_v39, %v3933_v20  ;;  %7879 = vmatmul.msk.f32.gmra.mxu0 %vm1795_vm1, %v1711_v5  ;;  %v8073_v20 = vld [vmem:[%s12230_s7 + $0x440] sm:$0xff] }
 0x6a2   : > { %6124 = vmatmul.f32.gmra.mxu3 %v5362_v34 }
 0x6a3   : > { %v4879_v52 = vpop.f32.mrf.mxu2  ;;  %v4387_v12 = vmax.f32 %v3934_v16, 0.0  ;;  %3980 = vmatmul.f32.gmra.mxu1 %v3406_v19  ;;  %6266 = vmatpush.msra.mxu3 %v8073_v20  ;;  %v1714_v16 = vld [vmem:[%s8923_s26 + $0x548] sm:$0xff] }
 0x6a5   : > { %v6027_v56 = vpop.f32.mrf.mxu3 }
 0x6a6   : > { %v10652_v6 = vadd.f32 %v6027_v56, %v10450_v3  ;;  %v2987_v3 = vpop.f32.mrf.mxu0  ;;  %v4880_v56 = vadd.f32 %v10363_v9, %v4879_v52 }
 0x6a7   : > { %v2988_v40 = vadd.f32 %v10423_v1, %v2987_v3 }
 0x6a8   : > { %4929 = vmatmul.f32.gmra.mxu2 %v4387_v12  ;;  %v3936_v26 = vpop.f32.mrf.mxu1  ;;  %v5367_v12 = vmax.f32 %v4880_v56, 0.0 }
 0x6a9   : > { %v3407_v53 = vmax.f32 %v2988_v40, 0.0  ;;  %v3937_v22 = vadd.f32 %v10523_v39, %v3936_v26  ;;  %7880 = vmatmul.msk.f32.gmra.mxu0 %vm1795_vm1, %v1712_v37  ;;  %v8072_v26 = vld [vmem:[%s12230_s7 + $0x438] sm:$0xff] }
 0x6aa   : > { %6177 = vmatmul.f32.vlgmr.msrb.gmra.mxu3 %v5363_v61 }
 0x6ab   : > { %v4882_v45 = vpop.f32.mrf.mxu2  ;;  %v4388_v36 = vmax.f32 %v3937_v22, 0.0  ;;  %3983 = vmatmul.f32.gmra.mxu1 %v3407_v53  ;;  %6267 = vmatpush.msra.mxu3 %v8072_v26  ;;  %v1715_v22 = vld [vmem:[%s8923_s26 + $0x550] sm:$0xff] }
 0x6ad   : > { %v6080_v57 = vpop.f32.mrf.mxu3 }
 0x6ae   : > { %v10663_v7 = vadd.f32 %v6080_v57, %v10461_v15  ;;  %v2990_v15 = vpop.f32.mrf.mxu0  ;;  %v4883_v57 = vadd.f32 %v10363_v9, %v4882_v45 }
 0x6af   : > { %v2991_v33 = vadd.f32 %v10423_v1, %v2990_v15 }
 0x6b0   : > { %4932 = vmatmul.f32.gmra.mxu2 %v4388_v36  ;;  %v3939_v30 = vpop.f32.mrf.mxu1  ;;  %v5368_v36 = vmax.f32 %v4883_v57, 0.0  ;;  %v1718_v57 = vld [vmem:[%s8923_s26 + $0x568] sm:$0xff] }
 0x6b1   : > { %v3408_v11 = vmax.f32 %v2991_v33, 0.0  ;;  %v3940_v54 = vadd.f32 %v10523_v39, %v3939_v30  ;;  %7881 = vmatmul.msk.f32.gmra.mxu0 %vm1795_vm1, %v1713_v46  ;;  %v10718_v33 = vld [vmem:[%s12229_s6] ss:$0 sm:$0xff]  ;;  %v6971_v30 = vld [vmem:[%s12232_s9 + $0x38] sm:$0xff]  ;;  %v8070_v46 = vld [vmem:[%s12230_s7 + $0x428] sm:$0xff] }
 0x6b2   : > { %6180 = vmatmul.f32.gmra.mxu3 %v5364_v38  ;;  %6992 = vmatpush.msrb.mxu0 %v6971_v30 }
 0x6b3   : > { %v4885_v2 = vpop.f32.mrf.mxu2  ;;  %v4389_v18 = vmax.f32 %v3940_v54, 0.0  ;;  %3986 = vmatmul.f32.gmra.mxu1 %v3408_v11 }
 0x6b5   : > { %v6083_v42 = vpop.f32.mrf.mxu3 }
 0x6b6   : > { %v10674_v32 = vadd.f32 %v6083_v42, %v10472_v8  ;;  %v2993_v8 = vpop.f32.mrf.mxu0  ;;  %v4886_v42 = vadd.f32 %v10718_v33, %v4885_v2 }
 0x6b7   : > { %v2994_v21 = vadd.f32 %v10423_v1, %v2993_v8 }
 0x6b8   : > { %4935 = vmatmul.f32.gmra.mxu2 %v4389_v18  ;;  %v3942_v24 = vpop.f32.mrf.mxu1  ;;  %v1716_v18 = vld [vmem:[%s8923_s26 + $0x558] sm:$0xff]  ;;  %v5369_v4 = vmax.f32 %v4886_v42, 0.0 }
 0x6b9   : > { %v3409_v25 = vmax.f32 %v2994_v21, 0.0  ;;  %v3943_v60 = vadd.f32 %v10523_v39, %v3942_v24  ;;  %7882 = vmatmul.msk.f32.gmra.mxu0 %vm1795_vm1, %v1714_v16  ;;  %v8069_v16 = vld [vmem:[%s12230_s7 + $0x420] sm:$0xff] }
 0x6ba   : > { %6183 = vmatmul.f32.gmra.mxu3 %v5365_v35 }
 0x6bb   : > { %v4888_v29 = vpop.f32.mrf.mxu2  ;;  %v4390_v28 = vmax.f32 %v3943_v60, 0.0  ;;  %3989 = vmatmul.f32.gmra.mxu1 %v3409_v25 }
 0x6bc   : > { %v4889_v24 = vadd.f32 %v10718_v33, %v4888_v29 }
 0x6bd   : > { %v6086_v34 = vpop.f32.mrf.mxu3 }
 0x6be   : > { %v10685_v63 = vadd.f32 %v6086_v34, %v10483_v58  ;;  %v2996_v58 = vpop.f32.mrf.mxu0  ;;  %v5370_v56 = vmax.f32 %v4889_v24, 0.0  ;;  %v1720_v24 = vld [vmem:[%s8923_s26 + $0x578] sm:$0xff] }
 0x6bf   : > { %v2997_v59 = vadd.f32 %v10423_v1, %v2996_v58 }
 0x6c0   : > { %4938 = vmatmul.f32.gmra.mxu2 %v4390_v28  ;;  %v3945_v19 = vpop.f32.mrf.mxu1  ;;  %v1717_v28 = vld [vmem:[%s8923_s26 + $0x560] sm:$0xff] }
 0x6c1   : > { %v3410_v49 = vmax.f32 %v2997_v59, 0.0  ;;  %v3946_v52 = vadd.f32 %v10523_v39, %v3945_v19  ;;  %7883 = vmatmul.msk.f32.gmra.mxu0 %vm1795_vm1, %v1715_v22 }
 0x6c2   : > { %6186 = vmatmul.f32.gmra.mxu3 %v5366_v50 }
 0x6c3   : > { %v10699_v3 = vpop.f32.mrf.mxu2  ;;  %v4391_v40 = vmax.f32 %v3946_v52, 0.0  ;;  %3992 = vmatmul.f32.gmra.mxu1 %v3410_v49 }
 0x6c5   : > { %v6089_v61 = vpop.f32.mrf.mxu3 }
 0x6c6   : > { %v10696_v48 = vadd.f32 %v6089_v61, %v10494_v51  ;;  %v2999_v51 = vpop.f32.mrf.mxu0  ;;  %v7073_v61 = vld [vmem:[%s12234_s11 + $0x40] sm:$0xff] }
 0x6c7   : > { %v3000_v5 = vadd.f32 %v10423_v1, %v2999_v51  ;;  %7092 = vmatpush.msrb.mxu1 %v7073_v61 }
 0x6c8   : > { %4941 = vmatmul.f32.gmra.mxu2 %v4391_v40  ;;  %v3948_v53 = vpop.f32.mrf.mxu1 }
 0x6c9   : > { %v3411_v31 = vmax.f32 %v3000_v5, 0.0  ;;  %v3949_v15 = vadd.f32 %v10523_v39, %v3948_v53  ;;  %7884 = vmatmul.msk.f32.gmra.mxu0 %vm1795_vm1, %v1716_v18  ;;  %v7175_v53 = vld [vmem:[%s12236_s13 + $0x48] sm:$0xff]  ;;  %v8067_v18 = vld [vmem:[%s12230_s7 + $0x410] sm:$0xff] }
 0x6ca   : > { %6189 = vmatmul.f32.gmra.mxu3 %v5367_v12  ;;  %7192 = vmatpush.msrb.mxu2 %v7175_v53  ;;  %v1722_v53 = vld [vmem:[%s8923_s26 + $0x588] sm:$0xff] }
 0x6cb   : > { %v10712_v9 = vpop.f32.mrf.mxu2  ;;  %v4392_v45 = vmax.f32 %v3949_v15, 0.0  ;;  %3995 = vmatmul.f32.gmra.mxu1 %v3411_v31 }
 0x6cd   : > { %v6092_v38 = vpop.f32.mrf.mxu3 }
 0x6ce   : > { %v10709_v17 = vadd.f32 %v6092_v38, %v10505_v0  ;;  %v8071_v0 = vld [vmem:[%s12230_s7 + $0x430] sm:$0xff]  ;;  %v3002_v37 = vpop.f32.mrf.mxu0 }
 0x6cf   : > { %6268 = vmatpush.msra.mxu3 %v8071_v0  ;;  %v3003_v35 = vadd.f32 %v10423_v1, %v3002_v37  ;;  %v1719_v0 = vld [vmem:[%s8923_s26 + $0x570] sm:$0xff] }
 0x6d0   : > { %4944 = vmatmul.f32.gmra.mxu2 %v4392_v45  ;;  %v3951_v54 = vpop.f32.mrf.mxu1 }
 0x6d1   : > { %v3412_v27 = vmax.f32 %v3003_v35, 0.0  ;;  %v3952_v8 = vadd.f32 %v10523_v39, %v3951_v54  ;;  %6269 = vmatpush.msra.mxu3 %v8070_v46  ;;  %7885 = vmatmul.msk.f32.gmra.mxu0 %vm1795_vm1, %v1717_v28 }
 0x6d2   : > { %6192 = vmatmul.f32.gmra.mxu3 %v5368_v36  ;;  %v4895_v36 = vadd.f32 %v10718_v33, %v10712_v9 }
 0x6d3   : > { %v10733_v21 = vpop.f32.mrf.mxu2  ;;  %v4393_v34 = vmax.f32 %v3952_v8, 0.0  ;;  %3998 = vmatmul.f32.gmra.mxu1 %v3412_v27  ;;  %6270 = vmatpush.msra.mxu3 %v8069_v16 }
 0x6d4   : > { %v5372_v30 = vmax.f32 %v4895_v36, 0.0 }
 0x6d5   : > { %v6095_v11 = vpop.f32.mrf.mxu3 }
 0x6d6   : > { %v10730_v2 = vadd.f32 %v6095_v11, %v10518_v55  ;;  %v3005_v55 = vpop.f32.mrf.mxu0 }
 0x6d7   : > { %v3006_v50 = vadd.f32 %v10423_v1, %v3005_v55 }
 0x6d8   : > { %4947 = vmatmul.f32.gmra.mxu2 %v4393_v34  ;;  %v3954_v60 = vpop.f32.mrf.mxu1 }
 0x6d9   : > { %v3413_v58 = vmax.f32 %v3006_v50, 0.0  ;;  %v3955_v59 = vadd.f32 %v10523_v39, %v3954_v60  ;;  %7886 = vmatmul.msk.f32.gmra.mxu0 %vm1795_vm1, %v1718_v57  ;;  %v8065_v57 = vld [vmem:[%s12230_s7 + $0x400] sm:$0xff] }
 0x6da   : > { %6195 = vmatmul.f32.gmra.mxu3 %v5369_v4  ;;  %v10787_v4 = vld [vmem:[%s12225_s2] ss:$0 sm:$0xff] }
 0x6db   : > { %v10746_v29 = vpop.f32.mrf.mxu2  ;;  %v4394_v19 = vmax.f32 %v3955_v59, 0.0  ;;  %4001 = vmatmul.f32.gmra.mxu1 %v3413_v58 }
 0x6dc   : > { %v4901_v28 = vadd.f32 %v10718_v33, %v10746_v29 }
 0x6dd   : > { %v6098_v25 = vpop.f32.mrf.mxu3 }
 0x6de   : > { %v10743_v20 = vadd.f32 %v6098_v25, %v10539_v43  ;;  %v4892_v43 = vadd.f32 %v10718_v33, %v10699_v3  ;;  %v3008_v12 = vpop.f32.mrf.mxu0 }
 0x6df   : > { %v3009_v49 = vadd.f32 %v10423_v1, %v3008_v12 }
 0x6e0   : > { %4950 = vmatmul.f32.gmra.mxu2 %v4394_v19  ;;  %v3957_v40 = vpop.f32.mrf.mxu1  ;;  %v5371_v26 = vmax.f32 %v4892_v43, 0.0  ;;  %v1721_v19 = vld [vmem:[%s8923_s26 + $0x580] sm:$0xff]  ;;  %v5374_v43 = vmax.f32 %v4901_v28, 0.0 }
 0x6e1   : > { %v3414_v5 = vmax.f32 %v3009_v49, 0.0  ;;  %v3958_v38 = vadd.f32 %v10523_v39, %v3957_v40  ;;  %7887 = vmatmul.msk.f32.gmra.mxu0 %vm1795_vm1, %v1719_v0 }
 0x6e2   : > { %6198 = vmatmul.f32.gmra.mxu3 %v5370_v56  ;;  %v8066_v56 = vld [vmem:[%s12230_s7 + $0x408] sm:$0xff] }
 0x6e3   : > { %v4903_v3 = vpop.f32.mrf.mxu2  ;;  %v4395_v22 = vmax.f32 %v3958_v38, 0.0  ;;  %4004 = vmatmul.f32.gmra.mxu1 %v3414_v5 }
 0x6e4   : > { %v4904_v40 = vadd.f32 %v10718_v33, %v4903_v3 }
 0x6e5   : > { %v6101_v52 = vpop.f32.mrf.mxu3 }
 0x6e6   : > { %v10760_v51 = vadd.f32 %v6101_v52, %v10552_v23  ;;  %v8068_v23 = vld [vmem:[%s12230_s7 + $0x418] sm:$0xff]  ;;  %v3011_v31 = vpop.f32.mrf.mxu0 }
 0x6e7   : > { %6271 = vmatpush.msra.mxu3 %v8068_v23  ;;  %v3012_v15 = vadd.f32 %v10423_v1, %v3011_v31  ;;  %v4898_v1 = vadd.f32 %v10718_v33, %v10733_v21 }
 0x6e8   : > { %4953 = vmatmul.f32.gmra.mxu2 %v4395_v22  ;;  %v3960_v42 = vpop.f32.mrf.mxu1  ;;  %v5375_v22 = vmax.f32 %v4904_v40, 0.0 }
 0x6e9   : > { %v3415_v35 = vmax.f32 %v3012_v15, 0.0  ;;  %v3961_v9 = vadd.f32 %v10523_v39, %v3960_v42  ;;  %6272 = vmatpush.msra.mxu3 %v8067_v18  ;;  %v5373_v46 = vmax.f32 %v4898_v1, 0.0  ;;  %7888 = vmatmul.msk.f32.gmra.mxu0 %vm1795_vm1, %v1720_v24  ;;  %v8096_v42 = vld [vmem:[%s12230_s7 + $0x4f8] sm:$0xff] }
 0x6ea   : > { %6201 = vmatmul.f32.gmra.mxu3 %v5371_v26 }
 0x6eb   : > { %v4906_v11 = vpop.f32.mrf.mxu2  ;;  %v4396_v54 = vmax.f32 %v3961_v9, 0.0  ;;  %4007 = vmatmul.f32.gmra.mxu1 %v3415_v35  ;;  %6273 = vmatpush.msra.mxu3 %v8066_v56  ;;  %v1723_v9 = vld [vmem:[%s8923_s26 + $0x590] sm:$0xff] }
 0x6ed   : > { %v6104_v45 = vpop.f32.mrf.mxu3  ;;  %6274 = vmatpush.msra.mxu3 %v8065_v57 }
 0x6ee   : > { %v10775_v37 = vadd.f32 %v6104_v45, %v10569_v13  ;;  %v3014_v13 = vpop.f32.mrf.mxu0  ;;  %v4907_v45 = vadd.f32 %v10718_v33, %v4906_v11 }
 0x6ef   : > { %v3015_v27 = vadd.f32 %v10787_v4, %v3014_v13  ;;  %6357 = vmatpush.msrb.mxu3 %v8096_v42 }
 0x6f0   : > { %4956 = vmatmul.f32.gmra.mxu2 %v4396_v54  ;;  %v3963_v34 = vpop.f32.mrf.mxu1  ;;  %v5376_v54 = vmax.f32 %v4907_v45, 0.0 }
 0x6f1   : > { %v3416_v55 = vmax.f32 %v3015_v27, 0.0  ;;  %v3964_v50 = vadd.f32 %v10523_v39, %v3963_v34  ;;  %7889 = vmatmul.msk.f32.gmra.mxu0 %vm1795_vm1, %v1721_v19  ;;  %v8095_v34 = vld [vmem:[%s12230_s7 + $0x4f0] sm:$0xff] }
 0x6f2   : > { %6204 = vmatmul.f32.gmra.mxu3 %v5372_v30 }
 0x6f3   : > { %v4909_v25 = vpop.f32.mrf.mxu2  ;;  %v4397_v60 = vmax.f32 %v3964_v50, 0.0  ;;  %4010 = vmatmul.f32.gmra.mxu1 %v3416_v55  ;;  %6358 = vmatpush.msrb.mxu3 %v8095_v34  ;;  %v1724_v50 = vld [vmem:[%s8923_s26 + $0x598] sm:$0xff] }
 0x6f5   : > { %v6107_v8 = vpop.f32.mrf.mxu3 }
 0x6f6   : > { %v10792_v21 = vadd.f32 %v6107_v8, %v10584_v41  ;;  %v3017_v41 = vpop.f32.mrf.mxu0  ;;  %v4910_v8 = vadd.f32 %v10718_v33, %v4909_v25 }
 0x6f7   : > { %v3018_v58 = vadd.f32 %v10787_v4, %v3017_v41 }
 0x6f8   : > { %4959 = vmatmul.f32.gmra.mxu2 %v4397_v60  ;;  %v3966_v61 = vpop.f32.mrf.mxu1  ;;  %v5377_v60 = vmax.f32 %v4910_v8, 0.0 }
 0x6f9   : > { %v3417_v12 = vmax.f32 %v3018_v58, 0.0  ;;  %v3967_v29 = vadd.f32 %v10523_v39, %v3966_v61  ;;  %7890 = vmatmul.msk.f32.gmra.mxu0 %vm1795_vm1, %v1722_v53  ;;  %v8094_v61 = vld [vmem:[%s12230_s7 + $0x4e8] sm:$0xff] }
 0x6fa   : > { %6207 = vmatmul.f32.gmra.mxu3 %v5373_v46 }
 0x6fb   : > { %v4912_v49 = vpop.f32.mrf.mxu2  ;;  %v4398_v52 = vmax.f32 %v3967_v29, 0.0  ;;  %4013 = vmatmul.f32.gmra.mxu1 %v3417_v12  ;;  %6359 = vmatpush.msrb.mxu3 %v8094_v61  ;;  %v1725_v29 = vld [vmem:[%s8923_s26 + $0x5a0] sm:$0xff] }
 0x6fd   : > { %v6110_v59 = vpop.f32.mrf.mxu3 }
 0x6fe   : > { %v10804_v16 = vadd.f32 %v6110_v59, %v10596_v44  ;;  %v3020_v44 = vpop.f32.mrf.mxu0  ;;  %v4913_v59 = vadd.f32 %v10718_v33, %v4912_v49 }
 0x6ff   : > { %v3021_v26 = vadd.f32 %v10787_v4, %v3020_v44 }
 0x700   : > { %4962 = vmatmul.f32.gmra.mxu2 %v4398_v52  ;;  %v3969_v38 = vpop.f32.mrf.mxu1  ;;  %v5378_v52 = vmax.f32 %v4913_v59, 0.0 }
 0x701   : > { %v3418_v23 = vmax.f32 %v3021_v26, 0.0  ;;  %v3970_v3 = vadd.f32 %v10523_v39, %v3969_v38  ;;  %7891 = vmatmul.msk.f32.gmra.mxu0 %vm1795_vm1, %v1723_v9  ;;  %v8093_v38 = vld [vmem:[%s12230_s7 + $0x4e0] sm:$0xff] }
 0x702   : > { %6210 = vmatmul.f32.gmra.mxu3 %v5374_v43 }
 0x703   : > { %v4915_v31 = vpop.f32.mrf.mxu2  ;;  %v4399_v15 = vmax.f32 %v3970_v3, 0.0  ;;  %4016 = vmatmul.f32.gmra.mxu1 %v3418_v23  ;;  %6360 = vmatpush.msrb.mxu3 %v8093_v38  ;;  %v1726_v3 = vld [vmem:[%s8923_s26 + $0x5a8] sm:$0xff] }
 0x705   : > { %v6113_v5 = vpop.f32.mrf.mxu3 }
 0x706   : > { %v10815_v36 = vadd.f32 %v6113_v5, %v10608_v10  ;;  %v3023_v10 = vpop.f32.mrf.mxu0  ;;  %v4916_v5 = vadd.f32 %v10718_v33, %v4915_v31 }
 0x707   : > { %v3024_v0 = vadd.f32 %v10787_v4, %v3023_v10 }
 0x708   : > { %4965 = vmatmul.f32.gmra.mxu2 %v4399_v15  ;;  %v3972_v35 = vpop.f32.mrf.mxu1  ;;  %v5379_v15 = vmax.f32 %v4916_v5, 0.0 }
 0x709   : > { %v3419_v18 = vmax.f32 %v3024_v0, 0.0  ;;  %v3973_v11 = vadd.f32 %v10523_v39, %v3972_v35  ;;  %7892 = vmatmul.msk.f32.gmra.mxu0 %vm1795_vm1, %v1724_v50  ;;  %v8092_v35 = vld [vmem:[%s12230_s7 + $0x4d8] sm:$0xff] }
 0x70a   : > { %6213 = vmatmul.f32.gmra.mxu3 %v5375_v22 }
 0x70b   : > { %v4918_v13 = vpop.f32.mrf.mxu2  ;;  %v4400_v27 = vmax.f32 %v3973_v11, 0.0  ;;  %4019 = vmatmul.f32.gmra.mxu1 %v3419_v18  ;;  %6361 = vmatpush.msrb.mxu3 %v8092_v35  ;;  %v1727_v11 = vld [vmem:[%s8923_s26 + $0x5b0] sm:$0xff] }
 0x70d   : > { %v6116_v30 = vpop.f32.mrf.mxu3 }
 0x70e   : > { %v10826_v1 = vadd.f32 %v6116_v30, %v10619_v47  ;;  %v3026_v47 = vpop.f32.mrf.mxu0  ;;  %v4919_v30 = vadd.f32 %v10718_v33, %v4918_v13 }
 0x70f   : > { %v3027_v24 = vadd.f32 %v10787_v4, %v3026_v47 }
 0x710   : > { %4968 = vmatmul.f32.gmra.mxu2 %v4400_v27  ;;  %v3975_v55 = vpop.f32.mrf.mxu1  ;;  %v5380_v27 = vmax.f32 %v4919_v30, 0.0 }
 0x711   : > { %v3420_v56 = vmax.f32 %v3027_v24, 0.0  ;;  %v3976_v25 = vadd.f32 %v10523_v39, %v3975_v55  ;;  %7893 = vmatmul.msk.f32.gmra.mxu0 %vm1795_vm1, %v1725_v29  ;;  %v8091_v55 = vld [vmem:[%s12230_s7 + $0x4d0] sm:$0xff] }
 0x712   : > { %6216 = vmatmul.f32.gmra.mxu3 %v5376_v54 }
 0x713   : > { %v4921_v41 = vpop.f32.mrf.mxu2  ;;  %v4401_v58 = vmax.f32 %v3976_v25, 0.0  ;;  %4022 = vmatmul.f32.gmra.mxu1 %v3420_v56  ;;  %6362 = vmatpush.msrb.mxu3 %v8091_v55 }
 0x715   : > { %v6119_v46 = vpop.f32.mrf.mxu3 }
 0x716   : > { %v10837_v28 = vadd.f32 %v6119_v46, %v10630_v14  ;;  %v3029_v14 = vpop.f32.mrf.mxu0  ;;  %v4922_v46 = vadd.f32 %v10718_v33, %v4921_v41  ;;  %v10886_v41 = vld [vmem:[%s12227_s4] ss:$0 sm:$0xff] }
 0x717   : > { %v3030_v19 = vadd.f32 %v10787_v4, %v3029_v14 }
 0x718   : > { %4971 = vmatmul.f32.gmra.mxu2 %v4401_v58  ;;  %v3978_v12 = vpop.f32.mrf.mxu1  ;;  %v5381_v25 = vmax.f32 %v4922_v46, 0.0 }
 0x719   : > { %v3421_v57 = vmax.f32 %v3030_v19, 0.0  ;;  %v3979_v49 = vadd.f32 %v10523_v39, %v3978_v12  ;;  %7894 = vmatmul.msk.f32.gmra.mxu0 %vm1795_vm1, %v1726_v3 }
 0x71a   : > { %6219 = vmatmul.f32.gmra.mxu3 %v5377_v60 }
 0x71b   : > { %v4924_v44 = vpop.f32.mrf.mxu2  ;;  %v4402_v26 = vmax.f32 %v3979_v49, 0.0  ;;  %4025 = vmatmul.f32.gmra.mxu1 %v3421_v57  ;;  %v1729_v49 = vld [vmem:[%s8923_s26 + $0x5c0] sm:$0xff] }
 0x71d   : > { %v6122_v43 = vpop.f32.mrf.mxu3 }
 0x71e   : > { %v10848_v40 = vadd.f32 %v6122_v43, %v10641_v62  ;;  %v3032_v62 = vpop.f32.mrf.mxu0  ;;  %v4925_v43 = vadd.f32 %v10718_v33, %v4924_v44 }
 0x71f   : > { %v3033_v53 = vadd.f32 %v10787_v4, %v3032_v62 }
 0x720   : > { %4974 = vmatmul.f32.gmra.mxu2 %v4402_v26  ;;  %v3981_v23 = vpop.f32.mrf.mxu1  ;;  %v5382_v26 = vmax.f32 %v4925_v43, 0.0 }
 0x721   : > { %v3422_v42 = vmax.f32 %v3033_v53, 0.0  ;;  %v3982_v31 = vadd.f32 %v10523_v39, %v3981_v23  ;;  %7895 = vmatmul.msk.f32.gmra.mxu0 %vm1795_vm1, %v1727_v11  ;;  %v8089_v23 = vld [vmem:[%s12230_s7 + $0x4c0] sm:$0xff] }
 0x722   : > { %6222 = vmatmul.f32.gmra.mxu3 %v5378_v52 }
 0x723   : > { %v4927_v10 = vpop.f32.mrf.mxu2  ;;  %v4403_v0 = vmax.f32 %v3982_v31, 0.0  ;;  %4028 = vmatmul.f32.gmra.mxu1 %v3422_v42  ;;  %v1730_v31 = vld [vmem:[%s8923_s26 + $0x5c8] sm:$0xff] }
 0x725   : > { %v6125_v22 = vpop.f32.mrf.mxu3 }
 0x726   : > { %v10859_v45 = vadd.f32 %v6125_v22, %v10652_v6  ;;  %v3035_v6 = vpop.f32.mrf.mxu0  ;;  %v4928_v22 = vadd.f32 %v10718_v33, %v4927_v10 }
 0x727   : > { %v3036_v9 = vadd.f32 %v10787_v4, %v3035_v6 }
 0x728   : > { %4977 = vmatmul.f32.gmra.mxu2 %v4403_v0  ;;  %v3984_v18 = vpop.f32.mrf.mxu1  ;;  %v5383_v0 = vmax.f32 %v4928_v22, 0.0  ;;  %v1733_v22 = vld [vmem:[%s8923_s26 + $0x5e0] sm:$0xff] }
 0x729   : > { %v3423_v34 = vmax.f32 %v3036_v9, 0.0  ;;  %v3985_v13 = vadd.f32 %v10523_v39, %v3984_v18  ;;  %v1728_v39 = vld [vmem:[%s8923_s26 + $0x5b8] sm:$0xff] }
 0x72a   : > { %6275 = vmatmul.f32.vlgmr.msra.gmra.mxu3 %v5379_v15  ;;  %7896 = vmatmul.msk.f32.gmra.mxu0 %vm1795_vm1, %v1728_v39  ;;  %v8088_v18 = vld [vmem:[%s12230_s7 + $0x4b8] sm:$0xff]  ;;  %v8087_v39 = vld [vmem:[%s12230_s7 + $0x4b0] sm:$0xff] }
 0x72b   : > { %v4930_v47 = vpop.f32.mrf.mxu2  ;;  %v4404_v24 = vmax.f32 %v3985_v13, 0.0  ;;  %4031 = vmatmul.f32.gmra.mxu1 %v3423_v34 }
 0x72d   : > { %v6178_v54 = vpop.f32.mrf.mxu3 }
 0x72e   : > { %v10870_v8 = vadd.f32 %v6178_v54, %v10663_v7  ;;  %v3038_v7 = vpop.f32.mrf.mxu0  ;;  %v4931_v54 = vadd.f32 %v10718_v33, %v4930_v47 }
 0x72f   : > { %v3039_v50 = vadd.f32 %v10787_v4, %v3038_v7 }
 0x730   : > { %4980 = vmatmul.f32.gmra.mxu2 %v4404_v24  ;;  %v3987_v56 = vpop.f32.mrf.mxu1  ;;  %v1731_v24 = vld [vmem:[%s8923_s26 + $0x5d0] sm:$0xff]  ;;  %v5384_v46 = vmax.f32 %v4931_v54, 0.0 }
 0x731   : > { %v3424_v59 = vmax.f32 %v3039_v50, 0.0  ;;  %v3988_v61 = vadd.f32 %v10886_v41, %v3987_v56 }
 0x732   : > { %6278 = vmatmul.f32.gmra.mxu3 %v5380_v27  ;;  %7897 = vmatmul.msk.f32.gmra.mxu0 %vm1795_vm1, %v1729_v49  ;;  %v8086_v49 = vld [vmem:[%s12230_s7 + $0x4a8] sm:$0xff] }
 0x733   : > { %v4933_v14 = vpop.f32.mrf.mxu2  ;;  %v4405_v19 = vmax.f32 %v3988_v61, 0.0  ;;  %4034 = vmatmul.f32.gmra.mxu1 %v3424_v59 }
 0x734   : > { %v4934_v56 = vadd.f32 %v10718_v33, %v4933_v14 }
 0x735   : > { %v6181_v60 = vpop.f32.mrf.mxu3 }
 0x736   : > { %v10881_v58 = vadd.f32 %v6181_v60, %v10674_v32  ;;  %v8090_v32 = vld [vmem:[%s12230_s7 + $0x4c8] sm:$0xff]  ;;  %v3041_v12 = vpop.f32.mrf.mxu0  ;;  %v5385_v43 = vmax.f32 %v4934_v56, 0.0  ;;  %v1735_v56 = vld [vmem:[%s8923_s26 + $0x5f0] sm:$0xff] }
 0x737   : > { %6363 = vmatpush.msrb.mxu3 %v8090_v32  ;;  %v3042_v29 = vadd.f32 %v10787_v4, %v3041_v12 }
 0x738   : > { %4983 = vmatmul.f32.gmra.mxu2 %v4405_v19  ;;  %v3990_v57 = vpop.f32.mrf.mxu1  ;;  %v1732_v19 = vld [vmem:[%s8923_s26 + $0x5d8] sm:$0xff] }
 0x739   : > { %v3425_v38 = vmax.f32 %v3042_v29, 0.0  ;;  %v3991_v44 = vadd.f32 %v10886_v41, %v3990_v57  ;;  %6364 = vmatpush.msrb.mxu3 %v8089_v23 }
 0x73a   : > { %6281 = vmatmul.f32.gmra.mxu3 %v5381_v25  ;;  %7898 = vmatmul.msk.f32.gmra.mxu0 %vm1795_vm1, %v1730_v31 }
 0x73b   : > { %v10900_v62 = vpop.f32.mrf.mxu2  ;;  %v4406_v53 = vmax.f32 %v3991_v44, 0.0  ;;  %4037 = vmatmul.f32.gmra.mxu1 %v3425_v38  ;;  %6365 = vmatpush.msrb.mxu3 %v8088_v18  ;;  %v1734_v18 = vld [vmem:[%s8923_s26 + $0x5e8] sm:$0xff] }
 0x73d   : > { %v6184_v52 = vpop.f32.mrf.mxu3  ;;  %6366 = vmatpush.msrb.mxu3 %v8087_v39 }
 0x73e   : > { %v10897_v5 = vadd.f32 %v6184_v52, %v10685_v63  ;;  %v3044_v63 = vpop.f32.mrf.mxu0  ;;  %v7072_v52 = vld [vmem:[%s12234_s11 + $0x38] sm:$0xff] }
 0x73f   : > { %v3045_v3 = vadd.f32 %v10787_v4, %v3044_v63  ;;  %7093 = vmatpush.msrb.mxu1 %v7072_v52  ;;  %6367 = vmatpush.msrb.mxu3 %v8086_v49 }
 0x740   : > { %4986 = vmatmul.f32.gmra.mxu2 %v4406_v53  ;;  %v3993_v42 = vpop.f32.mrf.mxu1 }
 0x741   : > { %v3426_v35 = vmax.f32 %v3045_v3, 0.0  ;;  %v3994_v6 = vadd.f32 %v10886_v41, %v3993_v42  ;;  %v7174_v42 = vld [vmem:[%s12236_s13 + $0x40] sm:$0xff] }
 0x742   : > { %6284 = vmatmul.f32.gmra.mxu3 %v5382_v26  ;;  %7899 = vmatmul.msk.f32.gmra.mxu0 %vm1795_vm1, %v1731_v24 }
 0x743   : > { %v10913_v10 = vpop.f32.mrf.mxu2  ;;  %v4407_v9 = vmax.f32 %v3994_v6, 0.0  ;;  %4040 = vmatmul.f32.gmra.mxu1 %v3426_v35  ;;  %7193 = vmatpush.msrb.mxu2 %v7174_v42  ;;  %v1737_v42 = vld [vmem:[%s8923_s26 + $0x600] sm:$0xff] }
 0x745   : > { %v6187_v15 = vpop.f32.mrf.mxu3 }
 0x746   : > { %v10910_v30 = vadd.f32 %v6187_v15, %v10696_v48  ;;  %v6970_v48 = vld [vmem:[%s12232_s9 + $0x30] sm:$0xff]  ;;  %v3047_v11 = vpop.f32.mrf.mxu0 }
 0x747   : > { %6993 = vmatpush.msrb.mxu0 %v6970_v48  ;;  %v3048_v27 = vadd.f32 %v10787_v4, %v3047_v11 }
 0x748   : > { %4989 = vmatmul.f32.gmra.mxu2 %v4407_v9  ;;  %v3996_v13 = vpop.f32.mrf.mxu1 }
 0x749   : > { %v3427_v55 = vmax.f32 %v3048_v27, 0.0  ;;  %v3997_v7 = vadd.f32 %v10886_v41, %v3996_v13 }
 0x74a   : > { %6287 = vmatmul.f32.gmra.mxu3 %v5383_v0  ;;  %7900 = vmatmul.msk.f32.gmra.mxu0 %vm1795_vm1, %v1732_v19  ;;  %v4940_v0 = vadd.f32 %v10718_v33, %v10913_v10 }
 0x74b   : > { %v10929_v50 = vpop.f32.mrf.mxu2  ;;  %v4408_v60 = vmax.f32 %v3997_v7, 0.0  ;;  %4043 = vmatmul.f32.gmra.mxu1 %v3427_v55 }
 0x74c   : > { %v5387_v48 = vmax.f32 %v4940_v0, 0.0  ;;  %v4943_v24 = vadd.f32 %v10718_v33, %v10929_v50 }
 0x74d   : > { %v6190_v34 = vpop.f32.mrf.mxu3 }
 0x74e   : > { %v10926_v47 = vadd.f32 %v6190_v34, %v10709_v17  ;;  %v3050_v17 = vpop.f32.mrf.mxu0  ;;  %v5388_v39 = vmax.f32 %v4943_v24, 0.0 }
 0x74f   : > { %v3051_v25 = vadd.f32 %v10787_v4, %v3050_v17 }
 0x750   : > { %4992 = vmatmul.f32.gmra.mxu2 %v4408_v60  ;;  %v3999_v61 = vpop.f32.mrf.mxu1 }
 0x751   : > { %v3428_v12 = vmax.f32 %v3051_v25, 0.0  ;;  %v4000_v29 = vadd.f32 %v10886_v41, %v3999_v61 }
 0x752   : > { %6290 = vmatmul.f32.gmra.mxu3 %v5384_v46  ;;  %7901 = vmatmul.msk.f32.gmra.mxu0 %vm1795_vm1, %v1733_v22  ;;  %v8084_v46 = vld [vmem:[%s12230_s7 + $0x498] sm:$0xff]  ;;  %v8082_v22 = vld [vmem:[%s12230_s7 + $0x488] sm:$0xff] }
 0x753   : > { %v10942_v14 = vpop.f32.mrf.mxu2  ;;  %v4409_v57 = vmax.f32 %v4000_v29, 0.0  ;;  %4046 = vmatmul.f32.gmra.mxu1 %v3428_v12 }
 0x754   : > { %v4946_v19 = vadd.f32 %v10718_v33, %v10942_v14 }
 0x755   : > { %v6193_v59 = vpop.f32.mrf.mxu3 }
 0x756   : > { %v10939_v32 = vadd.f32 %v6193_v59, %v10730_v2  ;;  %v4937_v2 = vadd.f32 %v10718_v33, %v10900_v62  ;;  %v3053_v26 = vpop.f32.mrf.mxu0 }
 0x757   : > { %v3054_v38 = vadd.f32 %v10787_v4, %v3053_v26 }
 0x758   : > { %4995 = vmatmul.f32.gmra.mxu2 %v4409_v57  ;;  %v4002_v53 = vpop.f32.mrf.mxu1  ;;  %v5386_v23 = vmax.f32 %v4937_v2, 0.0  ;;  %v1736_v57 = vld [vmem:[%s8923_s26 + $0x5f8] sm:$0xff]  ;;  %v5389_v2 = vmax.f32 %v4946_v19, 0.0 }
 0x759   : > { %v3429_v3 = vmax.f32 %v3054_v38, 0.0  ;;  %v4003_v15 = vadd.f32 %v10886_v41, %v4002_v53 }
 0x75a   : > { %6293 = vmatmul.f32.gmra.mxu3 %v5385_v43  ;;  %7902 = vmatmul.msk.f32.gmra.mxu0 %vm1795_vm1, %v1734_v18  ;;  %v8083_v43 = vld [vmem:[%s12230_s7 + $0x490] sm:$0xff] }
 0x75b   : > { %v4948_v62 = vpop.f32.mrf.mxu2  ;;  %v4410_v31 = vmax.f32 %v4003_v15, 0.0  ;;  %4049 = vmatmul.f32.gmra.mxu1 %v3429_v3 }
 0x75c   : > { %v4949_v53 = vadd.f32 %v10718_v33, %v4948_v62 }
 0x75d   : > { %v6196_v44 = vpop.f32.mrf.mxu3 }
 0x75e   : > { %v10956_v63 = vadd.f32 %v6196_v44, %v10743_v20  ;;  %v8085_v20 = vld [vmem:[%s12230_s7 + $0x4a0] sm:$0xff]  ;;  %v3056_v35 = vpop.f32.mrf.mxu0 }
 0x75f   : > { %6368 = vmatpush.msrb.mxu3 %v8085_v20  ;;  %v3057_v6 = vadd.f32 %v10787_v4, %v3056_v35 }
 0x760   : > { %4998 = vmatmul.f32.gmra.mxu2 %v4410_v31  ;;  %v4005_v54 = vpop.f32.mrf.mxu1  ;;  %v5390_v31 = vmax.f32 %v4949_v53, 0.0 }
 0x761   : > { %v3430_v27 = vmax.f32 %v3057_v6, 0.0  ;;  %v4006_v10 = vadd.f32 %v10886_v41, %v4005_v54  ;;  %6369 = vmatpush.msrb.mxu3 %v8084_v46  ;;  %v8081_v54 = vld [vmem:[%s12230_s7 + $0x480] sm:$0xff] }
 0x762   : > { %6296 = vmatmul.f32.gmra.mxu3 %v5386_v23  ;;  %7903 = vmatmul.msk.f32.gmra.mxu0 %vm1795_vm1, %v1735_v56 }
 0x763   : > { %v4951_v34 = vpop.f32.mrf.mxu2  ;;  %v4411_v13 = vmax.f32 %v4006_v10, 0.0  ;;  %4052 = vmatmul.f32.gmra.mxu1 %v3430_v27  ;;  %6370 = vmatpush.msrb.mxu3 %v8083_v43  ;;  %v1738_v10 = vld [vmem:[%s8923_s26 + $0x608] sm:$0xff] }
 0x765   : > { %v6199_v9 = vpop.f32.mrf.mxu3  ;;  %6371 = vmatpush.msrb.mxu3 %v8082_v22 }
 0x766   : > { %v10971_v11 = vadd.f32 %v6199_v9, %v10760_v51  ;;  %v3059_v51 = vpop.f32.mrf.mxu0  ;;  %v4952_v9 = vadd.f32 %v10718_v33, %v4951_v34 }
 0x767   : > { %v3060_v55 = vadd.f32 %v10787_v4, %v3059_v51  ;;  %6372 = vmatpush.msrb.mxu3 %v8081_v54 }
 0x768   : > { %5001 = vmatmul.f32.gmra.mxu2 %v4411_v13  ;;  %v4008_v60 = vpop.f32.mrf.mxu1  ;;  %v5391_v13 = vmax.f32 %v4952_v9, 0.0 }
 0x769   : > { %v3431_v25 = vmax.f32 %v3060_v55, 0.0  ;;  %v4009_v50 = vadd.f32 %v10886_v41, %v4008_v60  ;;  %v8112_v60 = vld [vmem:[%s12230_s7 + $0x578] sm:$0xff] }
 0x76a   : > { %6299 = vmatmul.f32.gmra.mxu3 %v5387_v48  ;;  %7904 = vmatmul.msk.f32.gmra.mxu0 %vm1795_vm1, %v1736_v57 }
 0x76b   : > { %v4954_v59 = vpop.f32.mrf.mxu2  ;;  %v4412_v61 = vmax.f32 %v4009_v50, 0.0  ;;  %4055 = vmatmul.f32.gmra.mxu1 %v3431_v25  ;;  %6455 = vmatpush.msra.mxu3 %v8112_v60  ;;  %v1739_v50 = vld [vmem:[%s8923_s26 + $0x610] sm:$0xff] }
 0x76d   : > { %v6202_v7 = vpop.f32.mrf.mxu3 }
 0x76e   : > { %v10983_v17 = vadd.f32 %v6202_v7, %v10775_v37  ;;  %v3062_v37 = vpop.f32.mrf.mxu0  ;;  %v4955_v7 = vadd.f32 %v10718_v33, %v4954_v59 }
 0x76f   : > { %v3063_v12 = vadd.f32 %v10787_v4, %v3062_v37 }
 0x770   : > { %5004 = vmatmul.f32.gmra.mxu2 %v4412_v61  ;;  %v4011_v52 = vpop.f32.mrf.mxu1  ;;  %v5392_v61 = vmax.f32 %v4955_v7, 0.0 }
 0x771   : > { %v3432_v26 = vmax.f32 %v3063_v12, 0.0  ;;  %v4012_v14 = vadd.f32 %v10886_v41, %v4011_v52  ;;  %v8111_v52 = vld [vmem:[%s12230_s7 + $0x570] sm:$0xff] }
 0x772   : > { %6302 = vmatmul.f32.gmra.mxu3 %v5388_v39  ;;  %7905 = vmatmul.msk.f32.gmra.mxu0 %vm1795_vm1, %v1737_v42 }
 0x773   : > { %v4957_v38 = vpop.f32.mrf.mxu2  ;;  %v4413_v44 = vmax.f32 %v4012_v14, 0.0  ;;  %4058 = vmatmul.f32.gmra.mxu1 %v3432_v26  ;;  %6456 = vmatpush.msra.mxu3 %v8111_v52  ;;  %v1740_v14 = vld [vmem:[%s8923_s26 + $0x618] sm:$0xff] }
 0x775   : > { %v6205_v29 = vpop.f32.mrf.mxu3 }
 0x776   : > { %v10995_v49 = vadd.f32 %v6205_v29, %v10792_v21  ;;  %v3065_v21 = vpop.f32.mrf.mxu0  ;;  %v4958_v29 = vadd.f32 %v10718_v33, %v4957_v38 }
 0x777   : > { %v3066_v23 = vadd.f32 %v10787_v4, %v3065_v21 }
 0x778   : > { %5007 = vmatmul.f32.gmra.mxu2 %v4413_v44  ;;  %v4014_v15 = vpop.f32.mrf.mxu1  ;;  %v5393_v44 = vmax.f32 %v4958_v29, 0.0 }
 0x779   : > { %v3433_v20 = vmax.f32 %v3066_v23, 0.0  ;;  %v4015_v62 = vadd.f32 %v10886_v41, %v4014_v15  ;;  %v8110_v15 = vld [vmem:[%s12230_s7 + $0x568] sm:$0xff] }
 0x77a   : > { %6305 = vmatmul.f32.gmra.mxu3 %v5389_v2  ;;  %7906 = vmatmul.msk.f32.gmra.mxu0 %vm1795_vm1, %v1738_v10 }
 0x77b   : > { %v4960_v35 = vpop.f32.mrf.mxu2  ;;  %v4414_v6 = vmax.f32 %v4015_v62, 0.0  ;;  %4061 = vmatmul.f32.gmra.mxu1 %v3433_v20  ;;  %6457 = vmatpush.msra.mxu3 %v8110_v15  ;;  %v1741_v62 = vld [vmem:[%s8923_s26 + $0x620] sm:$0xff] }
 0x77d   : > { %v6208_v3 = vpop.f32.mrf.mxu3 }
 0x77e   : > { %v11006_v0 = vadd.f32 %v6208_v3, %v10804_v16  ;;  %v3068_v16 = vpop.f32.mrf.mxu0  ;;  %v4961_v3 = vadd.f32 %v10718_v33, %v4960_v35 }
 0x77f   : > { %v3069_v18 = vadd.f32 %v10787_v4, %v3068_v16 }
 0x780   : > { %5010 = vmatmul.f32.gmra.mxu2 %v4414_v6  ;;  %v4017_v27 = vpop.f32.mrf.mxu1  ;;  %v5394_v6 = vmax.f32 %v4961_v3, 0.0 }
 0x781   : > { %v3434_v46 = vmax.f32 %v3069_v18, 0.0  ;;  %v4018_v34 = vadd.f32 %v10886_v41, %v4017_v27  ;;  %v8109_v27 = vld [vmem:[%s12230_s7 + $0x560] sm:$0xff] }
 0x782   : > { %6308 = vmatmul.f32.gmra.mxu3 %v5390_v31  ;;  %7907 = vmatmul.msk.f32.gmra.mxu0 %vm1795_vm1, %v1739_v50 }
 0x783   : > { %v4963_v51 = vpop.f32.mrf.mxu2  ;;  %v4415_v55 = vmax.f32 %v4018_v34, 0.0  ;;  %4064 = vmatmul.f32.gmra.mxu1 %v3434_v46  ;;  %6458 = vmatpush.msra.mxu3 %v8109_v27  ;;  %v1742_v34 = vld [vmem:[%s8923_s26 + $0x628] sm:$0xff] }
 0x785   : > { %v6211_v48 = vpop.f32.mrf.mxu3 }
 0x786   : > { %v11017_v24 = vadd.f32 %v6211_v48, %v10815_v36  ;;  %v3071_v36 = vpop.f32.mrf.mxu0  ;;  %v4964_v48 = vadd.f32 %v10718_v33, %v4963_v51 }
 0x787   : > { %v3072_v56 = vadd.f32 %v10787_v4, %v3071_v36 }
 0x788   : > { %5013 = vmatmul.f32.gmra.mxu2 %v4415_v55  ;;  %v4020_v25 = vpop.f32.mrf.mxu1  ;;  %v5395_v55 = vmax.f32 %v4964_v48, 0.0 }
 0x789   : > { %v3435_v43 = vmax.f32 %v3072_v56, 0.0  ;;  %v4021_v59 = vadd.f32 %v10886_v41, %v4020_v25  ;;  %v8108_v25 = vld [vmem:[%s12230_s7 + $0x558] sm:$0xff] }
 0x78a   : > { %6311 = vmatmul.f32.gmra.mxu3 %v5391_v13  ;;  %7908 = vmatmul.msk.f32.gmra.mxu0 %vm1795_vm1, %v1740_v14 }
 0x78b   : > { %v4966_v37 = vpop.f32.mrf.mxu2  ;;  %v4416_v12 = vmax.f32 %v4021_v59, 0.0  ;;  %4067 = vmatmul.f32.gmra.mxu1 %v3435_v43  ;;  %6459 = vmatpush.msra.mxu3 %v8108_v25  ;;  %v1743_v59 = vld [vmem:[%s8923_s26 + $0x630] sm:$0xff] }
 0x78d   : > { %v6214_v39 = vpop.f32.mrf.mxu3 }
 0x78e   : > { %v11028_v19 = vadd.f32 %v6214_v39, %v10826_v1  ;;  %v3074_v1 = vpop.f32.mrf.mxu0  ;;  %v4967_v39 = vadd.f32 %v10718_v33, %v4966_v37 }
 0x78f   : > { %v3075_v57 = vadd.f32 %v10787_v4, %v3074_v1 }
 0x790   : > { %5016 = vmatmul.f32.gmra.mxu2 %v4416_v12  ;;  %v4023_v26 = vpop.f32.mrf.mxu1  ;;  %v5396_v12 = vmax.f32 %v4967_v39, 0.0 }
 0x791   : > { %v3436_v22 = vmax.f32 %v3075_v57, 0.0  ;;  %v4024_v38 = vadd.f32 %v10886_v41, %v4023_v26  ;;  %v11079_v57 = vld [vmem:[%s12229_s6] ss:$0 sm:$0xff] }
 0x792   : > { %6314 = vmatmul.f32.gmra.mxu3 %v5392_v61  ;;  %7909 = vmatmul.msk.f32.gmra.mxu0 %vm1795_vm1, %v1741_v62 }
 0x793   : > { %v4969_v21 = vpop.f32.mrf.mxu2  ;;  %v4417_v23 = vmax.f32 %v4024_v38, 0.0  ;;  %4070 = vmatmul.f32.gmra.mxu1 %v3436_v22  ;;  %v1744_v38 = vld [vmem:[%s8923_s26 + $0x638] sm:$0xff] }
 0x795   : > { %v6217_v2 = vpop.f32.mrf.mxu3 }
 0x796   : > { %v11039_v53 = vadd.f32 %v6217_v2, %v10837_v28  ;;  %v3077_v28 = vpop.f32.mrf.mxu0  ;;  %v4970_v2 = vadd.f32 %v11079_v57, %v4969_v21 }
 0x797   : > { %v3078_v42 = vadd.f32 %v10787_v4, %v3077_v28 }
 0x798   : > { %5019 = vmatmul.f32.gmra.mxu2 %v4417_v23  ;;  %v4026_v20 = vpop.f32.mrf.mxu1  ;;  %v5397_v23 = vmax.f32 %v4970_v2, 0.0 }
 0x799   : > { %v3437_v54 = vmax.f32 %v3078_v42, 0.0  ;;  %v4027_v35 = vadd.f32 %v10886_v41, %v4026_v20  ;;  %v8106_v20 = vld [vmem:[%s12230_s7 + $0x548] sm:$0xff] }
 0x79a   : > { %6317 = vmatmul.f32.gmra.mxu3 %v5393_v44  ;;  %7910 = vmatmul.msk.f32.gmra.mxu0 %vm1795_vm1, %v1742_v34 }
 0x79b   : > { %v4972_v16 = vpop.f32.mrf.mxu2  ;;  %v4418_v18 = vmax.f32 %v4027_v35, 0.0  ;;  %4073 = vmatmul.f32.gmra.mxu1 %v3437_v54  ;;  %v1745_v35 = vld [vmem:[%s8923_s26 + $0x640] sm:$0xff] }
 0x79d   : > { %v6220_v31 = vpop.f32.mrf.mxu3 }
 0x79e   : > { %v11050_v9 = vadd.f32 %v6220_v31, %v10848_v40  ;;  %v3080_v40 = vpop.f32.mrf.mxu0  ;;  %v4973_v31 = vadd.f32 %v11079_v57, %v4972_v16 }
 0x79f   : > { %v3081_v10 = vadd.f32 %v10787_v4, %v3080_v40 }
 0x7a0   : > { %5022 = vmatmul.f32.gmra.mxu2 %v4418_v18  ;;  %v4029_v46 = vpop.f32.mrf.mxu1  ;;  %v5398_v18 = vmax.f32 %v4973_v31, 0.0  ;;  %v1748_v31 = vld [vmem:[%s8923_s26 + $0x658] sm:$0xff] }
 0x7a1   : > { %v3438_v60 = vmax.f32 %v3081_v10, 0.0  ;;  %v4030_v51 = vadd.f32 %v10886_v41, %v4029_v46  ;;  %v8105_v46 = vld [vmem:[%s12230_s7 + $0x540] sm:$0xff] }
 0x7a2   : > { %6320 = vmatmul.f32.gmra.mxu3 %v5394_v6  ;;  %7911 = vmatmul.msk.f32.gmra.mxu0 %vm1795_vm1, %v1743_v59  ;;  %v8104_v59 = vld [vmem:[%s12230_s7 + $0x538] sm:$0xff] }
 0x7a3   : > { %v4975_v36 = vpop.f32.mrf.mxu2  ;;  %v4419_v56 = vmax.f32 %v4030_v51, 0.0  ;;  %4076 = vmatmul.f32.gmra.mxu1 %v3438_v60 }
 0x7a5   : > { %v6223_v13 = vpop.f32.mrf.mxu3 }
 0x7a6   : > { %v11061_v7 = vadd.f32 %v6223_v13, %v10859_v45  ;;  %v3083_v45 = vpop.f32.mrf.mxu0  ;;  %v4976_v13 = vadd.f32 %v11079_v57, %v4975_v36 }
 0x7a7   : > { %v3084_v50 = vadd.f32 %v10787_v4, %v3083_v45 }
 0x7a8   : > { %5025 = vmatmul.f32.gmra.mxu2 %v4419_v56  ;;  %v4032_v43 = vpop.f32.mrf.mxu1  ;;  %v1746_v56 = vld [vmem:[%s8923_s26 + $0x648] sm:$0xff]  ;;  %v5399_v39 = vmax.f32 %v4976_v13, 0.0 }
 0x7a9   : > { %v3439_v52 = vmax.f32 %v3084_v50, 0.0  ;;  %v4033_v33 = vadd.f32 %v10886_v41, %v4032_v43 }
 0x7aa   : > { %6373 = vmatmul.f32.vlgmr.msrb.gmra.mxu3 %v5395_v55  ;;  %7912 = vmatmul.msk.f32.gmra.mxu0 %vm1795_vm1, %v1744_v38 }
 0x7ab   : > { %v4978_v37 = vpop.f32.mrf.mxu2  ;;  %v4420_v1 = vmax.f32 %v4033_v33, 0.0  ;;  %4079 = vmatmul.f32.gmra.mxu1 %v3439_v52 }
 0x7ac   : > { %v4979_v43 = vadd.f32 %v11079_v57, %v4978_v37 }
 0x7ad   : > { %v6276_v61 = vpop.f32.mrf.mxu3 }
 0x7ae   : > { %v11072_v29 = vadd.f32 %v6276_v61, %v10870_v8  ;;  %v8107_v8 = vld [vmem:[%s12230_s7 + $0x550] sm:$0xff]  ;;  %v3086_v26 = vpop.f32.mrf.mxu0  ;;  %v5400_v2 = vmax.f32 %v4979_v43, 0.0 }
 0x7af   : > { %6460 = vmatpush.msra.mxu3 %v8107_v8  ;;  %v3087_v14 = vadd.f32 %v10787_v4, %v3086_v26  ;;  %v1750_v43 = vld [vmem:[%s8923_s26 + $0x668] sm:$0xff] }
 0x7b0   : > { %5028 = vmatmul.f32.gmra.mxu2 %v4420_v1  ;;  %v4035_v22 = vpop.f32.mrf.mxu1  ;;  %v1747_v1 = vld [vmem:[%s8923_s26 + $0x650] sm:$0xff] }
 0x7b1   : > { %v3440_v15 = vmax.f32 %v3087_v14, 0.0  ;;  %v4036_v21 = vadd.f32 %v10886_v41, %v4035_v22  ;;  %6461 = vmatpush.msra.mxu3 %v8106_v20  ;;  %v8103_v22 = vld [vmem:[%s12230_s7 + $0x530] sm:$0xff] }
 0x7b2   : > { %6376 = vmatmul.f32.gmra.mxu3 %v5396_v12  ;;  %7913 = vmatmul.msk.f32.gmra.mxu0 %vm1795_vm1, %v1745_v35 }
 0x7b3   : > { %v11091_v28 = vpop.f32.mrf.mxu2  ;;  %v4421_v42 = vmax.f32 %v4036_v21, 0.0  ;;  %4082 = vmatmul.f32.gmra.mxu1 %v3440_v15  ;;  %6462 = vmatpush.msra.mxu3 %v8105_v46  ;;  %v1749_v46 = vld [vmem:[%s8923_s26 + $0x660] sm:$0xff] }
 0x7b5   : > { %v6279_v44 = vpop.f32.mrf.mxu3  ;;  %6463 = vmatpush.msra.mxu3 %v8104_v59 }
 0x7b6   : > { %v11088_v3 = vadd.f32 %v6279_v44, %v10881_v58  ;;  %v3089_v58 = vpop.f32.mrf.mxu0  ;;  %v7071_v44 = vld [vmem:[%s12234_s11 + $0x30] sm:$0xff] }
 0x7b7   : > { %v3090_v62 = vadd.f32 %v10787_v4, %v3089_v58  ;;  %7094 = vmatpush.msrb.mxu1 %v7071_v44  ;;  %6464 = vmatpush.msra.mxu3 %v8103_v22 }
 0x7b8   : > { %5031 = vmatmul.f32.gmra.mxu2 %v4421_v42  ;;  %v4038_v54 = vpop.f32.mrf.mxu1 }
 0x7b9   : > { %v3441_v27 = vmax.f32 %v3090_v62, 0.0  ;;  %v4039_v40 = vadd.f32 %v10886_v41, %v4038_v54  ;;  %v7173_v54 = vld [vmem:[%s12236_s13 + $0x38] sm:$0xff] }
 0x7ba   : > { %6379 = vmatmul.f32.gmra.mxu3 %v5397_v23  ;;  %7914 = vmatmul.msk.f32.gmra.mxu0 %vm1795_vm1, %v1746_v56  ;;  %v11147_v23 = vld [vmem:[%s12225_s2] ss:$0 sm:$0xff] }
 0x7bb   : > { %v11104_v16 = vpop.f32.mrf.mxu2  ;;  %v4422_v10 = vmax.f32 %v4039_v40, 0.0  ;;  %4085 = vmatmul.f32.gmra.mxu1 %v3441_v27  ;;  %7194 = vmatpush.msrb.mxu2 %v7173_v54  ;;  %v1752_v54 = vld [vmem:[%s8923_s26 + $0x678] sm:$0xff] }
 0x7bd   : > { %v6282_v6 = vpop.f32.mrf.mxu3 }
 0x7be   : > { %v11101_v48 = vadd.f32 %v6282_v6, %v10897_v5  ;;  %v6969_v5 = vld [vmem:[%s12232_s9 + $0x28] sm:$0xff]  ;;  %v3092_v34 = vpop.f32.mrf.mxu0 }
 0x7bf   : > { %6994 = vmatpush.msrb.mxu0 %v6969_v5  ;;  %v3093_v55 = vadd.f32 %v10787_v4, %v3092_v34 }
 0x7c0   : > { %5034 = vmatmul.f32.gmra.mxu2 %v4422_v10  ;;  %v4041_v51 = vpop.f32.mrf.mxu1 }
 0x7c1   : > { %v3442_v25 = vmax.f32 %v3093_v55, 0.0  ;;  %v4042_v45 = vadd.f32 %v10886_v41, %v4041_v51 }
 0x7c2   : > { %6382 = vmatmul.f32.gmra.mxu3 %v5398_v18  ;;  %7915 = vmatmul.msk.f32.gmra.mxu0 %vm1795_vm1, %v1747_v1  ;;  %v4985_v18 = vadd.f32 %v11079_v57, %v11104_v16 }
 0x7c3   : > { %v11120_v50 = vpop.f32.mrf.mxu2  ;;  %v4423_v61 = vmax.f32 %v4042_v45, 0.0  ;;  %4088 = vmatmul.f32.gmra.mxu1 %v3442_v25 }
 0x7c4   : > { %v5402_v5 = vmax.f32 %v4985_v18, 0.0  ;;  %v4988_v56 = vadd.f32 %v11079_v57, %v11120_v50 }
 0x7c5   : > { %v6285_v60 = vpop.f32.mrf.mxu3 }
 0x7c6   : > { %v11117_v36 = vadd.f32 %v6285_v60, %v10910_v30  ;;  %v3095_v30 = vpop.f32.mrf.mxu0  ;;  %v5403_v59 = vmax.f32 %v4988_v56, 0.0 }
 0x7c7   : > { %v3096_v12 = vadd.f32 %v10787_v4, %v3095_v30 }
 0x7c8   : > { %5037 = vmatmul.f32.gmra.mxu2 %v4423_v61  ;;  %v4044_v33 = vpop.f32.mrf.mxu1 }
 0x7c9   : > { %v3443_v26 = vmax.f32 %v3096_v12, 0.0  ;;  %v4045_v14 = vadd.f32 %v10886_v41, %v4044_v33 }
 0x7ca   : > { %6385 = vmatmul.f32.gmra.mxu3 %v5399_v39  ;;  %7916 = vmatmul.msk.f32.gmra.mxu0 %vm1795_vm1, %v1748_v31  ;;  %v8101_v39 = vld [vmem:[%s12230_s7 + $0x520] sm:$0xff]  ;;  %v8099_v31 = vld [vmem:[%s12230_s7 + $0x510] sm:$0xff] }
 0x7cb   : > { %v11133_v37 = vpop.f32.mrf.mxu2  ;;  %v4424_v4 = vmax.f32 %v4045_v14, 0.0  ;;  %4091 = vmatmul.f32.gmra.mxu1 %v3443_v26 }
 0x7cc   : > { %v4991_v1 = vadd.f32 %v11079_v57, %v11133_v37 }
 0x7cd   : > { %v6288_v52 = vpop.f32.mrf.mxu3 }
 0x7ce   : > { %v11130_v8 = vadd.f32 %v6288_v52, %v10926_v47  ;;  %v4982_v47 = vadd.f32 %v11079_v57, %v11091_v28  ;;  %v3098_v38 = vpop.f32.mrf.mxu0 }
 0x7cf   : > { %v3099_v15 = vadd.f32 %v11147_v23, %v3098_v38 }
 0x7d0   : > { %5040 = vmatmul.f32.gmra.mxu2 %v4424_v4  ;;  %v4047_v42 = vpop.f32.mrf.mxu1  ;;  %v5401_v20 = vmax.f32 %v4982_v47, 0.0  ;;  %v1751_v4 = vld [vmem:[%s8923_s26 + $0x670] sm:$0xff]  ;;  %v5404_v47 = vmax.f32 %v4991_v1, 0.0 }
 0x7d1   : > { %v3444_v58 = vmax.f32 %v3099_v15, 0.0  ;;  %v4048_v62 = vadd.f32 %v10886_v41, %v4047_v42 }
 0x7d2   : > { %6388 = vmatmul.f32.gmra.mxu3 %v5400_v2  ;;  %7917 = vmatmul.msk.f32.gmra.mxu0 %vm1795_vm1, %v1749_v46  ;;  %v8100_v2 = vld [vmem:[%s12230_s7 + $0x518] sm:$0xff] }
 0x7d3   : > { %v4993_v6 = vpop.f32.mrf.mxu2  ;;  %v4425_v35 = vmax.f32 %v4048_v62, 0.0  ;;  %4094 = vmatmul.f32.gmra.mxu1 %v3444_v58 }
 0x7d4   : > { %v4994_v42 = vadd.f32 %v11079_v57, %v4993_v6 }
 0x7d5   : > { %v6291_v21 = vpop.f32.mrf.mxu3 }
 0x7d6   : > { %v11152_v28 = vadd.f32 %v6291_v21, %v10939_v32  ;;  %v8102_v32 = vld [vmem:[%s12230_s7 + $0x528] sm:$0xff]  ;;  %v3101_v27 = vpop.f32.mrf.mxu0 }
 0x7d7   : > { %6465 = vmatpush.msra.mxu3 %v8102_v32  ;;  %v3102_v40 = vadd.f32 %v11147_v23, %v3101_v27 }
 0x7d8   : > { %5043 = vmatmul.f32.gmra.mxu2 %v4425_v35  ;;  %v4050_v13 = vpop.f32.mrf.mxu1  ;;  %v5405_v35 = vmax.f32 %v4994_v42, 0.0 }
 0x7d9   : > { %v3445_v55 = vmax.f32 %v3102_v40, 0.0  ;;  %v4051_v16 = vadd.f32 %v10886_v41, %v4050_v13  ;;  %6466 = vmatpush.msra.mxu3 %v8101_v39  ;;  %v8098_v13 = vld [vmem:[%s12230_s7 + $0x508] sm:$0xff] }
 0x7da   : > { %6391 = vmatmul.f32.gmra.mxu3 %v5401_v20  ;;  %7918 = vmatmul.msk.f32.gmra.mxu0 %vm1795_vm1, %v1750_v43 }
 0x7db   : > { %v4996_v60 = vpop.f32.mrf.mxu2  ;;  %v4426_v51 = vmax.f32 %v4051_v16, 0.0  ;;  %4097 = vmatmul.f32.gmra.mxu1 %v3445_v55  ;;  %6467 = vmatpush.msra.mxu3 %v8100_v2  ;;  %v1753_v16 = vld [vmem:[%s8923_s26 + $0x680] sm:$0xff] }
 0x7dd   : > { %v6294_v10 = vpop.f32.mrf.mxu3  ;;  %6468 = vmatpush.msra.mxu3 %v8099_v31 }
 0x7de   : > { %v11167_v34 = vadd.f32 %v6294_v10, %v10956_v63  ;;  %v3104_v63 = vpop.f32.mrf.mxu0  ;;  %v4997_v10 = vadd.f32 %v11079_v57, %v4996_v60 }
 0x7df   : > { %v3105_v25 = vadd.f32 %v11147_v23, %v3104_v63  ;;  %6469 = vmatpush.msra.mxu3 %v8098_v13 }
 0x7e0   : > { %5046 = vmatmul.f32.gmra.mxu2 %v4426_v51  ;;  %v4053_v61 = vpop.f32.mrf.mxu1  ;;  %v5406_v51 = vmax.f32 %v4997_v10, 0.0 }
 0x7e1   : > { %v3446_v12 = vmax.f32 %v3105_v25, 0.0  ;;  %v4054_v50 = vadd.f32 %v10886_v41, %v4053_v61  ;;  %v8097_v61 = vld [vmem:[%s12230_s7 + $0x500] sm:$0xff] }
 0x7e2   : > { %6394 = vmatmul.f32.gmra.mxu3 %v5402_v5  ;;  %7919 = vmatmul.msk.f32.gmra.mxu0 %vm1795_vm1, %v1751_v4 }
 0x7e3   : > { %v4999_v52 = vpop.f32.mrf.mxu2  ;;  %v4427_v33 = vmax.f32 %v4054_v50, 0.0  ;;  %4100 = vmatmul.f32.gmra.mxu1 %v3446_v12  ;;  %6470 = vmatpush.msra.mxu3 %v8097_v61  ;;  %v1754_v50 = vld [vmem:[%s8923_s26 + $0x688] sm:$0xff] }
 0x7e5   : > { %v6297_v45 = vpop.f32.mrf.mxu3 }
 0x7e6   : > { %v11179_v30 = vadd.f32 %v6297_v45, %v10971_v11  ;;  %v3107_v11 = vpop.f32.mrf.mxu0  ;;  %v5000_v45 = vadd.f32 %v11079_v57, %v4999_v52 }
 0x7e7   : > { %v3108_v26 = vadd.f32 %v11147_v23, %v3107_v11 }
 0x7e8   : > { %5049 = vmatmul.f32.gmra.mxu2 %v4427_v33  ;;  %v4056_v44 = vpop.f32.mrf.mxu1  ;;  %v5407_v33 = vmax.f32 %v5000_v45, 0.0 }
 0x7e9   : > { %v3447_v38 = vmax.f32 %v3108_v26, 0.0  ;;  %v4057_v37 = vadd.f32 %v10886_v41, %v4056_v44  ;;  %v8128_v44 = vld [vmem:[%s12230_s7 + $0x5f8] sm:$0xff] }
 0x7ea   : > { %6397 = vmatmul.f32.gmra.mxu3 %v5403_v59  ;;  %7920 = vmatmul.msk.f32.gmra.mxu0 %vm1795_vm1, %v1752_v54 }
 0x7eb   : > { %v5002_v15 = vpop.f32.mrf.mxu2  ;;  %v4428_v21 = vmax.f32 %v4057_v37, 0.0  ;;  %4103 = vmatmul.f32.gmra.mxu1 %v3447_v38  ;;  %6553 = vmatpush.msrb.mxu3 %v8128_v44  ;;  %v1755_v37 = vld [vmem:[%s8923_s26 + $0x690] sm:$0xff] }
 0x7ed   : > { %v6300_v14 = vpop.f32.mrf.mxu3 }
 0x7ee   : > { %v11191_v22 = vadd.f32 %v6300_v14, %v10983_v17  ;;  %v3110_v17 = vpop.f32.mrf.mxu0  ;;  %v5003_v14 = vadd.f32 %v11079_v57, %v5002_v15 }
 0x7ef   : > { %v3111_v20 = vadd.f32 %v11147_v23, %v3110_v17 }
 0x7f0   : > { %5052 = vmatmul.f32.gmra.mxu2 %v4428_v21  ;;  %v4059_v62 = vpop.f32.mrf.mxu1  ;;  %v5408_v21 = vmax.f32 %v5003_v14, 0.0 }
 0x7f1   : > { %v3448_v32 = vmax.f32 %v3111_v20, 0.0  ;;  %v4060_v6 = vadd.f32 %v10886_v41, %v4059_v62  ;;  %v8127_v62 = vld [vmem:[%s12230_s7 + $0x5f0] sm:$0xff] }
 0x7f2   : > { %6400 = vmatmul.f32.gmra.mxu3 %v5404_v47  ;;  %7921 = vmatmul.msk.f32.gmra.mxu0 %vm1795_vm1, %v1753_v16 }
 0x7f3   : > { %v5005_v27 = vpop.f32.mrf.mxu2  ;;  %v4429_v40 = vmax.f32 %v4060_v6, 0.0  ;;  %4106 = vmatmul.f32.gmra.mxu1 %v3448_v32  ;;  %6554 = vmatpush.msrb.mxu3 %v8127_v62 }
 0x7f5   : > { %v6303_v58 = vpop.f32.mrf.mxu3 }
 0x7f6   : > { %v11202_v18 = vadd.f32 %v6303_v58, %v10995_v49  ;;  %v3113_v49 = vpop.f32.mrf.mxu0  ;;  %v5006_v58 = vadd.f32 %v11079_v57, %v5005_v27  ;;  %v11251_v27 = vld [vmem:[%s12227_s4] ss:$0 sm:$0xff] }
 0x7f7   : > { %v3114_v46 = vadd.f32 %v11147_v23, %v3113_v49 }
 0x7f8   : > { %5055 = vmatmul.f32.gmra.mxu2 %v4429_v40  ;;  %v4062_v55 = vpop.f32.mrf.mxu1  ;;  %v5409_v6 = vmax.f32 %v5006_v58, 0.0 }
 0x7f9   : > { %v3449_v39 = vmax.f32 %v3114_v46, 0.0  ;;  %v4063_v60 = vadd.f32 %v10886_v41, %v4062_v55 }
 0x7fa   : > { %6403 = vmatmul.f32.gmra.mxu3 %v5405_v35  ;;  %7922 = vmatmul.msk.f32.gmra.mxu0 %vm1795_vm1, %v1754_v50 }
 0x7fb   : > { %v5008_v63 = vpop.f32.mrf.mxu2  ;;  %v4430_v25 = vmax.f32 %v4063_v60, 0.0  ;;  %4109 = vmatmul.f32.gmra.mxu1 %v3449_v39  ;;  %v1757_v60 = vld [vmem:[%s8923_s26 + $0x6a0] sm:$0xff] }
 0x7fd   : > { %v6306_v5 = vpop.f32.mrf.mxu3 }
 0x7fe   : > { %v11213_v56 = vadd.f32 %v6306_v5, %v11006_v0  ;;  %v3116_v0 = vpop.f32.mrf.mxu0  ;;  %v5009_v5 = vadd.f32 %v11079_v57, %v5008_v63 }
 0x7ff   : > { %v3117_v43 = vadd.f32 %v11147_v23, %v3116_v0 }
 0x800   : > { %5058 = vmatmul.f32.gmra.mxu2 %v4430_v25  ;;  %v4065_v12 = vpop.f32.mrf.mxu1  ;;  %v5410_v25 = vmax.f32 %v5009_v5, 0.0 }
 0x801   : > { %v3450_v2 = vmax.f32 %v3117_v43, 0.0  ;;  %v4066_v52 = vadd.f32 %v10886_v41, %v4065_v12  ;;  %v8125_v12 = vld [vmem:[%s12230_s7 + $0x5e0] sm:$0xff] }
 0x802   : > { %6406 = vmatmul.f32.gmra.mxu3 %v5406_v51  ;;  %7923 = vmatmul.msk.f32.gmra.mxu0 %vm1795_vm1, %v1755_v37 }
 0x803   : > { %v5011_v11 = vpop.f32.mrf.mxu2  ;;  %v4431_v26 = vmax.f32 %v4066_v52, 0.0  ;;  %4112 = vmatmul.f32.gmra.mxu1 %v3450_v2  ;;  %v1758_v52 = vld [vmem:[%s8923_s26 + $0x6a8] sm:$0xff] }
 0x805   : > { %v6309_v59 = vpop.f32.mrf.mxu3 }
 0x806   : > { %v11224_v1 = vadd.f32 %v6309_v59, %v11017_v24  ;;  %v3119_v24 = vpop.f32.mrf.mxu0  ;;  %v5012_v59 = vadd.f32 %v11079_v57, %v5011_v11 }
 0x807   : > { %v3120_v4 = vadd.f32 %v11147_v23, %v3119_v24 }
 0x808   : > { %5061 = vmatmul.f32.gmra.mxu2 %v4431_v26  ;;  %v4068_v38 = vpop.f32.mrf.mxu1  ;;  %v5411_v26 = vmax.f32 %v5012_v59, 0.0 }
 0x809   : > { %v3451_v31 = vmax.f32 %v3120_v4, 0.0  ;;  %v4069_v15 = vadd.f32 %v10886_v41, %v4068_v38  ;;  %v1756_v41 = vld [vmem:[%s8923_s26 + $0x698] sm:$0xff] }
 0x80a   : > { %6409 = vmatmul.f32.gmra.mxu3 %v5407_v33  ;;  %7924 = vmatmul.msk.f32.gmra.mxu0 %vm1795_vm1, %v1756_v41  ;;  %v8124_v38 = vld [vmem:[%s12230_s7 + $0x5d8] sm:$0xff] }
 0x80b   : > { %v5014_v17 = vpop.f32.mrf.mxu2  ;;  %v4432_v20 = vmax.f32 %v4069_v15, 0.0  ;;  %4115 = vmatmul.f32.gmra.mxu1 %v3451_v31  ;;  %v1759_v15 = vld [vmem:[%s8923_s26 + $0x6b0] sm:$0xff] }
 0x80d   : > { %v6312_v47 = vpop.f32.mrf.mxu3 }
 0x80e   : > { %v11235_v42 = vadd.f32 %v6312_v47, %v11028_v19  ;;  %v3122_v19 = vpop.f32.mrf.mxu0  ;;  %v5015_v47 = vadd.f32 %v11079_v57, %v5014_v17 }
 0x80f   : > { %v3123_v54 = vadd.f32 %v11147_v23, %v3122_v19 }
 0x810   : > { %5064 = vmatmul.f32.gmra.mxu2 %v4432_v20  ;;  %v4071_v32 = vpop.f32.mrf.mxu1  ;;  %v5412_v20 = vmax.f32 %v5015_v47, 0.0 }
 0x811   : > { %v3452_v10 = vmax.f32 %v3123_v54, 0.0  ;;  %v4072_v13 = vadd.f32 %v11251_v27, %v4071_v32  ;;  %v8123_v32 = vld [vmem:[%s12230_s7 + $0x5d0] sm:$0xff] }
 0x812   : > { %6412 = vmatmul.f32.gmra.mxu3 %v5408_v21  ;;  %7925 = vmatmul.msk.f32.gmra.mxu0 %vm1795_vm1, %v1757_v60 }
 0x813   : > { %v5017_v49 = vpop.f32.mrf.mxu2  ;;  %v4433_v46 = vmax.f32 %v4072_v13, 0.0  ;;  %4118 = vmatmul.f32.gmra.mxu1 %v3452_v10  ;;  %v1760_v13 = vld [vmem:[%s8923_s26 + $0x6b8] sm:$0xff] }
 0x815   : > { %v6315_v35 = vpop.f32.mrf.mxu3 }
 0x816   : > { %v11246_v40 = vadd.f32 %v6315_v35, %v11039_v53  ;;  %v8126_v53 = vld [vmem:[%s12230_s7 + $0x5e8] sm:$0xff]  ;;  %v3125_v55 = vpop.f32.mrf.mxu0  ;;  %v5018_v35 = vadd.f32 %v11079_v57, %v5017_v49 }
 0x817   : > { %6555 = vmatpush.msrb.mxu3 %v8126_v53  ;;  %v3126_v16 = vadd.f32 %v11147_v23, %v3125_v55 }
 0x818   : > { %5067 = vmatmul.f32.gmra.mxu2 %v4433_v46  ;;  %v4074_v39 = vpop.f32.mrf.mxu1  ;;  %v5413_v46 = vmax.f32 %v5018_v35, 0.0  ;;  %v1763_v35 = vld [vmem:[%s8923_s26 + $0x6d0] sm:$0xff] }
 0x819   : > { %v3453_v61 = vmax.f32 %v3126_v16, 0.0  ;;  %v4075_v63 = vadd.f32 %v11251_v27, %v4074_v39  ;;  %6556 = vmatpush.msrb.mxu3 %v8125_v12  ;;  %v8122_v39 = vld [vmem:[%s12230_s7 + $0x5c8] sm:$0xff] }
 0x81a   : > { %6415 = vmatmul.f32.gmra.mxu3 %v5409_v6  ;;  %7926 = vmatmul.msk.f32.gmra.mxu0 %vm1795_vm1, %v1758_v52  ;;  %v8121_v52 = vld [vmem:[%s12230_s7 + $0x5c0] sm:$0xff] }
 0x81b   : > { %v5020_v0 = vpop.f32.mrf.mxu2  ;;  %v4434_v43 = vmax.f32 %v4075_v63, 0.0  ;;  %4121 = vmatmul.f32.gmra.mxu1 %v3453_v61  ;;  %6557 = vmatpush.msrb.mxu3 %v8124_v38 }
 0x81d   : > { %v6318_v51 = vpop.f32.mrf.mxu3  ;;  %6558 = vmatpush.msrb.mxu3 %v8123_v32 }
 0x81e   : > { %v11262_v45 = vadd.f32 %v6318_v51, %v11050_v9  ;;  %v3128_v9 = vpop.f32.mrf.mxu0  ;;  %v5021_v51 = vadd.f32 %v11079_v57, %v5020_v0 }
 0x81f   : > { %v3129_v50 = vadd.f32 %v11147_v23, %v3128_v9  ;;  %6559 = vmatpush.msrb.mxu3 %v8122_v39  ;;  %v1764_v39 = vld [vmem:[%s8923_s26 + $0x6d8] sm:$0xff] }
 0x820   : > { %5070 = vmatmul.f32.gmra.mxu2 %v4434_v43  ;;  %v4077_v2 = vpop.f32.mrf.mxu1  ;;  %v1761_v43 = vld [vmem:[%s8923_s26 + $0x6c0] sm:$0xff]  ;;  %v5414_v59 = vmax.f32 %v5021_v51, 0.0 }
 0x821   : > { %v3454_v44 = vmax.f32 %v3129_v50, 0.0  ;;  %v4078_v11 = vadd.f32 %v11251_v27, %v4077_v2  ;;  %6560 = vmatpush.msrb.mxu3 %v8121_v52 }
 0x822   : > { %6418 = vmatmul.f32.gmra.mxu3 %v5410_v25  ;;  %7927 = vmatmul.msk.f32.gmra.mxu0 %vm1795_vm1, %v1759_v15  ;;  %v8120_v15 = vld [vmem:[%s12230_s7 + $0x5b8] sm:$0xff] }
 0x823   : > { %v5023_v24 = vpop.f32.mrf.mxu2  ;;  %v4435_v4 = vmax.f32 %v4078_v11, 0.0  ;;  %4124 = vmatmul.f32.gmra.mxu1 %v3454_v44  ;;  %6561 = vmatpush.msrb.mxu3 %v8120_v15 }
 0x824   : > { %v5024_v2 = vadd.f32 %v11079_v57, %v5023_v24 }
 0x825   : > { %v6321_v33 = vpop.f32.mrf.mxu3 }
 0x826   : > { %v11273_v14 = vadd.f32 %v6321_v33, %v11061_v7  ;;  %v3131_v7 = vpop.f32.mrf.mxu0  ;;  %v5415_v47 = vmax.f32 %v5024_v2, 0.0  ;;  %v1765_v2 = vld [vmem:[%s8923_s26 + $0x6e0] sm:$0xff] }
 0x827   : > { %v3132_v37 = vadd.f32 %v11147_v23, %v3131_v7 }
 0x828   : > { %5073 = vmatmul.f32.gmra.mxu2 %v4435_v4  ;;  %v4080_v31 = vpop.f32.mrf.mxu1  ;;  %v1762_v4 = vld [vmem:[%s8923_s26 + $0x6c8] sm:$0xff] }
 0x829   : > { %v3455_v62 = vmax.f32 %v3132_v37, 0.0  ;;  %v4081_v17 = vadd.f32 %v11251_v27, %v4080_v31 }
 0x82a   : > { %6471 = vmatmul.f32.vlgmr.msra.gmra.mxu3 %v5411_v26  ;;  %7928 = vmatmul.msk.f32.gmra.mxu0 %vm1795_vm1, %v1760_v13 }
 0x82b   : > { %v11287_v19 = vpop.f32.mrf.mxu2  ;;  %v4436_v54 = vmax.f32 %v4081_v17, 0.0  ;;  %4127 = vmatmul.f32.gmra.mxu1 %v3455_v62 }
 0x82d   : > { %v6374_v21 = vpop.f32.mrf.mxu3 }
 0x82e   : > { %v11284_v58 = vadd.f32 %v6374_v21, %v11072_v29  ;;  %v3134_v29 = vpop.f32.mrf.mxu0  ;;  %v7070_v21 = vld [vmem:[%s12234_s11 + $0x28] sm:$0xff] }
 0x82f   : > { %v3135_v41 = vadd.f32 %v11147_v23, %v3134_v29  ;;  %7095 = vmatpush.msrb.mxu1 %v7070_v21 }
 0x830   : > { %5076 = vmatmul.f32.gmra.mxu2 %v4436_v54  ;;  %v4083_v10 = vpop.f32.mrf.mxu1 }
 0x831   : > { %v3456_v53 = vmax.f32 %v3135_v41, 0.0  ;;  %v4084_v55 = vadd.f32 %v11251_v27, %v4083_v10  ;;  %v7172_v10 = vld [vmem:[%s12236_s13 + $0x30] sm:$0xff] }
 0x832   : > { %6474 = vmatmul.f32.gmra.mxu3 %v5412_v20  ;;  %7929 = vmatmul.msk.f32.gmra.mxu0 %vm1795_vm1, %v1761_v43 }
 0x833   : > { %v11300_v49 = vpop.f32.mrf.mxu2  ;;  %v4437_v16 = vmax.f32 %v4084_v55, 0.0  ;;  %4130 = vmatmul.f32.gmra.mxu1 %v3456_v53  ;;  %7195 = vmatpush.msrb.mxu2 %v7172_v10  ;;  %v1767_v10 = vld [vmem:[%s8923_s26 + $0x6f0] sm:$0xff] }
 0x835   : > { %v6377_v6 = vpop.f32.mrf.mxu3 }
 0x836   : > { %v11297_v5 = vadd.f32 %v6377_v6, %v11088_v3  ;;  %v6968_v3 = vld [vmem:[%s12232_s9 + $0x20] sm:$0xff]  ;;  %v3137_v60 = vpop.f32.mrf.mxu0 }
 0x837   : > { %6995 = vmatpush.msrb.mxu0 %v6968_v3  ;;  %v3138_v25 = vadd.f32 %v11147_v23, %v3137_v60 }
 0x838   : > { %5079 = vmatmul.f32.gmra.mxu2 %v4437_v16  ;;  %v4086_v63 = vpop.f32.mrf.mxu1 }
 0x839   : > { %v3457_v12 = vmax.f32 %v3138_v25, 0.0  ;;  %v4087_v9 = vadd.f32 %v11251_v27, %v4086_v63 }
 0x83a   : > { %6477 = vmatmul.f32.gmra.mxu3 %v5413_v46  ;;  %7930 = vmatmul.msk.f32.gmra.mxu0 %vm1795_vm1, %v1762_v4  ;;  %v5030_v46 = vadd.f32 %v11079_v57, %v11300_v49 }
 0x83b   : > { %v11316_v50 = vpop.f32.mrf.mxu2  ;;  %v4438_v33 = vmax.f32 %v4087_v9, 0.0  ;;  %4133 = vmatmul.f32.gmra.mxu1 %v3457_v12 }
 0x83c   : > { %v5417_v3 = vmax.f32 %v5030_v46, 0.0  ;;  %v5033_v43 = vadd.f32 %v11079_v57, %v11316_v50 }
 0x83d   : > { %v6380_v61 = vpop.f32.mrf.mxu3 }
 0x83e   : > { %v11313_v0 = vadd.f32 %v6380_v61, %v11101_v48  ;;  %v3140_v48 = vpop.f32.mrf.mxu0  ;;  %v5418_v52 = vmax.f32 %v5033_v43, 0.0 }
 0x83f   : > { %v3141_v26 = vadd.f32 %v11147_v23, %v3140_v48 }
 0x840   : > { %5082 = vmatmul.f32.gmra.mxu2 %v4438_v33  ;;  %v4089_v11 = vpop.f32.mrf.mxu1 }
 0x841   : > { %v3458_v7 = vmax.f32 %v3141_v26, 0.0  ;;  %v4090_v37 = vadd.f32 %v11251_v27, %v4089_v11 }
 0x842   : > { %6480 = vmatmul.f32.gmra.mxu3 %v5414_v59  ;;  %7931 = vmatmul.msk.f32.gmra.mxu0 %vm1795_vm1, %v1763_v35  ;;  %v8118_v59 = vld [vmem:[%s12230_s7 + $0x5a8] sm:$0xff]  ;;  %v8116_v35 = vld [vmem:[%s12230_s7 + $0x598] sm:$0xff] }
 0x843   : > { %v11329_v24 = vpop.f32.mrf.mxu2  ;;  %v4439_v31 = vmax.f32 %v4090_v37, 0.0  ;;  %4136 = vmatmul.f32.gmra.mxu1 %v3458_v7 }
 0x844   : > { %v5036_v4 = vadd.f32 %v11079_v57, %v11329_v24 }
 0x845   : > { %v6383_v44 = vpop.f32.mrf.mxu3 }
 0x846   : > { %v11326_v38 = vadd.f32 %v6383_v44, %v11117_v36  ;;  %v5027_v36 = vadd.f32 %v11079_v57, %v11287_v19  ;;  %v3143_v20 = vpop.f32.mrf.mxu0 }
 0x847   : > { %v3144_v62 = vadd.f32 %v11147_v23, %v3143_v20 }
 0x848   : > { %5085 = vmatmul.f32.gmra.mxu2 %v4439_v31  ;;  %v4092_v54 = vpop.f32.mrf.mxu1  ;;  %v5416_v32 = vmax.f32 %v5027_v36, 0.0  ;;  %v1766_v31 = vld [vmem:[%s8923_s26 + $0x6e8] sm:$0xff]  ;;  %v5419_v36 = vmax.f32 %v5036_v4, 0.0 }
 0x849   : > { %v3459_v41 = vmax.f32 %v3144_v62, 0.0  ;;  %v4093_v6 = vadd.f32 %v11251_v27, %v4092_v54 }
 0x84a   : > { %6483 = vmatmul.f32.gmra.mxu3 %v5415_v47  ;;  %7932 = vmatmul.msk.f32.gmra.mxu0 %vm1795_vm1, %v1764_v39  ;;  %v8117_v47 = vld [vmem:[%s12230_s7 + $0x5a0] sm:$0xff] }
 0x84b   : > { %v5038_v19 = vpop.f32.mrf.mxu2  ;;  %v4440_v13 = vmax.f32 %v4093_v6, 0.0  ;;  %4139 = vmatmul.f32.gmra.mxu1 %v3459_v41 }
 0x84c   : > { %v5039_v54 = vadd.f32 %v11079_v57, %v5038_v19 }
 0x84d   : > { %v6386_v17 = vpop.f32.mrf.mxu3 }
 0x84e   : > { %v11343_v29 = vadd.f32 %v6386_v17, %v11130_v8  ;;  %v8119_v8 = vld [vmem:[%s12230_s7 + $0x5b0] sm:$0xff]  ;;  %v3146_v53 = vpop.f32.mrf.mxu0 }
 0x84f   : > { %6562 = vmatpush.msrb.mxu3 %v8119_v8  ;;  %v3147_v55 = vadd.f32 %v11147_v23, %v3146_v53 }
 0x850   : > { %5088 = vmatmul.f32.gmra.mxu2 %v4440_v13  ;;  %v4095_v51 = vpop.f32.mrf.mxu1  ;;  %v5420_v13 = vmax.f32 %v5039_v54, 0.0 }
 0x851   : > { %v3460_v25 = vmax.f32 %v3147_v55, 0.0  ;;  %v4096_v49 = vadd.f32 %v11251_v27, %v4095_v51  ;;  %6563 = vmatpush.msrb.mxu3 %v8118_v59  ;;  %v8115_v51 = vld [vmem:[%s12230_s7 + $0x590] sm:$0xff] }
 0x852   : > { %6486 = vmatmul.f32.gmra.mxu3 %v5416_v32  ;;  %7933 = vmatmul.msk.f32.gmra.mxu0 %vm1795_vm1, %v1765_v2 }
 0x853   : > { %v5041_v61 = vpop.f32.mrf.mxu2  ;;  %v4441_v63 = vmax.f32 %v4096_v49, 0.0  ;;  %4142 = vmatmul.f32.gmra.mxu1 %v3460_v25  ;;  %6564 = vmatpush.msrb.mxu3 %v8117_v47  ;;  %v1768_v49 = vld [vmem:[%s8923_s26 + $0x6f8] sm:$0xff] }
 0x855   : > { %v6389_v16 = vpop.f32.mrf.mxu3  ;;  %6565 = vmatpush.msrb.mxu3 %v8116_v35 }
 0x856   : > { %v11358_v60 = vadd.f32 %v6389_v16, %v11152_v28  ;;  %v3149_v28 = vpop.f32.mrf.mxu0  ;;  %v5042_v16 = vadd.f32 %v11079_v57, %v5041_v61 }
 0x857   : > { %v3150_v12 = vadd.f32 %v11147_v23, %v3149_v28  ;;  %6566 = vmatpush.msrb.mxu3 %v8115_v51 }
 0x858   : > { %5091 = vmatmul.f32.gmra.mxu2 %v4441_v63  ;;  %v4098_v33 = vpop.f32.mrf.mxu1  ;;  %v5421_v63 = vmax.f32 %v5042_v16, 0.0 }
 0x859   : > { %v3461_v26 = vmax.f32 %v3150_v12, 0.0  ;;  %v4099_v50 = vadd.f32 %v11251_v27, %v4098_v33  ;;  %v8114_v33 = vld [vmem:[%s12230_s7 + $0x588] sm:$0xff] }
 0x85a   : > { %6489 = vmatmul.f32.gmra.mxu3 %v5417_v3  ;;  %7934 = vmatmul.msk.f32.gmra.mxu0 %vm1795_vm1, %v1766_v31 }
 0x85b   : > { %v5044_v44 = vpop.f32.mrf.mxu2  ;;  %v4442_v11 = vmax.f32 %v4099_v50, 0.0  ;;  %4145 = vmatmul.f32.gmra.mxu1 %v3461_v26  ;;  %6567 = vmatpush.msrb.mxu3 %v8114_v33  ;;  %v1769_v50 = vld [vmem:[%s8923_s26 + $0x700] sm:$0xff] }
 0x85d   : > { %v6392_v9 = vpop.f32.mrf.mxu3 }
 0x85e   : > { %v11370_v48 = vadd.f32 %v6392_v9, %v11167_v34  ;;  %v3152_v34 = vpop.f32.mrf.mxu0  ;;  %v5045_v9 = vadd.f32 %v11079_v57, %v5044_v44 }
 0x85f   : > { %v3153_v7 = vadd.f32 %v11147_v23, %v3152_v34 }
 0x860   : > { %5094 = vmatmul.f32.gmra.mxu2 %v4442_v11  ;;  %v4101_v21 = vpop.f32.mrf.mxu1  ;;  %v5422_v11 = vmax.f32 %v5045_v9, 0.0 }
 0x861   : > { %v3462_v20 = vmax.f32 %v3153_v7, 0.0  ;;  %v4102_v24 = vadd.f32 %v11251_v27, %v4101_v21  ;;  %v8113_v21 = vld [vmem:[%s12230_s7 + $0x580] sm:$0xff] }
 0x862   : > { %6492 = vmatmul.f32.gmra.mxu3 %v5418_v52  ;;  %7935 = vmatmul.msk.f32.gmra.mxu0 %vm1795_vm1, %v1767_v10 }
 0x863   : > { %v5047_v62 = vpop.f32.mrf.mxu2  ;;  %v4443_v17 = vmax.f32 %v4102_v24, 0.0  ;;  %4148 = vmatmul.f32.gmra.mxu1 %v3462_v20  ;;  %6568 = vmatpush.msrb.mxu3 %v8113_v21  ;;  %v1770_v24 = vld [vmem:[%s8923_s26 + $0x708] sm:$0xff] }
 0x865   : > { %v6395_v37 = vpop.f32.mrf.mxu3 }
 0x866   : > { %v11382_v15 = vadd.f32 %v6395_v37, %v11179_v30  ;;  %v3155_v30 = vpop.f32.mrf.mxu0  ;;  %v5048_v37 = vadd.f32 %v11079_v57, %v5047_v62 }
 0x867   : > { %v3156_v32 = vadd.f32 %v11147_v23, %v3155_v30 }
 0x868   : > { %5097 = vmatmul.f32.gmra.mxu2 %v4443_v17  ;;  %v4104_v6 = vpop.f32.mrf.mxu1  ;;  %v5423_v17 = vmax.f32 %v5048_v37, 0.0 }
 0x869   : > { %v3463_v8 = vmax.f32 %v3156_v32, 0.0  ;;  %v4105_v19 = vadd.f32 %v11251_v27, %v4104_v6  ;;  %v8144_v6 = vld [vmem:[%s12230_s7 + $0x678] sm:$0xff] }
 0x86a   : > { %6495 = vmatmul.f32.gmra.mxu3 %v5419_v36  ;;  %7936 = vmatmul.msk.f32.gmra.mxu0 %vm1795_vm1, %v1768_v49 }
 0x86b   : > { %v5050_v53 = vpop.f32.mrf.mxu2  ;;  %v4444_v55 = vmax.f32 %v4105_v19, 0.0  ;;  %4151 = vmatmul.f32.gmra.mxu1 %v3463_v8  ;;  %6651 = vmatpush.msra.mxu3 %v8144_v6  ;;  %v1771_v19 = vld [vmem:[%s8923_s26 + $0x710] sm:$0xff] }
 0x86d   : > { %v6398_v41 = vpop.f32.mrf.mxu3 }
 0x86e   : > { %v11393_v46 = vadd.f32 %v6398_v41, %v11191_v22  ;;  %v3158_v22 = vpop.f32.mrf.mxu0  ;;  %v5051_v41 = vadd.f32 %v11079_v57, %v5050_v53 }
 0x86f   : > { %v3159_v39 = vadd.f32 %v11147_v23, %v3158_v22 }
 0x870   : > { %5100 = vmatmul.f32.gmra.mxu2 %v4444_v55  ;;  %v4107_v25 = vpop.f32.mrf.mxu1  ;;  %v5424_v55 = vmax.f32 %v5051_v41, 0.0 }
 0x871   : > { %v3464_v59 = vmax.f32 %v3159_v39, 0.0  ;;  %v4108_v61 = vadd.f32 %v11251_v27, %v4107_v25  ;;  %v11444_v39 = vld [vmem:[%s12229_s6] ss:$0 sm:$0xff] }
 0x872   : > { %6498 = vmatmul.f32.gmra.mxu3 %v5420_v13  ;;  %7937 = vmatmul.msk.f32.gmra.mxu0 %vm1795_vm1, %v1769_v50 }
 0x873   : > { %v5053_v28 = vpop.f32.mrf.mxu2  ;;  %v4445_v12 = vmax.f32 %v4108_v61, 0.0  ;;  %4154 = vmatmul.f32.gmra.mxu1 %v3464_v59  ;;  %v1772_v61 = vld [vmem:[%s8923_s26 + $0x718] sm:$0xff] }
 0x875   : > { %v6401_v3 = vpop.f32.mrf.mxu3 }
 0x876   : > { %v11404_v43 = vadd.f32 %v6401_v3, %v11202_v18  ;;  %v3161_v18 = vpop.f32.mrf.mxu0  ;;  %v5054_v3 = vadd.f32 %v11444_v39, %v5053_v28 }
 0x877   : > { %v3162_v2 = vadd.f32 %v11147_v23, %v3161_v18 }
 0x878   : > { %5103 = vmatmul.f32.gmra.mxu2 %v4445_v12  ;;  %v4110_v26 = vpop.f32.mrf.mxu1  ;;  %v5425_v12 = vmax.f32 %v5054_v3, 0.0 }
 0x879   : > { %v3465_v47 = vmax.f32 %v3162_v2, 0.0  ;;  %v4111_v44 = vadd.f32 %v11251_v27, %v4110_v26  ;;  %v8142_v26 = vld [vmem:[%s12230_s7 + $0x668] sm:$0xff] }
 0x87a   : > { %6501 = vmatmul.f32.gmra.mxu3 %v5421_v63  ;;  %7938 = vmatmul.msk.f32.gmra.mxu0 %vm1795_vm1, %v1770_v24 }
 0x87b   : > { %v5056_v34 = vpop.f32.mrf.mxu2  ;;  %v4446_v7 = vmax.f32 %v4111_v44, 0.0  ;;  %4157 = vmatmul.f32.gmra.mxu1 %v3465_v47  ;;  %v1773_v44 = vld [vmem:[%s8923_s26 + $0x720] sm:$0xff] }
 0x87d   : > { %v6404_v52 = vpop.f32.mrf.mxu3 }
 0x87e   : > { %v11415_v4 = vadd.f32 %v6404_v52, %v11213_v56  ;;  %v3164_v56 = vpop.f32.mrf.mxu0  ;;  %v5057_v52 = vadd.f32 %v11444_v39, %v5056_v34 }
 0x87f   : > { %v3165_v31 = vadd.f32 %v11147_v23, %v3164_v56 }
 0x880   : > { %5106 = vmatmul.f32.gmra.mxu2 %v4446_v7  ;;  %v4113_v20 = vpop.f32.mrf.mxu1  ;;  %v5426_v7 = vmax.f32 %v5057_v52, 0.0 }
 0x881   : > { %v3466_v35 = vmax.f32 %v3165_v31, 0.0  ;;  %v4114_v62 = vadd.f32 %v11251_v27, %v4113_v20  ;;  %v8141_v20 = vld [vmem:[%s12230_s7 + $0x660] sm:$0xff] }
 0x882   : > { %6504 = vmatmul.f32.gmra.mxu3 %v5422_v11  ;;  %7939 = vmatmul.msk.f32.gmra.mxu0 %vm1795_vm1, %v1771_v19 }
 0x883   : > { %v5059_v30 = vpop.f32.mrf.mxu2  ;;  %v4447_v32 = vmax.f32 %v4114_v62, 0.0  ;;  %4160 = vmatmul.f32.gmra.mxu1 %v3466_v35  ;;  %v1774_v62 = vld [vmem:[%s8923_s26 + $0x728] sm:$0xff] }
 0x885   : > { %v6407_v36 = vpop.f32.mrf.mxu3 }
 0x886   : > { %v11426_v54 = vadd.f32 %v6407_v36, %v11224_v1  ;;  %v3167_v1 = vpop.f32.mrf.mxu0  ;;  %v5060_v36 = vadd.f32 %v11444_v39, %v5059_v30 }
 0x887   : > { %v3168_v10 = vadd.f32 %v11147_v23, %v3167_v1 }
 0x888   : > { %5109 = vmatmul.f32.gmra.mxu2 %v4447_v32  ;;  %v4116_v8 = vpop.f32.mrf.mxu1  ;;  %v5427_v32 = vmax.f32 %v5060_v36, 0.0 }
 0x889   : > { %v3467_v51 = vmax.f32 %v3168_v10, 0.0  ;;  %v4117_v57 = vadd.f32 %v11251_v27, %v4116_v8  ;;  %v8140_v8 = vld [vmem:[%s12230_s7 + $0x658] sm:$0xff] }
 0x88a   : > { %6507 = vmatmul.f32.gmra.mxu3 %v5423_v17  ;;  %7940 = vmatmul.msk.f32.gmra.mxu0 %vm1795_vm1, %v1772_v61  ;;  %v11504_v61 = vld [vmem:[%s12225_s2] ss:$0 sm:$0xff] }
 0x88b   : > { %v5062_v53 = vpop.f32.mrf.mxu2  ;;  %v4448_v22 = vmax.f32 %v4117_v57, 0.0  ;;  %4163 = vmatmul.f32.gmra.mxu1 %v3467_v51  ;;  %v1775_v57 = vld [vmem:[%s8923_s26 + $0x730] sm:$0xff] }
 0x88d   : > { %v6410_v13 = vpop.f32.mrf.mxu3 }
 0x88e   : > { %v11437_v16 = vadd.f32 %v6410_v13, %v11235_v42  ;;  %v8143_v42 = vld [vmem:[%s12230_s7 + $0x670] sm:$0xff]  ;;  %v3170_v25 = vpop.f32.mrf.mxu0  ;;  %v5063_v13 = vadd.f32 %v11444_v39, %v5062_v53 }
 0x88f   : > { %6652 = vmatpush.msra.mxu3 %v8143_v42  ;;  %v3171_v49 = vadd.f32 %v11147_v23, %v3170_v25 }
 0x890   : > { %5112 = vmatmul.f32.gmra.mxu2 %v4448_v22  ;;  %v4119_v59 = vpop.f32.mrf.mxu1  ;;  %v5428_v22 = vmax.f32 %v5063_v13, 0.0  ;;  %v1778_v13 = vld [vmem:[%s8923_s26 + $0x748] sm:$0xff] }
 0x891   : > { %v3468_v33 = vmax.f32 %v3171_v49, 0.0  ;;  %v4120_v28 = vadd.f32 %v11251_v27, %v4119_v59  ;;  %6653 = vmatpush.msra.mxu3 %v8142_v26 }
 0x892   : > { %6510 = vmatmul.f32.gmra.mxu3 %v5424_v55  ;;  %7941 = vmatmul.msk.f32.gmra.mxu0 %vm1795_vm1, %v1773_v44  ;;  %v8138_v44 = vld [vmem:[%s12230_s7 + $0x648] sm:$0xff] }
 0x893   : > { %v5065_v18 = vpop.f32.mrf.mxu2  ;;  %v4449_v2 = vmax.f32 %v4120_v28, 0.0  ;;  %4166 = vmatmul.f32.gmra.mxu1 %v3468_v33  ;;  %6654 = vmatpush.msra.mxu3 %v8141_v20 }
 0x895   : > { %v6413_v63 = vpop.f32.mrf.mxu3  ;;  %6655 = vmatpush.msra.mxu3 %v8140_v8 }
 0x896   : > { %v11453_v9 = vadd.f32 %v6413_v63, %v11246_v40  ;;  %v3173_v40 = vpop.f32.mrf.mxu0  ;;  %v8139_v63 = vld [vmem:[%s12230_s7 + $0x650] sm:$0xff] }
 0x897   : > { %v3174_v50 = vadd.f32 %v11147_v23, %v3173_v40  ;;  %6656 = vmatpush.msra.mxu3 %v8139_v63  ;;  %v1779_v63 = vld [vmem:[%s8923_s26 + $0x750] sm:$0xff] }
 0x898   : > { %5115 = vmatmul.f32.gmra.mxu2 %v4449_v2  ;;  %v4122_v47 = vpop.f32.mrf.mxu1 }
 0x899   : > { %v3469_v21 = vmax.f32 %v3174_v50, 0.0  ;;  %v4123_v34 = vadd.f32 %v11251_v27, %v4122_v47  ;;  %6657 = vmatpush.msra.mxu3 %v8138_v44 }
 0x89a   : > { %6513 = vmatmul.f32.gmra.mxu3 %v5425_v12  ;;  %7942 = vmatmul.msk.f32.gmra.mxu0 %vm1795_vm1, %v1774_v62  ;;  %v8137_v62 = vld [vmem:[%s12230_s7 + $0x640] sm:$0xff] }
 0x89b   : > { %v5068_v56 = vpop.f32.mrf.mxu2  ;;  %v4450_v31 = vmax.f32 %v4123_v34, 0.0  ;;  %4169 = vmatmul.f32.gmra.mxu1 %v3469_v21  ;;  %6658 = vmatpush.msra.mxu3 %v8137_v62 }
 0x89c   : > { %v5069_v47 = vadd.f32 %v11444_v39, %v5068_v56 }
 0x89d   : > { %v6416_v11 = vpop.f32.mrf.mxu3 }
 0x89e   : > { %v11464_v37 = vadd.f32 %v6416_v11, %v11262_v45  ;;  %v3176_v45 = vpop.f32.mrf.mxu0  ;;  %v5430_v36 = vmax.f32 %v5069_v47, 0.0  ;;  %v1780_v47 = vld [vmem:[%s8923_s26 + $0x758] sm:$0xff] }
 0x89f   : > { %v3177_v24 = vadd.f32 %v11147_v23, %v3176_v45 }
 0x8a0   : > { %5118 = vmatmul.f32.gmra.mxu2 %v4450_v31  ;;  %v4125_v35 = vpop.f32.mrf.mxu1  ;;  %v1777_v31 = vld [vmem:[%s8923_s26 + $0x740] sm:$0xff] }
 0x8a1   : > { %v3470_v6 = vmax.f32 %v3177_v24, 0.0  ;;  %v4126_v30 = vadd.f32 %v11251_v27, %v4125_v35 }
 0x8a2   : > { %6516 = vmatmul.f32.gmra.mxu3 %v5426_v7  ;;  %7943 = vmatmul.msk.f32.gmra.mxu0 %vm1795_vm1, %v1775_v57 }
 0x8a3   : > { %v11478_v1 = vpop.f32.mrf.mxu2  ;;  %v4451_v10 = vmax.f32 %v4126_v30, 0.0  ;;  %4172 = vmatmul.f32.gmra.mxu1 %v3470_v6 }
 0x8a5   : > { %v6419_v17 = vpop.f32.mrf.mxu3 }
 0x8a6   : > { %v11475_v41 = vadd.f32 %v6419_v17, %v11273_v14  ;;  %v3179_v14 = vpop.f32.mrf.mxu0  ;;  %v7069_v17 = vld [vmem:[%s12234_s11 + $0x20] sm:$0xff] }
 0x8a7   : > { %v3180_v19 = vadd.f32 %v11147_v23, %v3179_v14  ;;  %v5066_v23 = vadd.f32 %v11444_v39, %v5065_v18  ;;  %v1776_v18 = vld [vmem:[%s8923_s26 + $0x738] sm:$0xff]  ;;  %7096 = vmatpush.msrb.mxu1 %v7069_v17 }
 0x8a8   : > { %5121 = vmatmul.f32.gmra.mxu2 %v4451_v10  ;;  %v4128_v51 = vpop.f32.mrf.mxu1 }
 0x8a9   : > { %v3471_v42 = vmax.f32 %v3180_v19, 0.0  ;;  %v4129_v25 = vadd.f32 %v11251_v27, %v4128_v51  ;;  %v5429_v2 = vmax.f32 %v5066_v23, 0.0  ;;  %v7171_v51 = vld [vmem:[%s12236_s13 + $0x28] sm:$0xff] }
 0x8aa   : > { %6569 = vmatmul.f32.vlgmr.msrb.gmra.mxu3 %v5427_v32  ;;  %7944 = vmatmul.msk.f32.gmra.mxu0 %vm1795_vm1, %v1776_v18 }
 0x8ab   : > { %v11491_v53 = vpop.f32.mrf.mxu2  ;;  %v4452_v49 = vmax.f32 %v4129_v25, 0.0  ;;  %4175 = vmatmul.f32.gmra.mxu1 %v3471_v42  ;;  %7196 = vmatpush.msrb.mxu2 %v7171_v51  ;;  %v1782_v51 = vld [vmem:[%s8923_s26 + $0x768] sm:$0xff] }
 0x8ad   : > { %v6472_v55 = vpop.f32.mrf.mxu3 }
 0x8ae   : > { %v11488_v3 = vadd.f32 %v6472_v55, %v11284_v58  ;;  %v6967_v58 = vld [vmem:[%s12232_s9 + $0x18] sm:$0xff]  ;;  %v3182_v59 = vpop.f32.mrf.mxu0 }
 0x8af   : > { %6996 = vmatpush.msrb.mxu0 %v6967_v58  ;;  %v3183_v12 = vadd.f32 %v11504_v61, %v3182_v59 }
 0x8b0   : > { %5124 = vmatmul.f32.gmra.mxu2 %v4452_v49  ;;  %v4131_v28 = vpop.f32.mrf.mxu1 }
 0x8b1   : > { %v3472_v26 = vmax.f32 %v3183_v12, 0.0  ;;  %v4132_v40 = vadd.f32 %v11251_v27, %v4131_v28 }
 0x8b2   : > { %6572 = vmatmul.f32.gmra.mxu3 %v5428_v22  ;;  %7945 = vmatmul.msk.f32.gmra.mxu0 %vm1795_vm1, %v1777_v31  ;;  %v5075_v22 = vadd.f32 %v11444_v39, %v11491_v53 }
 0x8b3   : > { %v11512_v50 = vpop.f32.mrf.mxu2  ;;  %v4453_v11 = vmax.f32 %v4132_v40, 0.0  ;;  %4178 = vmatmul.f32.gmra.mxu1 %v3472_v26 }
 0x8b4   : > { %v5432_v58 = vmax.f32 %v5075_v22, 0.0  ;;  %v5078_v18 = vadd.f32 %v11444_v39, %v11512_v50 }
 0x8b5   : > { %v6475_v33 = vpop.f32.mrf.mxu3 }
 0x8b6   : > { %v11509_v52 = vadd.f32 %v6475_v33, %v11297_v5  ;;  %v3185_v5 = vpop.f32.mrf.mxu0  ;;  %v5433_v44 = vmax.f32 %v5078_v18, 0.0 }
 0x8b7   : > { %v3186_v7 = vadd.f32 %v11504_v61, %v3185_v5 }
 0x8b8   : > { %5127 = vmatmul.f32.gmra.mxu2 %v4453_v11  ;;  %v4134_v34 = vpop.f32.mrf.mxu1 }
 0x8b9   : > { %v3473_v45 = vmax.f32 %v3186_v7, 0.0  ;;  %v4135_v24 = vadd.f32 %v11251_v27, %v4134_v34 }
 0x8ba   : > { %6575 = vmatmul.f32.gmra.mxu3 %v5429_v2  ;;  %7946 = vmatmul.msk.f32.gmra.mxu0 %vm1795_vm1, %v1778_v13  ;;  %v8135_v2 = vld [vmem:[%s12230_s7 + $0x630] sm:$0xff]  ;;  %v8133_v13 = vld [vmem:[%s12230_s7 + $0x620] sm:$0xff] }
 0x8bb   : > { %v11525_v56 = vpop.f32.mrf.mxu2  ;;  %v4454_v35 = vmax.f32 %v4135_v24, 0.0  ;;  %4181 = vmatmul.f32.gmra.mxu1 %v3473_v45 }
 0x8bc   : > { %v5081_v31 = vadd.f32 %v11444_v39, %v11525_v56 }
 0x8bd   : > { %v6478_v21 = vpop.f32.mrf.mxu3 }
 0x8be   : > { %v11522_v20 = vadd.f32 %v6478_v21, %v11313_v0  ;;  %v5072_v0 = vadd.f32 %v11444_v39, %v11478_v1  ;;  %v3188_v32 = vpop.f32.mrf.mxu0 }
 0x8bf   : > { %v3189_v6 = vadd.f32 %v11504_v61, %v3188_v32 }
 0x8c0   : > { %5130 = vmatmul.f32.gmra.mxu2 %v4454_v35  ;;  %v4137_v10 = vpop.f32.mrf.mxu1  ;;  %v5431_v8 = vmax.f32 %v5072_v0, 0.0  ;;  %v1781_v35 = vld [vmem:[%s8923_s26 + $0x760] sm:$0xff]  ;;  %v5434_v0 = vmax.f32 %v5081_v31, 0.0 }
 0x8c1   : > { %v3474_v19 = vmax.f32 %v3189_v6, 0.0  ;;  %v4138_v55 = vadd.f32 %v11251_v27, %v4137_v10 }
 0x8c2   : > { %6578 = vmatmul.f32.gmra.mxu3 %v5430_v36  ;;  %7947 = vmatmul.msk.f32.gmra.mxu0 %vm1795_vm1, %v1779_v63  ;;  %v8134_v36 = vld [vmem:[%s12230_s7 + $0x628] sm:$0xff] }
 0x8c3   : > { %v5083_v1 = vpop.f32.mrf.mxu2  ;;  %v4455_v57 = vmax.f32 %v4138_v55, 0.0  ;;  %4184 = vmatmul.f32.gmra.mxu1 %v3474_v19 }
 0x8c4   : > { %v5084_v10 = vadd.f32 %v11444_v39, %v5083_v1 }
 0x8c5   : > { %v6481_v30 = vpop.f32.mrf.mxu3 }
 0x8c6   : > { %v11539_v14 = vadd.f32 %v6481_v30, %v11326_v38  ;;  %v8136_v38 = vld [vmem:[%s12230_s7 + $0x638] sm:$0xff]  ;;  %v3191_v42 = vpop.f32.mrf.mxu0 }
 0x8c7   : > { %6659 = vmatpush.msra.mxu3 %v8136_v38  ;;  %v3192_v25 = vadd.f32 %v11504_v61, %v3191_v42 }
 0x8c8   : > { %5133 = vmatmul.f32.gmra.mxu2 %v4455_v57  ;;  %v4140_v23 = vpop.f32.mrf.mxu1  ;;  %v5435_v57 = vmax.f32 %v5084_v10, 0.0 }
 0x8c9   : > { %v3475_v12 = vmax.f32 %v3192_v25, 0.0  ;;  %v4141_v53 = vadd.f32 %v11251_v27, %v4140_v23  ;;  %6660 = vmatpush.msra.mxu3 %v8135_v2  ;;  %v8132_v23 = vld [vmem:[%s12230_s7 + $0x618] sm:$0xff] }
 0x8ca   : > { %6581 = vmatmul.f32.gmra.mxu3 %v5431_v8  ;;  %7948 = vmatmul.msk.f32.gmra.mxu0 %vm1795_vm1, %v1780_v47 }
 0x8cb   : > { %v5086_v33 = vpop.f32.mrf.mxu2  ;;  %v4456_v28 = vmax.f32 %v4141_v53, 0.0  ;;  %4187 = vmatmul.f32.gmra.mxu1 %v3475_v12  ;;  %6661 = vmatpush.msra.mxu3 %v8134_v36  ;;  %v1783_v53 = vld [vmem:[%s8923_s26 + $0x770] sm:$0xff] }
 0x8cd   : > { %v6484_v49 = vpop.f32.mrf.mxu3  ;;  %6662 = vmatpush.msra.mxu3 %v8133_v13 }
 0x8ce   : > { %v11554_v59 = vadd.f32 %v6484_v49, %v11343_v29  ;;  %v3194_v29 = vpop.f32.mrf.mxu0  ;;  %v5087_v49 = vadd.f32 %v11444_v39, %v5086_v33 }
 0x8cf   : > { %v3195_v26 = vadd.f32 %v11504_v61, %v3194_v29  ;;  %6663 = vmatpush.msra.mxu3 %v8132_v23 }
 0x8d0   : > { %5136 = vmatmul.f32.gmra.mxu2 %v4456_v28  ;;  %v4143_v11 = vpop.f32.mrf.mxu1  ;;  %v5436_v28 = vmax.f32 %v5087_v49, 0.0 }
 0x8d1   : > { %v3476_v7 = vmax.f32 %v3195_v26, 0.0  ;;  %v4144_v50 = vadd.f32 %v11251_v27, %v4143_v11  ;;  %v8131_v11 = vld [vmem:[%s12230_s7 + $0x610] sm:$0xff] }
 0x8d2   : > { %6584 = vmatmul.f32.gmra.mxu3 %v5432_v58  ;;  %7949 = vmatmul.msk.f32.gmra.mxu0 %vm1795_vm1, %v1781_v35 }
 0x8d3   : > { %v5089_v21 = vpop.f32.mrf.mxu2  ;;  %v4457_v34 = vmax.f32 %v4144_v50, 0.0  ;;  %4190 = vmatmul.f32.gmra.mxu1 %v3476_v7  ;;  %6664 = vmatpush.msra.mxu3 %v8131_v11 }
 0x8d5   : > { %v6487_v40 = vpop.f32.mrf.mxu3 }
 0x8d6   : > { %v11566_v5 = vadd.f32 %v6487_v40, %v11358_v60  ;;  %v3197_v60 = vpop.f32.mrf.mxu0  ;;  %v5090_v40 = vadd.f32 %v11444_v39, %v5089_v21  ;;  %v11616_v21 = vld [vmem:[%s12227_s4] ss:$0 sm:$0xff] }
 0x8d7   : > { %v3198_v45 = vadd.f32 %v11504_v61, %v3197_v60 }
 0x8d8   : > { %5139 = vmatmul.f32.gmra.mxu2 %v4457_v34  ;;  %v4146_v17 = vpop.f32.mrf.mxu1  ;;  %v5437_v50 = vmax.f32 %v5090_v40, 0.0 }
 0x8d9   : > { %v3477_v32 = vmax.f32 %v3198_v45, 0.0  ;;  %v4147_v56 = vadd.f32 %v11251_v27, %v4146_v17 }
 0x8da   : > { %6587 = vmatmul.f32.gmra.mxu3 %v5433_v44  ;;  %7950 = vmatmul.msk.f32.gmra.mxu0 %vm1795_vm1, %v1782_v51 }
 0x8db   : > { %v5092_v6 = vpop.f32.mrf.mxu2  ;;  %v4458_v30 = vmax.f32 %v4147_v56, 0.0  ;;  %4193 = vmatmul.f32.gmra.mxu1 %v3477_v32 }
 0x8dd   : > { %v6490_v24 = vpop.f32.mrf.mxu3 }
 0x8de   : > { %v11578_v62 = vadd.f32 %v6490_v24, %v11370_v48  ;;  %v3200_v48 = vpop.f32.mrf.mxu0  ;;  %v5093_v24 = vadd.f32 %v11444_v39, %v5092_v6 }
 0x8df   : > { %v3201_v8 = vadd.f32 %v11504_v61, %v3200_v48 }
 0x8e0   : > { %5142 = vmatmul.f32.gmra.mxu2 %v4458_v30  ;;  %v4149_v55 = vpop.f32.mrf.mxu1  ;;  %v5438_v56 = vmax.f32 %v5093_v24, 0.0 }
 0x8e1   : > { %v3478_v38 = vmax.f32 %v3201_v8, 0.0  ;;  %v4150_v1 = vadd.f32 %v11251_v27, %v4149_v55 }
 0x8e2   : > { %6590 = vmatmul.f32.gmra.mxu3 %v5434_v0  ;;  %7951 = vmatmul.msk.f32.gmra.mxu0 %vm1795_vm1, %v1783_v53 }
 0x8e3   : > { %v5095_v42 = vpop.f32.mrf.mxu2  ;;  %v4459_v25 = vmax.f32 %v4150_v1, 0.0  ;;  %4196 = vmatmul.f32.gmra.mxu1 %v3478_v38 }
 0x8e4   : > { %v5096_v8 = vadd.f32 %v11444_v39, %v5095_v42 }
 0x8e5   : > { %v6493_v19 = vpop.f32.mrf.mxu3 }
 0x8e6   : > { %v11589_v22 = vadd.f32 %v6493_v19, %v11382_v15  ;;  %v3203_v15 = vpop.f32.mrf.mxu0  ;;  %v8129_v19 = vld [vmem:[%s12230_s7 + $0x600] sm:$0xff]  ;;  %v5439_v38 = vmax.f32 %v5096_v8, 0.0 }
 0x8e7   : > { %v3204_v63 = vadd.f32 %v11504_v61, %v3203_v15 }
 0x8e8   : > { %5145 = vmatmul.f32.gmra.mxu2 %v4459_v25  ;;  %v4152_v12 = vpop.f32.mrf.mxu1 }
 0x8e9   : > { %v3479_v2 = vmax.f32 %v3204_v63, 0.0  ;;  %v4153_v33 = vadd.f32 %v11251_v27, %v4152_v12  ;;  %v1784_v27 = vld [vmem:[%s8923_s26 + $0x778] sm:$0xff] }
 0x8ea   : > { %6593 = vmatmul.f32.gmra.mxu3 %v5435_v57  ;;  %7952 = vmatmul.msk.f32.gmra.mxu0 %vm1795_vm1, %v1784_v27  ;;  %v8160_v63 = vld [vmem:[%s12230_s7 + $0x6f8] sm:$0xff] }
 0x8eb   : > { %v5098_v29 = vpop.f32.mrf.mxu2  ;;  %v4460_v26 = vmax.f32 %v4153_v33, 0.0  ;;  %4199 = vmatmul.f32.gmra.mxu1 %v3479_v2 }
 0x8ec   : > { %v5099_v15 = vadd.f32 %v11444_v39, %v5098_v29 }
 0x8ed   : > { %v6496_v58 = vpop.f32.mrf.mxu3 }
 0x8ee   : > { %v11600_v18 = vadd.f32 %v6496_v58, %v11393_v46  ;;  %v3206_v46 = vpop.f32.mrf.mxu0 }
 0x8ef   : > { %v3207_v47 = vadd.f32 %v11504_v61, %v3206_v46  ;;  %v8159_v46 = vld [vmem:[%s12230_s7 + $0x6f0] sm:$0xff] }
 0x8f0   : > { %5148 = vmatmul.f32.gmra.mxu2 %v4460_v26  ;;  %v4155_v7 = vpop.f32.mrf.mxu1 }
 0x8f1   : > { %v3480_v31 = vmax.f32 %v3207_v47, 0.0  ;;  %v4156_v36 = vadd.f32 %v11616_v21, %v4155_v7 }
 0x8f2   : > { %6596 = vmatmul.f32.gmra.mxu3 %v5436_v28  ;;  %v5440_v28 = vmax.f32 %v5099_v15, 0.0 }
 0x8f3   : > { %v5101_v60 = vpop.f32.mrf.mxu2  ;;  %v4461_v45 = vmax.f32 %v4156_v36, 0.0  ;;  %4202 = vmatmul.f32.gmra.mxu1 %v3480_v31 }
 0x8f4   : > { %v5102_v11 = vadd.f32 %v11444_v39, %v5101_v60 }
 0x8f5   : > { %v6499_v44 = vpop.f32.mrf.mxu3 }
 0x8f6   : > { %v11611_v34 = vadd.f32 %v6499_v44, %v11404_v43  ;;  %v8130_v43 = vld [vmem:[%s12230_s7 + $0x608] sm:$0xff]  ;;  %v3209_v17 = vpop.f32.mrf.mxu0  ;;  %v5441_v27 = vmax.f32 %v5102_v11, 0.0 }
 0x8f7   : > { %6665 = vmatpush.msra.mxu3 %v8130_v43  ;;  %v3210_v35 = vadd.f32 %v11504_v61, %v3209_v17  ;;  %v8158_v43 = vld [vmem:[%s12230_s7 + $0x6e8] sm:$0xff] }
 0x8f8   : > { %5151 = vmatmul.f32.gmra.mxu2 %v4461_v45  ;;  %v4158_v32 = vpop.f32.mrf.mxu1 }
 0x8f9   : > { %v3481_v10 = vmax.f32 %v3210_v35, 0.0  ;;  %v4159_v13 = vadd.f32 %v11616_v21, %v4158_v32  ;;  %6666 = vmatpush.msra.mxu3 %v8129_v19  ;;  %v8157_v19 = vld [vmem:[%s12230_s7 + $0x6e0] sm:$0xff] }
 0x8fa   : > { %6599 = vmatmul.f32.gmra.mxu3 %v5437_v50 }
 0x8fb   : > { %v5104_v48 = vpop.f32.mrf.mxu2  ;;  %v4462_v6 = vmax.f32 %v4159_v13, 0.0  ;;  %4205 = vmatmul.f32.gmra.mxu1 %v3481_v10  ;;  %6749 = vmatpush.msrb.mxu3 %v8160_v63  ;;  %v8156_v63 = vld [vmem:[%s12230_s7 + $0x6d8] sm:$0xff] }
 0x8fc   : > { %v5105_v24 = vadd.f32 %v11444_v39, %v5104_v48 }
 0x8fd   : > { %v6502_v0 = vpop.f32.mrf.mxu3  ;;  %6750 = vmatpush.msrb.mxu3 %v8159_v46 }
 0x8fe   : > { %v11626_v30 = vadd.f32 %v6502_v0, %v11415_v4  ;;  %v3212_v55 = vpop.f32.mrf.mxu0  ;;  %v5442_v32 = vmax.f32 %v5105_v24, 0.0 }
 0x8ff   : > { %v3213_v51 = vadd.f32 %v11504_v61, %v3212_v55  ;;  %6751 = vmatpush.msrb.mxu3 %v8158_v43 }
 0x900   : > { %5154 = vmatmul.f32.gmra.mxu2 %v4462_v6  ;;  %v4161_v57 = vpop.f32.mrf.mxu1 }
 0x901   : > { %v3482_v25 = vmax.f32 %v3213_v51, 0.0  ;;  %v4162_v49 = vadd.f32 %v11616_v21, %v4161_v57  ;;  %6752 = vmatpush.msrb.mxu3 %v8157_v19 }
 0x902   : > { %6602 = vmatmul.f32.gmra.mxu3 %v5438_v56 }
 0x903   : > { %v5107_v23 = vpop.f32.mrf.mxu2  ;;  %v4463_v42 = vmax.f32 %v4162_v49, 0.0  ;;  %4208 = vmatmul.f32.gmra.mxu1 %v3482_v25  ;;  %6753 = vmatpush.msrb.mxu3 %v8156_v63 }
 0x904   : > { %v5108_v8 = vadd.f32 %v11444_v39, %v5107_v23 }
 0x905   : > { %v6505_v4 = vpop.f32.mrf.mxu3 }
 0x906   : > { %v11635_v1 = vadd.f32 %v6505_v4, %v11426_v54  ;;  %v3215_v58 = vpop.f32.mrf.mxu0  ;;  %v5443_v57 = vmax.f32 %v5108_v8, 0.0 }
 0x907   : > { %v3216_v12 = vadd.f32 %v11504_v61, %v3215_v58  ;;  %v6966_v58 = vld [vmem:[%s12232_s9 + $0x10] sm:$0xff] }
 0x908   : > { %5157 = vmatmul.f32.gmra.mxu2 %v4463_v42  ;;  %v4164_v53 = vpop.f32.mrf.mxu1  ;;  %6997 = vmatpush.msrb.mxu0 %v6966_v58 }
 0x909   : > { %v3483_v33 = vmax.f32 %v3216_v12, 0.0  ;;  %v4165_v26 = vadd.f32 %v11616_v21, %v4164_v53 }
 0x90a   : > { %6605 = vmatmul.f32.gmra.mxu3 %v5439_v38 }
 0x90b   : > { %v5110_v40 = vpop.f32.mrf.mxu2  ;;  %v4464_v29 = vmax.f32 %v4165_v26, 0.0  ;;  %4211 = vmatmul.f32.gmra.mxu1 %v3483_v33 }
 0x90c   : > { %v5111_v15 = vadd.f32 %v11444_v39, %v5110_v40 }
 0x90d   : > { %v6508_v54 = vpop.f32.mrf.mxu3 }
 0x90e   : > { %v11644_v2 = vadd.f32 %v6508_v54, %v11437_v16  ;;  %v3218_v47 = vpop.f32.mrf.mxu0 }
 0x90f   : > { %v3219_v44 = vadd.f32 %v11504_v61, %v3218_v47  ;;  %v8155_v47 = vld [vmem:[%s12230_s7 + $0x6d0] sm:$0xff] }
 0x910   : > { %5160 = vmatmul.f32.gmra.mxu2 %v4464_v29  ;;  %v4167_v7 = vpop.f32.mrf.mxu1  ;;  %6754 = vmatpush.msrb.mxu3 %v8155_v47 }
 0x911   : > { %v3484_v31 = vmax.f32 %v3219_v44, 0.0  ;;  %v4168_v36 = vadd.f32 %v11616_v21, %v4167_v7 }
 0x912   : > { %6608 = vmatmul.f32.gmra.mxu3 %v5440_v28  ;;  %v5444_v28 = vmax.f32 %v5111_v15, 0.0 }
 0x913   : > { %v5113_v45 = vpop.f32.mrf.mxu2  ;;  %v4465_v60 = vmax.f32 %v4168_v36, 0.0  ;;  %4214 = vmatmul.f32.gmra.mxu1 %v3484_v31 }
 0x914   : > { %v5114_v46 = vadd.f32 %v11444_v39, %v5113_v45  ;;  %v7068_v45 = vld [vmem:[%s12234_s11 + $0x18] sm:$0xff] }
 0x915   : > { %v6511_v16 = vpop.f32.mrf.mxu3  ;;  %7097 = vmatpush.msrb.mxu1 %v7068_v45 }
 0x916   : > { %v11653_v50 = vadd.f32 %v6511_v16, %v11453_v9  ;;  %v3221_v17 = vpop.f32.mrf.mxu0 }
 0x917   : > { %v3222_v35 = vadd.f32 %v11504_v61, %v3221_v17 }
 0x918   : > { %5163 = vmatmul.f32.gmra.mxu2 %v4465_v60  ;;  %v4170_v0 = vpop.f32.mrf.mxu1 }
 0x919   : > { %v3485_v10 = vmax.f32 %v3222_v35, 0.0  ;;  %v4171_v13 = vadd.f32 %v11616_v21, %v4170_v0 }
 0x91a   : > { %6611 = vmatmul.f32.gmra.mxu3 %v5441_v27  ;;  %v5445_v27 = vmax.f32 %v5114_v46, 0.0 }
 0x91b   : > { %v5116_v6 = vpop.f32.mrf.mxu2  ;;  %v4466_v48 = vmax.f32 %v4171_v13, 0.0  ;;  %4217 = vmatmul.f32.gmra.mxu1 %v3485_v10 }
 0x91c   : > { %v5117_v17 = vadd.f32 %v11444_v39, %v5116_v6  ;;  %v7170_v6 = vld [vmem:[%s12236_s13 + $0x20] sm:$0xff] }
 0x91d   : > { %v6514_v9 = vpop.f32.mrf.mxu3  ;;  %7197 = vmatpush.msrb.mxu2 %v7170_v6 }
 0x91e   : > { %v11662_v56 = vadd.f32 %v6514_v9, %v11464_v37  ;;  %v3224_v55 = vpop.f32.mrf.mxu0  ;;  %v5446_v10 = vmax.f32 %v5117_v17, 0.0 }
 0x91f   : > { %v3225_v51 = vadd.f32 %v11504_v61, %v3224_v55 }
 0x920   : > { %5166 = vmatmul.f32.gmra.mxu2 %v4466_v48  ;;  %v4173_v4 = vpop.f32.mrf.mxu1 }
 0x921   : > { %v3486_v25 = vmax.f32 %v3225_v51, 0.0  ;;  %v4174_v49 = vadd.f32 %v11616_v21, %v4173_v4 }
 0x922   : > { %6614 = vmatmul.f32.gmra.mxu3 %v5442_v32 }
 0x923   : > { %v5119_v42 = vpop.f32.mrf.mxu2  ;;  %v4467_v23 = vmax.f32 %v4174_v49, 0.0  ;;  %4220 = vmatmul.f32.gmra.mxu1 %v3486_v25 }
 0x924   : > { %v5120_v51 = vadd.f32 %v11444_v39, %v5119_v42 }
 0x925   : > { %v6517_v37 = vpop.f32.mrf.mxu3 }
 0x926   : > { %v11671_v38 = vadd.f32 %v6517_v37, %v11475_v41  ;;  %v3227_v41 = vpop.f32.mrf.mxu0  ;;  %v5447_v49 = vmax.f32 %v5120_v51, 0.0 }
 0x927   : > { %v3228_v12 = vadd.f32 %v11504_v61, %v3227_v41 }
 0x928   : > { %5169 = vmatmul.f32.gmra.mxu2 %v4467_v23  ;;  %v4176_v53 = vpop.f32.mrf.mxu1 }
 0x929   : > { %v3487_v26 = vmax.f32 %v3228_v12, 0.0  ;;  %v4177_v40 = vadd.f32 %v11616_v21, %v4176_v53  ;;  %v8152_v12 = vld [vmem:[%s12230_s7 + $0x6b8] sm:$0xff] }
 0x92a   : > { %6667 = vmatmul.f32.vlgmr.msra.gmra.mxu3 %v5443_v57 }
 0x92b   : > { %v5122_v29 = vpop.f32.mrf.mxu2  ;;  %v4468_v11 = vmax.f32 %v4177_v40, 0.0  ;;  %4223 = vmatmul.f32.gmra.mxu1 %v3487_v26 }
 0x92c   : > { %v5123_v41 = vadd.f32 %v11444_v39, %v5122_v29 }
 0x92d   : > { %v6570_v54 = vpop.f32.mrf.mxu3 }
 0x92e   : > { %v11683_v33 = vadd.f32 %v6570_v54, %v11488_v3  ;;  %v3230_v44 = vpop.f32.mrf.mxu0  ;;  %v5448_v26 = vmax.f32 %v5123_v41, 0.0 }
 0x92f   : > { %v3231_v16 = vadd.f32 %v11504_v61, %v3230_v44 }
 0x930   : > { %5172 = vmatmul.f32.gmra.mxu2 %v4468_v11  ;;  %v4179_v7 = vpop.f32.mrf.mxu1 }
 0x931   : > { %v3488_v36 = vmax.f32 %v3231_v16, 0.0  ;;  %v4180_v60 = vadd.f32 %v11616_v21, %v4179_v7  ;;  %v8151_v16 = vld [vmem:[%s12230_s7 + $0x6b0] sm:$0xff] }
 0x932   : > { %6670 = vmatmul.f32.gmra.mxu3 %v5444_v28 }
 0x933   : > { %v5125_v24 = vpop.f32.mrf.mxu2  ;;  %v4469_v43 = vmax.f32 %v4180_v60, 0.0  ;;  %4226 = vmatmul.f32.gmra.mxu1 %v3488_v36 }
 0x934   : > { %v5126_v44 = vadd.f32 %v11444_v39, %v5125_v24 }
 0x935   : > { %v6573_v3 = vpop.f32.mrf.mxu3 }
 0x936   : > { %v11692_v31 = vadd.f32 %v6573_v3, %v11509_v52  ;;  %v8154_v52 = vld [vmem:[%s12230_s7 + $0x6c8] sm:$0xff]  ;;  %v3233_v35 = vpop.f32.mrf.mxu0  ;;  %v5449_v36 = vmax.f32 %v5126_v44, 0.0 }
 0x937   : > { %6755 = vmatpush.msrb.mxu3 %v8154_v52  ;;  %v3234_v9 = vadd.f32 %v11504_v61, %v3233_v35  ;;  %v8150_v35 = vld [vmem:[%s12230_s7 + $0x6a8] sm:$0xff] }
 0x938   : > { %5175 = vmatmul.f32.gmra.mxu2 %v4469_v43  ;;  %v4182_v32 = vpop.f32.mrf.mxu1 }
 0x939   : > { %v3489_v48 = vmax.f32 %v3234_v9, 0.0  ;;  %v4183_v8 = vadd.f32 %v11616_v21, %v4182_v32 }
 0x93a   : > { %6673 = vmatmul.f32.gmra.mxu3 %v5445_v27 }
 0x93b   : > { %v5128_v19 = vpop.f32.mrf.mxu2  ;;  %v4470_v55 = vmax.f32 %v4183_v8, 0.0  ;;  %4229 = vmatmul.f32.gmra.mxu1 %v3489_v48 }
 0x93c   : > { %v5129_v52 = vadd.f32 %v11444_v39, %v5128_v19 }
 0x93d   : > { %v6576_v0 = vpop.f32.mrf.mxu3 }
 0x93e   : > { %v11704_v13 = vadd.f32 %v6576_v0, %v11522_v20  ;;  %v8153_v20 = vld [vmem:[%s12230_s7 + $0x6c0] sm:$0xff]  ;;  %v3236_v37 = vpop.f32.mrf.mxu0 }
 0x93f   : > { %6756 = vmatpush.msrb.mxu3 %v8153_v20  ;;  %v3237_v4 = vadd.f32 %v11504_v61, %v3236_v37  ;;  %v8149_v20 = vld [vmem:[%s12230_s7 + $0x6a0] sm:$0xff] }
 0x940   : > { %5178 = vmatmul.f32.gmra.mxu2 %v4470_v55  ;;  %v4185_v25 = vpop.f32.mrf.mxu1 }
 0x941   : > { %v3490_v15 = vmax.f32 %v3237_v4, 0.0  ;;  %v4186_v63 = vadd.f32 %v11616_v21, %v4185_v25  ;;  %6757 = vmatpush.msrb.mxu3 %v8152_v12  ;;  %v8148_v12 = vld [vmem:[%s12230_s7 + $0x698] sm:$0xff] }
 0x942   : > { %6676 = vmatmul.f32.gmra.mxu3 %v5446_v10  ;;  %v5450_v10 = vmax.f32 %v5129_v52, 0.0 }
 0x943   : > { %v5131_v58 = vpop.f32.mrf.mxu2  ;;  %v4471_v42 = vmax.f32 %v4186_v63, 0.0  ;;  %4232 = vmatmul.f32.gmra.mxu1 %v3490_v15  ;;  %6758 = vmatpush.msrb.mxu3 %v8151_v16  ;;  %v8147_v16 = vld [vmem:[%s12230_s7 + $0x690] sm:$0xff] }
 0x944   : > { %v5132_v51 = vadd.f32 %v11444_v39, %v5131_v58 }
 0x945   : > { %v6579_v57 = vpop.f32.mrf.mxu3  ;;  %6759 = vmatpush.msrb.mxu3 %v8150_v35 }
 0x946   : > { %v11716_v23 = vadd.f32 %v6579_v57, %v11539_v14  ;;  %v3239_v54 = vpop.f32.mrf.mxu0  ;;  %v5451_v25 = vmax.f32 %v5132_v51, 0.0 }
 0x947   : > { %v3240_v53 = vadd.f32 %v11504_v61, %v3239_v54  ;;  %6760 = vmatpush.msrb.mxu3 %v8149_v20 }
 0x948   : > { %5181 = vmatmul.f32.gmra.mxu2 %v4471_v42  ;;  %v4188_v28 = vpop.f32.mrf.mxu1 }
 0x949   : > { %v3491_v11 = vmax.f32 %v3240_v53, 0.0  ;;  %v4189_v46 = vadd.f32 %v11616_v21, %v4188_v28  ;;  %6761 = vmatpush.msrb.mxu3 %v8148_v12 }
 0x94a   : > { %6679 = vmatmul.f32.gmra.mxu3 %v5447_v49 }
 0x94b   : > { %v5134_v47 = vpop.f32.mrf.mxu2  ;;  %v4472_v29 = vmax.f32 %v4189_v46, 0.0  ;;  %4235 = vmatmul.f32.gmra.mxu1 %v3491_v11  ;;  %6762 = vmatpush.msrb.mxu3 %v8147_v16 }
 0x94c   : > { %v5135_v41 = vadd.f32 %v11444_v39, %v5134_v47 }
 0x94d   : > { %v6582_v14 = vpop.f32.mrf.mxu3 }
 0x94e   : > { %v11725_v40 = vadd.f32 %v6582_v14, %v11554_v59  ;;  %v3242_v3 = vpop.f32.mrf.mxu0  ;;  %v5452_v28 = vmax.f32 %v5135_v41, 0.0 }
 0x94f   : > { %v3243_v7 = vadd.f32 %v11504_v61, %v3242_v3 }
 0x950   : > { %5184 = vmatmul.f32.gmra.mxu2 %v4472_v29  ;;  %v4191_v27 = vpop.f32.mrf.mxu1 }
 0x951   : > { %v3492_v45 = vmax.f32 %v3243_v7, 0.0  ;;  %v4192_v43 = vadd.f32 %v11616_v21, %v4191_v27 }
 0x952   : > { %6682 = vmatmul.f32.gmra.mxu3 %v5448_v26 }
 0x953   : > { %v5137_v17 = vpop.f32.mrf.mxu2  ;;  %v4473_v24 = vmax.f32 %v4192_v43, 0.0  ;;  %4238 = vmatmul.f32.gmra.mxu1 %v3492_v45 }
 0x954   : > { %v5138_v44 = vadd.f32 %v11444_v39, %v5137_v17 }
 0x955   : > { %v6585_v59 = vpop.f32.mrf.mxu3 }
 0x956   : > { %v11734_v60 = vadd.f32 %v6585_v59, %v11566_v5  ;;  %v3245_v9 = vpop.f32.mrf.mxu0  ;;  %v5453_v27 = vmax.f32 %v5138_v44, 0.0 }
 0x957   : > { %v3246_v0 = vadd.f32 %v11504_v61, %v3245_v9 }
 0x958   : > { %5187 = vmatmul.f32.gmra.mxu2 %v4473_v24  ;;  %v4194_v32 = vpop.f32.mrf.mxu1 }
 0x959   : > { %v3493_v8 = vmax.f32 %v3246_v0, 0.0  ;;  %v4195_v6 = vadd.f32 %v11616_v21, %v4194_v32 }
 0x95a   : > { %6685 = vmatmul.f32.gmra.mxu3 %v5449_v36 }
 0x95b   : > { %v5140_v55 = vpop.f32.mrf.mxu2  ;;  %v4474_v19 = vmax.f32 %v4195_v6, 0.0  ;;  %4241 = vmatmul.f32.gmra.mxu1 %v3493_v8  ;;  %v8145_v6 = vld [vmem:[%s12230_s7 + $0x680] sm:$0xff] }
 0x95c   : > { %v5141_v52 = vadd.f32 %v11444_v39, %v5140_v55  ;;  %v11784_v39 = vld [vmem:[%s12229_s6] ss:$0 sm:$0xff] }
 0x95d   : > { %v6588_v5 = vpop.f32.mrf.mxu3 }
 0x95e   : > { %v11743_v48 = vadd.f32 %v6588_v5, %v11578_v62  ;;  %v3248_v37 = vpop.f32.mrf.mxu0  ;;  %v5454_v0 = vmax.f32 %v5141_v52, 0.0 }
 0x95f   : > { %v3249_v4 = vadd.f32 %v11504_v61, %v3248_v37 }
 0x960   : > { %5190 = vmatmul.f32.gmra.mxu2 %v4474_v19  ;;  %v4197_v57 = vpop.f32.mrf.mxu1 }
 0x961   : > { %v3494_v15 = vmax.f32 %v3249_v4, 0.0  ;;  %v4198_v63 = vadd.f32 %v11616_v21, %v4197_v57  ;;  %v8176_v57 = vld [vmem:[%s12230_s7 + $0x778] sm:$0xff] }
 0x962   : > { %6688 = vmatmul.f32.gmra.mxu3 %v5450_v10 }
 0x963   : > { %v5143_v42 = vpop.f32.mrf.mxu2  ;;  %v4475_v58 = vmax.f32 %v4198_v63, 0.0  ;;  %4244 = vmatmul.f32.gmra.mxu1 %v3494_v15 }
 0x964   : > { %v5144_v8 = vadd.f32 %v11784_v39, %v5143_v42 }
 0x965   : > { %v6591_v62 = vpop.f32.mrf.mxu3 }
 0x966   : > { %v11752_v49 = vadd.f32 %v6591_v62, %v11589_v22  ;;  %v3251_v54 = vpop.f32.mrf.mxu0  ;;  %v5455_v19 = vmax.f32 %v5144_v8, 0.0 }
 0x967   : > { %v3252_v53 = vadd.f32 %v11504_v61, %v3251_v54  ;;  %v8175_v54 = vld [vmem:[%s12230_s7 + $0x770] sm:$0xff] }
 0x968   : > { %5193 = vmatmul.f32.gmra.mxu2 %v4475_v58  ;;  %v4200_v14 = vpop.f32.mrf.mxu1 }
 0x969   : > { %v3495_v11 = vmax.f32 %v3252_v53, 0.0  ;;  %v4201_v46 = vadd.f32 %v11616_v21, %v4200_v14 }
 0x96a   : > { %6691 = vmatmul.f32.gmra.mxu3 %v5451_v25 }
 0x96b   : > { %v5146_v29 = vpop.f32.mrf.mxu2  ;;  %v4476_v47 = vmax.f32 %v4201_v46, 0.0  ;;  %4247 = vmatmul.f32.gmra.mxu1 %v3495_v11 }
 0x96c   : > { %v5147_v62 = vadd.f32 %v11784_v39, %v5146_v29 }
 0x96d   : > { %v6594_v22 = vpop.f32.mrf.mxu3 }
 0x96e   : > { %v11761_v26 = vadd.f32 %v6594_v22, %v11600_v18  ;;  %v3254_v3 = vpop.f32.mrf.mxu0  ;;  %v5456_v63 = vmax.f32 %v5147_v62, 0.0 }
 0x96f   : > { %v3255_v7 = vadd.f32 %v11504_v61, %v3254_v3  ;;  %v8146_v61 = vld [vmem:[%s12230_s7 + $0x688] sm:$0xff] }
 0x970   : > { %5196 = vmatmul.f32.gmra.mxu2 %v4476_v47  ;;  %v4203_v59 = vpop.f32.mrf.mxu1  ;;  %6763 = vmatpush.msrb.mxu3 %v8146_v61  ;;  %v8174_v47 = vld [vmem:[%s12230_s7 + $0x768] sm:$0xff] }
 0x971   : > { %v3496_v45 = vmax.f32 %v3255_v7, 0.0  ;;  %v4204_v43 = vadd.f32 %v11616_v21, %v4203_v59 }
 0x972   : > { %6694 = vmatmul.f32.gmra.mxu3 %v5452_v28 }
 0x973   : > { %v5149_v24 = vpop.f32.mrf.mxu2  ;;  %v4477_v17 = vmax.f32 %v4204_v43, 0.0  ;;  %4250 = vmatmul.f32.gmra.mxu1 %v3496_v45  ;;  %6764 = vmatpush.msrb.mxu3 %v8145_v6  ;;  %v8173_v45 = vld [vmem:[%s12230_s7 + $0x760] sm:$0xff]  ;;  %v6965_v43 = vld [vmem:[%s12232_s9 + $0x8] sm:$0xff] }
 0x974   : > { %v5150_v12 = vadd.f32 %v11784_v39, %v5149_v24  ;;  %6998 = vmatpush.msrb.mxu0 %v6965_v43 }
 0x975   : > { %v6597_v18 = vpop.f32.mrf.mxu3  ;;  %6847 = vmatpush.msra.mxu3 %v8176_v57 }
 0x976   : > { %v11770_v36 = vadd.f32 %v6597_v18, %v11611_v34  ;;  %v5457_v14 = vmax.f32 %v5150_v12, 0.0 }
 0x977   : > { %6848 = vmatpush.msra.mxu3 %v8175_v54 }
 0x978   : > { %5199 = vmatmul.f32.gmra.mxu2 %v4477_v17  ;;  %v4206_v9 = vpop.f32.mrf.mxu1 }
 0x979   : > { %v4207_v5 = vadd.f32 %v11616_v21, %v4206_v9  ;;  %6849 = vmatpush.msra.mxu3 %v8174_v47 }
 0x97a   : > { %6697 = vmatmul.f32.gmra.mxu3 %v5453_v27 }
 0x97b   : > { %v5152_v32 = vpop.f32.mrf.mxu2  ;;  %v4478_v10 = vmax.f32 %v4207_v5, 0.0  ;;  %6850 = vmatpush.msra.mxu3 %v8173_v45  ;;  %v8172_v5 = vld [vmem:[%s12230_s7 + $0x758] sm:$0xff] }
 0x97c   : > { %v5153_v29 = vadd.f32 %v11784_v39, %v5152_v32 }
 0x97d   : > { %v6600_v35 = vpop.f32.mrf.mxu3  ;;  %6851 = vmatpush.msra.mxu3 %v8172_v5 }
 0x97e   : > { %v11778_v34 = vadd.f32 %v6600_v35, %v11626_v30  ;;  %v5458_v3 = vmax.f32 %v5153_v29, 0.0 }
 0x980   : > { %5202 = vmatmul.f32.gmra.mxu2 %v4478_v10  ;;  %v4209_v55 = vpop.f32.mrf.mxu1 }
 0x981   : > { %v4210_v20 = vadd.f32 %v11616_v21, %v4209_v55  ;;  %v7067_v55 = vld [vmem:[%s12234_s11 + $0x10] sm:$0xff] }
 0x982   : > { %6700 = vmatmul.f32.gmra.mxu3 %v5454_v0  ;;  %7098 = vmatpush.msrb.mxu1 %v7067_v55 }
 0x983   : > { %v5155_v37 = vpop.f32.mrf.mxu2  ;;  %v4479_v4 = vmax.f32 %v4210_v20, 0.0 }
 0x984   : > { %v5156_v27 = vadd.f32 %v11784_v39, %v5155_v37  ;;  %v8171_v37 = vld [vmem:[%s12230_s7 + $0x750] sm:$0xff] }
 0x985   : > { %v6603_v30 = vpop.f32.mrf.mxu3  ;;  %6852 = vmatpush.msra.mxu3 %v8171_v37 }
 0x986   : > { %v11791_v51 = vadd.f32 %v6603_v30, %v11635_v1  ;;  %v5459_v17 = vmax.f32 %v5156_v27, 0.0 }
 0x988   : > { %5205 = vmatmul.f32.gmra.mxu2 %v4479_v4  ;;  %v4212_v15 = vpop.f32.mrf.mxu1 }
 0x989   : > { %v4213_v1 = vadd.f32 %v11616_v21, %v4212_v15 }
 0x98a   : > { %6703 = vmatmul.f32.gmra.mxu3 %v5455_v19 }
 0x98b   : > { %v5158_v58 = vpop.f32.mrf.mxu2  ;;  %v4480_v41 = vmax.f32 %v4213_v1, 0.0 }
 0x98c   : > { %v5159_v0 = vadd.f32 %v11784_v39, %v5158_v58 }
 0x98d   : > { %v6606_v25 = vpop.f32.mrf.mxu3 }
 0x98e   : > { %v11799_v42 = vadd.f32 %v6606_v25, %v11644_v2  ;;  %v5460_v8 = vmax.f32 %v5159_v0, 0.0 }
 0x990   : > { %5208 = vmatmul.f32.gmra.mxu2 %v4480_v41  ;;  %v4215_v22 = vpop.f32.mrf.mxu1  ;;  %v8170_v41 = vld [vmem:[%s12230_s7 + $0x748] sm:$0xff] }
 0x991   : > { %v4216_v2 = vadd.f32 %v11616_v21, %v4215_v22  ;;  %6853 = vmatpush.msra.mxu3 %v8170_v41 }
 0x992   : > { %6706 = vmatmul.f32.gmra.mxu3 %v5456_v63  ;;  %v7169_v63 = vld [vmem:[%s12236_s13 + $0x18] sm:$0xff] }
 0x993   : > { %v5161_v11 = vpop.f32.mrf.mxu2  ;;  %v4481_v46 = vmax.f32 %v4216_v2, 0.0  ;;  %7198 = vmatpush.msrb.mxu2 %v7169_v63 }
 0x994   : > { %v5162_v20 = vadd.f32 %v11784_v39, %v5161_v11 }
 0x995   : > { %v6609_v53 = vpop.f32.mrf.mxu3 }
 0x996   : > { %v11807_v28 = vadd.f32 %v6609_v53, %v11653_v50  ;;  %v5461_v62 = vmax.f32 %v5162_v20, 0.0 }
 0x998   : > { %5211 = vmatmul.f32.gmra.mxu2 %v4481_v46  ;;  %v4218_v16 = vpop.f32.mrf.mxu1  ;;  %v8169_v46 = vld [vmem:[%s12230_s7 + $0x740] sm:$0xff] }
 0x999   : > { %v4219_v50 = vadd.f32 %v11616_v21, %v4218_v16  ;;  %6854 = vmatpush.msra.mxu3 %v8169_v46 }
 0x99a   : > { %6709 = vmatmul.f32.gmra.mxu3 %v5457_v14 }
 0x99b   : > { %v5164_v18 = vpop.f32.mrf.mxu2  ;;  %v4482_v59 = vmax.f32 %v4219_v50, 0.0 }
 0x99c   : > { %v5165_v58 = vadd.f32 %v11784_v39, %v5164_v18 }
 0x99d   : > { %v6612_v44 = vpop.f32.mrf.mxu3 }
 0x99e   : > { %v11815_v7 = vadd.f32 %v6612_v44, %v11662_v56  ;;  %v5462_v54 = vmax.f32 %v5165_v58, 0.0 }
 0x9a0   : > { %5214 = vmatmul.f32.gmra.mxu2 %v4482_v59  ;;  %v4221_v24 = vpop.f32.mrf.mxu1  ;;  %v8168_v59 = vld [vmem:[%s12230_s7 + $0x738] sm:$0xff] }
 0x9a1   : > { %v4222_v61 = vadd.f32 %v11616_v21, %v4221_v24  ;;  %6855 = vmatpush.msra.mxu3 %v8168_v59 }
 0x9a2   : > { %6712 = vmatmul.f32.gmra.mxu3 %v5458_v3 }
 0x9a3   : > { %v5167_v35 = vpop.f32.mrf.mxu2  ;;  %v4483_v9 = vmax.f32 %v4222_v61, 0.0 }
 0x9a4   : > { %v5168_v11 = vadd.f32 %v11784_v39, %v5167_v35  ;;  %v8167_v35 = vld [vmem:[%s12230_s7 + $0x730] sm:$0xff] }
 0x9a5   : > { %v6615_v56 = vpop.f32.mrf.mxu3  ;;  %6856 = vmatpush.msra.mxu3 %v8167_v35 }
 0x9a6   : > { %v11826_v52 = vadd.f32 %v6615_v56, %v11671_v38  ;;  %v5463_v44 = vmax.f32 %v5168_v11, 0.0 }
 0x9a8   : > { %5217 = vmatmul.f32.gmra.mxu2 %v4483_v9  ;;  %v4224_v10 = vpop.f32.mrf.mxu1 }
 0x9a9   : > { %v4225_v38 = vadd.f32 %v11616_v21, %v4224_v10 }
 0x9aa   : > { %6765 = vmatmul.f32.vlgmr.msrb.gmra.mxu3 %v5459_v17 }
 0x9ab   : > { %v5170_v30 = vpop.f32.mrf.mxu2  ;;  %v4484_v19 = vmax.f32 %v4225_v38, 0.0 }
 0x9ac   : > { %v5171_v18 = vadd.f32 %v11784_v39, %v5170_v30  ;;  %v8166_v30 = vld [vmem:[%s12230_s7 + $0x728] sm:$0xff] }
 0x9ad   : > { %v6668_v32 = vpop.f32.mrf.mxu3  ;;  %6857 = vmatpush.msra.mxu3 %v8166_v30 }
 0x9ae   : > { %v11834_v6 = vadd.f32 %v6668_v32, %v11683_v33  ;;  %v5464_v43 = vmax.f32 %v5171_v18, 0.0 }
 0x9b0   : > { %5220 = vmatmul.f32.gmra.mxu2 %v4484_v19  ;;  %v4227_v4 = vpop.f32.mrf.mxu1 }
 0x9b1   : > { %v4228_v25 = vadd.f32 %v11616_v21, %v4227_v4 }
 0x9b2   : > { %6768 = vmatmul.f32.gmra.mxu3 %v5460_v8 }
 0x9b3   : > { %v5173_v15 = vpop.f32.mrf.mxu2  ;;  %v4485_v1 = vmax.f32 %v4228_v25, 0.0  ;;  %v8165_v25 = vld [vmem:[%s12230_s7 + $0x720] sm:$0xff] }
 0x9b4   : > { %v5174_v61 = vadd.f32 %v11784_v39, %v5173_v15  ;;  %6858 = vmatpush.msra.mxu3 %v8165_v25 }
 0x9b5   : > { %v6671_v33 = vpop.f32.mrf.mxu3 }
 0x9b6   : > { %v11845_v57 = vadd.f32 %v6671_v33, %v11692_v31  ;;  %v5465_v5 = vmax.f32 %v5174_v61, 0.0  ;;  %v8161_v61 = vld [vmem:[%s12230_s7 + $0x700] sm:$0xff] }
 0x9b8   : > { %5223 = vmatmul.f32.gmra.mxu2 %v4485_v1  ;;  %v4230_v12 = vpop.f32.mrf.mxu1 }
 0x9b9   : > { %v4231_v22 = vadd.f32 %v11616_v21, %v4230_v12 }
 0x9ba   : > { %6771 = vmatmul.f32.gmra.mxu3 %v5461_v62 }
 0x9bb   : > { %v5176_v14 = vpop.f32.mrf.mxu2  ;;  %v4486_v2 = vmax.f32 %v4231_v22, 0.0 }
 0x9bc   : > { %v5177_v38 = vadd.f32 %v11784_v39, %v5176_v14 }
 0x9bd   : > { %v6674_v31 = vpop.f32.mrf.mxu3 }
 0x9be   : > { %v11856_v53 = vadd.f32 %v6674_v31, %v11704_v13  ;;  %v5466_v20 = vmax.f32 %v5177_v38, 0.0 }
 0x9c0   : > { %5226 = vmatmul.f32.gmra.mxu2 %v4486_v2  ;;  %v4233_v47 = vpop.f32.mrf.mxu1 }
 0x9c1   : > { %v4234_v13 = vadd.f32 %v11616_v21, %v4233_v47 }
 0x9c2   : > { %6774 = vmatmul.f32.gmra.mxu3 %v5462_v54  ;;  %v8164_v54 = vld [vmem:[%s12230_s7 + $0x718] sm:$0xff] }
 0x9c3   : > { %v5179_v3 = vpop.f32.mrf.mxu2  ;;  %v4487_v50 = vmax.f32 %v4234_v13, 0.0  ;;  %6859 = vmatpush.msra.mxu3 %v8164_v54 }
 0x9c4   : > { %v5180_v62 = vadd.f32 %v11784_v39, %v5179_v3 }
 0x9c5   : > { %v6677_v29 = vpop.f32.mrf.mxu3 }
 0x9c6   : > { %v11864_v16 = vadd.f32 %v6677_v29, %v11716_v23  ;;  %v5467_v1 = vmax.f32 %v5180_v62, 0.0 }
 0x9c8   : > { %5229 = vmatmul.f32.gmra.mxu2 %v4487_v50  ;;  %v4236_v45 = vpop.f32.mrf.mxu1 }
 0x9c9   : > { %v4237_v23 = vadd.f32 %v11616_v21, %v4236_v45 }
 0x9ca   : > { %6777 = vmatmul.f32.gmra.mxu3 %v5463_v44  ;;  %v8163_v44 = vld [vmem:[%s12230_s7 + $0x710] sm:$0xff] }
 0x9cb   : > { %v5182_v24 = vpop.f32.mrf.mxu2  ;;  %v4488_v17 = vmax.f32 %v4237_v23, 0.0  ;;  %6860 = vmatpush.msra.mxu3 %v8163_v44 }
 0x9cc   : > { %v5183_v12 = vadd.f32 %v11784_v39, %v5182_v24 }
 0x9cd   : > { %v6680_v27 = vpop.f32.mrf.mxu3 }
 0x9ce   : > { %v11872_v56 = vadd.f32 %v6680_v27, %v11725_v40  ;;  %v5468_v2 = vmax.f32 %v5183_v12, 0.0 }
 0x9d0   : > { %5232 = vmatmul.f32.gmra.mxu2 %v4488_v17  ;;  %v4239_v0 = vpop.f32.mrf.mxu1 }
 0x9d1   : > { %v4240_v40 = vadd.f32 %v11616_v21, %v4239_v0 }
 0x9d2   : > { %6780 = vmatmul.f32.gmra.mxu3 %v5464_v43  ;;  %v8162_v43 = vld [vmem:[%s12230_s7 + $0x708] sm:$0xff] }
 0x9d3   : > { %v5185_v10 = vpop.f32.mrf.mxu2  ;;  %v4489_v8 = vmax.f32 %v4240_v40, 0.0  ;;  %6861 = vmatpush.msra.mxu3 %v8162_v43 }
 0x9d4   : > { %v5186_v47 = vadd.f32 %v11784_v39, %v5185_v10 }
 0x9d5   : > { %v6683_v9 = vpop.f32.mrf.mxu3  ;;  %6862 = vmatpush.msra.mxu3 %v8161_v61 }
 0x9d6   : > { %v11880_v32 = vadd.f32 %v6683_v9, %v11734_v60  ;;  %v5469_v50 = vmax.f32 %v5186_v47, 0.0 }
 0x9d8   : > { %5235 = vmatmul.f32.gmra.mxu2 %v4489_v8  ;;  %v4242_v19 = vpop.f32.mrf.mxu1 }
 0x9d9   : > { %v4243_v60 = vadd.f32 %v11616_v21, %v4242_v19 }
 0x9da   : > { %6783 = vmatmul.f32.gmra.mxu3 %v5465_v5 }
 0x9db   : > { %v5188_v33 = vpop.f32.mrf.mxu2  ;;  %v4490_v4 = vmax.f32 %v4243_v60, 0.0 }
 0x9dc   : > { %v5189_v45 = vadd.f32 %v11784_v39, %v5188_v33  ;;  %v6964_v33 = vld [vmem:[%s12232_s9] sm:$0xff] }
 0x9dd   : > { %v6686_v55 = vpop.f32.mrf.mxu3  ;;  %6999 = vmatpush.msrb.mxu0 %v6964_v33 }
 0x9de   : > { %v11888_v37 = vadd.f32 %v6686_v55, %v11743_v48  ;;  %v5470_v24 = vmax.f32 %v5189_v45, 0.0 }
 0x9e0   : > { %5238 = vmatmul.f32.gmra.mxu2 %v4490_v4  ;;  %v4245_v63 = vpop.f32.mrf.mxu1 }
 0x9e1   : > { %v4246_v48 = vadd.f32 %v11616_v21, %v4245_v63 }
 0x9e2   : > { %6786 = vmatmul.f32.gmra.mxu3 %v5466_v20 }
 0x9e3   : > { %v5191_v41 = vpop.f32.mrf.mxu2  ;;  %v4491_v31 = vmax.f32 %v4246_v48, 0.0  ;;  %v7066_v48 = vld [vmem:[%s12234_s11 + $0x8] sm:$0xff] }
 0x9e4   : > { %7099 = vmatpush.msrb.mxu1 %v7066_v48 }
 0x9e5   : > { %v6689_v15 = vpop.f32.mrf.mxu3 }
 0x9e6   : > { %v11896_v58 = vadd.f32 %v6689_v15, %v11752_v49 }
 0x9e8   : > { %5241 = vmatmul.f32.gmra.mxu2 %v4491_v31  ;;  %v4248_v14 = vpop.f32.mrf.mxu1 }
 0x9e9   : > { %v4249_v49 = vadd.f32 %v11616_v21, %v4248_v14 }
 0x9ea   : > { %6789 = vmatmul.f32.gmra.mxu3 %v5467_v1 }
 0x9eb   : > { %v5194_v46 = vpop.f32.mrf.mxu2  ;;  %v4492_v29 = vmax.f32 %v4249_v49, 0.0 }
 0x9ec   : > { %v5195_v40 = vadd.f32 %v11784_v39, %v5194_v46 }
 0x9ed   : > { %v6692_v22 = vpop.f32.mrf.mxu3 }
 0x9ee   : > { %v11904_v11 = vadd.f32 %v6692_v22, %v11761_v26  ;;  %v5472_v10 = vmax.f32 %v5195_v40, 0.0  ;;  %v7168_v22 = vld [vmem:[%s12236_s13 + $0x10] sm:$0xff] }
 0x9ef   : > { %7199 = vmatpush.msrb.mxu2 %v7168_v22 }
 0x9f0   : > { %5244 = vmatmul.f32.gmra.mxu2 %v4492_v29  ;;  %v4251_v3 = vpop.f32.mrf.mxu1 }
 0x9f1   : > { %v4252_v26 = vadd.f32 %v11616_v21, %v4251_v3  ;;  %v5192_v21 = vadd.f32 %v11784_v39, %v5191_v41 }
 0x9f2   : > { %6792 = vmatmul.f32.gmra.mxu3 %v5468_v2 }
 0x9f3   : > { %v5197_v59 = vpop.f32.mrf.mxu2  ;;  %v4493_v27 = vmax.f32 %v4252_v26, 0.0  ;;  %v5471_v9 = vmax.f32 %v5192_v21, 0.0 }
 0x9f4   : > { %v5198_v30 = vadd.f32 %v11784_v39, %v5197_v59 }
 0x9f5   : > { %v6695_v13 = vpop.f32.mrf.mxu3 }
 0x9f6   : > { %v11912_v18 = vadd.f32 %v6695_v13, %v11770_v36  ;;  %v5473_v19 = vmax.f32 %v5198_v30, 0.0 }
 0x9f8   : > { %5247 = vmatmul.f32.gmra.mxu2 %v4493_v27 }
 0x9fa   : > { %6795 = vmatmul.f32.gmra.mxu3 %v5469_v50 }
 0x9fb   : > { %v5200_v36 = vpop.f32.mrf.mxu2 }
 0x9fc   : > { %v5201_v60 = vadd.f32 %v11784_v39, %v5200_v36 }
 0x9fd   : > { %v6698_v23 = vpop.f32.mrf.mxu3 }
 0x9fe   : > { %v11920_v17 = vadd.f32 %v6698_v23, %v11778_v34  ;;  %v5474_v4 = vmax.f32 %v5201_v60, 0.0 }
 0xa02   : > { %6798 = vmatmul.f32.gmra.mxu3 %v5470_v24 }
 0xa03   : > { %v5203_v5 = vpop.f32.mrf.mxu2 }
 0xa04   : > { %v5204_v15 = vadd.f32 %v11784_v39, %v5203_v5 }
 0xa05   : > { %v6701_v35 = vpop.f32.mrf.mxu3 }
 0xa06   : > { %v11927_v0 = vadd.f32 %v6701_v35, %v11791_v51  ;;  %v5475_v63 = vmax.f32 %v5204_v15, 0.0 }
 0xa0a   : > { %6801 = vmatmul.f32.gmra.mxu3 %v5471_v9 }
 0xa0b   : > { %v5206_v38 = vpop.f32.mrf.mxu2 }
 0xa0c   : > { %v5207_v31 = vadd.f32 %v11784_v39, %v5206_v38 }
 0xa0d   : > { %v6704_v34 = vpop.f32.mrf.mxu3 }
 0xa0e   : > { %v11931_v8 = vadd.f32 %v6704_v34, %v11799_v42  ;;  %v5476_v12 = vmax.f32 %v5207_v31, 0.0 }
 0xa12   : > { %6804 = vmatmul.f32.gmra.mxu3 %v5472_v10 }
 0xa13   : > { %v5209_v51 = vpop.f32.mrf.mxu2 }
 0xa15   : > { %v6707_v55 = vpop.f32.mrf.mxu3 }
 0xa16   : > { %v11935_v20 = vadd.f32 %v6707_v55, %v11807_v28 }
 0xa1a   : > { %6807 = vmatmul.f32.gmra.mxu3 %v5473_v19 }
 0xa1b   : > { %v5212_v25 = vpop.f32.mrf.mxu2 }
 0xa1c   : > { %v5213_v29 = vadd.f32 %v11784_v39, %v5212_v25 }
 0xa1d   : > { %v6710_v42 = vpop.f32.mrf.mxu3 }
 0xa1e   : > { %v11942_v62 = vadd.f32 %v6710_v42, %v11815_v7  ;;  %v5478_v44 = vmax.f32 %v5213_v29, 0.0 }
 0xa22   : > { %6810 = vmatmul.f32.gmra.mxu3 %v5474_v4 }
 0xa23   : > { %v5215_v41 = vpop.f32.mrf.mxu2 }
 0xa24   : > { %v5216_v3 = vadd.f32 %v11784_v39, %v5215_v41 }
 0xa25   : > { %v6713_v28 = vpop.f32.mrf.mxu3 }
 0xa26   : > { %v11946_v1 = vadd.f32 %v6713_v28, %v11826_v52  ;;  %v5210_v52 = vadd.f32 %v11784_v39, %v5209_v51  ;;  %v5479_v26 = vmax.f32 %v5216_v3, 0.0  ;;  %v7167_v3 = vld [vmem:[%s12236_s13 + $0x8] sm:$0xff] }
 0xa27   : > { %7200 = vmatpush.msrb.mxu2 %v7167_v3 }
 0xa28   : > { %v5477_v49 = vmax.f32 %v5210_v52, 0.0 }
 0xa2a   : > { %6863 = vmatmul.f32.vlgmr.msra.gmra.mxu3 %v5475_v63 }
 0xa2b   : > { %v5218_v14 = vpop.f32.mrf.mxu2 }
 0xa2d   : > { %v6766_v7 = vpop.f32.mrf.mxu3 }
 0xa2e   : > { %v11953_v54 = vadd.f32 %v6766_v7, %v11834_v6 }
 0xa32   : > { %6866 = vmatmul.f32.gmra.mxu3 %v5476_v12 }
 0xa33   : > { %v5221_v6 = vpop.f32.mrf.mxu2 }
 0xa35   : > { %v6769_v2 = vpop.f32.mrf.mxu3 }
 0xa36   : > { %v11960_v46 = vadd.f32 %v6769_v2, %v11845_v57  ;;  %v5219_v57 = vadd.f32 %v11784_v39, %v5218_v14 }
 0xa38   : > { %v5480_v43 = vmax.f32 %v5219_v57, 0.0 }
 0xa3a   : > { %6869 = vmatmul.f32.gmra.mxu3 %v5477_v49 }
 0xa3b   : > { %v5224_v27 = vpop.f32.mrf.mxu2 }
 0xa3d   : > { %v6772_v47 = vpop.f32.mrf.mxu3 }
 0xa3e   : > { %v11964_v13 = vadd.f32 %v6772_v47, %v11856_v53  ;;  %v5222_v53 = vadd.f32 %v11784_v39, %v5221_v6  ;;  %v7065_v6 = vld [vmem:[%s12234_s11] sm:$0xff] }
 0xa3f   : > { %7100 = vmatpush.msrb.mxu1 %v7065_v6 }
 0xa40   : > { %v5481_v21 = vmax.f32 %v5222_v53, 0.0 }
 0xa42   : > { %6872 = vmatmul.f32.gmra.mxu3 %v5478_v44 }
 0xa43   : > { %v5227_v24 = vpop.f32.mrf.mxu2 }
 0xa45   : > { %v6775_v50 = vpop.f32.mrf.mxu3 }
 0xa46   : > { %v11968_v59 = vadd.f32 %v6775_v50, %v11864_v16  ;;  %v5225_v16 = vadd.f32 %v11784_v39, %v5224_v27 }
 0xa48   : > { %v5482_v5 = vmax.f32 %v5225_v16, 0.0 }
 0xa4a   : > { %6875 = vmatmul.f32.gmra.mxu3 %v5479_v26 }
 0xa4b   : > { %v5230_v35 = vpop.f32.mrf.mxu2 }
 0xa4d   : > { %v6778_v45 = vpop.f32.mrf.mxu3 }
 0xa4e   : > { %v11972_v23 = vadd.f32 %v6778_v45, %v11872_v56  ;;  %v5228_v56 = vadd.f32 %v11784_v39, %v5227_v24 }
 0xa50   : > { %v5483_v38 = vmax.f32 %v5228_v56, 0.0 }
 0xa52   : > { %6878 = vmatmul.f32.gmra.mxu3 %v5480_v43 }
 0xa53   : > { %v5233_v10 = vpop.f32.mrf.mxu2 }
 0xa55   : > { %v6781_v36 = vpop.f32.mrf.mxu3 }
 0xa56   : > { %v11976_v61 = vadd.f32 %v6781_v36, %v11880_v32  ;;  %v5231_v32 = vadd.f32 %v11784_v39, %v5230_v35 }
 0xa58   : > { %v5484_v19 = vmax.f32 %v5231_v32, 0.0 }
 0xa5a   : > { %6881 = vmatmul.f32.gmra.mxu3 %v5481_v21 }
 0xa5b   : > { %v5236_v51 = vpop.f32.mrf.mxu2 }
 0xa5c   : > { %v5237_v4 = vadd.f32 %v11784_v39, %v5236_v51 }
 0xa5d   : > { %v6784_v9 = vpop.f32.mrf.mxu3 }
 0xa5e   : > { %v11980_v40 = vadd.f32 %v6784_v9, %v11888_v37  ;;  %v5234_v37 = vadd.f32 %v11784_v39, %v5233_v10 }
 0xa60   : > { %v5485_v33 = vmax.f32 %v5234_v37, 0.0 }
 0xa62   : > { %6884 = vmatmul.f32.gmra.mxu3 %v5482_v5 }
 0xa63   : > { %v5239_v42 = vpop.f32.mrf.mxu2 }
 0xa64   : > { %v5240_v15 = vadd.f32 %v11784_v39, %v5239_v42 }
 0xa65   : > { %v6787_v34 = vpop.f32.mrf.mxu3 }
 0xa66   : > { %v11984_v30 = vadd.f32 %v6787_v34, %v11896_v58  ;;  %v5486_v58 = vmax.f32 %v5237_v4, 0.0  ;;  %v5487_v48 = vmax.f32 %v5240_v15, 0.0 }
 0xa6a   : > { %6887 = vmatmul.f32.gmra.mxu3 %v5483_v38 }
 0xa6b   : > { %v5242_v28 = vpop.f32.mrf.mxu2 }
 0xa6c   : > { %v5243_v41 = vadd.f32 %v11784_v39, %v5242_v28 }
 0xa6d   : > { %v11987_v55 = vpop.f32.mrf.mxu3 }
 0xa6e   : > { %v5488_v12 = vmax.f32 %v5243_v41, 0.0 }
 0xa72   : > { %6890 = vmatmul.f32.gmra.mxu3 %v5484_v19 }
 0xa73   : > { %v5245_v7 = vpop.f32.mrf.mxu2 }
 0xa74   : > { %v5246_v22 = vadd.f32 %v11784_v39, %v5245_v7 }
 0xa75   : > { %v11990_v60 = vpop.f32.mrf.mxu3 }
 0xa76   : > { %v5489_v14 = vmax.f32 %v5246_v22, 0.0 }
 0xa7a   : > { %6893 = vmatmul.f32.gmra.mxu3 %v5485_v33 }
 0xa7b   : > { %v5248_v2 = vpop.f32.mrf.mxu2 }
 0xa7c   : > { %v5249_v49 = vadd.f32 %v11784_v39, %v5248_v2  ;;  %v12018_v39 = vld [vmem:[%s12231_s8] ss:$0 sm:$0xff] }
 0xa7d   : > { %v11993_v25 = vpop.f32.mrf.mxu3 }
 0xa7e   : > { %v5490_v47 = vmax.f32 %v5249_v49, 0.0  ;;  %v6824_v2 = vadd.f32 %v11993_v25, %v11920_v17 }
 0xa82   : > { %6896 = vmatmul.f32.gmra.mxu3 %v5486_v58 }
 0xa85   : > { %v11996_v63 = vpop.f32.mrf.mxu3 }
 0xa86   : > { %v6825_v6 = vadd.f32 %v11996_v63, %v11927_v0 }
 0xa8a   : > { %6899 = vmatmul.f32.gmra.mxu3 %v5487_v48 }
 0xa8d   : > { %v11999_v31 = vpop.f32.mrf.mxu3 }
 0xa92   : > { %6902 = vmatmul.f32.gmra.mxu3 %v5488_v12 }
 0xa95   : > { %v12002_v52 = vpop.f32.mrf.mxu3 }
 0xa9a   : > { %6905 = vmatmul.f32.gmra.mxu3 %v5489_v14 }
 0xa9d   : > { %v12005_v29 = vpop.f32.mrf.mxu3 }
 0xaa2   : > { %6908 = vmatmul.f32.gmra.mxu3 %v5490_v47 }
 0xaa5   : > { %v12010_v44 = vpop.f32.mrf.mxu3 }
 0xaad   : > { %v6864_v50 = vpop.f32.mrf.mxu3 }
 0xaae   : > { %v6912_v26 = vadd.f32 %v6864_v50, %v11953_v54 }
 0xab0   : > { %v6932_v27 = vadd.f32 %v12018_v39, %v6912_v26  ;;  %v6826_v26 = vadd.f32 %v11999_v31, %v11931_v8 }
 0xab2   : > { %v6948_v57 = vmax.f32 %v6932_v27, 0.0 }
 0xab4   : > { %7000 = vmatmul.f32.vlgmr.msrb.gmra.mxu0 %v6948_v57 }
 0xab5   : > { %v6867_v45 = vpop.f32.mrf.mxu3 }
 0xab6   : > { %v6913_v43 = vadd.f32 %v6867_v45, %v11960_v46  ;;  %v6827_v45 = vadd.f32 %v12002_v52, %v11935_v20  ;;  %v6829_v52 = vadd.f32 %v12010_v44, %v11946_v1 }
 0xab8   : > { %v6933_v24 = vadd.f32 %v12018_v39, %v6913_v43 }
 0xaba   : > { %v6949_v53 = vmax.f32 %v6933_v24, 0.0 }
 0xabc   : > { %7003 = vmatmul.f32.gmra.mxu0 %v6949_v53  ;;  %v6828_v53 = vadd.f32 %v12005_v29, %v11942_v62  ;;  %v12066_v29 = vld [vmem:[%s12233_s10] ss:$0 sm:$0xff] }
 0xabd   : > { %v6870_v36 = vpop.f32.mrf.mxu3 }
 0xabe   : > { %v6914_v21 = vadd.f32 %v6870_v36, %v11964_v13  ;;  %v7166_v36 = vld [vmem:[%s12236_s13] sm:$0xff] }
 0xabf   : > { %7201 = vmatpush.msrb.mxu2 %v7166_v36  ;;  %v7279_v36 = vld [vmem:[%s12238_s15 + $0x60] sm:$0xff] }
 0xac0   : > { %v6934_v16 = vadd.f32 %v12018_v39, %v6914_v21 }
 0xac2   : > { %v6950_v35 = vmax.f32 %v6934_v16, 0.0 }
 0xac4   : > { %7006 = vmatmul.f32.gmra.mxu0 %v6950_v35 }
 0xac5   : > { %v6873_v9 = vpop.f32.mrf.mxu3 }
 0xac6   : > { %v6915_v54 = vadd.f32 %v6873_v9, %v11968_v59 }
 0xac8   : > { %v6935_v5 = vadd.f32 %v12018_v39, %v6915_v54 }
 0xaca   : > { %v6951_v56 = vmax.f32 %v6935_v5, 0.0 }
 0xacc   : > { %7009 = vmatmul.f32.gmra.mxu0 %v6951_v56 }
 0xacd   : > { %v6876_v34 = vpop.f32.mrf.mxu3 }
 0xace   : > { %v6916_v46 = vadd.f32 %v6876_v34, %v11972_v23 }
 0xad0   : > { %v6936_v10 = vadd.f32 %v12018_v39, %v6916_v46 }
 0xad2   : > { %v6952_v38 = vmax.f32 %v6936_v10, 0.0 }
 0xad4   : > { %7012 = vmatmul.f32.gmra.mxu0 %v6952_v38 }
 0xad5   : > { %v6879_v32 = vpop.f32.mrf.mxu3 }
 0xad6   : > { %v6917_v13 = vadd.f32 %v6879_v32, %v11976_v61  ;;  %v6822_v61 = vadd.f32 %v11987_v55, %v11904_v11 }
 0xad8   : > { %v6937_v19 = vadd.f32 %v12018_v39, %v6917_v13 }
 0xada   : > { %v6953_v51 = vmax.f32 %v6937_v19, 0.0 }
 0xadc   : > { %7015 = vmatmul.f32.gmra.mxu0 %v6953_v51 }
 0xadd   : > { %v6882_v37 = vpop.f32.mrf.mxu3 }
 0xade   : > { %v6918_v59 = vadd.f32 %v6882_v37, %v11980_v40  ;;  %v6823_v40 = vadd.f32 %v11990_v60, %v11912_v18 }
 0xae0   : > { %v6938_v33 = vadd.f32 %v12018_v39, %v6918_v59 }
 0xae2   : > { %v6954_v42 = vmax.f32 %v6938_v33, 0.0 }
 0xae4   : > { %7018 = vmatmul.f32.gmra.mxu0 %v6954_v42 }
 0xae5   : > { %v6885_v4 = vpop.f32.mrf.mxu3 }
 0xae6   : > { %v6919_v23 = vadd.f32 %v6885_v4, %v11984_v30 }
 0xae8   : > { %v6939_v58 = vadd.f32 %v12018_v39, %v6919_v23 }
 0xaea   : > { %v6955_v15 = vmax.f32 %v6939_v58, 0.0 }
 0xaec   : > { %7021 = vmatmul.f32.gmra.mxu0 %v6955_v15 }
 0xaed   : > { %v6888_v28 = vpop.f32.mrf.mxu3 }
 0xaee   : > { %v6920_v48 = vadd.f32 %v6888_v28, %v6822_v61 }
 0xaf0   : > { %v6940_v41 = vadd.f32 %v12018_v39, %v6920_v48 }
 0xaf2   : > { %v6956_v7 = vmax.f32 %v6940_v41, 0.0 }
 0xaf4   : > { %7024 = vmatmul.f32.gmra.mxu0 %v6956_v7 }
 0xaf5   : > { %v6891_v12 = vpop.f32.mrf.mxu3 }
 0xaf6   : > { %v6921_v22 = vadd.f32 %v6891_v12, %v6823_v40 }
 0xaf8   : > { %v6941_v30 = vadd.f32 %v12018_v39, %v6921_v22 }
 0xafa   : > { %v6957_v14 = vmax.f32 %v6941_v30, 0.0 }
 0xafc   : > { %7027 = vmatmul.f32.gmra.mxu0 %v6957_v14 }
 0xafd   : > { %v6894_v11 = vpop.f32.mrf.mxu3 }
 0xafe   : > { %v6922_v55 = vadd.f32 %v6894_v11, %v6824_v2 }
 0xb00   : > { %v6942_v49 = vadd.f32 %v12018_v39, %v6922_v55 }
 0xb02   : > { %v6958_v47 = vmax.f32 %v6942_v49, 0.0 }
 0xb04   : > { %7030 = vmatmul.f32.gmra.mxu0 %v6958_v47 }
 0xb05   : > { %v6897_v18 = vpop.f32.mrf.mxu3 }
 0xb06   : > { %v6923_v60 = vadd.f32 %v6897_v18, %v6825_v6 }
 0xb08   : > { %v6943_v3 = vadd.f32 %v12018_v39, %v6923_v60 }
 0xb0a   : > { %v6959_v50 = vmax.f32 %v6943_v3, 0.0 }
 0xb0c   : > { %7033 = vmatmul.f32.gmra.mxu0 %v6959_v50 }
 0xb0d   : > { %v6900_v17 = vpop.f32.mrf.mxu3 }
 0xb0e   : > { %v6924_v25 = vadd.f32 %v6900_v17, %v6826_v26  ;;  %v7282_v26 = vld [vmem:[%s12238_s15 + $0x78] sm:$0xff] }
 0xb0f   : > { %7287 = vmatpush.msrb.mxu3 %v7282_v26 }
 0xb10   : > { %v6944_v27 = vadd.f32 %v12018_v39, %v6924_v25 }
 0xb12   : > { %v6960_v57 = vmax.f32 %v6944_v27, 0.0 }
 0xb14   : > { %7036 = vmatmul.f32.gmra.mxu0 %v6960_v57  ;;  %v7281_v57 = vld [vmem:[%s12238_s15 + $0x70] sm:$0xff] }
 0xb15   : > { %v6903_v0 = vpop.f32.mrf.mxu3  ;;  %7288 = vmatpush.msrb.mxu3 %v7281_v57 }
 0xb16   : > { %v6925_v63 = vadd.f32 %v6903_v0, %v6827_v45 }
 0xb18   : > { %v6945_v43 = vadd.f32 %v12018_v39, %v6925_v63 }
 0xb1a   : > { %v6961_v24 = vmax.f32 %v6945_v43, 0.0  ;;  %v12093_v43 = vld [vmem:[%s12235_s12] ss:$0 sm:$0xff] }
 0xb1c   : > { %7039 = vmatmul.f32.gmra.mxu0 %v6961_v24  ;;  %v7280_v24 = vld [vmem:[%s12238_s15 + $0x68] sm:$0xff] }
 0xb1d   : > { %v6906_v8 = vpop.f32.mrf.mxu3  ;;  %7289 = vmatpush.msrb.mxu3 %v7280_v24 }
 0xb1e   : > { %v6926_v31 = vadd.f32 %v6906_v8, %v6828_v53 }
 0xb1f   : > { %7290 = vmatpush.msrb.mxu3 %v7279_v36 }
 0xb20   : > { %v6946_v21 = vadd.f32 %v12018_v39, %v6926_v31 }
 0xb22   : > { %v6962_v20 = vmax.f32 %v6946_v21, 0.0 }
 0xb24   : > { %7042 = vmatmul.f32.gmra.mxu0 %v6962_v20 }
 0xb25   : > { %v6909_v16 = vpop.f32.mrf.mxu3 }
 0xb26   : > { %v6927_v35 = vadd.f32 %v6909_v16, %v6829_v52  ;;  %v7278_v16 = vld [vmem:[%s12238_s15 + $0x58] sm:$0xff] }
 0xb27   : > { %7291 = vmatpush.msrb.mxu3 %v7278_v16 }
 0xb28   : > { %v6947_v9 = vadd.f32 %v12018_v39, %v6927_v35 }
 0xb2a   : > { %v6963_v62 = vmax.f32 %v6947_v9, 0.0 }
 0xb2c   : > { %7045 = vmatmul.f32.gmra.mxu0 %v6963_v62 }
 0xb31   : > { %v7001_v54 = vpop.f32.mrf.mxu0 }
 0xb32   : > { %v7002_v5 = vadd.f32 %v12066_v29, %v7001_v54 }
 0xb34   : > { %v7049_v56 = vmax.f32 %v7002_v5, 0.0 }
 0xb36   : > { %7101 = vmatmul.f32.vlgmr.msrb.gmra.mxu1 %v7049_v56 }
 0xb39   : > { %v7004_v34 = vpop.f32.mrf.mxu0 }
 0xb3a   : > { %v7005_v1 = vadd.f32 %v12066_v29, %v7004_v34  ;;  %v7276_v34 = vld [vmem:[%s12238_s15 + $0x48] sm:$0xff] }
 0xb3c   : > { %v7050_v44 = vmax.f32 %v7005_v1, 0.0 }
 0xb3e   : > { %7104 = vmatmul.f32.gmra.mxu1 %v7050_v44 }
 0xb41   : > { %v7007_v46 = vpop.f32.mrf.mxu0 }
 0xb42   : > { %v7008_v39 = vadd.f32 %v12066_v29, %v7007_v46 }
 0xb44   : > { %v7051_v10 = vmax.f32 %v7008_v39, 0.0  ;;  %v7275_v39 = vld [vmem:[%s12238_s15 + $0x40] sm:$0xff] }
 0xb46   : > { %7107 = vmatmul.f32.gmra.mxu1 %v7051_v10 }
 0xb49   : > { %v7010_v38 = vpop.f32.mrf.mxu0 }
 0xb4a   : > { %v7011_v32 = vadd.f32 %v12066_v29, %v7010_v38 }
 0xb4c   : > { %v7052_v13 = vmax.f32 %v7011_v32, 0.0 }
 0xb4e   : > { %7110 = vmatmul.f32.gmra.mxu1 %v7052_v13  ;;  %v7274_v13 = vld [vmem:[%s12238_s15 + $0x38] sm:$0xff] }
 0xb51   : > { %v7013_v19 = vpop.f32.mrf.mxu0 }
 0xb52   : > { %v7014_v51 = vadd.f32 %v12066_v29, %v7013_v19 }
 0xb54   : > { %v7053_v37 = vmax.f32 %v7014_v51, 0.0 }
 0xb56   : > { %7113 = vmatmul.f32.gmra.mxu1 %v7053_v37 }
 0xb59   : > { %v7016_v59 = vpop.f32.mrf.mxu0 }
 0xb5a   : > { %v7017_v33 = vadd.f32 %v12066_v29, %v7016_v59  ;;  %v7273_v59 = vld [vmem:[%s12238_s15 + $0x30] sm:$0xff] }
 0xb5c   : > { %v7054_v42 = vmax.f32 %v7017_v33, 0.0 }
 0xb5e   : > { %7116 = vmatmul.f32.gmra.mxu1 %v7054_v42 }
 0xb61   : > { %v7019_v4 = vpop.f32.mrf.mxu0 }
 0xb62   : > { %v7020_v23 = vadd.f32 %v12066_v29, %v7019_v4 }
 0xb64   : > { %v7055_v58 = vmax.f32 %v7020_v23, 0.0  ;;  %v7272_v23 = vld [vmem:[%s12238_s15 + $0x28] sm:$0xff] }
 0xb66   : > { %7119 = vmatmul.f32.gmra.mxu1 %v7055_v58 }
 0xb69   : > { %v7022_v15 = vpop.f32.mrf.mxu0 }
 0xb6a   : > { %v7023_v61 = vadd.f32 %v12066_v29, %v7022_v15 }
 0xb6c   : > { %v7056_v28 = vmax.f32 %v7023_v61, 0.0 }
 0xb6e   : > { %7122 = vmatmul.f32.gmra.mxu1 %v7056_v28  ;;  %v7271_v28 = vld [vmem:[%s12238_s15 + $0x20] sm:$0xff] }
 0xb71   : > { %v7025_v48 = vpop.f32.mrf.mxu0 }
 0xb72   : > { %v7026_v41 = vadd.f32 %v12066_v29, %v7025_v48 }
 0xb74   : > { %v7057_v7 = vmax.f32 %v7026_v41, 0.0 }
 0xb76   : > { %7125 = vmatmul.f32.gmra.mxu1 %v7057_v7 }
 0xb79   : > { %v7028_v40 = vpop.f32.mrf.mxu0 }
 0xb7a   : > { %v7029_v12 = vadd.f32 %v12066_v29, %v7028_v40  ;;  %v7270_v40 = vld [vmem:[%s12238_s15 + $0x18] sm:$0xff] }
 0xb7c   : > { %v7058_v22 = vmax.f32 %v7029_v12, 0.0 }
 0xb7e   : > { %7128 = vmatmul.f32.gmra.mxu1 %v7058_v22 }
 0xb81   : > { %v7031_v30 = vpop.f32.mrf.mxu0 }
 0xb82   : > { %v7032_v14 = vadd.f32 %v12066_v29, %v7031_v30 }
 0xb84   : > { %v7059_v2 = vmax.f32 %v7032_v14, 0.0  ;;  %v7269_v14 = vld [vmem:[%s12238_s15 + $0x10] sm:$0xff] }
 0xb86   : > { %7131 = vmatmul.f32.gmra.mxu1 %v7059_v2 }
 0xb89   : > { %v7034_v11 = vpop.f32.mrf.mxu0 }
 0xb8a   : > { %v7035_v55 = vadd.f32 %v12066_v29, %v7034_v11 }
 0xb8c   : > { %v7060_v49 = vmax.f32 %v7035_v55, 0.0 }
 0xb8e   : > { %7134 = vmatmul.f32.gmra.mxu1 %v7060_v49  ;;  %v7268_v49 = vld [vmem:[%s12238_s15 + $0x8] sm:$0xff] }
 0xb91   : > { %v7037_v47 = vpop.f32.mrf.mxu0 }
 0xb92   : > { %v7038_v6 = vadd.f32 %v12066_v29, %v7037_v47  ;;  %v7267_v47 = vld [vmem:[%s12238_s15] sm:$0xff] }
 0xb94   : > { %v7061_v18 = vmax.f32 %v7038_v6, 0.0 }
 0xb96   : > { %7137 = vmatmul.f32.gmra.mxu1 %v7061_v18 }
 0xb99   : > { %v7040_v60 = vpop.f32.mrf.mxu0 }
 0xb9a   : > { %v7041_v3 = vadd.f32 %v12066_v29, %v7040_v60 }
 0xb9c   : > { %v7062_v50 = vmax.f32 %v7041_v3, 0.0 }
 0xb9e   : > { %7140 = vmatmul.f32.gmra.mxu1 %v7062_v50 }
 0xba1   : > { %v7043_v17 = vpop.f32.mrf.mxu0 }
 0xba2   : > { %v7044_v25 = vadd.f32 %v12066_v29, %v7043_v17 }
 0xba4   : > { %v7063_v27 = vmax.f32 %v7044_v25, 0.0 }
 0xba6   : > { %7143 = vmatmul.f32.gmra.mxu1 %v7063_v27 }
 0xba9   : > { %v7046_v45 = vpop.f32.mrf.mxu0 }
 0xbaa   : > { %v7047_v0 = vadd.f32 %v12066_v29, %v7046_v45  ;;  %v7277_v29 = vld [vmem:[%s12238_s15 + $0x50] sm:$0xff] }
 0xbab   : > { %7292 = vmatpush.msrb.mxu3 %v7277_v29 }
 0xbac   : > { %v7064_v63 = vmax.f32 %v7047_v0, 0.0 }
 0xbad   : > { %7293 = vmatpush.msrb.mxu3 %v7276_v34 }
 0xbae   : > { %7146 = vmatmul.f32.gmra.mxu1 %v7064_v63  ;;  %v8212_v63 = vld [vmem:[%s12237_s14] ss:$0 sm:$0xff] }
 0xbaf   : > { %7294 = vmatpush.msrb.mxu3 %v7275_v39 }
 0xbb1   : > { %7295 = vmatpush.msrb.mxu3 %v7274_v13 }
 0xbb3   : > { %v7102_v53 = vpop.f32.mrf.mxu1  ;;  %7296 = vmatpush.msrb.mxu3 %v7273_v59 }
 0xbb4   : > { %v7103_v8 = vadd.f32 %v12093_v43, %v7102_v53 }
 0xbb5   : > { %7297 = vmatpush.msrb.mxu3 %v7272_v23 }
 0xbb6   : > { %v7150_v31 = vmax.f32 %v7103_v8, 0.0 }
 0xbb7   : > { %7298 = vmatpush.msrb.mxu3 %v7271_v28 }
 0xbb8   : > { %7202 = vmatmul.f32.vlgmr.msrb.gmra.mxu2 %v7150_v31 }
 0xbb9   : > { %7299 = vmatpush.msrb.mxu3 %v7270_v40 }
 0xbbb   : > { %v7105_v21 = vpop.f32.mrf.mxu1  ;;  %7300 = vmatpush.msrb.mxu3 %v7269_v14 }
 0xbbc   : > { %v7106_v20 = vadd.f32 %v12093_v43, %v7105_v21 }
 0xbbd   : > { %7301 = vmatpush.msrb.mxu3 %v7268_v49 }
 0xbbe   : > { %v7151_v52 = vmax.f32 %v7106_v20, 0.0 }
 0xbbf   : > { %7302 = vmatpush.msrb.mxu3 %v7267_v47 }
 0xbc0   : > { %7205 = vmatmul.f32.gmra.mxu2 %v7151_v52 }
 0xbc3   : > { %v7108_v35 = vpop.f32.mrf.mxu1 }
 0xbc4   : > { %v7109_v9 = vadd.f32 %v12093_v43, %v7108_v35 }
 0xbc6   : > { %v7152_v62 = vmax.f32 %v7109_v9, 0.0 }
 0xbc8   : > { %7208 = vmatmul.f32.gmra.mxu2 %v7152_v62 }
 0xbcb   : > { %v7111_v54 = vpop.f32.mrf.mxu1 }
 0xbcc   : > { %v7112_v5 = vadd.f32 %v12093_v43, %v7111_v54 }
 0xbce   : > { %v7153_v56 = vmax.f32 %v7112_v5, 0.0 }
 0xbd0   : > { %7211 = vmatmul.f32.gmra.mxu2 %v7153_v56 }
 0xbd3   : > { %v7114_v1 = vpop.f32.mrf.mxu1 }
 0xbd4   : > { %v7115_v44 = vadd.f32 %v12093_v43, %v7114_v1 }
 0xbd6   : > { %v7154_v46 = vmax.f32 %v7115_v44, 0.0 }
 0xbd8   : > { %7214 = vmatmul.f32.gmra.mxu2 %v7154_v46 }
 0xbdb   : > { %v7117_v10 = vpop.f32.mrf.mxu1 }
 0xbdc   : > { %v7118_v38 = vadd.f32 %v12093_v43, %v7117_v10 }
 0xbde   : > { %v7155_v32 = vmax.f32 %v7118_v38, 0.0 }
 0xbe0   : > { %7217 = vmatmul.f32.gmra.mxu2 %v7155_v32 }
 0xbe3   : > { %v7120_v19 = vpop.f32.mrf.mxu1 }
 0xbe4   : > { %v7121_v51 = vadd.f32 %v12093_v43, %v7120_v19 }
 0xbe6   : > { %v7156_v37 = vmax.f32 %v7121_v51, 0.0 }
 0xbe8   : > { %7220 = vmatmul.f32.gmra.mxu2 %v7156_v37 }
 0xbeb   : > { %v7123_v33 = vpop.f32.mrf.mxu1 }
 0xbec   : > { %v7124_v42 = vadd.f32 %v12093_v43, %v7123_v33 }
 0xbee   : > { %v7157_v4 = vmax.f32 %v7124_v42, 0.0 }
 0xbf0   : > { %7223 = vmatmul.f32.gmra.mxu2 %v7157_v4 }
 0xbf3   : > { %v7126_v58 = vpop.f32.mrf.mxu1 }
 0xbf4   : > { %v7127_v15 = vadd.f32 %v12093_v43, %v7126_v58 }
 0xbf6   : > { %v7158_v61 = vmax.f32 %v7127_v15, 0.0 }
 0xbf8   : > { %7226 = vmatmul.f32.gmra.mxu2 %v7158_v61 }
 0xbfb   : > { %v7129_v48 = vpop.f32.mrf.mxu1 }
 0xbfc   : > { %v7130_v41 = vadd.f32 %v12093_v43, %v7129_v48 }
 0xbfe   : > { %v7159_v7 = vmax.f32 %v7130_v41, 0.0 }
 0xc00   : > { %7229 = vmatmul.f32.gmra.mxu2 %v7159_v7 }
 0xc03   : > { %v7132_v12 = vpop.f32.mrf.mxu1 }
 0xc04   : > { %v7133_v22 = vadd.f32 %v12093_v43, %v7132_v12 }
 0xc06   : > { %v7160_v30 = vmax.f32 %v7133_v22, 0.0 }
 0xc08   : > { %7232 = vmatmul.f32.gmra.mxu2 %v7160_v30 }
 0xc0b   : > { %v7135_v2 = vpop.f32.mrf.mxu1 }
 0xc0c   : > { %v7136_v11 = vadd.f32 %v12093_v43, %v7135_v2 }
 0xc0e   : > { %v7161_v55 = vmax.f32 %v7136_v11, 0.0 }
 0xc10   : > { %7235 = vmatmul.f32.gmra.mxu2 %v7161_v55  ;;  %v12156_v55 = vld [vmem:[#allocation2] ss:$0 sm:$0xff] }
 0xc13   : > { %v7138_v6 = vpop.f32.mrf.mxu1 }
 0xc14   : > { %v7139_v18 = vadd.f32 %v12093_v43, %v7138_v6 }
 0xc16   : > { %v7162_v60 = vmax.f32 %v7139_v18, 0.0 }
 0xc18   : > { %7238 = vmatmul.f32.gmra.mxu2 %v7162_v60 }
 0xc1b   : > { %v7141_v3 = vpop.f32.mrf.mxu1 }
 0xc1c   : > { %v7142_v50 = vadd.f32 %v12093_v43, %v7141_v3 }
 0xc1e   : > { %v7163_v26 = vmax.f32 %v7142_v50, 0.0 }
 0xc20   : > { %7241 = vmatmul.f32.gmra.mxu2 %v7163_v26 }
 0xc23   : > { %v7144_v17 = vpop.f32.mrf.mxu1 }
 0xc24   : > { %v7145_v25 = vadd.f32 %v12093_v43, %v7144_v17 }
 0xc26   : > { %v7164_v27 = vmax.f32 %v7145_v25, 0.0 }
 0xc28   : > { %7244 = vmatmul.f32.gmra.mxu2 %v7164_v27 }
 0xc2b   : > { %v7147_v57 = vpop.f32.mrf.mxu1 }
 0xc2c   : > { %v7148_v45 = vadd.f32 %v12093_v43, %v7147_v57 }
 0xc2e   : > { %v7165_v0 = vmax.f32 %v7148_v45, 0.0 }
 0xc30   : > { %7247 = vmatmul.f32.gmra.mxu2 %v7165_v0 }
 0xc3b   : > { %v7203_v24 = vpop.f32.mrf.mxu2 }
 0xc3c   : > { %v7204_v53 = vadd.f32 %v8212_v63, %v7203_v24 }
 0xc3e   : > { %v7251_v8 = vmax.f32 %v7204_v53, 0.0 }
 0xc40   : > { %7303 = vmatmul.f32.vlgmr.msrb.gmra.mxu3 %v7251_v8 }
 0xc43   : > { %v7206_v31 = vpop.f32.mrf.mxu2 }
 0xc44   : > { %v7207_v36 = vadd.f32 %v8212_v63, %v7206_v31 }
 0xc46   : > { %v7252_v21 = vmax.f32 %v7207_v36, 0.0 }
 0xc48   : > { %7306 = vmatmul.f32.gmra.mxu3 %v7252_v21 }
 0xc4b   : > { %v7209_v20 = vpop.f32.mrf.mxu2 }
 0xc4c   : > { %v7210_v52 = vadd.f32 %v8212_v63, %v7209_v20 }
 0xc4e   : > { %v7253_v16 = vmax.f32 %v7210_v52, 0.0 }
 0xc50   : > { %7309 = vmatmul.f32.gmra.mxu3 %v7253_v16 }
 0xc53   : > { %v7212_v35 = vpop.f32.mrf.mxu2 }
 0xc54   : > { %v7213_v43 = vadd.f32 %v8212_v63, %v7212_v35 }
 0xc56   : > { %v7254_v9 = vmax.f32 %v7213_v43, 0.0 }
 0xc58   : > { %7312 = vmatmul.f32.gmra.mxu3 %v7254_v9 }
 0xc5b   : > { %v7215_v62 = vpop.f32.mrf.mxu2 }
 0xc5c   : > { %v7216_v29 = vadd.f32 %v8212_v63, %v7215_v62 }
 0xc5e   : > { %v7255_v54 = vmax.f32 %v7216_v29, 0.0 }
 0xc60   : > { %7315 = vmatmul.f32.gmra.mxu3 %v7255_v54 }
 0xc63   : > { %v7218_v5 = vpop.f32.mrf.mxu2 }
 0xc64   : > { %v7219_v56 = vadd.f32 %v8212_v63, %v7218_v5 }
 0xc66   : > { %v7256_v34 = vmax.f32 %v7219_v56, 0.0 }
 0xc68   : > { %7318 = vmatmul.f32.gmra.mxu3 %v7256_v34 }
 0xc6b   : > { %v7221_v1 = vpop.f32.mrf.mxu2 }
 0xc6c   : > { %v7222_v44 = vadd.f32 %v8212_v63, %v7221_v1 }
 0xc6e   : > { %v7257_v46 = vmax.f32 %v7222_v44, 0.0 }
 0xc70   : > { %7321 = vmatmul.f32.gmra.mxu3 %v7257_v46 }
 0xc73   : > { %v7224_v39 = vpop.f32.mrf.mxu2 }
 0xc74   : > { %v7225_v10 = vadd.f32 %v8212_v63, %v7224_v39 }
 0xc76   : > { %v7258_v38 = vmax.f32 %v7225_v10, 0.0 }
 0xc78   : > { %7324 = vmatmul.f32.gmra.mxu3 %v7258_v38 }
 0xc7b   : > { %v7227_v32 = vpop.f32.mrf.mxu2 }
 0xc7c   : > { %v7228_v13 = vadd.f32 %v8212_v63, %v7227_v32 }
 0xc7e   : > { %v7259_v19 = vmax.f32 %v7228_v13, 0.0 }
 0xc80   : > { %7327 = vmatmul.f32.gmra.mxu3 %v7259_v19 }
 0xc83   : > { %v7230_v51 = vpop.f32.mrf.mxu2 }
 0xc84   : > { %v7231_v37 = vadd.f32 %v8212_v63, %v7230_v51 }
 0xc86   : > { %v7260_v59 = vmax.f32 %v7231_v37, 0.0 }
 0xc88   : > { %7330 = vmatmul.f32.gmra.mxu3 %v7260_v59 }
 0xc8b   : > { %v7233_v33 = vpop.f32.mrf.mxu2 }
 0xc8c   : > { %v7234_v42 = vadd.f32 %v8212_v63, %v7233_v33 }
 0xc8e   : > { %v7261_v4 = vmax.f32 %v7234_v42, 0.0 }
 0xc90   : > { %7333 = vmatmul.f32.gmra.mxu3 %v7261_v4 }
 0xc93   : > { %v7236_v23 = vpop.f32.mrf.mxu2 }
 0xc94   : > { %v7237_v58 = vadd.f32 %v8212_v63, %v7236_v23 }
 0xc96   : > { %v7262_v15 = vmax.f32 %v7237_v58, 0.0 }
 0xc98   : > { %7336 = vmatmul.f32.gmra.mxu3 %v7262_v15 }
 0xc9b   : > { %v7239_v61 = vpop.f32.mrf.mxu2 }
 0xc9c   : > { %v7240_v28 = vadd.f32 %v8212_v63, %v7239_v61 }
 0xc9e   : > { %v7263_v48 = vmax.f32 %v7240_v28, 0.0 }
 0xca0   : > { %7339 = vmatmul.f32.gmra.mxu3 %v7263_v48 }
 0xca3   : > { %v7242_v41 = vpop.f32.mrf.mxu2 }
 0xca4   : > { %v7243_v7 = vadd.f32 %v8212_v63, %v7242_v41 }
 0xca6   : > { %v7264_v40 = vmax.f32 %v7243_v7, 0.0 }
 0xca8   : > { %7342 = vmatmul.f32.gmra.mxu3 %v7264_v40 }
 0xcab   : > { %v7245_v12 = vpop.f32.mrf.mxu2 }
 0xcac   : > { %v7246_v22 = vadd.f32 %v8212_v63, %v7245_v12 }
 0xcae   : > { %v7265_v30 = vmax.f32 %v7246_v22, 0.0 }
 0xcb0   : > { %7345 = vmatmul.f32.gmra.mxu3 %v7265_v30 }
 0xcb3   : > { %v7248_v14 = vpop.f32.mrf.mxu2 }
 0xcb4   : > { %v7249_v2 = vadd.f32 %v8212_v63, %v7248_v14 }
 0xcb6   : > { %v7266_v11 = vmax.f32 %v7249_v2, 0.0 }
 0xcb8   : > { %7348 = vmatmul.f32.gmra.mxu3 %v7266_v11 }
 0xcc3   : > { %v7304_v49 = vpop.f32.mrf.mxu3 }
 0xcc4   : > { %v7305_v47 = vadd.f32 %v12156_v55, %v7304_v49 }
 0xcc6   : > { %v7352_v6 = vand.u32 2147483647, %v7305_v47 }
 0xcc8   : > { %v7368_v18 = vadd.f32 1.0, %v7352_v6 }
 0xcca   : > { %8214 = vrcp.f32 %v7368_v18  ;;  %v7395_v45 = vand.u32 2147483648, %v7368_v18  ;;  %v7393_v24 = vand.u32 2147483647, %v7368_v18  ;;  %vm7389_vm3 = vweird.f32 %v7368_v18 }
 0xccb   : > { %v7307_v60 = vpop.f32.mrf.mxu3 }
 0xccc   : > { %v7308_v3 = vadd.f32 %v12156_v55, %v7307_v60  ;;  %v7396_v36 = vor.u32 1.1754944e-38, %v7395_v45  ;;  %vm7394_vm5 = vcmp.eq.f32.partialorder %v7393_v24, 8.507059e+37 }
 0xcce   : > { %v7353_v50 = vand.u32 2147483647, %v7308_v3 }
 0xcd0   : > { %v8215_v26 = vpop.eup %8214  ;;  %v7369_v17 = vadd.f32 1.0, %v7353_v50 }
 0xcd1   : > { %v7385_v25 = vmul.f32 %v8215_v26, %v7368_v18  ;;  %vm7390_vm2 = vweird.f32 %v8215_v26 }
 0xcd2   : > { %8216 = vrcp.f32 %v7369_v17  ;;  %vm7391_vm4 = vmor %vm7389_vm3, %vm7390_vm2  ;;  %v7410_v62 = vand.u32 2147483648, %v7369_v17  ;;  %v7408_v5 = vand.u32 2147483647, %v7369_v17  ;;  %vm7404_vm8 = vweird.f32 %v7369_v17 }
 0xcd3   : > { %v7386_v27 = vsub.f32 1.0, %v7385_v25  ;;  %v7310_v57 = vpop.f32.mrf.mxu3 }
 0xcd4   : > { %v7311_v0 = vadd.f32 %v12156_v55, %v7310_v57  ;;  %v7411_v44 = vor.u32 1.1754944e-38, %v7410_v62  ;;  %vm7409_vm10 = vcmp.eq.f32.partialorder %v7408_v5, 8.507059e+37 }
 0xcd5   : > { %v7387_v63 = vmul.f32 %v8215_v26, %v7386_v27 }
 0xcd6   : > { %v7354_v53 = vand.u32 2147483647, %v7311_v0 }
 0xcd7   : > { %v7388_v8 = vadd.f32 %v8215_v26, %v7387_v63 }
 0xcd8   : > { %v8217_v31 = vpop.eup %8216  ;;  %v7370_v21 = vadd.f32 1.0, %v7354_v53 }
 0xcd9   : > { %v7392_v20 = vsel %vm7391_vm4, %v8215_v26, %v7388_v8  ;;  %v7400_v52 = vmul.f32 %v8217_v31, %v7369_v17  ;;  %vm7405_vm7 = vweird.f32 %v8217_v31 }
 0xcda   : > { %v7397_v16 = vsel %vm7394_vm5, %v7396_v36, %v7392_v20  ;;  %8218 = vrcp.f32 %v7370_v21  ;;  %vm7406_vm9 = vmor %vm7404_vm8, %vm7405_vm7  ;;  %v7425_v51 = vand.u32 2147483648, %v7370_v21  ;;  %v7423_v33 = vand.u32 2147483647, %v7370_v21 }
 0xcdb   : > { %v7398_v35 = vmul.f32 %v7397_v16, %v7305_v47  ;;  %v7401_v43 = vsub.f32 1.0, %v7400_v52  ;;  %v7313_v9 = vpop.f32.mrf.mxu3  ;;  %vm7419_vm12 = vweird.f32 %v7370_v21 }
 0xcdc   : > { %v7314_v29 = vadd.f32 %v12156_v55, %v7313_v9  ;;  %v7426_v58 = vor.u32 1.1754944e-38, %v7425_v51  ;;  %vm7424_vm14 = vcmp.eq.f32.partialorder %v7423_v33, 8.507059e+37 }
 0xcdd   : > { %7625 = vst.msk [vmem:[%s12166_s20] sm:$0xff] %vm7624_vm6, %v7398_v35  ;;  %v7402_v54 = vmul.f32 %v8217_v31, %v7401_v43 }
 0xcde   : > { %v7355_v56 = vand.u32 2147483647, %v7314_v29 }
 0xcdf   : > { %v7403_v34 = vadd.f32 %v8217_v31, %v7402_v54 }
 0xce0   : > { %v8219_v1 = vpop.eup %8218  ;;  %v7371_v46 = vadd.f32 1.0, %v7355_v56 }
 0xce1   : > { %v7407_v39 = vsel %vm7406_vm9, %v8217_v31, %v7403_v34  ;;  %v7415_v10 = vmul.f32 %v8219_v1, %v7370_v21  ;;  %vm7420_vm11 = vweird.f32 %v8219_v1 }
 0xce2   : > { %v7412_v38 = vsel %vm7409_vm10, %v7411_v44, %v7407_v39  ;;  %8220 = vrcp.f32 %v7371_v46  ;;  %vm7421_vm13 = vmor %vm7419_vm12, %vm7420_vm11  ;;  %v7440_v12 = vand.u32 2147483648, %v7371_v46  ;;  %v7438_v14 = vand.u32 2147483647, %v7371_v46 }
 0xce3   : > { %v7413_v32 = vmul.f32 %v7412_v38, %v7308_v3  ;;  %v7416_v13 = vsub.f32 1.0, %v7415_v10  ;;  %v7316_v19 = vpop.f32.mrf.mxu3  ;;  %vm7434_vm0 = vweird.f32 %v7371_v46 }
 0xce4   : > { %v7317_v37 = vadd.f32 %v12156_v55, %v7316_v19  ;;  %v7441_v47 = vor.u32 1.1754944e-38, %v7440_v12  ;;  %vm7439_vm2 = vcmp.eq.f32.partialorder %v7438_v14, 8.507059e+37 }
 0xce5   : > { %7626 = vst.msk [vmem:[%s12166_s20 + $0x8] sm:$0xff] %vm7624_vm6, %v7413_v32  ;;  %v7417_v59 = vmul.f32 %v8219_v1, %v7416_v13 }
 0xce6   : > { %v7356_v42 = vand.u32 2147483647, %v7317_v37 }
 0xce7   : > { %v7418_v4 = vadd.f32 %v8219_v1, %v7417_v59 }
 0xce8   : > { %v8221_v23 = vpop.eup %8220  ;;  %v7372_v15 = vadd.f32 1.0, %v7356_v42 }
 0xce9   : > { %v7422_v61 = vsel %vm7421_vm13, %v8219_v1, %v7418_v4  ;;  %v7430_v28 = vmul.f32 %v8221_v23, %v7371_v46  ;;  %vm7435_vm15 = vweird.f32 %v8221_v23 }
 0xcea   : > { %v7427_v48 = vsel %vm7424_vm14, %v7426_v58, %v7422_v61  ;;  %8222 = vrcp.f32 %v7372_v15  ;;  %vm7436_vm1 = vmor %vm7434_vm0, %vm7435_vm15  ;;  %v7455_v25 = vand.u32 2147483648, %v7372_v15  ;;  %v7453_v45 = vand.u32 2147483647, %v7372_v15 }
 0xceb   : > { %v7428_v41 = vmul.f32 %v7427_v48, %v7311_v0  ;;  %v7431_v7 = vsub.f32 1.0, %v7430_v28  ;;  %v7319_v40 = vpop.f32.mrf.mxu3  ;;  %vm7449_vm4 = vweird.f32 %v7372_v15 }
 0xcec   : > { %v7320_v22 = vadd.f32 %v12156_v55, %v7319_v40  ;;  %v7456_v53 = vor.u32 1.1754944e-38, %v7455_v25  ;;  %vm7454_vm7 = vcmp.eq.f32.partialorder %v7453_v45, 8.507059e+37 }
 0xced   : > { %7627 = vst.msk [vmem:[%s12166_s20 + $0x10] sm:$0xff] %vm7624_vm6, %v7428_v41  ;;  %v7432_v30 = vmul.f32 %v8221_v23, %v7431_v7 }
 0xcee   : > { %v7357_v2 = vand.u32 2147483647, %v7320_v22 }
 0xcef   : > { %v7433_v11 = vadd.f32 %v8221_v23, %v7432_v30 }
 0xcf0   : > { %v8223_v49 = vpop.eup %8222  ;;  %v7373_v6 = vadd.f32 1.0, %v7357_v2 }
 0xcf1   : > { %v7437_v18 = vsel %vm7436_vm1, %v8221_v23, %v7433_v11  ;;  %v7445_v60 = vmul.f32 %v8223_v49, %v7372_v15  ;;  %vm7450_vm3 = vweird.f32 %v8223_v49 }
 0xcf2   : > { %v7442_v3 = vsel %vm7439_vm2, %v7441_v47, %v7437_v18  ;;  %8224 = vrcp.f32 %v7373_v6  ;;  %vm7451_vm5 = vmor %vm7449_vm4, %vm7450_vm3  ;;  %v7470_v35 = vand.u32 2147483648, %v7373_v6  ;;  %v7468_v62 = vand.u32 2147483647, %v7373_v6 }
 0xcf3   : > { %v7443_v50 = vmul.f32 %v7442_v3, %v7314_v29  ;;  %v7446_v26 = vsub.f32 1.0, %v7445_v60  ;;  %v7322_v17 = vpop.f32.mrf.mxu3  ;;  %vm7464_vm9 = vweird.f32 %v7373_v6 }
 0xcf4   : > { %v7323_v27 = vadd.f32 %v12156_v55, %v7322_v17  ;;  %v7471_v56 = vor.u32 1.1754944e-38, %v7470_v35  ;;  %vm7469_vm11 = vcmp.eq.f32.partialorder %v7468_v62, 8.507059e+37 }
 0xcf5   : > { %7628 = vst.msk [vmem:[%s12166_s20 + $0x18] sm:$0xff] %vm7624_vm6, %v7443_v50  ;;  %v7447_v57 = vmul.f32 %v8223_v49, %v7446_v26 }
 0xcf6   : > { %v7358_v0 = vand.u32 2147483647, %v7323_v27 }
 0xcf7   : > { %v7448_v63 = vadd.f32 %v8223_v49, %v7447_v57 }
 0xcf8   : > { %v8225_v24 = vpop.eup %8224  ;;  %v7374_v8 = vadd.f32 1.0, %v7358_v0 }
 0xcf9   : > { %v7452_v31 = vsel %vm7451_vm5, %v8223_v49, %v7448_v63  ;;  %v7460_v36 = vmul.f32 %v8225_v24, %v7373_v6  ;;  %vm7465_vm8 = vweird.f32 %v8225_v24 }
 0xcfa   : > { %v7457_v21 = vsel %vm7454_vm7, %v7456_v53, %v7452_v31  ;;  %8226 = vrcp.f32 %v7374_v8  ;;  %vm7466_vm10 = vmor %vm7464_vm9, %vm7465_vm8  ;;  %v7485_v32 = vand.u32 2147483648, %v7374_v8  ;;  %v7483_v51 = vand.u32 2147483647, %v7374_v8 }
 0xcfb   : > { %v7458_v20 = vmul.f32 %v7457_v21, %v7317_v37  ;;  %v7461_v52 = vsub.f32 1.0, %v7460_v36  ;;  %v7325_v16 = vpop.f32.mrf.mxu3  ;;  %vm7479_vm13 = vweird.f32 %v7374_v8 }
 0xcfc   : > { %v7326_v43 = vadd.f32 %v12156_v55, %v7325_v16  ;;  %v7486_v42 = vor.u32 1.1754944e-38, %v7485_v32  ;;  %vm7484_vm15 = vcmp.eq.f32.partialorder %v7483_v51, 8.507059e+37 }
 0xcfd   : > { %7629 = vst.msk [vmem:[%s12166_s20 + $0x20] sm:$0xff] %vm7624_vm6, %v7458_v20  ;;  %v7462_v9 = vmul.f32 %v8225_v24, %v7461_v52 }
 0xcfe   : > { %v7359_v29 = vand.u32 2147483647, %v7326_v43 }
 0xcff   : > { %v7463_v54 = vadd.f32 %v8225_v24, %v7462_v9 }
 0xd00   : > { %v8227_v5 = vpop.eup %8226  ;;  %v7375_v34 = vadd.f32 1.0, %v7359_v29 }
 0xd01   : > { %v7467_v1 = vsel %vm7466_vm10, %v8225_v24, %v7463_v54  ;;  %v7475_v44 = vmul.f32 %v8227_v5, %v7374_v8  ;;  %vm7480_vm12 = vweird.f32 %v8227_v5 }
 0xd02   : > { %v7472_v46 = vsel %vm7469_vm11, %v7471_v56, %v7467_v1  ;;  %8228 = vrcp.f32 %v7375_v34  ;;  %vm7481_vm14 = vmor %vm7479_vm13, %vm7480_vm12  ;;  %v7500_v41 = vand.u32 2147483648, %v7375_v34  ;;  %v7498_v12 = vand.u32 2147483647, %v7375_v34 }
 0xd03   : > { %v7473_v39 = vmul.f32 %v7472_v46, %v7320_v22  ;;  %v7476_v10 = vsub.f32 1.0, %v7475_v44  ;;  %v7328_v38 = vpop.f32.mrf.mxu3  ;;  %vm7494_vm1 = vweird.f32 %v7375_v34 }
 0xd04   : > { %v7329_v13 = vadd.f32 %v12156_v55, %v7328_v38  ;;  %v7501_v2 = vor.u32 1.1754944e-38, %v7500_v41  ;;  %vm7499_vm3 = vcmp.eq.f32.partialorder %v7498_v12, 8.507059e+37 }
 0xd05   : > { %7630 = vst.msk [vmem:[%s12166_s20 + $0x28] sm:$0xff] %vm7624_vm6, %v7473_v39  ;;  %v7477_v19 = vmul.f32 %v8227_v5, %v7476_v10 }
 0xd06   : > { %v7360_v37 = vand.u32 2147483647, %v7329_v13 }
 0xd07   : > { %v7478_v59 = vadd.f32 %v8227_v5, %v7477_v19 }
 0xd08   : > { %v8229_v33 = vpop.eup %8228  ;;  %v7376_v4 = vadd.f32 1.0, %v7360_v37 }
 0xd09   : > { %v7482_v23 = vsel %vm7481_vm14, %v8227_v5, %v7478_v59  ;;  %v7490_v58 = vmul.f32 %v8229_v33, %v7375_v34  ;;  %vm7495_vm0 = vweird.f32 %v8229_v33 }
 0xd0a   : > { %v7487_v15 = vsel %vm7484_vm15, %v7486_v42, %v7482_v23  ;;  %8230 = vrcp.f32 %v7376_v4  ;;  %vm7496_vm2 = vmor %vm7494_vm1, %vm7495_vm0  ;;  %v7515_v50 = vand.u32 2147483648, %v7376_v4  ;;  %v7513_v25 = vand.u32 2147483647, %v7376_v4 }
 0xd0b   : > { %v7488_v61 = vmul.f32 %v7487_v15, %v7323_v27  ;;  %v7491_v28 = vsub.f32 1.0, %v7490_v58  ;;  %v7331_v48 = vpop.f32.mrf.mxu3  ;;  %vm7509_vm5 = vweird.f32 %v7376_v4 }
 0xd0c   : > { %v7332_v7 = vadd.f32 %v12156_v55, %v7331_v48  ;;  %v7516_v0 = vor.u32 1.1754944e-38, %v7515_v50  ;;  %vm7514_vm8 = vcmp.eq.f32.partialorder %v7513_v25, 8.507059e+37 }
 0xd0d   : > { %7631 = vst.msk [vmem:[%s12166_s20 + $0x30] sm:$0xff] %vm7624_vm6, %v7488_v61  ;;  %v7492_v40 = vmul.f32 %v8229_v33, %v7491_v28 }
 0xd0e   : > { %v7361_v22 = vand.u32 2147483647, %v7332_v7 }
 0xd0f   : > { %v7493_v30 = vadd.f32 %v8229_v33, %v7492_v40 }
 0xd10   : > { %v8231_v14 = vpop.eup %8230  ;;  %v7377_v11 = vadd.f32 1.0, %v7361_v22 }
 0xd11   : > { %v7497_v49 = vsel %vm7496_vm2, %v8229_v33, %v7493_v30  ;;  %v7505_v47 = vmul.f32 %v8231_v14, %v7376_v4  ;;  %vm7510_vm4 = vweird.f32 %v8231_v14 }
 0xd12   : > { %v7502_v6 = vsel %vm7499_vm3, %v7501_v2, %v7497_v49  ;;  %8232 = vrcp.f32 %v7377_v11  ;;  %vm7511_vm7 = vmor %vm7509_vm5, %vm7510_vm4  ;;  %v7530_v20 = vand.u32 2147483648, %v7377_v11  ;;  %v7528_v35 = vand.u32 2147483647, %v7377_v11 }
 0xd13   : > { %v7503_v18 = vmul.f32 %v7502_v6, %v7326_v43  ;;  %v7506_v60 = vsub.f32 1.0, %v7505_v47  ;;  %v7334_v3 = vpop.f32.mrf.mxu3  ;;  %vm7524_vm10 = vweird.f32 %v7377_v11 }
 0xd14   : > { %v7335_v26 = vadd.f32 %v12156_v55, %v7334_v3  ;;  %v7531_v29 = vor.u32 1.1754944e-38, %v7530_v20  ;;  %vm7529_vm12 = vcmp.eq.f32.partialorder %v7528_v35, 8.507059e+37 }
 0xd15   : > { %7632 = vst.msk [vmem:[%s12166_s20 + $0x38] sm:$0xff] %vm7624_vm6, %v7503_v18  ;;  %v7507_v17 = vmul.f32 %v8231_v14, %v7506_v60 }
 0xd16   : > { %v7362_v27 = vand.u32 2147483647, %v7335_v26 }
 0xd17   : > { %v7508_v57 = vadd.f32 %v8231_v14, %v7507_v17 }
 0xd18   : > { %v8233_v45 = vpop.eup %8232  ;;  %v7378_v63 = vadd.f32 1.0, %v7362_v27 }
 0xd19   : > { %v7512_v24 = vsel %vm7511_vm7, %v8231_v14, %v7508_v57  ;;  %v7520_v53 = vmul.f32 %v8233_v45, %v7377_v11  ;;  %vm7525_vm9 = vweird.f32 %v8233_v45 }
 0xd1a   : > { %v7517_v8 = vsel %vm7514_vm8, %v7516_v0, %v7512_v24  ;;  %8234 = vrcp.f32 %v7378_v63  ;;  %vm7526_vm11 = vmor %vm7524_vm10, %vm7525_vm9  ;;  %v7545_v39 = vand.u32 2147483648, %v7378_v63  ;;  %v7543_v32 = vand.u32 2147483647, %v7378_v63 }
 0xd1b   : > { %v7518_v31 = vmul.f32 %v7517_v8, %v7329_v13  ;;  %v7521_v36 = vsub.f32 1.0, %v7520_v53  ;;  %v7337_v21 = vpop.f32.mrf.mxu3  ;;  %vm7539_vm14 = vweird.f32 %v7378_v63 }
 0xd1c   : > { %v7338_v52 = vadd.f32 %v12156_v55, %v7337_v21  ;;  %v7546_v37 = vor.u32 1.1754944e-38, %v7545_v39  ;;  %vm7544_vm0 = vcmp.eq.f32.partialorder %v7543_v32, 8.507059e+37 }
 0xd1d   : > { %7633 = vst.msk [vmem:[%s12166_s20 + $0x40] sm:$0xff] %vm7624_vm6, %v7518_v31  ;;  %v7522_v16 = vmul.f32 %v8233_v45, %v7521_v36 }
 0xd1e   : > { %v7363_v43 = vand.u32 2147483647, %v7338_v52 }
 0xd1f   : > { %v7523_v9 = vadd.f32 %v8233_v45, %v7522_v16 }
 0xd20   : > { %v8235_v62 = vpop.eup %8234  ;;  %v7379_v54 = vadd.f32 1.0, %v7363_v43 }
 0xd21   : > { %v7527_v5 = vsel %vm7526_vm11, %v8233_v45, %v7523_v9  ;;  %v7535_v56 = vmul.f32 %v8235_v62, %v7378_v63  ;;  %vm7540_vm13 = vweird.f32 %v8235_v62 }
 0xd22   : > { %v7532_v34 = vsel %vm7529_vm12, %v7531_v29, %v7527_v5  ;;  %8236 = vrcp.f32 %v7379_v54  ;;  %vm7541_vm15 = vmor %vm7539_vm14, %vm7540_vm13  ;;  %v7560_v61 = vand.u32 2147483648, %v7379_v54  ;;  %v7558_v41 = vand.u32 2147483647, %v7379_v54 }
 0xd23   : > { %v7533_v1 = vmul.f32 %v7532_v34, %v7332_v7  ;;  %v7536_v44 = vsub.f32 1.0, %v7535_v56  ;;  %v7340_v46 = vpop.f32.mrf.mxu3  ;;  %vm7554_vm2 = vweird.f32 %v7379_v54 }
 0xd24   : > { %v7341_v10 = vadd.f32 %v12156_v55, %v7340_v46  ;;  %v7561_v22 = vor.u32 1.1754944e-38, %v7560_v61  ;;  %vm7559_vm4 = vcmp.eq.f32.partialorder %v7558_v41, 8.507059e+37 }
 0xd25   : > { %7634 = vst.msk [vmem:[%s12166_s20 + $0x48] sm:$0xff] %vm7624_vm6, %v7533_v1  ;;  %v7537_v38 = vmul.f32 %v8235_v62, %v7536_v44 }
 0xd26   : > { %v7364_v13 = vand.u32 2147483647, %v7341_v10 }
 0xd27   : > { %v7538_v19 = vadd.f32 %v8235_v62, %v7537_v38 }
 0xd28   : > { %v8237_v51 = vpop.eup %8236  ;;  %v7380_v59 = vadd.f32 1.0, %v7364_v13 }
 0xd29   : > { %v7542_v33 = vsel %vm7541_vm15, %v8235_v62, %v7538_v19  ;;  %v7550_v42 = vmul.f32 %v8237_v51, %v7379_v54  ;;  %vm7555_vm1 = vweird.f32 %v8237_v51 }
 0xd2a   : > { %v7547_v4 = vsel %vm7544_vm0, %v7546_v37, %v7542_v33  ;;  %8238 = vrcp.f32 %v7380_v59  ;;  %vm7556_vm3 = vmor %vm7554_vm2, %vm7555_vm1  ;;  %v7575_v18 = vand.u32 2147483648, %v7380_v59  ;;  %v7573_v50 = vand.u32 2147483647, %v7380_v59 }
 0xd2b   : > { %v7548_v23 = vmul.f32 %v7547_v4, %v7335_v26  ;;  %v7551_v58 = vsub.f32 1.0, %v7550_v42  ;;  %v7343_v15 = vpop.f32.mrf.mxu3  ;;  %vm7569_vm7 = vweird.f32 %v7380_v59 }
 0xd2c   : > { %v7344_v28 = vadd.f32 %v12156_v55, %v7343_v15  ;;  %v7576_v27 = vor.u32 1.1754944e-38, %v7575_v18  ;;  %vm7574_vm9 = vcmp.eq.f32.partialorder %v7573_v50, 8.507059e+37 }
 0xd2d   : > { %7635 = vst.msk [vmem:[%s12166_s20 + $0x50] sm:$0xff] %vm7624_vm6, %v7548_v23  ;;  %v7552_v48 = vmul.f32 %v8237_v51, %v7551_v58 }
 0xd2e   : > { %v7365_v7 = vand.u32 2147483647, %v7344_v28 }
 0xd2f   : > { %v7553_v40 = vadd.f32 %v8237_v51, %v7552_v48 }
 0xd30   : > { %v8239_v12 = vpop.eup %8238  ;;  %v7381_v30 = vadd.f32 1.0, %v7365_v7 }
 0xd31   : > { %v7557_v14 = vsel %vm7556_vm3, %v8237_v51, %v7553_v40  ;;  %v7565_v2 = vmul.f32 %v8239_v12, %v7380_v59  ;;  %vm7570_vm5 = vweird.f32 %v8239_v12 }
 0xd32   : > { %v7562_v11 = vsel %vm7559_vm4, %v7561_v22, %v7557_v14  ;;  %8240 = vrcp.f32 %v7381_v30  ;;  %vm7571_vm8 = vmor %vm7569_vm7, %vm7570_vm5  ;;  %v7590_v31 = vand.u32 2147483648, %v7381_v30  ;;  %v7588_v20 = vand.u32 2147483647, %v7381_v30 }
 0xd33   : > { %v7563_v49 = vmul.f32 %v7562_v11, %v7338_v52  ;;  %v7566_v47 = vsub.f32 1.0, %v7565_v2  ;;  %v7346_v6 = vpop.f32.mrf.mxu3  ;;  %vm7584_vm11 = vweird.f32 %v7381_v30 }
 0xd34   : > { %v7347_v60 = vadd.f32 %v12156_v55, %v7346_v6  ;;  %v7591_v43 = vor.u32 1.1754944e-38, %v7590_v31  ;;  %vm7589_vm13 = vcmp.eq.f32.partialorder %v7588_v20, 8.507059e+37 }
 0xd35   : > { %7636 = vst.msk [vmem:[%s12166_s20 + $0x58] sm:$0xff] %vm7624_vm6, %v7563_v49  ;;  %v7567_v3 = vmul.f32 %v8239_v12, %v7566_v47 }
 0xd36   : > { %v7366_v26 = vand.u32 2147483647, %v7347_v60 }
 0xd37   : > { %v7568_v17 = vadd.f32 %v8239_v12, %v7567_v3 }
 0xd38   : > { %v8241_v25 = vpop.eup %8240  ;;  %v7382_v57 = vadd.f32 1.0, %v7366_v26 }
 0xd39   : > { %v7572_v45 = vsel %vm7571_vm8, %v8239_v12, %v7568_v17  ;;  %v7580_v0 = vmul.f32 %v8241_v25, %v7381_v30  ;;  %vm7585_vm10 = vweird.f32 %v8241_v25 }
 0xd3a   : > { %v7577_v63 = vsel %vm7574_vm9, %v7576_v27, %v7572_v45  ;;  %8242 = vrcp.f32 %v7382_v57  ;;  %vm7586_vm12 = vmor %vm7584_vm11, %vm7585_vm10  ;;  %v7605_v56 = vand.u32 2147483648, %v7382_v57  ;;  %v7603_v1 = vand.u32 2147483647, %v7382_v57 }
 0xd3b   : > { %v7578_v24 = vmul.f32 %v7577_v63, %v7341_v10  ;;  %v7581_v53 = vsub.f32 1.0, %v7580_v0  ;;  %v7349_v8 = vpop.f32.mrf.mxu3  ;;  %vm7599_vm15 = vweird.f32 %v7382_v57 }
 0xd3c   : > { %v7350_v36 = vadd.f32 %v12156_v55, %v7349_v8  ;;  %v7606_v39 = vor.u32 1.1754944e-38, %v7605_v56  ;;  %vm7604_vm1 = vcmp.eq.f32.partialorder %v7603_v1, 8.507059e+37 }
 0xd3d   : > { %7637 = vst.msk [vmem:[%s12166_s20 + $0x60] sm:$0xff] %vm7624_vm6, %v7578_v24  ;;  %v7582_v21 = vmul.f32 %v8241_v25, %v7581_v53 }
 0xd3e   : > { %v7367_v52 = vand.u32 2147483647, %v7350_v36 }
 0xd3f   : > { %v7583_v16 = vadd.f32 %v8241_v25, %v7582_v21 }
 0xd40   : > { %v8243_v35 = vpop.eup %8242  ;;  %v7383_v9 = vadd.f32 1.0, %v7367_v52 }
 0xd41   : > { %v7587_v62 = vsel %vm7586_vm12, %v8241_v25, %v7583_v16  ;;  %v7595_v29 = vmul.f32 %v8243_v35, %v7382_v57  ;;  %vm7600_vm14 = vweird.f32 %v8243_v35 }
 0xd42   : > { %v7592_v54 = vsel %vm7589_vm13, %v7591_v43, %v7587_v62  ;;  %8244 = vrcp.f32 %v7383_v9  ;;  %vm7601_vm0 = vmor %vm7599_vm15, %vm7600_vm14  ;;  %v7620_v51 = vand.u32 2147483648, %v7383_v9  ;;  %v7618_v59 = vand.u32 2147483647, %v7383_v9 }
 0xd43   : > { %v7593_v5 = vmul.f32 %v7592_v54, %v7344_v28  ;;  %v7596_v55 = vsub.f32 1.0, %v7595_v29  ;;  %vm7614_vm3 = vweird.f32 %v7383_v9 }
 0xd44   : > { %v7621_v42 = vor.u32 1.1754944e-38, %v7620_v51  ;;  %vm7619_vm5 = vcmp.eq.f32.partialorder %v7618_v59, 8.507059e+37 }
 0xd45   : > { %7638 = vst.msk [vmem:[%s12166_s20 + $0x68] sm:$0xff] %vm7624_vm6, %v7593_v5  ;;  %v7597_v34 = vmul.f32 %v8243_v35, %v7596_v55 }
 0xd47   : > { %v7598_v44 = vadd.f32 %v8243_v35, %v7597_v34 }
 0xd48   : > { %v8245_v46 = vpop.eup %8244 }
 0xd49   : > { %v7602_v10 = vsel %vm7601_vm0, %v8243_v35, %v7598_v44  ;;  %v7610_v38 = vmul.f32 %v8245_v46, %v7383_v9  ;;  %vm7615_vm2 = vweird.f32 %v8245_v46 }
 0xd4a   : > { %v7607_v32 = vsel %vm7604_vm1, %v7606_v39, %v7602_v10  ;;  %vm7616_vm4 = vmor %vm7614_vm3, %vm7615_vm2 }
 0xd4b   : > { %v7608_v13 = vmul.f32 %v7607_v32, %v7347_v60  ;;  %v7611_v19 = vsub.f32 1.0, %v7610_v38 }
 0xd4d   : > { %7639 = vst.msk [vmem:[%s12166_s20 + $0x70] sm:$0xff] %vm7624_vm6, %v7608_v13  ;;  %v7612_v37 = vmul.f32 %v8245_v46, %v7611_v19 }
 0xd4f   : > { %v7613_v33 = vadd.f32 %v8245_v46, %v7612_v37 }
 0xd51   : > { %v7617_v4 = vsel %vm7616_vm4, %v8245_v46, %v7613_v33 }
 0xd52   : > { %v7622_v23 = vsel %vm7619_vm5, %v7621_v42, %v7617_v4 }
 0xd53   : > { %v7623_v58 = vmul.f32 %v7622_v23, %v7350_v36 }
 0xd55   : > { %7640 = vst.msk [vmem:[%s12166_s20 + $0x78] sm:$0xff] %vm7624_vm6, %v7623_v58 }
 0xd56 PF: > { %p26_p9 = scmp.ge.s32.totalorder %s8401_s29, 4   ;;  %s12247_s26 = smov %s8285_s27 }
 0xd57   : > { %s12248_s27 = smov %s8410_s18  ;;  %s12249_s28 = smov %s8401_s29 }
 0xd58   :  { %28 = sbr.rel (!%p26_p9) target bundleno = 5 (0x5), region = 175 }

</bundles_post_ra>
